<compile_context>
chip_gen: v5e
topology: v5e:2x2
jax: 0.10.0
libtpu: 0.0.40
codegen_flags: <defaults>
</compile_context>

<pallas_src>
import functools

import jax
import jax.numpy as jnp
from jax.experimental import pallas as pl
from jax.experimental.pallas import tpu as pltpu

# ----------------------- model config (small but TPU-friendly) -----------------------
D = 8                  # depth -> D//2 = 4 hidden layers per skip-MLP
W = 128                # hidden width (lane-aligned; module default 256 also works)
INPUT_CH = 3
INPUT_CH_VIEWS = 3
N_POINTS = 1024        # batch of sample points
TM = 512               # batch tile (grid=2 -> both v7x TensorCores busy; overhead amortized)
OUT_LANES = 128        # lane-dense output block; rgb in lanes 0:3, sigma in lane 3

assert W % 128 == 0 and N_POINTS % TM == 0


def _epilogue_dtype():
    """bf16 bias-add/ReLU epilogue on chips with a bf16 VPU (v6e/v7x+); f32 on v5e and older."""
    try:
        kind = jax.devices()[0].device_kind.lower()
    except Exception:
        return jnp.bfloat16
    if any(old in kind for old in ("v2", "v3", "v4", "v5")):
        return jnp.float32
    return jnp.bfloat16


# ----------------------------------- kernel ------------------------------------------
def nerf_kernel(x_ref, w_in_ref, w_hid_ref, b_hid_ref, w_out_ref, b_out_ref, o_ref, *, edt):
    f32 = jnp.float32
    bf16 = jnp.bfloat16
    n = D // 2

    def mm(a, w):
        # bf16 x bf16 matmul with f32 accumulation on the MXU.
        return jnp.dot(a.astype(bf16), w, preferred_element_type=f32)

    x = x_ref[...].astype(bf16)                  # (TM, 6) = [pts | views]
    b_hid = b_hid_ref[...].astype(edt)           # (12, W), cast once per step

    # ---- ONE fused input projection: x(6) @ (6, 3W) with zeroed cross-terms ----
    #      lanes [0:W)   -> pts @ w0        (before_skip layer 0)
    #      lanes [W:2W)  -> pts @ a0p       (skip-concat contribution)
    #      lanes [2W:3W) -> views @ wr0v    (rgb-hidden contribution, zero-padded lanes)
    proj = jnp.dot(x, w_in_ref[...], preferred_element_type=f32)    # (TM, 3W) f32
    p_l0 = proj[:, 0:W]
    p_skip = proj[:, W:2 * W]
    p_view = proj[:, 2 * W:3 * W]

    def layer(acc_f32, bias_row, relu=True):
        # f32 MXU accumulator -> cast once to the epilogue dtype -> bias add (+ReLU).
        a = acc_f32.astype(edt) + b_hid[bias_row:bias_row + 1, :]
        return jnp.maximum(a, 0) if relu else a

    # ---- before_skip MLP: 3->W then n x (W->W), ReLU after every layer ----
    h = layer(p_l0, 0)
    for k in range(n):
        h = layer(mm(h, w_hid_ref[k]), k + 1)

    # ---- skip: cat([h, pts]) @ A0 == h @ a0h + pts @ a0p (extra term added in f32) ----
    h = layer(mm(h, w_hid_ref[n]) + p_skip, n + 1)
    for k in range(n):
        h = layer(mm(h, w_hid_ref[n + 1 + k]), n + 2 + k)

    # hoisted cast: reused by the feature head and by the fused output concat
    h_mm = h.astype(bf16)

    # ---- feature head: W->W, no activation ----
    feature = layer(jnp.dot(h_mm, w_hid_ref[2 * n + 1], preferred_element_type=f32),
                    2 * n + 2, relu=False)

    # ---- rgb hidden layer, W//2 zero-padded to W lanes (pad lanes compute exactly 0):
    #      cat([feature, views]) @ Wr0 == feature @ wr0f + views @ wr0v ----
    r = layer(mm(feature, w_hid_ref[2 * n + 2]) + p_view, 2 * n + 3)

    # ---- fused, lane-dense output head: cat([r, h]) (TM,2W) @ (2W,128) ----
    #      rgb -> lanes 0:3, sigma -> lane 3, lanes 4:128 are exact zeros.
    out_in = jnp.concatenate([r.astype(bf16), h_mm], axis=-1)       # (TM, 2W) bf16
    out = jnp.dot(out_in, w_out_ref[...], preferred_element_type=f32) + b_out_ref[...]
    o_ref[...] = out.astype(o_ref.dtype)                            # one unmasked store


# ----------------------------------- wrapper ------------------------------------------
def nerf_forward(x, packed, *, edt=None):
    """x: (N, 6) f32; packed: (w_in, w_hid, b_hid, w_out, b_out). Returns (N, 4) f32."""
    w_in, w_hid, b_hid, w_out, b_out = packed
    N, C = x.shape
    assert N % TM == 0 and C == INPUT_CH + INPUT_CH_VIEWS
    if edt is None:
        edt = _epilogue_dtype()

    def full(shape):
        nd = len(shape)
        return pl.BlockSpec(shape, lambda i, _n=nd: (0,) * _n)

    kernel = functools.partial(nerf_kernel, edt=edt)

    out = pl.pallas_call(
        kernel,
        out_shape=jax.ShapeDtypeStruct((N, OUT_LANES), jnp.float32),
        grid_spec=pltpu.PrefetchScalarGridSpec(
            num_scalar_prefetch=0,
            grid=(N // TM,),
            in_specs=[
                pl.BlockSpec((TM, INPUT_CH + INPUT_CH_VIEWS), lambda i: (i, 0)),
                full(w_in.shape),
                full(w_hid.shape),
                full(b_hid.shape),
                full(w_out.shape),
                full(b_out.shape),
            ],
            out_specs=pl.BlockSpec((TM, OUT_LANES), lambda i: (i, 0)),
        ),
        compiler_params=pltpu.CompilerParams(
            dimension_semantics=("parallel",),
        ),
    )(x, w_in, w_hid, b_hid, w_out, b_out)
    return out[:, :4]


# ----------------------------- deterministic parameter init ----------------------------
def init_raw_params(key):
    """Params in the module's natural structure (f32, (in,out) weights, (1,out) biases)."""
    def linear(k, n_in, n_out):
        kw, kb = jax.random.split(k)
        w = jax.random.normal(kw, (n_in, n_out), jnp.float32) / jnp.sqrt(jnp.float32(n_in))
        b = 0.01 * jax.random.normal(kb, (1, n_out), jnp.float32)
        return w, b

    keys = iter(jax.random.split(key, 16))
    raw = {}

    bs = [linear(next(keys), INPUT_CH, W)]
    for _ in range(D // 2):
        bs.append(linear(next(keys), W, W))
    raw["before_skip"] = bs

    asl = [linear(next(keys), W + INPUT_CH, W)]
    for _ in range(D // 2):
        asl.append(linear(next(keys), W, W))
    raw["after_skip"] = asl

    raw["out_sigma"] = linear(next(keys), W, 1)
    raw["out_feature"] = linear(next(keys), W, W)
    raw["out_rgb"] = [linear(next(keys), W + INPUT_CH_VIEWS, W // 2),
                      linear(next(keys), W // 2, 3)]
    return raw


def pack_params(raw):
    """Pack module params into a few stacked kernel arrays (weights bf16, biases f32)."""
    bf16 = jnp.bfloat16
    H = W // 2

    bs = raw["before_skip"]
    asl = raw["after_skip"]
    ws, bsig = raw["out_sigma"]
    wf, bfeat = raw["out_feature"]
    (wr0, br0), (wr1, br1) = raw["out_rgb"]

    w0, b0 = bs[0]                        # (3, W), (1, W)
    a0, ab0 = asl[0]                      # (W+3, W), (1, W)
    a0h, a0p = a0[:W, :], a0[W:, :]       # split of the skip-concat weight
    wr0f, wr0v = wr0[:W, :], wr0[W:, :]   # split of the rgb-hidden concat weight

    # --- fused input projection: x(6) @ (6, 3W) with zeroed cross-terms ---
    w_in = jnp.zeros((INPUT_CH + INPUT_CH_VIEWS, 3 * W), jnp.float32)
    w_in = w_in.at[:INPUT_CH, 0:W].set(w0)                   # pts -> before_skip layer 0
    w_in = w_in.at[:INPUT_CH, W:2 * W].set(a0p)              # pts -> skip concat
    w_in = w_in.at[INPUT_CH:, 2 * W:2 * W + H].set(wr0v)     # views -> rgb hidden (pad lanes 0)
    w_in = w_in.astype(bf16)                                 # (6, 3W)

    # --- stacked hidden weights (rgb-hidden width W//2 zero-padded to W lanes) ---
    wr0f_pad = jnp.pad(wr0f, ((0, 0), (0, W - H)))
    w_hid = jnp.stack([w for w, _ in bs[1:]] + [a0h]
                      + [w for w, _ in asl[1:]] + [wf, wr0f_pad]).astype(bf16)   # (11, W, W)

    br0_pad = jnp.pad(br0, ((0, 0), (0, W - H)))
    b_hid = jnp.concatenate([b0] + [b for _, b in bs[1:]] + [ab0]
                            + [b for _, b in asl[1:]] + [bfeat, br0_pad], axis=0)  # (12, W) f32

    # --- fused, lane-dense output head: cat([r, h]) @ (2W, 128) ---
    w_out = jnp.zeros((2 * W, OUT_LANES), jnp.float32)
    w_out = w_out.at[:H, 0:3].set(wr1)        # rgb from r (pad rows/cols are zero)
    w_out = w_out.at[W:, 3:4].set(ws)         # sigma from h
    w_out = w_out.astype(bf16)                                # (2W, 128)
    b_out = jnp.zeros((1, OUT_LANES), jnp.float32)
    b_out = b_out.at[:, 0:3].set(br1)
    b_out = b_out.at[:, 3:4].set(bsig)                        # (1, 128) f32
    return w_in, w_hid, b_hid, w_out, b_out


# ----------------------------- pure-JAX reference (module structure) -------------------
def nerf_reference(x, raw, edt):
    """Mirrors the PyTorch forward structure (cat + full matmuls) using the same numerics
    policy as the kernel: bf16 weights, f32 MXU accumulation, hidden-layer epilogue in
    `edt` (f32 on v5e and older, bf16 on v6e/v7x); final rgb/sigma stay f32."""
    bf16 = jnp.bfloat16
    f32 = jnp.float32

    def mm(h, w):
        return jnp.dot(h.astype(bf16), w.astype(bf16), preferred_element_type=f32)

    def hidden(h, w, b, relu=True):
        a = mm(h, w).astype(edt) + b.astype(edt)
        return jnp.maximum(a, 0) if relu else a

    pts = x[:, :INPUT_CH]
    views = x[:, INPUT_CH:INPUT_CH + INPUT_CH_VIEWS]

    h = pts
    for w, b in raw["before_skip"]:
        h = hidden(h, w, b)
    h = jnp.concatenate([h, pts], -1)
    for w, b in raw["after_skip"]:
        h = hidden(h, w, b)

    sigma = mm(h, raw["out_sigma"][0]) + raw["out_sigma"][1]
    feature = hidden(h, *raw["out_feature"], relu=False)
    hr = jnp.concatenate([feature, views], -1)
    (wr0, br0), (wr1, br1) = raw["out_rgb"]
    r = hidden(hr, wr0, br0)
    rgb = mm(r, wr1) + br1
    return jnp.concatenate([rgb, sigma], -1)


if __name__ == "__main__":
    key = jax.random.PRNGKey(0)
    kx, kp = jax.random.split(key)

    x = jax.random.normal(kx, (N_POINTS, INPUT_CH + INPUT_CH_VIEWS), jnp.float32)
    raw = init_raw_params(kp)
    packed = pack_params(raw)
    edt = _epilogue_dtype()

    out = nerf_forward(x, packed, edt=edt)
    out = jax.block_until_ready(out)

    ref = nerf_reference(x, raw, edt)
    assert out.shape == (N_POINTS, 4)
    max_err = jnp.max(jnp.abs(out - ref))
    assert jnp.allclose(out, ref, atol=1e-2, rtol=1e-2), \
        f"mismatch vs reference (max abs err {max_err})"

    print("KERNEL_OK")
</pallas_src>

<mosaic_0001>
module attributes {stable_mosaic.version = 11 : i64} {
  func.func @nerf_kernel(%arg0: i32, %arg1: memref<512x6xf32, #tpu.memory_space<vmem>>, %arg2: memref<6x384xbf16, #tpu.memory_space<vmem>>, %arg3: memref<11x128x128xbf16, #tpu.memory_space<vmem>>, %arg4: memref<12x128xf32, #tpu.memory_space<vmem>>, %arg5: memref<256x128xbf16, #tpu.memory_space<vmem>>, %arg6: memref<1x128xf32, #tpu.memory_space<vmem>>, %arg7: memref<512x128xf32, #tpu.memory_space<vmem>>) attributes {dimension_semantics = [#tpu.dimension_semantics<parallel>], iteration_bounds = array<i64: 2>, scalar_prefetch = 0 : i64, scratch_operands = 0 : i64, tpu.core_type = #tpu.core_type<tc>, window_params = [{transform_indices = @transform_0, window_bounds = array<i64: 512, 6>}, {pipeline_mode = #tpu.pipeline_mode<synchronous>, transform_indices = @transform_1, window_bounds = array<i64: 6, 384>}, {pipeline_mode = #tpu.pipeline_mode<synchronous>, transform_indices = @transform_2, window_bounds = array<i64: 11, 128, 128>}, {pipeline_mode = #tpu.pipeline_mode<synchronous>, transform_indices = @transform_3, window_bounds = array<i64: 12, 128>}, {pipeline_mode = #tpu.pipeline_mode<synchronous>, transform_indices = @transform_4, window_bounds = array<i64: 256, 128>}, {pipeline_mode = #tpu.pipeline_mode<synchronous>, transform_indices = @transform_5, window_bounds = array<i64: 1, 128>}, {transform_indices = @transform_6, window_bounds = array<i64: 512, 128>}]} {
    %c0 = arith.constant 0 : index
    %c0_0 = arith.constant 0 : index
    %0 = vector.load %arg1[%c0, %c0_0] : memref<512x6xf32, #tpu.memory_space<vmem>>, vector<512x6xf32>
    %1 = arith.truncf %0 : vector<512x6xf32> to vector<512x6xbf16>
    %c0_1 = arith.constant 0 : index
    %c0_2 = arith.constant 0 : index
    %2 = vector.load %arg4[%c0_1, %c0_2] : memref<12x128xf32, #tpu.memory_space<vmem>>, vector<12x128xf32>
    %3 = arith.truncf %2 : vector<12x128xf32> to vector<12x128xbf16>
    %c0_3 = arith.constant 0 : index
    %c0_4 = arith.constant 0 : index
    %4 = vector.load %arg2[%c0_3, %c0_4] : memref<6x384xbf16, #tpu.memory_space<vmem>>, vector<6x384xbf16>
    %cst = arith.constant dense<0.000000e+00> : vector<512x384xf32>
    %5 = tpu.matmul %1, %4, %cst {dimension_numbers = #tpu.dot_dimension_numbers<[1], [0], [0], [1], [0, 0, 1, 1], [], []>} : vector<512x6xbf16>, vector<6x384xbf16>, vector<512x384xf32> -> vector<512x384xf32>
    %6 = vector.extract_strided_slice %5 {offsets = [0, 0], sizes = [512, 128], strides = [1, 1]} : vector<512x384xf32> to vector<512x128xf32>
    %7 = vector.extract_strided_slice %5 {offsets = [0, 128], sizes = [512, 128], strides = [1, 1]} : vector<512x384xf32> to vector<512x128xf32>
    %8 = vector.extract_strided_slice %5 {offsets = [0, 256], sizes = [512, 128], strides = [1, 1]} : vector<512x384xf32> to vector<512x128xf32>
    %9 = arith.truncf %6 : vector<512x128xf32> to vector<512x128xbf16>
    %10 = vector.extract_strided_slice %3 {offsets = [0, 0], sizes = [1, 128], strides = [1, 1]} : vector<12x128xbf16> to vector<1x128xbf16>
    %11 = vector.broadcast %10 : vector<1x128xbf16> to vector<512x128xbf16>
    %12 = arith.addf %9, %11 : vector<512x128xbf16>
    %cst_5 = arith.constant 0.000000e+00 : bf16
    %13 = vector.broadcast %cst_5 : bf16 to vector<512x128xbf16>
    %14 = arith.maximumf %12, %13 : vector<512x128xbf16>
    %c0_6 = arith.constant 0 : index
    %c0_7 = arith.constant 0 : index
    %c0_8 = arith.constant 0 : index
    %15 = vector.load %arg3[%c0_6, %c0_7, %c0_8] : memref<11x128x128xbf16, #tpu.memory_space<vmem>>, vector<1x128x128xbf16>
    %16 = vector.shape_cast %15 : vector<1x128x128xbf16> to vector<128x128xbf16>
    %cst_9 = arith.constant dense<0.000000e+00> : vector<512x128xf32>
    %17 = tpu.matmul %14, %16, %cst_9 {dimension_numbers = #tpu.dot_dimension_numbers<[1], [0], [0], [1], [0, 0, 1, 1], [], []>} : vector<512x128xbf16>, vector<128x128xbf16>, vector<512x128xf32> -> vector<512x128xf32>
    %18 = arith.truncf %17 : vector<512x128xf32> to vector<512x128xbf16>
    %19 = vector.extract_strided_slice %3 {offsets = [1, 0], sizes = [1, 128], strides = [1, 1]} : vector<12x128xbf16> to vector<1x128xbf16>
    %20 = vector.broadcast %19 : vector<1x128xbf16> to vector<512x128xbf16>
    %21 = arith.addf %18, %20 : vector<512x128xbf16>
    %cst_10 = arith.constant 0.000000e+00 : bf16
    %22 = vector.broadcast %cst_10 : bf16 to vector<512x128xbf16>
    %23 = arith.maximumf %21, %22 : vector<512x128xbf16>
    %c1 = arith.constant 1 : index
    %c0_11 = arith.constant 0 : index
    %c0_12 = arith.constant 0 : index
    %24 = vector.load %arg3[%c1, %c0_11, %c0_12] : memref<11x128x128xbf16, #tpu.memory_space<vmem>>, vector<1x128x128xbf16>
    %25 = vector.shape_cast %24 : vector<1x128x128xbf16> to vector<128x128xbf16>
    %cst_13 = arith.constant dense<0.000000e+00> : vector<512x128xf32>
    %26 = tpu.matmul %23, %25, %cst_13 {dimension_numbers = #tpu.dot_dimension_numbers<[1], [0], [0], [1], [0, 0, 1, 1], [], []>} : vector<512x128xbf16>, vector<128x128xbf16>, vector<512x128xf32> -> vector<512x128xf32>
    %27 = arith.truncf %26 : vector<512x128xf32> to vector<512x128xbf16>
    %28 = vector.extract_strided_slice %3 {offsets = [2, 0], sizes = [1, 128], strides = [1, 1]} : vector<12x128xbf16> to vector<1x128xbf16>
    %29 = vector.broadcast %28 : vector<1x128xbf16> to vector<512x128xbf16>
    %30 = arith.addf %27, %29 : vector<512x128xbf16>
    %cst_14 = arith.constant 0.000000e+00 : bf16
    %31 = vector.broadcast %cst_14 : bf16 to vector<512x128xbf16>
    %32 = arith.maximumf %30, %31 : vector<512x128xbf16>
    %c2 = arith.constant 2 : index
    %c0_15 = arith.constant 0 : index
    %c0_16 = arith.constant 0 : index
    %33 = vector.load %arg3[%c2, %c0_15, %c0_16] : memref<11x128x128xbf16, #tpu.memory_space<vmem>>, vector<1x128x128xbf16>
    %34 = vector.shape_cast %33 : vector<1x128x128xbf16> to vector<128x128xbf16>
    %cst_17 = arith.constant dense<0.000000e+00> : vector<512x128xf32>
    %35 = tpu.matmul %32, %34, %cst_17 {dimension_numbers = #tpu.dot_dimension_numbers<[1], [0], [0], [1], [0, 0, 1, 1], [], []>} : vector<512x128xbf16>, vector<128x128xbf16>, vector<512x128xf32> -> vector<512x128xf32>
    %36 = arith.truncf %35 : vector<512x128xf32> to vector<512x128xbf16>
    %37 = vector.extract_strided_slice %3 {offsets = [3, 0], sizes = [1, 128], strides = [1, 1]} : vector<12x128xbf16> to vector<1x128xbf16>
    %38 = vector.broadcast %37 : vector<1x128xbf16> to vector<512x128xbf16>
    %39 = arith.addf %36, %38 : vector<512x128xbf16>
    %cst_18 = arith.constant 0.000000e+00 : bf16
    %40 = vector.broadcast %cst_18 : bf16 to vector<512x128xbf16>
    %41 = arith.maximumf %39, %40 : vector<512x128xbf16>
    %c3 = arith.constant 3 : index
    %c0_19 = arith.constant 0 : index
    %c0_20 = arith.constant 0 : index
    %42 = vector.load %arg3[%c3, %c0_19, %c0_20] : memref<11x128x128xbf16, #tpu.memory_space<vmem>>, vector<1x128x128xbf16>
    %43 = vector.shape_cast %42 : vector<1x128x128xbf16> to vector<128x128xbf16>
    %cst_21 = arith.constant dense<0.000000e+00> : vector<512x128xf32>
    %44 = tpu.matmul %41, %43, %cst_21 {dimension_numbers = #tpu.dot_dimension_numbers<[1], [0], [0], [1], [0, 0, 1, 1], [], []>} : vector<512x128xbf16>, vector<128x128xbf16>, vector<512x128xf32> -> vector<512x128xf32>
    %45 = arith.truncf %44 : vector<512x128xf32> to vector<512x128xbf16>
    %46 = vector.extract_strided_slice %3 {offsets = [4, 0], sizes = [1, 128], strides = [1, 1]} : vector<12x128xbf16> to vector<1x128xbf16>
    %47 = vector.broadcast %46 : vector<1x128xbf16> to vector<512x128xbf16>
    %48 = arith.addf %45, %47 : vector<512x128xbf16>
    %cst_22 = arith.constant 0.000000e+00 : bf16
    %49 = vector.broadcast %cst_22 : bf16 to vector<512x128xbf16>
    %50 = arith.maximumf %48, %49 : vector<512x128xbf16>
    %c4 = arith.constant 4 : index
    %c0_23 = arith.constant 0 : index
    %c0_24 = arith.constant 0 : index
    %51 = vector.load %arg3[%c4, %c0_23, %c0_24] : memref<11x128x128xbf16, #tpu.memory_space<vmem>>, vector<1x128x128xbf16>
    %52 = vector.shape_cast %51 : vector<1x128x128xbf16> to vector<128x128xbf16>
    %cst_25 = arith.constant dense<0.000000e+00> : vector<512x128xf32>
    %53 = tpu.matmul %50, %52, %cst_25 {dimension_numbers = #tpu.dot_dimension_numbers<[1], [0], [0], [1], [0, 0, 1, 1], [], []>} : vector<512x128xbf16>, vector<128x128xbf16>, vector<512x128xf32> -> vector<512x128xf32>
    %54 = arith.addf %53, %7 : vector<512x128xf32>
    %55 = arith.truncf %54 : vector<512x128xf32> to vector<512x128xbf16>
    %56 = vector.extract_strided_slice %3 {offsets = [5, 0], sizes = [1, 128], strides = [1, 1]} : vector<12x128xbf16> to vector<1x128xbf16>
    %57 = vector.broadcast %56 : vector<1x128xbf16> to vector<512x128xbf16>
    %58 = arith.addf %55, %57 : vector<512x128xbf16>
    %cst_26 = arith.constant 0.000000e+00 : bf16
    %59 = vector.broadcast %cst_26 : bf16 to vector<512x128xbf16>
    %60 = arith.maximumf %58, %59 : vector<512x128xbf16>
    %c5 = arith.constant 5 : index
    %c0_27 = arith.constant 0 : index
    %c0_28 = arith.constant 0 : index
    %61 = vector.load %arg3[%c5, %c0_27, %c0_28] : memref<11x128x128xbf16, #tpu.memory_space<vmem>>, vector<1x128x128xbf16>
    %62 = vector.shape_cast %61 : vector<1x128x128xbf16> to vector<128x128xbf16>
    %cst_29 = arith.constant dense<0.000000e+00> : vector<512x128xf32>
    %63 = tpu.matmul %60, %62, %cst_29 {dimension_numbers = #tpu.dot_dimension_numbers<[1], [0], [0], [1], [0, 0, 1, 1], [], []>} : vector<512x128xbf16>, vector<128x128xbf16>, vector<512x128xf32> -> vector<512x128xf32>
    %64 = arith.truncf %63 : vector<512x128xf32> to vector<512x128xbf16>
    %65 = vector.extract_strided_slice %3 {offsets = [6, 0], sizes = [1, 128], strides = [1, 1]} : vector<12x128xbf16> to vector<1x128xbf16>
    %66 = vector.broadcast %65 : vector<1x128xbf16> to vector<512x128xbf16>
    %67 = arith.addf %64, %66 : vector<512x128xbf16>
    %cst_30 = arith.constant 0.000000e+00 : bf16
    %68 = vector.broadcast %cst_30 : bf16 to vector<512x128xbf16>
    %69 = arith.maximumf %67, %68 : vector<512x128xbf16>
    %c6 = arith.constant 6 : index
    %c0_31 = arith.constant 0 : index
    %c0_32 = arith.constant 0 : index
    %70 = vector.load %arg3[%c6, %c0_31, %c0_32] : memref<11x128x128xbf16, #tpu.memory_space<vmem>>, vector<1x128x128xbf16>
    %71 = vector.shape_cast %70 : vector<1x128x128xbf16> to vector<128x128xbf16>
    %cst_33 = arith.constant dense<0.000000e+00> : vector<512x128xf32>
    %72 = tpu.matmul %69, %71, %cst_33 {dimension_numbers = #tpu.dot_dimension_numbers<[1], [0], [0], [1], [0, 0, 1, 1], [], []>} : vector<512x128xbf16>, vector<128x128xbf16>, vector<512x128xf32> -> vector<512x128xf32>
    %73 = arith.truncf %72 : vector<512x128xf32> to vector<512x128xbf16>
    %74 = vector.extract_strided_slice %3 {offsets = [7, 0], sizes = [1, 128], strides = [1, 1]} : vector<12x128xbf16> to vector<1x128xbf16>
    %75 = vector.broadcast %74 : vector<1x128xbf16> to vector<512x128xbf16>
    %76 = arith.addf %73, %75 : vector<512x128xbf16>
    %cst_34 = arith.constant 0.000000e+00 : bf16
    %77 = vector.broadcast %cst_34 : bf16 to vector<512x128xbf16>
    %78 = arith.maximumf %76, %77 : vector<512x128xbf16>
    %c7 = arith.constant 7 : index
    %c0_35 = arith.constant 0 : index
    %c0_36 = arith.constant 0 : index
    %79 = vector.load %arg3[%c7, %c0_35, %c0_36] : memref<11x128x128xbf16, #tpu.memory_space<vmem>>, vector<1x128x128xbf16>
    %80 = vector.shape_cast %79 : vector<1x128x128xbf16> to vector<128x128xbf16>
    %cst_37 = arith.constant dense<0.000000e+00> : vector<512x128xf32>
    %81 = tpu.matmul %78, %80, %cst_37 {dimension_numbers = #tpu.dot_dimension_numbers<[1], [0], [0], [1], [0, 0, 1, 1], [], []>} : vector<512x128xbf16>, vector<128x128xbf16>, vector<512x128xf32> -> vector<512x128xf32>
    %82 = arith.truncf %81 : vector<512x128xf32> to vector<512x128xbf16>
    %83 = vector.extract_strided_slice %3 {offsets = [8, 0], sizes = [1, 128], strides = [1, 1]} : vector<12x128xbf16> to vector<1x128xbf16>
    %84 = vector.broadcast %83 : vector<1x128xbf16> to vector<512x128xbf16>
    %85 = arith.addf %82, %84 : vector<512x128xbf16>
    %cst_38 = arith.constant 0.000000e+00 : bf16
    %86 = vector.broadcast %cst_38 : bf16 to vector<512x128xbf16>
    %87 = arith.maximumf %85, %86 : vector<512x128xbf16>
    %c8 = arith.constant 8 : index
    %c0_39 = arith.constant 0 : index
    %c0_40 = arith.constant 0 : index
    %88 = vector.load %arg3[%c8, %c0_39, %c0_40] : memref<11x128x128xbf16, #tpu.memory_space<vmem>>, vector<1x128x128xbf16>
    %89 = vector.shape_cast %88 : vector<1x128x128xbf16> to vector<128x128xbf16>
    %cst_41 = arith.constant dense<0.000000e+00> : vector<512x128xf32>
    %90 = tpu.matmul %87, %89, %cst_41 {dimension_numbers = #tpu.dot_dimension_numbers<[1], [0], [0], [1], [0, 0, 1, 1], [], []>} : vector<512x128xbf16>, vector<128x128xbf16>, vector<512x128xf32> -> vector<512x128xf32>
    %91 = arith.truncf %90 : vector<512x128xf32> to vector<512x128xbf16>
    %92 = vector.extract_strided_slice %3 {offsets = [9, 0], sizes = [1, 128], strides = [1, 1]} : vector<12x128xbf16> to vector<1x128xbf16>
    %93 = vector.broadcast %92 : vector<1x128xbf16> to vector<512x128xbf16>
    %94 = arith.addf %91, %93 : vector<512x128xbf16>
    %cst_42 = arith.constant 0.000000e+00 : bf16
    %95 = vector.broadcast %cst_42 : bf16 to vector<512x128xbf16>
    %96 = arith.maximumf %94, %95 : vector<512x128xbf16>
    %c9 = arith.constant 9 : index
    %c0_43 = arith.constant 0 : index
    %c0_44 = arith.constant 0 : index
    %97 = vector.load %arg3[%c9, %c0_43, %c0_44] : memref<11x128x128xbf16, #tpu.memory_space<vmem>>, vector<1x128x128xbf16>
    %98 = vector.shape_cast %97 : vector<1x128x128xbf16> to vector<128x128xbf16>
    %cst_45 = arith.constant dense<0.000000e+00> : vector<512x128xf32>
    %99 = tpu.matmul %96, %98, %cst_45 {dimension_numbers = #tpu.dot_dimension_numbers<[1], [0], [0], [1], [0, 0, 1, 1], [], []>} : vector<512x128xbf16>, vector<128x128xbf16>, vector<512x128xf32> -> vector<512x128xf32>
    %100 = arith.truncf %99 : vector<512x128xf32> to vector<512x128xbf16>
    %101 = vector.extract_strided_slice %3 {offsets = [10, 0], sizes = [1, 128], strides = [1, 1]} : vector<12x128xbf16> to vector<1x128xbf16>
    %102 = vector.broadcast %101 : vector<1x128xbf16> to vector<512x128xbf16>
    %103 = arith.addf %100, %102 : vector<512x128xbf16>
    %c10 = arith.constant 10 : index
    %c0_46 = arith.constant 0 : index
    %c0_47 = arith.constant 0 : index
    %104 = vector.load %arg3[%c10, %c0_46, %c0_47] : memref<11x128x128xbf16, #tpu.memory_space<vmem>>, vector<1x128x128xbf16>
    %105 = vector.shape_cast %104 : vector<1x128x128xbf16> to vector<128x128xbf16>
    %cst_48 = arith.constant dense<0.000000e+00> : vector<512x128xf32>
    %106 = tpu.matmul %103, %105, %cst_48 {dimension_numbers = #tpu.dot_dimension_numbers<[1], [0], [0], [1], [0, 0, 1, 1], [], []>} : vector<512x128xbf16>, vector<128x128xbf16>, vector<512x128xf32> -> vector<512x128xf32>
    %107 = arith.addf %106, %8 : vector<512x128xf32>
    %108 = arith.truncf %107 : vector<512x128xf32> to vector<512x128xbf16>
    %109 = vector.extract_strided_slice %3 {offsets = [11, 0], sizes = [1, 128], strides = [1, 1]} : vector<12x128xbf16> to vector<1x128xbf16>
    %110 = vector.broadcast %109 : vector<1x128xbf16> to vector<512x128xbf16>
    %111 = arith.addf %108, %110 : vector<512x128xbf16>
    %cst_49 = arith.constant 0.000000e+00 : bf16
    %112 = vector.broadcast %cst_49 : bf16 to vector<512x128xbf16>
    %113 = arith.maximumf %111, %112 : vector<512x128xbf16>
    %114 = tpu.concatenate %113, %96 in 1 : vector<512x128xbf16>, vector<512x128xbf16> -> vector<512x256xbf16>
    %c0_50 = arith.constant 0 : index
    %c0_51 = arith.constant 0 : index
    %115 = vector.load %arg5[%c0_50, %c0_51] : memref<256x128xbf16, #tpu.memory_space<vmem>>, vector<256x128xbf16>
    %cst_52 = arith.constant dense<0.000000e+00> : vector<512x128xf32>
    %116 = tpu.matmul %114, %115, %cst_52 {dimension_numbers = #tpu.dot_dimension_numbers<[1], [0], [0], [1], [0, 0, 1, 1], [], []>} : vector<512x256xbf16>, vector<256x128xbf16>, vector<512x128xf32> -> vector<512x128xf32>
    %c0_53 = arith.constant 0 : index
    %c0_54 = arith.constant 0 : index
    %117 = vector.load %arg6[%c0_53, %c0_54] : memref<1x128xf32, #tpu.memory_space<vmem>>, vector<1x128xf32>
    %118 = vector.broadcast %117 : vector<1x128xf32> to vector<512x128xf32>
    %119 = arith.addf %116, %118 : vector<512x128xf32>
    %c0_55 = arith.constant 0 : index
    %c0_56 = arith.constant 0 : index
    %120 = vector.load %arg7[%c0_55, %c0_56] : memref<512x128xf32, #tpu.memory_space<vmem>>, vector<512x128xf32>
    tpu.vector_store %arg7[%c0_55, %c0_56], %119 {strides = array<i32>} : memref<512x128xf32, #tpu.memory_space<vmem>>, vector<512x128xf32>,
    return
  }
  func.func @transform_0(%arg0: i32) -> (i32, i32) {
    %c0_i32 = arith.constant 0 : i32
    %c0_i32_0 = arith.constant 0 : i32
    return %arg0, %c0_i32 : i32, i32
  }
  func.func @transform_1(%arg0: i32) -> (i32, i32) {
    %c0_i32 = arith.constant 0 : i32
    %c0_i32_0 = arith.constant 0 : i32
    %c0_i32_1 = arith.constant 0 : i32
    return %c0_i32, %c0_i32_0 : i32, i32
  }
  func.func @transform_2(%arg0: i32) -> (i32, i32, i32) {
    %c0_i32 = arith.constant 0 : i32
    %c0_i32_0 = arith.constant 0 : i32
    %c0_i32_1 = arith.constant 0 : i32
    %c0_i32_2 = arith.constant 0 : i32
    return %c0_i32, %c0_i32_0, %c0_i32_1 : i32, i32, i32
  }
  func.func @transform_3(%arg0: i32) -> (i32, i32) {
    %c0_i32 = arith.constant 0 : i32
    %c0_i32_0 = arith.constant 0 : i32
    %c0_i32_1 = arith.constant 0 : i32
    return %c0_i32, %c0_i32_0 : i32, i32
  }
  func.func @transform_4(%arg0: i32) -> (i32, i32) {
    %c0_i32 = arith.constant 0 : i32
    %c0_i32_0 = arith.constant 0 : i32
    %c0_i32_1 = arith.constant 0 : i32
    return %c0_i32, %c0_i32_0 : i32, i32
  }
  func.func @transform_5(%arg0: i32) -> (i32, i32) {
    %c0_i32 = arith.constant 0 : i32
    %c0_i32_0 = arith.constant 0 : i32
    %c0_i32_1 = arith.constant 0 : i32
    return %c0_i32, %c0_i32_0 : i32, i32
  }
  func.func @transform_6(%arg0: i32) -> (i32, i32) {
    %c0_i32 = arith.constant 0 : i32
    %c0_i32_0 = arith.constant 0 : i32
    return %arg0, %c0_i32 : i32, i32
  }
}

</mosaic_0001>

<bundles_post_ra>
// kernel: tpu_custom_call.1
= control target key start
LH: loop header
LB: loop body
LE: loop exit
PB: predicated region body
PF: predicated region fallthrough
CT: control target
= control target key end

     0   :  { %11 = vsyncpa [#allocation3], 0  ;;  %s12866_s0 = inlined_call_operand.vmem [shape: f32[1024,6], index: 0, kind: input, shape index: {}]   ;;  %s12867_s1 = inlined_call_operand.vmem [shape: bf16[6,384], index: 1, kind: input, shape index: {}]   ;;  %s12868_s2 = inlined_call_operand.vmem [shape: bf16[11,128,128], index: 2, kind: input, shape index: {}]   ;;  %s12869_s3 = inlined_call_operand.vmem [shape: f32[12,128], index: 3, kind: input, shape index: {}]   ;;  %s12870_s4 = inlined_call_operand.vmem [shape: bf16[256,128], index: 4, kind: input, shape index: {}]   ;;  %s12871_s5 = inlined_call_operand.vmem [shape: f32[1,128], index: 5, kind: input, shape index: {}]   ;;  %s12872_s6 = inlined_call_operand.hbm [shape: f32[1024,128], index: 6, kind: output, shape index: {}]  }
   0x1   :  { %13 = vsyncpa [#allocation3 + $0x1], 0  ;;  %s10388_s21 = smov 0   ;;  %s10390_s22 = smov 0  }
   0x2   :  { %s10392_s23 = smov 0   ;;  %s10394_s24 = smov 0  }
   0x3 LB: > { %s10409_s25 = sadd.s32 4294967295, %s10349_s24   ;;  %s9447_s26 = sadd.s32 4294967294, %s10349_s24   ;;  %s10349_s24 = sphi %s10394_s24, %s13072_s24   ;;  %s10345_s23 = sphi %s10392_s23, %s13071_s23   ;;  %s10341_s22 = sphi %s10390_s22, %s13070_s22   ;;  %s10337_s21 = sphi %s10388_s21, %s13069_s21  }
   0x4   : > { %s10413_s27 = sadd.s32 1, %s10349_s24   ;;  %s157_s28 = sadd.s32 1, %s10345_s23 }
   0x5   : > { %s154_s29 = ssub.s32 %s10349_s24, %s10413_s27  ;;  %p167_p0 = scmp.ne.s32.totalorder %s10345_s23, %s10341_s22 }
   0x6   : > { %p155_p1 = scmp.eq.s32.totalorder %s154_s29, 0  ;;  %p168_p2 = scmp.eq.s32.totalorder %s10409_s25, 1 }
   0x7   : > { %p173_p3 = scmp.ne.s32.totalorder %s10341_s22, %s10337_s21  ;;  %p174_p4 = scmp.eq.s32.totalorder %s9447_s26, 1 }
   0x8   : > { %s10424_s30 = scalar_select %p155_p1, %s10345_s23, %s157_s28  }
   0x9   : > { %p10426_p5 = por %p168_p2, %p167_p0  ;;  %p10430_p6 = por %p174_p4, %p173_p3 }
   0xa   : > { %p9450_p7 = scmp.ge.s32.totalorder %s10349_s24, 1  ;;  %p216_p8 = scmp.lt.s32.totalorder %s10349_s24, 3 }
   0xc   : > { %p217_p9 = pnand %p9450_p7, %p216_p8 }
   0xe   : > { %220 = sbr.rel (%p217_p9) target bundleno = 2708 (0xa94), region = 44 }
  0x13   : > { %v354_v0 = vld [vmem:[%s12867_s1] sm:$0x77]  ;;  %s9452_s11 = sshll.u32 %s10409_s25, 6  ;;  %vm461_vm0 = vcmask 1042432   ;;  %v10146_v3 = vld [vmem:[%s12868_s2 + $0x78] sm:$0xff]  ;;  %vm364_vm1 = vcmask 48128  }
  0x14   : > { %v358_v1 = vunpack.c.l.b16 %v354_v0  ;;  %p247_p10 = scmp.lt.s32.totalorder %s9452_s11, 127  ;;  %v10145_v14 = vld [vmem:[%s12868_s2 + $0x70] sm:$0xff]  ;;  %v10138_v24 = vld [vmem:[%s12868_s2 + $0x38] sm:$0xff]  ;;  %v10136_v26 = vld [vmem:[%s12868_s2 + $0x28] sm:$0xff]  ;;  %v359_v32 = vunpack.c.h.b16 %v354_v0  ;;  %s243_s29 = sand.u32 1, %s10341_s22  }
  0x15   : > { %1463 = vmatpush.bf16.msra.mxu3 %v10138_v24  ;;  %v10137_v25 = vld [vmem:[%s12868_s2 + $0x30] sm:$0xff]  ;;  %v10135_v29 = vld [vmem:[%s12868_s2 + $0x20] sm:$0xff]  ;;  %v10134_v31 = vld [vmem:[%s12868_s2 + $0x18] sm:$0xff]  ;;  %s10235_s15 = sshll.u32 %s10409_s25, 9  ;;  %s9370_s25 = scalar_lea.sflag [#allocation3], %s243_s29 }
  0x16   : > { %v361_v2 = vpack.c.b16 %v358_v1, %v358_v1  ;;  %s13074_s11 = smov (!%p247_p10, %s9452_s11), 127  ;;  %v10144_v33 = vld [vmem:[%s12868_s2 + $0x68] sm:$0xff]  ;;  %v362_v34 = vpack.c.b16 %v359_v32, %v359_v32  ;;  %v10133_v35 = vld [vmem:[%s12868_s2 + $0x10] sm:$0xff]  ;;  %v10131_v40 = vld [vmem:[%s12868_s2] sm:$0xff]  ;;  %s9381_s19 = scalar_lea.hbm %s12872_s6, %s10235_s15 }
  0x17   : > { %s9453_s14 = sshll.u32 %s13074_s11, 3  ;;  %v10132_v37 = vld [vmem:[%s12868_s2 + $0x8] sm:$0xff]  ;;  %v10154_v42 = vld [vmem:[%s12868_s2 + $0xb8] sm:$0xff]  ;;  %v350_v43 = vld [vmem:[%s12869_s3] sm:$0xff]  ;;  %s9451_s11 = sshll.u32 %s243_s29, 9 }
  0x18   : > { %v463_v4 = vsel %vm461_vm0, %v361_v2, 0  ;;  %s10447_s17 = scalar_lea.vmem %s12866_s0, %s9453_s14  ;;  %v466_v36 = vsel %vm461_vm0, %v362_v34, 0  ;;  %v10536_v44 = vpack.c.bf16 %v350_v43, %v350_v43  ;;  %s12476_s12 = scalar_lea.vmem [#allocation2], %s9451_s11 }
  0x19   : > { %478 = vmatpush.bf16.msra.mxu0 %v463_v4  ;;  %v254_v5 = vld [vmem:[%s10447_s17] sm:$0xff]  ;;  %v255_v6 = vld [vmem:[%s10447_s17 + $0x8] sm:$0xff]  ;;  %v256_v8 = vld [vmem:[%s10447_s17 + $0x10] sm:$0xff]  ;;  %1464 = vmatpush.bf16.msra.mxu3 %v10137_v25  ;;  %s9384_s20 = sshll.u32 %s9381_s19, 4  ;;  %s10307_s11 = scalar_lea.hbm %s12872_s6, 1024  ;;  %s9385_s20 = int_to_ptr.hbm [resolvable:$true] %s9384_s20 }
  0x1a   : > { %v10451_v7 = vpack.c.bf16 %v255_v6, %v254_v5  ;;  %v257_v9 = vld [vmem:[%s10447_s17 + $0x18] sm:$0xff]  ;;  %v258_v11 = vld [vmem:[%s10447_s17 + $0x20] sm:$0xff]  ;;  %v259_v12 = vld [vmem:[%s10447_s17 + $0x28] sm:$0xff]  ;;  %647 = vmatpush.bf16.msra.mxu1 %v466_v36  ;;  %v10544_v47 = vpack.i.b16 %v10536_v44, %v10536_v44  ;;  %s10301_s26 = sshra.s32 %s9385_s20, 4  ;;  %s10302_s26 = int_to_ptr.hbm [resolvable:$true] %s10301_s26 }
  0x1b   : > { %v10457_v10 = vpack.c.bf16 %v257_v9, %v256_v8  ;;  %v10463_v13 = vpack.c.bf16 %v259_v12, %v258_v11  ;;  %v260_v15 = vld [vmem:[%s10447_s17 + $0x30] sm:$0xff]  ;;  %v261_v16 = vld [vmem:[%s10447_s17 + $0x38] sm:$0xff]  ;;  %v262_v18 = vld [vmem:[%s10447_s17 + $0x40] sm:$0xff]  ;;  %s10303_s28 = scalar_lea.hbm %s10302_s26, 512  ;;  %p10308_p0 = scmp.lt.s32.totalorder %s10302_s26, %s12872_s6 }
  0x1c   : > { %9454 = vmatmul.msk.bf16.vlgmr.msra.gmra.mxu0 %vm364_vm1, %v10451_v7  ;;  %v10472_v17 = vpack.c.bf16 %v261_v16, %v260_v15  ;;  %v263_v19 = vld [vmem:[%s10447_s17 + $0x48] sm:$0xff]  ;;  %v264_v21 = vld [vmem:[%s10447_s17 + $0x50] sm:$0xff]  ;;  %v265_v22 = vld [vmem:[%s10447_s17 + $0x58] sm:$0xff]  ;;  %v1045_v51 = vperm.slane %v10544_v47, 0  ;;  %p10304_p11 = scmp.ne.s32.totalorder %s10302_s26, %s10303_s28  ;;  %p10309_p1 = scmp.lt.s32.totalorder %s10307_s11, %s10303_s28 }
  0x1d   : > { %2118 = vmatpush.bf16.msrb.mxu0 %v10146_v3  ;;  %v10478_v20 = vpack.c.bf16 %v263_v19, %v262_v18  ;;  %v10484_v23 = vpack.c.bf16 %v265_v22, %v264_v21  ;;  %v266_v27 = vld [vmem:[%s10447_s17 + $0x60] sm:$0xff]  ;;  %v267_v28 = vld [vmem:[%s10447_s17 + $0x68] sm:$0xff]  ;;  %1465 = vmatpush.bf16.msra.mxu3 %v10136_v26  ;;  %v268_v38 = vld [vmem:[%s10447_s17 + $0x70] sm:$0xff] }
  0x1e   : > { %v10502_v30 = vpack.c.bf16 %v267_v28, %v266_v27  ;;  %9486 = vmatmul.msk.bf16.vlgmr.msra.gmra.mxu1 %vm364_vm1, %v10451_v7  ;;  %v269_v39 = vld [vmem:[%s10447_s17 + $0x78] sm:$0xff]  ;;  %v270_v45 = vld [vmem:[%s10447_s17 + $0x80] sm:$0xff]  ;;  %v271_v46 = vld [vmem:[%s10447_s17 + $0x88] sm:$0xff]  ;;  %v10551_v53 = vunpack.c.l.bf16 %v1045_v51  ;;  %p10305_p12 = pnand %p10304_p11, %p10426_p5  ;;  %p10310_p2 = por %p10309_p1, %p10308_p0 }
  0x1f   : > { %v10526_v41 = vpack.c.bf16 %v269_v39, %v268_v38  ;;  %2770 = vmatpush.bf16.msrb.mxu1 %v10154_v42  ;;  %v10546_v48 = vpack.c.bf16 %v271_v46, %v270_v45  ;;  %v272_v58 = vld [vmem:[%s10447_s17 + $0x90] sm:$0xff]  ;;  %v273_v59 = vld [vmem:[%s10447_s17 + $0x98] sm:$0xff]  ;;  %v274_v9 = vld [vmem:[%s10447_s17 + $0xa0] sm:$0xff] }
  0x20   : > { %v10559_v61 = vpack.c.bf16 %v273_v59, %v272_v58  ;;  %v275_v11 = vld [vmem:[%s10447_s17 + $0xa8] sm:$0xff]  ;;  %v10143_v22 = vld [vmem:[%s12868_s2 + $0x60] sm:$0xff]  ;;  %v10153_v39 = vld [vmem:[%s12868_s2 + $0xb0] sm:$0xff]  ;;  %p10306_p13 = pneg %p10305_p12 }
  0x21   : > { %2119 = vmatpush.bf16.msrb.mxu0 %v10145_v14  ;;  %1466 = vmatpush.bf16.msra.mxu3 %v10135_v29  ;;  %v10569_v14 = vpack.c.bf16 %v275_v11, %v274_v9  ;;  %v276_v29 = vld [vmem:[%s10447_s17 + $0xb0] sm:$0xff] }
  0x22   : > { %p10311_p3 = pnand %p10310_p2, %p10306_p13 }
  0x23   : > { %2771 = vmatpush.bf16.msrb.mxu1 %v10153_v39 }
  0x25   : > { %1467 = vmatpush.bf16.msra.mxu3 %v10134_v31  ;;  %2120 = vmatpush.bf16.msrb.mxu0 %v10144_v33  ;;  %v277_v31 = vld [vmem:[%s10447_s17 + $0xb8] sm:$0xff] }
  0x26   : > { %v10582_v33 = vpack.c.bf16 %v277_v31, %v276_v29 }
  0x29   : > { %1468 = vmatpush.bf16.msra.mxu3 %v10133_v35  ;;  %2121 = vmatpush.bf16.msrb.mxu0 %v10143_v22  ;;  %v283_v22 = vld [vmem:[%s10447_s17 + $0xe8] sm:$0xff] }
  0x2c   : > { %9455 = vmatmul.msk.bf16.gmra.mxu0 %vm364_vm1, %v10457_v10 }
  0x2d   : > { %1469 = vmatpush.bf16.msra.mxu3 %v10132_v37 }
  0x2e   : > { %9487 = vmatmul.msk.bf16.gmra.mxu1 %vm364_vm1, %v10457_v10 }
  0x31   : > { %1470 = vmatpush.bf16.msra.mxu3 %v10131_v40 }
  0x3c   : > { %9456 = vmatmul.msk.bf16.gmra.mxu0 %vm364_vm1, %v10463_v13 }
  0x3e   : > { %9488 = vmatmul.msk.bf16.gmra.mxu1 %vm364_vm1, %v10463_v13 }
  0x4c   : > { %9457 = vmatmul.msk.bf16.gmra.mxu0 %vm364_vm1, %v10472_v17 }
  0x4e   : > { %9489 = vmatmul.msk.bf16.gmra.mxu1 %vm364_vm1, %v10472_v17 }
  0x5c   : > { %9458 = vmatmul.msk.bf16.gmra.mxu0 %vm364_vm1, %v10478_v20 }
  0x5e   : > { %9490 = vmatmul.msk.bf16.gmra.mxu1 %vm364_vm1, %v10478_v20 }
  0x6c   : > { %9459 = vmatmul.msk.bf16.gmra.mxu0 %vm364_vm1, %v10484_v23 }
  0x6e   : > { %9491 = vmatmul.msk.bf16.gmra.mxu1 %vm364_vm1, %v10484_v23 }
  0x7c   : > { %9460 = vmatmul.msk.bf16.gmra.mxu0 %vm364_vm1, %v10502_v30 }
  0x7e   : > { %9492 = vmatmul.msk.bf16.gmra.mxu1 %vm364_vm1, %v10502_v30 }
  0x8c   : > { %9461 = vmatmul.msk.bf16.gmra.mxu0 %vm364_vm1, %v10526_v41 }
  0x8e   : > { %9493 = vmatmul.msk.bf16.gmra.mxu1 %vm364_vm1, %v10526_v41 }
  0x99   : > { %v480_v49 = vpop.f32.mrf.mxu0 }
  0x9a   : > { %v978_v50 = vpack.c.bf16 %v480_v49, %v480_v49  ;;  %v278_v49 = vld [vmem:[%s10447_s17 + $0xc0] sm:$0xff] }
  0x9c   : > { %9462 = vmatmul.msk.bf16.gmra.mxu0 %vm364_vm1, %v10546_v48  ;;  %v1046_v52 = vunpack.c.l.bf16 %v978_v50  ;;  %v279_v50 = vld [vmem:[%s10447_s17 + $0xc8] sm:$0xff] }
  0x9e   : > { %v1111_v56 = vadd.f32 %v10551_v53, %v1046_v52  ;;  %v10595_v52 = vpack.c.bf16 %v279_v50, %v278_v49  ;;  %9494 = vmatmul.msk.bf16.gmra.mxu1 %vm364_vm1, %v10546_v48 }
  0xa0   : > { %v1303_v62 = vmax.f32 %v1111_v56, 0.0 }
  0xa1   : > { %v482_v54 = vpop.f32.mrf.mxu0 }
  0xa2   : > { %v979_v55 = vpack.c.bf16 %v482_v54, %v482_v54 }
  0xa4   : > { %v1047_v57 = vunpack.c.l.bf16 %v979_v55 }
  0xa6   : > { %v1112_v60 = vadd.f32 %v10551_v53, %v1047_v57 }
  0xa8   : > { %v1304_v63 = vmax.f32 %v1112_v60, 0.0 }
  0xa9   : > { %v485_v0 = vpop.f32.mrf.mxu0 }
  0xaa   : > { %v1367_v1 = vpack.c.bf16 %v1304_v63, %v1303_v62  ;;  %v980_v2 = vpack.c.bf16 %v485_v0, %v485_v0 }
  0xac   : > { %9463 = vmatmul.msk.bf16.gmra.mxu0 %vm364_vm1, %v10559_v61  ;;  %1471 = vmatmul.bf16.vlgmr.msra.gmra.mxu3 %v1367_v1  ;;  %v1048_v3 = vunpack.c.l.bf16 %v980_v2  ;;  %v280_v1 = vld [vmem:[%s10447_s17 + $0xd0] sm:$0xff]  ;;  %v281_v2 = vld [vmem:[%s10447_s17 + $0xd8] sm:$0xff] }
  0xae   : > { %v1113_v6 = vadd.f32 %v10551_v53, %v1048_v3  ;;  %9495 = vmatmul.msk.bf16.gmra.mxu1 %vm364_vm1, %v10559_v61 }
  0xb0   : > { %v1305_v15 = vmax.f32 %v1113_v6, 0.0 }
  0xb1   : > { %v487_v4 = vpop.f32.mrf.mxu0 }
  0xb2   : > { %v981_v5 = vpack.c.bf16 %v487_v4, %v487_v4  ;;  %v10605_v4 = vpack.c.bf16 %v281_v2, %v280_v1 }
  0xb4   : > { %v1049_v8 = vunpack.c.l.bf16 %v981_v5 }
  0xb6   : > { %v1114_v12 = vadd.f32 %v10551_v53, %v1049_v8 }
  0xb8   : > { %v1306_v16 = vmax.f32 %v1114_v12, 0.0 }
  0xb9   : > { %v490_v18 = vpop.f32.mrf.mxu0 }
  0xba   : > { %v1368_v19 = vpack.c.bf16 %v1306_v16, %v1305_v15  ;;  %v982_v21 = vpack.c.bf16 %v490_v18, %v490_v18 }
  0xbc   : > { %9464 = vmatmul.msk.bf16.gmra.mxu0 %vm364_vm1, %v10569_v14  ;;  %1476 = vmatmul.bf16.gmra.mxu3 %v1368_v19  ;;  %v1050_v24 = vunpack.c.l.bf16 %v982_v21  ;;  %v282_v21 = vld [vmem:[%s10447_s17 + $0xe0] sm:$0xff] }
  0xbe   : > { %v1115_v27 = vadd.f32 %v10551_v53, %v1050_v24  ;;  %9496 = vmatmul.msk.bf16.gmra.mxu1 %vm364_vm1, %v10569_v14 }
  0xc0   : > { %v1307_v34 = vmax.f32 %v1115_v27, 0.0 }
  0xc1   : > { %v492_v25 = vpop.f32.mrf.mxu0 }
  0xc2   : > { %v983_v26 = vpack.c.bf16 %v492_v25, %v492_v25  ;;  %v10615_v25 = vpack.c.bf16 %v283_v22, %v282_v21  ;;  %v10162_v21 = vld [vmem:[%s12868_s2 + $0xf8] sm:$0xff] }
  0xc4   : > { %v1051_v28 = vunpack.c.l.bf16 %v983_v26 }
  0xc6   : > { %v1116_v32 = vadd.f32 %v10551_v53, %v1051_v28 }
  0xc8   : > { %v1308_v35 = vmax.f32 %v1116_v32, 0.0  ;;  %v10142_v32 = vld [vmem:[%s12868_s2 + $0x58] sm:$0xff] }
  0xc9   : > { %v495_v36 = vpop.f32.mrf.mxu0  ;;  %2122 = vmatpush.bf16.msrb.mxu0 %v10142_v32 }
  0xca   : > { %v1369_v37 = vpack.c.bf16 %v1308_v35, %v1307_v34  ;;  %v984_v38 = vpack.c.bf16 %v495_v36, %v495_v36  ;;  %v10622_v36 = vpop.f32.mrf.mxu1 }
  0xcc   : > { %9465 = vmatmul.msk.bf16.gmra.mxu0 %vm364_vm1, %v10582_v33  ;;  %1481 = vmatmul.bf16.gmra.mxu3 %v1369_v37  ;;  %v1052_v40 = vunpack.c.l.bf16 %v984_v38 }
  0xce   : > { %v1117_v45 = vadd.f32 %v10551_v53, %v1052_v40  ;;  %v284_v40 = vld [vmem:[%s10447_s17 + $0xf0] sm:$0xff]  ;;  %9497 = vmatmul.msk.bf16.gmra.mxu1 %vm364_vm1, %v10582_v33 }
  0xd0   : > { %v1309_v54 = vmax.f32 %v1117_v45, 0.0 }
  0xd1   : > { %v497_v42 = vpop.f32.mrf.mxu0 }
  0xd2   : > { %v985_v43 = vpack.c.bf16 %v497_v42, %v497_v42  ;;  %v285_v42 = vld [vmem:[%s10447_s17 + $0xf8] sm:$0xff] }
  0xd3   : > { %v10630_v45 = vpack.c.bf16 %v285_v42, %v284_v40  ;;  %v1696_v40 = vshrl.u32 %v10536_v44, 16 }
  0xd4   : > { %v1053_v46 = vunpack.c.l.bf16 %v985_v43 }
  0xd6   : > { %v1118_v51 = vadd.f32 %v10551_v53, %v1053_v46 }
  0xd8   : > { %v1310_v55 = vmax.f32 %v1118_v51, 0.0  ;;  %v10632_v51 = vpop.f32.mrf.mxu1 }
  0xd9   : > { %v500_v56 = vpop.f32.mrf.mxu0 }
  0xda   : > { %v1370_v57 = vpack.c.bf16 %v1310_v55, %v1309_v54  ;;  %v986_v58 = vpack.c.bf16 %v500_v56, %v500_v56  ;;  %v355_v55 = vld [vmem:[%s12867_s1 + $0x8] sm:$0x7] }
  0xdc   : > { %9466 = vmatmul.msk.bf16.gmra.mxu0 %vm364_vm1, %v10595_v52  ;;  %1486 = vmatmul.bf16.gmra.mxu3 %v1370_v57  ;;  %v1054_v59 = vunpack.c.l.bf16 %v986_v58  ;;  %v360_v57 = vunpack.c.l.b16 %v355_v55  ;;  %v10152_v58 = vld [vmem:[%s12868_s2 + $0xa8] sm:$0xff] }
  0xdd   : > { %2772 = vmatpush.bf16.msrb.mxu1 %v10152_v58 }
  0xde   : > { %v1119_v63 = vadd.f32 %v10551_v53, %v1054_v59  ;;  %v363_v59 = vpack.c.b16 %v360_v57, %v360_v57  ;;  %9498 = vmatmul.msk.bf16.gmra.mxu1 %vm364_vm1, %v10595_v52 }
  0xe0   : > { %v1311_v5 = vmax.f32 %v1119_v63, 0.0 }
  0xe1   : > { %v502_v60 = vpop.f32.mrf.mxu0 }
  0xe2   : > { %v987_v62 = vpack.c.bf16 %v502_v60, %v502_v60 }
  0xe4   : > { %v1055_v0 = vunpack.c.l.bf16 %v987_v62  ;;  %v469_v62 = vsel %vm461_vm0, %v363_v59, 0  ;;  %v290_v59 = vld [vmem:[%s10447_s17 + $0x120] sm:$0xff] }
  0xe5   : > { %816 = vmatpush.bf16.msra.mxu2 %v469_v62 }
  0xe6   : > { %v1120_v3 = vadd.f32 %v10551_v53, %v1055_v0  ;;  %v10643_v0 = vpop.f32.mrf.mxu1 }
  0xe8   : > { %v1312_v6 = vmax.f32 %v1120_v3, 0.0  ;;  %9518 = vmatmul.msk.bf16.vlgmr.msra.gmra.mxu2 %vm364_vm1, %v10451_v7 }
  0xe9   : > { %v505_v8 = vpop.f32.mrf.mxu0  ;;  %3422 = vmatpush.bf16.msrb.mxu2 %v10162_v21 }
  0xea   : > { %v1371_v9 = vpack.c.bf16 %v1312_v6, %v1311_v5  ;;  %v988_v11 = vpack.c.bf16 %v505_v8, %v505_v8  ;;  %v286_v5 = vld [vmem:[%s10447_s17 + $0x100] sm:$0xff]  ;;  %v287_v6 = vld [vmem:[%s10447_s17 + $0x108] sm:$0xff] }
  0xec   : > { %9467 = vmatmul.msk.bf16.gmra.mxu0 %vm364_vm1, %v10605_v4  ;;  %1491 = vmatmul.bf16.gmra.mxu3 %v1371_v9  ;;  %v1056_v12 = vunpack.c.l.bf16 %v988_v11  ;;  %v10653_v9 = vpack.c.bf16 %v287_v6, %v286_v5 }
  0xee   : > { %v1121_v18 = vadd.f32 %v10551_v53, %v1056_v12 }
  0xf0   : > { %v1313_v26 = vmax.f32 %v1121_v18, 0.0 }
  0xf1   : > { %v507_v15 = vpop.f32.mrf.mxu0 }
  0xf2   : > { %v989_v16 = vpack.c.bf16 %v507_v15, %v507_v15 }
  0xf4   : > { %v1057_v19 = vunpack.c.l.bf16 %v989_v16  ;;  %v10655_v16 = vpop.f32.mrf.mxu1  ;;  %9499 = vmatmul.msk.bf16.gmra.mxu1 %vm364_vm1, %v10605_v4 }
  0xf6   : > { %v1122_v24 = vadd.f32 %v10551_v53, %v1057_v19 }
  0xf8   : > { %v1314_v27 = vmax.f32 %v1122_v24, 0.0  ;;  %9519 = vmatmul.msk.bf16.gmra.mxu2 %vm364_vm1, %v10457_v10  ;;  %v10679_v10 = vpack.i.b16 %v1696_v40, %v1696_v40 }
  0xf9   : > { %v510_v28 = vpop.f32.mrf.mxu0 }
  0xfa   : > { %v1372_v29 = vpack.c.bf16 %v1314_v27, %v1313_v26  ;;  %v990_v31 = vpack.c.bf16 %v510_v28, %v510_v28 }
  0xfc   : > { %9468 = vmatmul.msk.bf16.gmra.mxu0 %vm364_vm1, %v10615_v25  ;;  %1496 = vmatmul.bf16.gmra.mxu3 %v1372_v29  ;;  %v1058_v34 = vunpack.c.l.bf16 %v990_v31  ;;  %v10662_v24 = vpop.f32.mrf.mxu1  ;;  %v288_v29 = vld [vmem:[%s10447_s17 + $0x110] sm:$0xff]  ;;  %v289_v31 = vld [vmem:[%s10447_s17 + $0x118] sm:$0xff] }
  0xfe   : > { %v1123_v38 = vadd.f32 %v10551_v53, %v1058_v34  ;;  %v10672_v34 = vpack.c.bf16 %v289_v31, %v288_v29  ;;  %v10141_v29 = vld [vmem:[%s12868_s2 + $0x50] sm:$0xff] }
  0xff   : > { %2123 = vmatpush.bf16.msrb.mxu0 %v10141_v29  ;;  %v295_v29 = vld [vmem:[%s10447_s17 + $0x148] sm:$0xff] }
 0x100   : > { %v1315_v46 = vmax.f32 %v1123_v38, 0.0 }
 0x101   : > { %v512_v35 = vpop.f32.mrf.mxu0 }
 0x102   : > { %v991_v37 = vpack.c.bf16 %v512_v35, %v512_v35 }
 0x104   : > { %v1059_v39 = vunpack.c.l.bf16 %v991_v37 }
 0x106   : > { %v1124_v43 = vadd.f32 %v10551_v53, %v1059_v39  ;;  %v10674_v39 = vpop.f32.mrf.mxu1  ;;  %9500 = vmatmul.msk.bf16.gmra.mxu1 %vm364_vm1, %v10615_v25 }
 0x108   : > { %v1316_v49 = vmax.f32 %v1124_v43, 0.0  ;;  %9520 = vmatmul.msk.bf16.gmra.mxu2 %vm364_vm1, %v10463_v13 }
 0x109   : > { %v515_v50 = vpop.f32.mrf.mxu0 }
 0x10a   : > { %v1373_v54 = vpack.c.bf16 %v1316_v49, %v1315_v46  ;;  %v992_v56 = vpack.c.bf16 %v515_v50, %v515_v50 }
 0x10c   : > { %9469 = vmatmul.msk.bf16.gmra.mxu0 %vm364_vm1, %v10630_v45  ;;  %1501 = vmatmul.bf16.gmra.mxu3 %v1373_v54  ;;  %v1060_v60 = vunpack.c.l.bf16 %v992_v56  ;;  %v1699_v56 = vperm.slane %v10679_v10, 0 }
 0x10e   : > { %v1125_v2 = vadd.f32 %v10551_v53, %v1060_v60  ;;  %v10681_v54 = vpop.f32.mrf.mxu1  ;;  %v291_v60 = vld [vmem:[%s10447_s17 + $0x128] sm:$0xff] }
 0x10f   : > { %v10694_v5 = vpack.c.bf16 %v291_v60, %v290_v59 }
 0x110   : > { %v1317_v11 = vmax.f32 %v1125_v2, 0.0 }
 0x111   : > { %v517_v63 = vpop.f32.mrf.mxu0 }
 0x112   : > { %v993_v1 = vpack.c.bf16 %v517_v63, %v517_v63  ;;  %v10691_v63 = vunpack.c.l.bf16 %v1699_v56 }
 0x114   : > { %v1061_v3 = vunpack.c.l.bf16 %v993_v1 }
 0x116   : > { %v1126_v8 = vadd.f32 %v10551_v53, %v1061_v3 }
 0x118   : > { %v1318_v12 = vmax.f32 %v1126_v8, 0.0  ;;  %9521 = vmatmul.msk.bf16.gmra.mxu2 %vm364_vm1, %v10472_v17 }
 0x119   : > { %v520_v15 = vpop.f32.mrf.mxu0 }
 0x11a   : > { %v1374_v18 = vpack.c.bf16 %v1318_v12, %v1317_v11  ;;  %v994_v19 = vpack.c.bf16 %v520_v15, %v520_v15  ;;  %v10696_v12 = vpop.f32.mrf.mxu1  ;;  %9501 = vmatmul.msk.bf16.gmra.mxu1 %vm364_vm1, %v10630_v45 }
 0x11c   : > { %9470 = vmatmul.msk.bf16.gmra.mxu0 %vm364_vm1, %v10653_v9  ;;  %1506 = vmatmul.bf16.gmra.mxu3 %v1374_v18  ;;  %v1062_v7 = vunpack.c.l.bf16 %v994_v19 }
 0x11e   : > { %v1127_v27 = vadd.f32 %v10551_v53, %v1062_v7 }
 0x120   : > { %v1319_v35 = vmax.f32 %v1127_v27, 0.0 }
 0x121   : > { %v522_v22 = vpop.f32.mrf.mxu0 }
 0x122   : > { %v995_v26 = vpack.c.bf16 %v522_v22, %v522_v22 }
 0x124   : > { %v1063_v28 = vunpack.c.l.bf16 %v995_v26 }
 0x126   : > { %v1128_v32 = vadd.f32 %v10551_v53, %v1063_v28 }
 0x128   : > { %v1320_v37 = vmax.f32 %v1128_v32, 0.0  ;;  %v10707_v32 = vpop.f32.mrf.mxu1  ;;  %9522 = vmatmul.msk.bf16.gmra.mxu2 %vm364_vm1, %v10478_v20 }
 0x129   : > { %v525_v38 = vpop.f32.mrf.mxu0 }
 0x12a   : > { %v1375_v42 = vpack.c.bf16 %v1320_v37, %v1319_v35  ;;  %v996_v43 = vpack.c.bf16 %v525_v38, %v525_v38 }
 0x12c   : > { %9471 = vmatmul.msk.bf16.gmra.mxu0 %vm364_vm1, %v10672_v34  ;;  %1511 = vmatmul.bf16.gmra.mxu3 %v1375_v42  ;;  %v1064_v49 = vunpack.c.l.bf16 %v996_v43  ;;  %v292_v42 = vld [vmem:[%s10447_s17 + $0x130] sm:$0xff]  ;;  %v293_v43 = vld [vmem:[%s10447_s17 + $0x138] sm:$0xff] }
 0x12d   : > { %v10717_v56 = vpack.c.bf16 %v293_v43, %v292_v42 }
 0x12e   : > { %v1129_v44 = vadd.f32 %v10551_v53, %v1064_v49 }
 0x12f   : > { %v1472_v46 = vpop.f32.mrf.mxu3 }
 0x130   : > { %v1632_v55 = vpack.c.bf16 %v1472_v46, %v1472_v46  ;;  %v1321_v6 = vmax.f32 %v1129_v44, 0.0  ;;  %v10719_v59 = vpop.f32.mrf.mxu1  ;;  %9502 = vmatmul.msk.bf16.gmra.mxu1 %vm364_vm1, %v10653_v9 }
 0x131   : > { %v527_v50 = vpop.f32.mrf.mxu0 }
 0x132   : > { %v997_v57 = vpack.c.bf16 %v527_v50, %v527_v50  ;;  %v1700_v62 = vunpack.c.l.bf16 %v1632_v55 }
 0x134   : > { %v1065_v58 = vunpack.c.l.bf16 %v997_v57  ;;  %v1765_v15 = vadd.f32 %v10691_v63, %v1700_v62 }
 0x136   : > { %v1130_v1 = vadd.f32 %v10551_v53, %v1065_v58  ;;  %v1957_v21 = vmax.f32 %v1765_v15, 0.0  ;;  %v10151_v15 = vld [vmem:[%s12868_s2 + $0xa0] sm:$0xff] }
 0x137   : > { %v1474_v2 = vpop.f32.mrf.mxu3  ;;  %2773 = vmatpush.bf16.msrb.mxu1 %v10151_v15 }
 0x138   : > { %v1633_v3 = vpack.c.bf16 %v1474_v2, %v1474_v2  ;;  %v1322_v8 = vmax.f32 %v1130_v1, 0.0  ;;  %9523 = vmatmul.msk.bf16.gmra.mxu2 %vm364_vm1, %v10484_v23 }
 0x139   : > { %v530_v11 = vpop.f32.mrf.mxu0 }
 0x13a   : > { %v1701_v18 = vunpack.c.l.bf16 %v1633_v3  ;;  %v1376_v13 = vpack.c.bf16 %v1322_v8, %v1321_v6  ;;  %v998_v7 = vpack.c.bf16 %v530_v11, %v530_v11 }
 0x13c   : > { %v1766_v19 = vadd.f32 %v10691_v63, %v1701_v18  ;;  %9472 = vmatmul.msk.bf16.gmra.mxu0 %vm364_vm1, %v10694_v5  ;;  %1516 = vmatmul.bf16.gmra.mxu3 %v1376_v13  ;;  %v1066_v28 = vunpack.c.l.bf16 %v998_v7 }
 0x13e   : > { %v1958_v22 = vmax.f32 %v1766_v19, 0.0  ;;  %v1131_v38 = vadd.f32 %v10551_v53, %v1066_v28  ;;  %v10730_v19 = vpop.f32.mrf.mxu1  ;;  %v294_v28 = vld [vmem:[%s10447_s17 + $0x140] sm:$0xff] }
 0x13f   : > { %v1477_v26 = vpop.f32.mrf.mxu3 }
 0x140   : > { %v10702_v27 = vpack.c.bf16 %v1958_v22, %v1957_v21  ;;  %v1634_v35 = vpack.c.bf16 %v1477_v26, %v1477_v26  ;;  %v1323_v57 = vmax.f32 %v1131_v38, 0.0 }
 0x141   : > { %v532_v31 = vpop.f32.mrf.mxu0 }
 0x142   : > { %v999_v37 = vpack.c.bf16 %v532_v31, %v532_v31  ;;  %v1702_v46 = vunpack.c.l.bf16 %v1634_v35 }
 0x144   : > { %v1067_v40 = vunpack.c.l.bf16 %v999_v37  ;;  %v1767_v60 = vadd.f32 %v10691_v63, %v1702_v46 }
 0x146   : > { %v1132_v49 = vadd.f32 %v10551_v53, %v1067_v40  ;;  %v1959_v3 = vmax.f32 %v1767_v60, 0.0  ;;  %v10740_v40 = vpack.c.bf16 %v295_v29, %v294_v28 }
 0x147   : > { %v1479_v50 = vpop.f32.mrf.mxu3 }
 0x148   : > { %v1635_v55 = vpack.c.bf16 %v1479_v50, %v1479_v50  ;;  %v1324_v44 = vmax.f32 %v1132_v49, 0.0  ;;  %v10742_v49 = vpop.f32.mrf.mxu1  ;;  %9524 = vmatmul.msk.bf16.gmra.mxu2 %vm364_vm1, %v10502_v30  ;;  %9503 = vmatmul.msk.bf16.gmra.mxu1 %vm364_vm1, %v10672_v34 }
 0x149   : > { %v535_v58 = vpop.f32.mrf.mxu0 }
 0x14a   : > { %v1703_v62 = vunpack.c.l.bf16 %v1635_v55  ;;  %v1377_v1 = vpack.c.bf16 %v1324_v44, %v1323_v57  ;;  %v1000_v2 = vpack.c.bf16 %v535_v58, %v535_v58 }
 0x14c   : > { %v1768_v17 = vadd.f32 %v10691_v63, %v1703_v62  ;;  %9473 = vmatmul.msk.bf16.gmra.mxu0 %vm364_vm1, %v10717_v56  ;;  %1521 = vmatmul.bf16.gmra.mxu3 %v1377_v1  ;;  %v1068_v11 = vunpack.c.l.bf16 %v1000_v2 }
 0x14e   : > { %v1960_v6 = vmax.f32 %v1768_v17, 0.0  ;;  %v1133_v22 = vadd.f32 %v10551_v53, %v1068_v11  ;;  %v10161_v17 = vld [vmem:[%s12868_s2 + $0xf0] sm:$0xff] }
 0x14f   : > { %v1482_v8 = vpop.f32.mrf.mxu3  ;;  %3423 = vmatpush.bf16.msrb.mxu2 %v10161_v17 }
 0x150   : > { %v10728_v18 = vpack.c.bf16 %v1960_v6, %v1959_v3  ;;  %v1636_v7 = vpack.c.bf16 %v1482_v8, %v1482_v8  ;;  %v1325_v42 = vmax.f32 %v1133_v22, 0.0  ;;  %v10753_v6 = vpop.f32.mrf.mxu1 }
 0x151   : > { %v537_v13 = vpop.f32.mrf.mxu0 }
 0x152   : > { %v1001_v21 = vpack.c.bf16 %v537_v13, %v537_v13  ;;  %v1704_v31 = vunpack.c.l.bf16 %v1636_v7  ;;  %v296_v7 = vld [vmem:[%s10447_s17 + $0x150] sm:$0xff] }
 0x154   : > { %v1069_v26 = vunpack.c.l.bf16 %v1001_v21  ;;  %v1769_v50 = vadd.f32 %v10691_v63, %v1704_v31  ;;  %v297_v21 = vld [vmem:[%s10447_s17 + $0x158] sm:$0xff] }
 0x156   : > { %v1134_v35 = vadd.f32 %v10551_v53, %v1069_v26  ;;  %v1961_v58 = vmax.f32 %v1769_v50, 0.0 }
 0x157   : > { %v1484_v37 = vpop.f32.mrf.mxu3 }
 0x158   : > { %v1637_v38 = vpack.c.bf16 %v1484_v37, %v1484_v37  ;;  %v1326_v43 = vmax.f32 %v1134_v35, 0.0  ;;  %v10763_v37 = vpack.c.bf16 %v297_v21, %v296_v7  ;;  %9525 = vmatmul.msk.bf16.gmra.mxu2 %vm364_vm1, %v10526_v41 }
 0x159   : > { %v540_v46 = vpop.f32.mrf.mxu0 }
 0x15a   : > { %v1705_v55 = vunpack.c.l.bf16 %v1637_v38  ;;  %v1378_v57 = vpack.c.bf16 %v1326_v43, %v1325_v42  ;;  %v1002_v44 = vpack.c.bf16 %v540_v46, %v540_v46  ;;  %v10765_v42 = vpop.f32.mrf.mxu1  ;;  %9504 = vmatmul.msk.bf16.gmra.mxu1 %vm364_vm1, %v10694_v5 }
 0x15b   : > { %12875 = vst [vmem:[#allocation5_spill] sm:$0xff] %v10765_v42 }
 0x15c   : > { %v1770_v20 = vadd.f32 %v10691_v63, %v1705_v55  ;;  %9474 = vmatmul.msk.bf16.gmra.mxu0 %vm364_vm1, %v10740_v40  ;;  %1526 = vmatmul.bf16.gmra.mxu3 %v1378_v57  ;;  %v1070_v1 = vunpack.c.l.bf16 %v1002_v44 }
 0x15e   : > { %v1962_v60 = vmax.f32 %v1770_v20, 0.0  ;;  %v1135_v15 = vadd.f32 %v10551_v53, %v1070_v1 }
 0x15f   : > { %v1487_v62 = vpop.f32.mrf.mxu3 }
 0x160   : > { %v10751_v2 = vpack.c.bf16 %v1962_v60, %v1961_v58  ;;  %v1638_v8 = vpack.c.bf16 %v1487_v62, %v1487_v62  ;;  %v1327_v29 = vmax.f32 %v1135_v15, 0.0  ;;  %v298_v15 = vld [vmem:[%s10447_s17 + $0x160] sm:$0xff] }
 0x161   : > { %v542_v3 = vpop.f32.mrf.mxu0 }
 0x162   : > { %v1003_v11 = vpack.c.bf16 %v542_v3, %v542_v3  ;;  %v1706_v22 = vunpack.c.l.bf16 %v1638_v8  ;;  %v10773_v1 = vpop.f32.mrf.mxu1 }
 0x163   : > { %12876 = vst [vmem:[#allocation6_spill] sm:$0xff] %v10773_v1 }
 0x164   : > { %v1071_v13 = vunpack.c.l.bf16 %v1003_v11  ;;  %v1771_v43 = vadd.f32 %v10691_v63, %v1706_v22 }
 0x166   : > { %v1136_v26 = vadd.f32 %v10551_v53, %v1071_v13  ;;  %v1963_v57 = vmax.f32 %v1771_v43, 0.0  ;;  %v299_v13 = vld [vmem:[%s10447_s17 + $0x168] sm:$0xff] }
 0x167   : > { %v1489_v28 = vpop.f32.mrf.mxu3 }
 0x168   : > { %v1328_v31 = vmax.f32 %v1136_v26, 0.0  ;;  %v1639_v35 = vpack.c.bf16 %v1489_v28, %v1489_v28  ;;  %9526 = vmatmul.msk.bf16.gmra.mxu2 %vm364_vm1, %v10546_v48 }
 0x169   : > { %v545_v38 = vpop.f32.mrf.mxu0 }
 0x16a   : > { %v1707_v46 = vunpack.c.l.bf16 %v1639_v35  ;;  %v1379_v50 = vpack.c.bf16 %v1328_v31, %v1327_v29  ;;  %v1004_v55 = vpack.c.bf16 %v545_v38, %v545_v38  ;;  %v10783_v31 = vpack.c.bf16 %v299_v13, %v298_v15  ;;  %v10785_v38 = vpop.f32.mrf.mxu1  ;;  %9505 = vmatmul.msk.bf16.gmra.mxu1 %vm364_vm1, %v10717_v56 }
 0x16b   : > { %12877 = vst [vmem:[#allocation7_spill] sm:$0xff] %v10785_v38 }
 0x16c   : > { %v1772_v23 = vadd.f32 %v10691_v63, %v1707_v46  ;;  %9475 = vmatmul.msk.bf16.gmra.mxu0 %vm364_vm1, %v10763_v37  ;;  %1531 = vmatmul.bf16.gmra.mxu3 %v1379_v50  ;;  %v1072_v58 = vunpack.c.l.bf16 %v1004_v55 }
 0x16e   : > { %v1964_v20 = vmax.f32 %v1772_v23, 0.0  ;;  %v1137_v8 = vadd.f32 %v10551_v53, %v1072_v58  ;;  %v10140_v58 = vld [vmem:[%s12868_s2 + $0x48] sm:$0xff] }
 0x16f   : > { %v1492_v44 = vpop.f32.mrf.mxu3  ;;  %2124 = vmatpush.bf16.msrb.mxu0 %v10140_v58 }
 0x170   : > { %v10771_v60 = vpack.c.bf16 %v1964_v20, %v1963_v57  ;;  %v1640_v17 = vpack.c.bf16 %v1492_v44, %v1492_v44  ;;  %v1329_v26 = vmax.f32 %v1137_v8, 0.0 }
 0x171   : > { %v547_v62 = vpop.f32.mrf.mxu0 }
 0x172   : > { %v1005_v3 = vpack.c.bf16 %v547_v62, %v547_v62  ;;  %v1708_v7 = vunpack.c.l.bf16 %v1640_v17 }
 0x174   : > { %v1073_v11 = vunpack.c.l.bf16 %v1005_v3  ;;  %v1773_v43 = vadd.f32 %v10691_v63, %v1708_v7  ;;  %v10796_v3 = vpop.f32.mrf.mxu1  ;;  %v300_v7 = vld [vmem:[%s10447_s17 + $0x170] sm:$0xff] }
 0x175   : > { %12878 = vst [vmem:[#allocation8_spill] sm:$0xff] %v10796_v3 }
 0x176   : > { %v1138_v21 = vadd.f32 %v10551_v53, %v1073_v11  ;;  %v1965_v55 = vmax.f32 %v1773_v43, 0.0 }
 0x177   : > { %v1494_v22 = vpop.f32.mrf.mxu3 }
 0x178   : > { %v1330_v28 = vmax.f32 %v1138_v21, 0.0  ;;  %v1641_v29 = vpack.c.bf16 %v1494_v22, %v1494_v22  ;;  %v301_v21 = vld [vmem:[%s10447_s17 + $0x178] sm:$0xff]  ;;  %9527 = vmatmul.msk.bf16.gmra.mxu2 %vm364_vm1, %v10559_v61 }
 0x179   : > { %v550_v35 = vpop.f32.mrf.mxu0 }
 0x17a   : > { %v1709_v46 = vunpack.c.l.bf16 %v1641_v29  ;;  %v1380_v50 = vpack.c.bf16 %v1330_v28, %v1329_v26  ;;  %v1006_v23 = vpack.c.bf16 %v550_v35, %v550_v35 }
 0x17c   : > { %v1774_v30 = vadd.f32 %v10691_v63, %v1709_v46  ;;  %9476 = vmatmul.msk.bf16.gmra.mxu0 %vm364_vm1, %v10783_v31  ;;  %1536 = vmatmul.bf16.gmra.mxu3 %v1380_v50  ;;  %v1074_v44 = vunpack.c.l.bf16 %v1006_v23  ;;  %v10806_v46 = vpack.c.bf16 %v301_v21, %v300_v7 }
 0x17e   : > { %v1966_v57 = vmax.f32 %v1774_v30, 0.0  ;;  %v1139_v15 = vadd.f32 %v10551_v53, %v1074_v44  ;;  %v10808_v30 = vpop.f32.mrf.mxu1  ;;  %9506 = vmatmul.msk.bf16.gmra.mxu1 %vm364_vm1, %v10740_v40 }
 0x17f   : > { %v1497_v20 = vpop.f32.mrf.mxu3  ;;  %12879 = vst [vmem:[#allocation9_spill] sm:$0xff] %v10808_v30 }
 0x180   : > { %v10794_v62 = vpack.c.bf16 %v1966_v57, %v1965_v55  ;;  %v1642_v8 = vpack.c.bf16 %v1497_v20, %v1497_v20  ;;  %v1331_v29 = vmax.f32 %v1139_v15, 0.0 }
 0x181   : > { %v552_v17 = vpop.f32.mrf.mxu0 }
 0x182   : > { %v1007_v11 = vpack.c.bf16 %v552_v17, %v552_v17  ;;  %v1710_v22 = vunpack.c.l.bf16 %v1642_v8 }
 0x184   : > { %v1075_v13 = vunpack.c.l.bf16 %v1007_v11  ;;  %v1775_v23 = vadd.f32 %v10691_v63, %v1710_v22  ;;  %v10150_v11 = vld [vmem:[%s12868_s2 + $0x98] sm:$0xff] }
 0x185   : > { %2774 = vmatpush.bf16.msrb.mxu1 %v10150_v11 }
 0x186   : > { %v1140_v26 = vadd.f32 %v10551_v53, %v1075_v13  ;;  %v1967_v44 = vmax.f32 %v1775_v23, 0.0  ;;  %v10819_v7 = vpop.f32.mrf.mxu1 }
 0x187   : > { %v1499_v28 = vpop.f32.mrf.mxu3  ;;  %12880 = vst [vmem:[#allocation10_spill] sm:$0xff] %v10819_v7 }
 0x188   : > { %v1332_v35 = vmax.f32 %v1140_v26, 0.0  ;;  %v1643_v43 = vpack.c.bf16 %v1499_v28, %v1499_v28  ;;  %9528 = vmatmul.msk.bf16.gmra.mxu2 %vm364_vm1, %v10569_v14 }
 0x189   : > { %v555_v50 = vpop.f32.mrf.mxu0 }
 0x18a   : > { %v1711_v55 = vunpack.c.l.bf16 %v1643_v43  ;;  %v1381_v57 = vpack.c.bf16 %v1332_v35, %v1331_v29  ;;  %v1008_v20 = vpack.c.bf16 %v555_v50, %v555_v50  ;;  %v302_v29 = vld [vmem:[%s10447_s17 + $0x180] sm:$0xff]  ;;  %v303_v35 = vld [vmem:[%s10447_s17 + $0x188] sm:$0xff] }
 0x18c   : > { %v1776_v41 = vadd.f32 %v10691_v63, %v1711_v55  ;;  %9477 = vmatmul.msk.bf16.gmra.mxu0 %vm364_vm1, %v10806_v46  ;;  %1541 = vmatmul.bf16.gmra.mxu3 %v1381_v57  ;;  %v1076_v8 = vunpack.c.l.bf16 %v1008_v20  ;;  %v10829_v55 = vpop.f32.mrf.mxu2 }
 0x18d   : > { %12881 = vst [vmem:[#allocation11_spill] sm:$0xff] %v10829_v55 }
 0x18e   : > { %v1968_v58 = vmax.f32 %v1776_v41, 0.0  ;;  %v1141_v26 = vadd.f32 %v10551_v53, %v1076_v8 }
 0x18f   : > { %v1502_v17 = vpop.f32.mrf.mxu3 }
 0x190   : > { %v10817_v15 = vpack.c.bf16 %v1968_v58, %v1967_v44  ;;  %v1644_v21 = vpack.c.bf16 %v1502_v17, %v1502_v17  ;;  %v1333_v57 = vmax.f32 %v1141_v26, 0.0  ;;  %v10831_v44 = vpack.c.bf16 %v303_v35, %v302_v29  ;;  %v10833_v17 = vpop.f32.mrf.mxu1  ;;  %9507 = vmatmul.msk.bf16.gmra.mxu1 %vm364_vm1, %v10763_v37 }
 0x191   : > { %v557_v13 = vpop.f32.mrf.mxu0  ;;  %12882 = vst [vmem:[#allocation12_spill] sm:$0xff] %v10833_v17 }
 0x192   : > { %v1009_v22 = vpack.c.bf16 %v557_v13, %v557_v13  ;;  %v1712_v43 = vunpack.c.l.bf16 %v1644_v21 }
 0x194   : > { %v1077_v28 = vunpack.c.l.bf16 %v1009_v22  ;;  %v1777_v8 = vadd.f32 %v10691_v63, %v1712_v43  ;;  %v10839_v29 = vpop.f32.mrf.mxu2  ;;  %v10160_v43 = vld [vmem:[%s12868_s2 + $0xe8] sm:$0xff] }
 0x195   : > { %12883 = vst [vmem:[#allocation13_spill] sm:$0xff] %v10839_v29  ;;  %3424 = vmatpush.bf16.msrb.mxu2 %v10160_v43 }
 0x196   : > { %v1142_v50 = vadd.f32 %v10551_v53, %v1077_v28  ;;  %v1969_v22 = vmax.f32 %v1777_v8, 0.0 }
 0x197   : > { %v1504_v23 = vpop.f32.mrf.mxu3 }
 0x198   : > { %v1334_v41 = vmax.f32 %v1142_v50, 0.0  ;;  %v1645_v20 = vpack.c.bf16 %v1504_v23, %v1504_v23  ;;  %9529 = vmatmul.msk.bf16.gmra.mxu2 %vm364_vm1, %v10582_v33 }
 0x199   : > { %v560_v58 = vpop.f32.mrf.mxu0 }
 0x19a   : > { %v1713_v11 = vunpack.c.l.bf16 %v1645_v20  ;;  %v1382_v48 = vpack.c.bf16 %v1334_v41, %v1333_v57  ;;  %v1010_v21 = vpack.c.bf16 %v560_v58, %v560_v58  ;;  %v10846_v57 = vpop.f32.mrf.mxu1 }
 0x19b   : > { %12884 = vst [vmem:[#allocation14_spill] sm:$0xff] %v10846_v57 }
 0x19c   : > { %v1778_v13 = vadd.f32 %v10691_v63, %v1713_v11  ;;  %9478 = vmatmul.msk.bf16.gmra.mxu0 %vm364_vm1, %v10831_v44  ;;  %1546 = vmatmul.bf16.gmra.mxu3 %v1382_v48  ;;  %v1078_v35 = vunpack.c.l.bf16 %v1010_v21  ;;  %v304_v11 = vld [vmem:[%s10447_s17 + $0x190] sm:$0xff]  ;;  %v305_v48 = vld [vmem:[%s10447_s17 + $0x198] sm:$0xff] }
 0x19d   : > { %v10858_v29 = vpack.c.bf16 %v305_v48, %v304_v11 }
 0x19e   : > { %v1970_v26 = vmax.f32 %v1778_v13, 0.0  ;;  %v1143_v58 = vadd.f32 %v10551_v53, %v1078_v35 }
 0x19f   : > { %v1507_v28 = vpop.f32.mrf.mxu3 }
 0x1a0   : > { %v10844_v50 = vpack.c.bf16 %v1970_v26, %v1969_v22  ;;  %v1646_v41 = vpack.c.bf16 %v1507_v28, %v1507_v28  ;;  %v10856_v26 = vpop.f32.mrf.mxu2  ;;  %v1335_v28 = vmax.f32 %v1143_v58, 0.0 }
 0x1a1   : > { %v562_v23 = vpop.f32.mrf.mxu0  ;;  %12885 = vst [vmem:[#allocation15_spill] sm:$0xff] %v10856_v26 }
 0x1a2   : > { %v1011_v20 = vpack.c.bf16 %v562_v23, %v562_v23  ;;  %v1714_v13 = vunpack.c.l.bf16 %v1646_v41 }
 0x1a4   : > { %v1079_v8 = vunpack.c.l.bf16 %v1011_v20  ;;  %v10860_v20 = vpop.f32.mrf.mxu1  ;;  %v1779_v55 = vadd.f32 %v10691_v63, %v1714_v13  ;;  %9508 = vmatmul.msk.bf16.gmra.mxu1 %vm364_vm1, %v10783_v31 }
 0x1a5   : > { %12886 = vst [vmem:[#allocation16_spill] sm:$0xff] %v10860_v20 }
 0x1a6   : > { %v1144_v21 = vadd.f32 %v10551_v53, %v1079_v8  ;;  %v1971_v58 = vmax.f32 %v1779_v55, 0.0  ;;  %v306_v55 = vld [vmem:[%s10447_s17 + $0x1a0] sm:$0xff] }
 0x1a7   : > { %v1509_v22 = vpop.f32.mrf.mxu3 }
 0x1a8   : > { %v1336_v23 = vmax.f32 %v1144_v21, 0.0  ;;  %v1647_v43 = vpack.c.bf16 %v1509_v22, %v1509_v22  ;;  %v10866_v48 = vpop.f32.mrf.mxu2  ;;  %9530 = vmatmul.msk.bf16.gmra.mxu2 %vm364_vm1, %v10595_v52 }
 0x1a9   : > { %v565_v35 = vpop.f32.mrf.mxu0  ;;  %12887 = vst [vmem:[#allocation17_spill] sm:$0xff] %v10866_v48 }
 0x1aa   : > { %v1715_v57 = vunpack.c.l.bf16 %v1647_v43  ;;  %v1383_v61 = vpack.c.bf16 %v1336_v23, %v1335_v28  ;;  %v1012_v41 = vpack.c.bf16 %v565_v35, %v565_v35 }
 0x1ac   : > { %v1780_v17 = vadd.f32 %v10691_v63, %v1715_v57  ;;  %9479 = vmatmul.msk.bf16.gmra.mxu0 %vm364_vm1, %v10858_v29  ;;  %1551 = vmatmul.bf16.gmra.mxu3 %v1383_v61  ;;  %v1080_v21 = vunpack.c.l.bf16 %v1012_v41  ;;  %v10870_v43 = vpop.f32.mrf.mxu1 }
 0x1ad   : > { %12888 = vst [vmem:[#allocation18_spill] sm:$0xff] %v10870_v43 }
 0x1ae   : > { %v1972_v8 = vmax.f32 %v1780_v17, 0.0  ;;  %v1145_v23 = vadd.f32 %v10551_v53, %v1080_v21  ;;  %v307_v17 = vld [vmem:[%s10447_s17 + $0x1a8] sm:$0xff]  ;;  %v10170_v21 = vld [vmem:[%s12868_s2 + $0x138] sm:$0xff] }
 0x1af   : > { %v1512_v11 = vpop.f32.mrf.mxu3  ;;  %v10882_v26 = vpack.c.bf16 %v307_v17, %v306_v55  ;;  %4074 = vmatpush.bf16.msrb.mxu3 %v10170_v21 }
 0x1b0   : > { %v10868_v22 = vpack.c.bf16 %v1972_v8, %v1971_v58  ;;  %v1648_v28 = vpack.c.bf16 %v1512_v11, %v1512_v11  ;;  %v10880_v8 = vpop.f32.mrf.mxu2  ;;  %v1337_v48 = vmax.f32 %v1145_v23, 0.0 }
 0x1b1   : > { %v567_v13 = vpop.f32.mrf.mxu0  ;;  %12889 = vst [vmem:[#allocation19_spill] sm:$0xff] %v10880_v8 }
 0x1b2   : > { %v1013_v57 = vpack.c.bf16 %v567_v13, %v567_v13  ;;  %v1716_v61 = vunpack.c.l.bf16 %v1648_v28 }
 0x1b4   : > { %v1081_v35 = vunpack.c.l.bf16 %v1013_v57  ;;  %v10887_v43 = vpop.f32.mrf.mxu1  ;;  %v1781_v14 = vadd.f32 %v10691_v63, %v1716_v61  ;;  %9509 = vmatmul.msk.bf16.gmra.mxu1 %vm364_vm1, %v10806_v46 }
 0x1b5   : > { %12890 = vst [vmem:[#allocation20_spill] sm:$0xff] %v10887_v43 }
 0x1b6   : > { %v1146_v41 = vadd.f32 %v10551_v53, %v1081_v35  ;;  %v1973_v23 = vmax.f32 %v1781_v14, 0.0 }
 0x1b7   : > { %v1514_v58 = vpop.f32.mrf.mxu3 }
 0x1b8   : > { %v1338_v11 = vmax.f32 %v1146_v41, 0.0  ;;  %v1649_v13 = vpack.c.bf16 %v1514_v58, %v1514_v58  ;;  %v10893_v41 = vpop.f32.mrf.mxu2  ;;  %9531 = vmatmul.msk.bf16.gmra.mxu2 %vm364_vm1, %v10605_v4 }
 0x1b9   : > { %v570_v57 = vpop.f32.mrf.mxu0  ;;  %12891 = vst [vmem:[#allocation21_spill] sm:$0xff] %v10893_v41 }
 0x1ba   : > { %v1717_v28 = vunpack.c.l.bf16 %v1649_v13  ;;  %v1384_v20 = vpack.c.bf16 %v1338_v11, %v1337_v48  ;;  %v1014_v8 = vpack.c.bf16 %v570_v57, %v570_v57  ;;  %v10139_v48 = vld [vmem:[%s12868_s2 + $0x40] sm:$0xff] }
 0x1bb   : > { %2125 = vmatpush.bf16.msrb.mxu0 %v10139_v48 }
 0x1bc   : > { %v1782_v35 = vadd.f32 %v10691_v63, %v1717_v28  ;;  %9480 = vmatmul.msk.bf16.gmra.mxu0 %vm364_vm1, %v10882_v26  ;;  %1556 = vmatmul.bf16.gmra.mxu3 %v1384_v20  ;;  %v1082_v58 = vunpack.c.l.bf16 %v1014_v8  ;;  %v10900_v13 = vpop.f32.mrf.mxu1  ;;  %v308_v8 = vld [vmem:[%s10447_s17 + $0x1b0] sm:$0xff]  ;;  %v309_v28 = vld [vmem:[%s10447_s17 + $0x1b8] sm:$0xff] }
 0x1bd   : > { %12892 = vst [vmem:[#allocation22_spill] sm:$0xff] %v10900_v13  ;;  %v10912_v13 = vpack.c.bf16 %v309_v28, %v308_v8 }
 0x1be   : > { %v1974_v55 = vmax.f32 %v1782_v35, 0.0  ;;  %v1147_v20 = vadd.f32 %v10551_v53, %v1082_v58 }
 0x1bf   : > { %v1517_v17 = vpop.f32.mrf.mxu3 }
 0x1c0   : > { %v10898_v61 = vpack.c.bf16 %v1974_v55, %v1973_v23  ;;  %v1650_v21 = vpack.c.bf16 %v1517_v17, %v1517_v17  ;;  %v10910_v41 = vpop.f32.mrf.mxu2  ;;  %v1339_v17 = vmax.f32 %v1147_v20, 0.0 }
 0x1c1   : > { %v572_v11 = vpop.f32.mrf.mxu0  ;;  %12893 = vst [vmem:[#allocation23_spill] sm:$0xff] %v10910_v41 }
 0x1c2   : > { %v1015_v57 = vpack.c.bf16 %v572_v11, %v572_v11  ;;  %v1718_v35 = vunpack.c.l.bf16 %v1650_v21 }
 0x1c4   : > { %v1083_v14 = vunpack.c.l.bf16 %v1015_v57  ;;  %v10914_v57 = vpop.f32.mrf.mxu1  ;;  %v1783_v43 = vadd.f32 %v10691_v63, %v1718_v35  ;;  %v10149_v35 = vld [vmem:[%s12868_s2 + $0x90] sm:$0xff]  ;;  %9510 = vmatmul.msk.bf16.gmra.mxu1 %vm364_vm1, %v10831_v44 }
 0x1c5   : > { %12894 = vst [vmem:[#allocation24_spill] sm:$0xff] %v10914_v57  ;;  %2775 = vmatpush.bf16.msrb.mxu1 %v10149_v35 }
 0x1c6   : > { %v1148_v23 = vadd.f32 %v10551_v53, %v1083_v14  ;;  %v1975_v14 = vmax.f32 %v1783_v43, 0.0 }
 0x1c7   : > { %v1519_v55 = vpop.f32.mrf.mxu3 }
 0x1c8   : > { %v1340_v11 = vmax.f32 %v1148_v23, 0.0  ;;  %v1651_v48 = vpack.c.bf16 %v1519_v55, %v1519_v55  ;;  %v10920_v28 = vpop.f32.mrf.mxu2  ;;  %9532 = vmatmul.msk.bf16.gmra.mxu2 %vm364_vm1, %v10615_v25 }
 0x1c9   : > { %v575_v58 = vpop.f32.mrf.mxu0  ;;  %12895 = vst [vmem:[#allocation25_spill] sm:$0xff] %v10920_v28 }
 0x1ca   : > { %v1719_v7 = vunpack.c.l.bf16 %v1651_v48  ;;  %v1385_v33 = vpack.c.bf16 %v1340_v11, %v1339_v17  ;;  %v1016_v21 = vpack.c.bf16 %v575_v58, %v575_v58  ;;  %v310_v58 = vld [vmem:[%s10447_s17 + $0x1c0] sm:$0xff] }
 0x1cc   : > { %v1784_v30 = vadd.f32 %v10691_v63, %v1719_v7  ;;  %9481 = vmatmul.msk.bf16.gmra.mxu0 %vm364_vm1, %v10912_v13  ;;  %1561 = vmatmul.bf16.gmra.mxu3 %v1385_v33  ;;  %v1084_v23 = vunpack.c.l.bf16 %v1016_v21  ;;  %v10927_v17 = vpop.f32.mrf.mxu1  ;;  %v311_v33 = vld [vmem:[%s10447_s17 + $0x1c8] sm:$0xff] }
 0x1cd   : > { %12896 = vst [vmem:[#allocation26_spill] sm:$0xff] %v10927_v17  ;;  %v10939_v41 = vpack.c.bf16 %v311_v33, %v310_v58 }
 0x1ce   : > { %v1976_v20 = vmax.f32 %v1784_v30, 0.0  ;;  %v1149_v43 = vadd.f32 %v10551_v53, %v1084_v23 }
 0x1cf   : > { %v1522_v8 = vpop.f32.mrf.mxu3 }
 0x1d0   : > { %v10925_v55 = vpack.c.bf16 %v1976_v20, %v1975_v14  ;;  %v1652_v11 = vpack.c.bf16 %v1522_v8, %v1522_v8  ;;  %v10937_v28 = vpop.f32.mrf.mxu2  ;;  %v1341_v8 = vmax.f32 %v1149_v43, 0.0 }
 0x1d1   : > { %v577_v7 = vpop.f32.mrf.mxu0  ;;  %12897 = vst [vmem:[#allocation27_spill] sm:$0xff] %v10937_v28 }
 0x1d2   : > { %v1017_v48 = vpack.c.bf16 %v577_v7, %v577_v7  ;;  %v1720_v21 = vunpack.c.l.bf16 %v1652_v11 }
 0x1d4   : > { %v1085_v30 = vunpack.c.l.bf16 %v1017_v48  ;;  %v10941_v48 = vpop.f32.mrf.mxu1  ;;  %v1785_v17 = vadd.f32 %v10691_v63, %v1720_v21  ;;  %v10159_v21 = vld [vmem:[%s12868_s2 + $0xe0] sm:$0xff]  ;;  %9511 = vmatmul.msk.bf16.gmra.mxu1 %vm364_vm1, %v10858_v29 }
 0x1d5   : > { %12898 = vst [vmem:[#allocation28_spill] sm:$0xff] %v10941_v48  ;;  %3425 = vmatpush.bf16.msrb.mxu2 %v10159_v21 }
 0x1d6   : > { %v1150_v14 = vadd.f32 %v10551_v53, %v1085_v30  ;;  %v1977_v30 = vmax.f32 %v1785_v17, 0.0 }
 0x1d7   : > { %v1524_v20 = vpop.f32.mrf.mxu3 }
 0x1d8   : > { %v1342_v7 = vmax.f32 %v1150_v14, 0.0  ;;  %v1653_v35 = vpack.c.bf16 %v1524_v20, %v1524_v20  ;;  %v10947_v33 = vpop.f32.mrf.mxu2  ;;  %9533 = vmatmul.msk.bf16.gmra.mxu2 %vm364_vm1, %v10630_v45 }
 0x1d9   : > { %v580_v23 = vpop.f32.mrf.mxu0  ;;  %12899 = vst [vmem:[#allocation29_spill] sm:$0xff] %v10947_v33 }
 0x1da   : > { %v1721_v57 = vunpack.c.l.bf16 %v1653_v35  ;;  %v1386_v52 = vpack.c.bf16 %v1342_v7, %v1341_v8  ;;  %v1018_v11 = vpack.c.bf16 %v580_v23, %v580_v23  ;;  %v312_v23 = vld [vmem:[%s10447_s17 + $0x1d0] sm:$0xff] }
 0x1dc   : > { %v1786_v3 = vadd.f32 %v10691_v63, %v1721_v57  ;;  %9482 = vmatmul.msk.bf16.gmra.mxu0 %vm364_vm1, %v10939_v41  ;;  %1566 = vmatmul.bf16.gmra.mxu3 %v1386_v52  ;;  %v1086_v14 = vunpack.c.l.bf16 %v1018_v11  ;;  %v10954_v8 = vpop.f32.mrf.mxu1  ;;  %v313_v52 = vld [vmem:[%s10447_s17 + $0x1d8] sm:$0xff] }
 0x1dd   : > { %12900 = vst [vmem:[#allocation30_spill] sm:$0xff] %v10954_v8  ;;  %v10966_v28 = vpack.c.bf16 %v313_v52, %v312_v23 }
 0x1de   : > { %v1978_v43 = vmax.f32 %v1786_v3, 0.0  ;;  %v1151_v17 = vadd.f32 %v10551_v53, %v1086_v14 }
 0x1df   : > { %v1527_v58 = vpop.f32.mrf.mxu3 }
 0x1e0   : > { %v10952_v20 = vpack.c.bf16 %v1978_v43, %v1977_v30  ;;  %v1654_v7 = vpack.c.bf16 %v1527_v58, %v1527_v58  ;;  %v10964_v33 = vpop.f32.mrf.mxu2  ;;  %v1343_v58 = vmax.f32 %v1151_v17, 0.0 }
 0x1e1   : > { %v582_v57 = vpop.f32.mrf.mxu0  ;;  %12901 = vst [vmem:[#allocation31_spill] sm:$0xff] %v10964_v33 }
 0x1e2   : > { %v1019_v35 = vpack.c.bf16 %v582_v57, %v582_v57  ;;  %v1722_v11 = vunpack.c.l.bf16 %v1654_v7 }
 0x1e4   : > { %v1087_v3 = vunpack.c.l.bf16 %v1019_v35  ;;  %v10968_v35 = vpop.f32.mrf.mxu1  ;;  %v1787_v8 = vadd.f32 %v10691_v63, %v1722_v11  ;;  %9512 = vmatmul.msk.bf16.gmra.mxu1 %vm364_vm1, %v10882_v26 }
 0x1e5   : > { %12902 = vst [vmem:[#allocation32_spill] sm:$0xff] %v10968_v35 }
 0x1e6   : > { %v1152_v30 = vadd.f32 %v10551_v53, %v1087_v3  ;;  %v1979_v17 = vmax.f32 %v1787_v8, 0.0  ;;  %v315_v8 = vld [vmem:[%s10447_s17 + $0x1e8] sm:$0xff] }
 0x1e7   : > { %v1529_v43 = vpop.f32.mrf.mxu3 }
 0x1e8   : > { %v1344_v57 = vmax.f32 %v1152_v30, 0.0  ;;  %v1655_v21 = vpack.c.bf16 %v1529_v43, %v1529_v43  ;;  %v10974_v52 = vpop.f32.mrf.mxu2  ;;  %9534 = vmatmul.msk.bf16.gmra.mxu2 %vm364_vm1, %v10653_v9 }
 0x1e9   : > { %v585_v14 = vpop.f32.mrf.mxu0  ;;  %12903 = vst [vmem:[#allocation33_spill] sm:$0xff] %v10974_v52 }
 0x1ea   : > { %v1723_v48 = vunpack.c.l.bf16 %v1655_v21  ;;  %v1387_v4 = vpack.c.bf16 %v1344_v57, %v1343_v58  ;;  %v1020_v7 = vpack.c.bf16 %v585_v14, %v585_v14 }
 0x1ec   : > { %v1788_v38 = vadd.f32 %v10691_v63, %v1723_v48  ;;  %9483 = vmatmul.msk.bf16.gmra.mxu0 %vm364_vm1, %v10966_v28  ;;  %1571 = vmatmul.bf16.gmra.mxu3 %v1387_v4  ;;  %v1088_v30 = vunpack.c.l.bf16 %v1020_v7  ;;  %v10978_v21 = vpop.f32.mrf.mxu1 }
 0x1ed   : > { %12904 = vst [vmem:[#allocation34_spill] sm:$0xff] %v10978_v21 }
 0x1ee   : > { %v1980_v3 = vmax.f32 %v1788_v38, 0.0  ;;  %v1153_v57 = vadd.f32 %v10551_v53, %v1088_v30  ;;  %v314_v38 = vld [vmem:[%s10447_s17 + $0x1e0] sm:$0xff]  ;;  %v10169_v30 = vld [vmem:[%s12868_s2 + $0x130] sm:$0xff] }
 0x1ef   : > { %v1532_v23 = vpop.f32.mrf.mxu3  ;;  %v10990_v33 = vpack.c.bf16 %v315_v8, %v314_v38  ;;  %4075 = vmatpush.bf16.msrb.mxu3 %v10169_v30 }
 0x1f0   : > { %v10976_v43 = vpack.c.bf16 %v1980_v3, %v1979_v17  ;;  %v1656_v58 = vpack.c.bf16 %v1532_v23, %v1532_v23  ;;  %v10988_v3 = vpop.f32.mrf.mxu2  ;;  %v1345_v52 = vmax.f32 %v1153_v57, 0.0 }
 0x1f1   : > { %v587_v11 = vpop.f32.mrf.mxu0  ;;  %12905 = vst [vmem:[#allocation35_spill] sm:$0xff] %v10988_v3 }
 0x1f2   : > { %v1021_v48 = vpack.c.bf16 %v587_v11, %v587_v11  ;;  %v1724_v4 = vunpack.c.l.bf16 %v1656_v58 }
 0x1f4   : > { %v1089_v14 = vunpack.c.l.bf16 %v1021_v48  ;;  %v10995_v21 = vpop.f32.mrf.mxu1  ;;  %v1789_v25 = vadd.f32 %v10691_v63, %v1724_v4  ;;  %9513 = vmatmul.msk.bf16.gmra.mxu1 %vm364_vm1, %v10912_v13 }
 0x1f5   : > { %12906 = vst [vmem:[#allocation36_spill] sm:$0xff] %v10995_v21 }
 0x1f6   : > { %v1154_v7 = vadd.f32 %v10551_v53, %v1089_v14  ;;  %v1981_v57 = vmax.f32 %v1789_v25, 0.0  ;;  %v317_v25 = vld [vmem:[%s10447_s17 + $0x1f8] sm:$0xff] }
 0x1f7   : > { %v1534_v17 = vpop.f32.mrf.mxu3 }
 0x1f8   : > { %v1346_v23 = vmax.f32 %v1154_v7, 0.0  ;;  %v1657_v11 = vpack.c.bf16 %v1534_v17, %v1534_v17  ;;  %v11001_v7 = vpop.f32.mrf.mxu2  ;;  %9535 = vmatmul.msk.bf16.gmra.mxu2 %vm364_vm1, %v10672_v34 }
 0x1f9   : > { %v590_v48 = vpop.f32.mrf.mxu0  ;;  %12907 = vst [vmem:[#allocation37_spill] sm:$0xff] %v11001_v7 }
 0x1fa   : > { %v1725_v58 = vunpack.c.l.bf16 %v1657_v11  ;;  %v1388_v35 = vpack.c.bf16 %v1346_v23, %v1345_v52  ;;  %v1022_v3 = vpack.c.bf16 %v590_v48, %v590_v48 }
 0x1fc   : > { %v1790_v14 = vadd.f32 %v10691_v63, %v1725_v58  ;;  %9484 = vmatmul.msk.bf16.gmra.mxu0 %vm364_vm1, %v10990_v33  ;;  %1576 = vmatmul.bf16.gmra.mxu3 %v1388_v35  ;;  %v1090_v17 = vunpack.c.l.bf16 %v1022_v3  ;;  %v11005_v52 = vpop.f32.mrf.mxu1  ;;  %v316_v35 = vld [vmem:[%s10447_s17 + $0x1f0] sm:$0xff]  ;;  %s9382_s17 = sshll.u32 %s12476_s12, 4  ;;  %s9383_s17 = int_to_ptr.vmem [resolvable:$true] %s9382_s17 }
 0x1fd   : > { %12908 = vst [vmem:[#allocation38_spill] sm:$0xff] %v11005_v52  ;;  %v11017_v7 = vpack.c.bf16 %v317_v25, %v316_v35  ;;  %v10148_v25 = vld [vmem:[%s12868_s2 + $0x88] sm:$0xff] }
 0x1fe   : > { %v1982_v38 = vmax.f32 %v1790_v14, 0.0  ;;  %v1155_v30 = vadd.f32 %v10551_v53, %v1090_v17  ;;  %2776 = vmatpush.bf16.msrb.mxu1 %v10148_v25 }
 0x1ff   : > { %v1537_v8 = vpop.f32.mrf.mxu3 }
 0x200   : > { %v11003_v21 = vpack.c.bf16 %v1982_v38, %v1981_v57  ;;  %v1658_v23 = vpack.c.bf16 %v1537_v8, %v1537_v8  ;;  %v11015_v57 = vpop.f32.mrf.mxu2  ;;  %v1347_v38 = vmax.f32 %v1155_v30, 0.0 }
 0x201   : > { %v592_v4 = vpop.f32.mrf.mxu0  ;;  %12909 = vst [vmem:[#allocation39_spill] sm:$0xff] %v11015_v57 }
 0x202   : > { %v1023_v11 = vpack.c.bf16 %v592_v4, %v592_v4  ;;  %v1726_v58 = vunpack.c.l.bf16 %v1658_v23 }
 0x204   : > { %v1091_v48 = vunpack.c.l.bf16 %v1023_v11  ;;  %v11019_v11 = vpop.f32.mrf.mxu1  ;;  %v1791_v52 = vadd.f32 %v10691_v63, %v1726_v58  ;;  %9514 = vmatmul.msk.bf16.gmra.mxu1 %vm364_vm1, %v10939_v41 }
 0x205   : > { %12910 = vst [vmem:[#allocation40_spill] sm:$0xff] %v11019_v11 }
 0x206   : > { %v1156_v3 = vadd.f32 %v10551_v53, %v1091_v48  ;;  %v1983_v48 = vmax.f32 %v1791_v52, 0.0 }
 0x207   : > { %v1539_v14 = vpop.f32.mrf.mxu3 }
 0x208   : > { %v1348_v8 = vmax.f32 %v1156_v3, 0.0  ;;  %v1659_v4 = vpack.c.bf16 %v1539_v14, %v1539_v14  ;;  %v11025_v14 = vpop.f32.mrf.mxu2  ;;  %9536 = vmatmul.msk.bf16.gmra.mxu2 %vm364_vm1, %v10694_v5 }
 0x209   : > { %v595_v17 = vpop.f32.mrf.mxu0  ;;  %12911 = vst [vmem:[#allocation41_spill] sm:$0xff] %v11025_v14 }
 0x20a   : > { %v1727_v1 = vunpack.c.l.bf16 %v1659_v4  ;;  %v1389_v45 = vpack.c.bf16 %v1348_v8, %v1347_v38  ;;  %v1024_v23 = vpack.c.bf16 %v595_v17, %v595_v17 }
 0x20c   : > { %v1792_v42 = vadd.f32 %v10691_v63, %v1727_v1  ;;  %9485 = vmatmul.msk.bf16.gmra.mxu0 %vm364_vm1, %v11017_v7  ;;  %1581 = vmatmul.bf16.gmra.mxu3 %v1389_v45  ;;  %v1092_v35 = vunpack.c.l.bf16 %v1024_v23  ;;  %v11032_v8 = vpop.f32.mrf.mxu1 }
 0x20d   : > { %12912 = vst [vmem:[#allocation42_spill] sm:$0xff] %v11032_v8 }
 0x20e   : > { %v1984_v30 = vmax.f32 %v1792_v42, 0.0  ;;  %v1157_v17 = vadd.f32 %v10551_v53, %v1092_v35 }
 0x20f   : > { %v1542_v3 = vpop.f32.mrf.mxu3 }
 0x210   : > { %v11030_v58 = vpack.c.bf16 %v1984_v30, %v1983_v48  ;;  %v1660_v1 = vpack.c.bf16 %v1542_v3, %v1542_v3  ;;  %v11040_v48 = vpop.f32.mrf.mxu2  ;;  %v1349_v30 = vmax.f32 %v1157_v17, 0.0 }
 0x211   : > { %v597_v38 = vpop.f32.mrf.mxu0  ;;  %12913 = vst [vmem:[#allocation43_spill] sm:$0xff] %v11040_v48 }
 0x212   : > { %v1025_v4 = vpack.c.bf16 %v597_v38, %v597_v38  ;;  %v1728_v42 = vunpack.c.l.bf16 %v1660_v1 }
 0x214   : > { %v1093_v52 = vunpack.c.l.bf16 %v1025_v4  ;;  %v11042_v25 = vpop.f32.mrf.mxu1  ;;  %v1793_v35 = vadd.f32 %v10691_v63, %v1728_v42  ;;  %9515 = vmatmul.msk.bf16.gmra.mxu1 %vm364_vm1, %v10966_v28 }
 0x216   : > { %v1158_v45 = vadd.f32 %v10551_v53, %v1093_v52  ;;  %v1985_v9 = vmax.f32 %v1793_v35, 0.0 }
 0x217   : > { %v1544_v23 = vpop.f32.mrf.mxu3 }
 0x218   : > { %v1350_v14 = vmax.f32 %v1158_v45, 0.0  ;;  %v1661_v3 = vpack.c.bf16 %v1544_v23, %v1544_v23  ;;  %v11047_v48 = vpop.f32.mrf.mxu2  ;;  %v10158_v45 = vld [vmem:[%s12868_s2 + $0xd8] sm:$0xff]  ;;  %9537 = vmatmul.msk.bf16.gmra.mxu2 %vm364_vm1, %v10717_v56 }
 0x219   : > { %v600_v38 = vpop.f32.mrf.mxu0  ;;  %12914 = vst [vmem:[#allocation44_spill] sm:$0xff] %v11047_v48  ;;  %3426 = vmatpush.bf16.msrb.mxu2 %v10158_v45 }
 0x21a   : > { %v1729_v4 = vunpack.c.l.bf16 %v1661_v3  ;;  %v1390_v57 = vpack.c.bf16 %v1350_v14, %v1349_v30  ;;  %v1026_v11 = vpack.c.bf16 %v600_v38, %v600_v38 }
 0x21c   : > { %v1794_v8 = vadd.f32 %v10691_v63, %v1729_v4  ;;  %1586 = vmatmul.bf16.gmra.mxu3 %v1390_v57  ;;  %2126 = vmatmul.bf16.vlgmr.msrb.gmra.mxu0 %v10702_v27  ;;  %v1094_v17 = vunpack.c.l.bf16 %v1026_v11  ;;  %v11054_v14 = vpop.f32.mrf.mxu1 }
 0x21d   : > { %12915 = vst [vmem:[#allocation45_spill] sm:$0xff] %v11054_v14 }
 0x21e   : > { %v1986_v1 = vmax.f32 %v1794_v8, 0.0  ;;  %v1159_v27 = vadd.f32 %v10551_v53, %v1094_v17 }
 0x21f   : > { %v1547_v52 = vpop.f32.mrf.mxu3 }
 0x220   : > { %v11052_v23 = vpack.c.bf16 %v1986_v1, %v1985_v9  ;;  %v1662_v30 = vpack.c.bf16 %v1547_v52, %v1547_v52  ;;  %v11062_v35 = vpop.f32.mrf.mxu2  ;;  %v1351_v4 = vmax.f32 %v1159_v27, 0.0 }
 0x221   : > { %v602_v42 = vpop.f32.mrf.mxu0  ;;  %12916 = vst [vmem:[#allocation46_spill] sm:$0xff] %v11062_v35 }
 0x222   : > { %v1027_v3 = vpack.c.bf16 %v602_v42, %v602_v42  ;;  %v1730_v11 = vunpack.c.l.bf16 %v1662_v30 }
 0x224   : > { %v1095_v57 = vunpack.c.l.bf16 %v1027_v3  ;;  %v11064_v45 = vpop.f32.mrf.mxu1  ;;  %v1795_v17 = vadd.f32 %v10691_v63, %v1730_v11  ;;  %9516 = vmatmul.msk.bf16.gmra.mxu1 %vm364_vm1, %v10990_v33 }
 0x225   : > { %12917 = vst [vmem:[#allocation47_spill] sm:$0xff] %v11064_v45 }
 0x226   : > { %v1160_v8 = vadd.f32 %v10551_v53, %v1095_v57  ;;  %v1987_v34 = vmax.f32 %v1795_v17, 0.0 }
 0x227   : > { %v1549_v38 = vpop.f32.mrf.mxu3 }
 0x228   : > { %v1352_v9 = vmax.f32 %v1160_v8, 0.0  ;;  %v1663_v1 = vpack.c.bf16 %v1549_v38, %v1549_v38  ;;  %v11069_v35 = vpop.f32.mrf.mxu2  ;;  %9538 = vmatmul.msk.bf16.gmra.mxu2 %vm364_vm1, %v10740_v40 }
 0x229   : > { %v605_v52 = vpop.f32.mrf.mxu0  ;;  %12918 = vst [vmem:[#allocation48_spill] sm:$0xff] %v11069_v35 }
 0x22a   : > { %v1731_v42 = vunpack.c.l.bf16 %v1663_v1  ;;  %v1391_v3 = vpack.c.bf16 %v1352_v9, %v1351_v4  ;;  %v1028_v14 = vpack.c.bf16 %v605_v52, %v605_v52 }
 0x22c   : > { %v1796_v48 = vadd.f32 %v10691_v63, %v1731_v42  ;;  %1591 = vmatmul.bf16.gmra.mxu3 %v1391_v3  ;;  %2131 = vmatmul.bf16.gmra.mxu0 %v10728_v18  ;;  %v1096_v27 = vunpack.c.l.bf16 %v1028_v14  ;;  %v11073_v45 = vpop.f32.mrf.mxu1 }
 0x22d   : > { %12919 = vst [vmem:[#allocation49_spill] sm:$0xff] %v11073_v45 }
 0x22e   : > { %v1988_v30 = vmax.f32 %v1796_v48, 0.0  ;;  %v1161_v4 = vadd.f32 %v10551_v53, %v1096_v27 }
 0x22f   : > { %v1552_v57 = vpop.f32.mrf.mxu3 }
 0x230   : > { %v11071_v8 = vpack.c.bf16 %v1988_v30, %v1987_v34  ;;  %v1664_v11 = vpack.c.bf16 %v1552_v57, %v1552_v57  ;;  %v11081_v52 = vpop.f32.mrf.mxu2  ;;  %v1353_v17 = vmax.f32 %v1161_v4, 0.0  ;;  %v10168_v34 = vld [vmem:[%s12868_s2 + $0x128] sm:$0xff] }
 0x231   : > { %v607_v38 = vpop.f32.mrf.mxu0  ;;  %12920 = vst [vmem:[#allocation50_spill] sm:$0xff] %v11081_v52  ;;  %4076 = vmatpush.bf16.msrb.mxu3 %v10168_v34 }
 0x232   : > { %v1029_v1 = vpack.c.bf16 %v607_v38, %v607_v38  ;;  %v1732_v18 = vunpack.c.l.bf16 %v1664_v11 }
 0x234   : > { %v1097_v9 = vunpack.c.l.bf16 %v1029_v1  ;;  %v11086_v57 = vpop.f32.mrf.mxu1  ;;  %v1797_v27 = vadd.f32 %v10691_v63, %v1732_v18  ;;  %9517 = vmatmul.msk.bf16.gmra.mxu1 %vm364_vm1, %v11017_v7 }
 0x235   : > { %12921 = vst [vmem:[#allocation51_spill] sm:$0xff] %v11086_v57 }
 0x236   : > { %v1162_v48 = vadd.f32 %v10551_v53, %v1097_v9  ;;  %v1989_v4 = vmax.f32 %v1797_v27, 0.0 }
 0x237   : > { %v1554_v14 = vpop.f32.mrf.mxu3 }
 0x238   : > { %v1354_v42 = vmax.f32 %v1162_v48, 0.0  ;;  %v1665_v3 = vpack.c.bf16 %v1554_v14, %v1554_v14  ;;  %v11091_v14 = vpop.f32.mrf.mxu2  ;;  %9539 = vmatmul.msk.bf16.gmra.mxu2 %vm364_vm1, %v10763_v37 }
 0x239   : > { %v610_v30 = vpop.f32.mrf.mxu0  ;;  %12922 = vst [vmem:[#allocation52_spill] sm:$0xff] %v11091_v14 }
 0x23a   : > { %v1733_v38 = vunpack.c.l.bf16 %v1665_v3  ;;  %v1392_v5 = vpack.c.bf16 %v1354_v42, %v1353_v17  ;;  %v1030_v1 = vpack.c.bf16 %v610_v30, %v610_v30 }
 0x23c   : > { %v1798_v11 = vadd.f32 %v10691_v63, %v1733_v38  ;;  %1596 = vmatmul.bf16.gmra.mxu3 %v1392_v5  ;;  %2136 = vmatmul.bf16.gmra.mxu0 %v10751_v2  ;;  %v1098_v52 = vunpack.c.l.bf16 %v1030_v1  ;;  %v11095_v45 = vpop.f32.mrf.mxu1 }
 0x23e   : > { %v1990_v9 = vmax.f32 %v1798_v11, 0.0  ;;  %v1163_v42 = vadd.f32 %v10551_v53, %v1098_v52 }
 0x23f   : > { %v1557_v48 = vpop.f32.mrf.mxu3 }
 0x240   : > { %v11093_v35 = vpack.c.bf16 %v1990_v9, %v1989_v4  ;;  %v1666_v18 = vpack.c.bf16 %v1557_v48, %v1557_v48  ;;  %v11103_v27 = vpop.f32.mrf.mxu2  ;;  %v1355_v38 = vmax.f32 %v1163_v42, 0.0 }
 0x241   : > { %v612_v57 = vpop.f32.mrf.mxu0  ;;  %12923 = vst [vmem:[#allocation53_spill] sm:$0xff] %v11103_v27 }
 0x242   : > { %v1031_v17 = vpack.c.bf16 %v612_v57, %v612_v57  ;;  %v1734_v2 = vunpack.c.l.bf16 %v1666_v18 }
 0x244   : > { %v1099_v3 = vunpack.c.l.bf16 %v1031_v17  ;;  %v11105_v57 = vpop.f32.mrf.mxu1  ;;  %v1799_v52 = vadd.f32 %v10691_v63, %v1734_v2  ;;  %v10147_v2 = vld [vmem:[%s12868_s2 + $0x80] sm:$0xff] }
 0x245   : > { %2777 = vmatpush.bf16.msrb.mxu1 %v10147_v2 }
 0x246   : > { %v1164_v34 = vadd.f32 %v10551_v53, %v1099_v3  ;;  %v1991_v56 = vmax.f32 %v1799_v52, 0.0 }
 0x247   : > { %v1559_v30 = vpop.f32.mrf.mxu3 }
 0x248   : > { %v1356_v5 = vmax.f32 %v1164_v34, 0.0  ;;  %v1667_v11 = vpack.c.bf16 %v1559_v30, %v1559_v30  ;;  %v11110_v27 = vpop.f32.mrf.mxu2  ;;  %v10178_v34 = vld [vmem:[%s12868_s2 + $0x178] sm:$0xff]  ;;  %9540 = vmatmul.msk.bf16.gmra.mxu2 %vm364_vm1, %v10783_v31 }
 0x249   : > { %v615_v1 = vpop.f32.mrf.mxu0  ;;  %12924 = vst [vmem:[#allocation54_spill] sm:$0xff] %v11110_v27  ;;  %4726 = vmatpush.bf16.msra.mxu0 %v10178_v34 }
 0x24a   : > { %v1735_v4 = vunpack.c.l.bf16 %v1667_v11  ;;  %v1393_v9 = vpack.c.bf16 %v1356_v5, %v1355_v38  ;;  %v1032_v17 = vpack.c.bf16 %v615_v1, %v615_v1 }
 0x24c   : > { %v1800_v48 = vadd.f32 %v10691_v63, %v1735_v4  ;;  %1601 = vmatmul.bf16.gmra.mxu3 %v1393_v9  ;;  %2141 = vmatmul.bf16.gmra.mxu0 %v10771_v60  ;;  %v1100_v42 = vunpack.c.l.bf16 %v1032_v17  ;;  %v11120_v5 = vpop.f32.mrf.mxu1 }
 0x24e   : > { %v1992_v18 = vmax.f32 %v1800_v48, 0.0  ;;  %v1165_v1 = vadd.f32 %v10551_v53, %v1100_v42 }
 0x24f   : > { %v1562_v3 = vpop.f32.mrf.mxu3 }
 0x250   : > { %v11118_v30 = vpack.c.bf16 %v1992_v18, %v1991_v56  ;;  %v1668_v60 = vpack.c.bf16 %v1562_v3, %v1562_v3  ;;  %v11128_v17 = vpop.f32.mrf.mxu2  ;;  %v1357_v56 = vmax.f32 %v1165_v1, 0.0 }
 0x251   : > { %v617_v38 = vpop.f32.mrf.mxu0  ;;  %12925 = vst [vmem:[#allocation55_spill] sm:$0xff] %v11128_v17 }
 0x252   : > { %v1033_v11 = vpack.c.bf16 %v617_v38, %v617_v38  ;;  %v1736_v4 = vunpack.c.l.bf16 %v1668_v60 }
 0x254   : > { %v1101_v52 = vunpack.c.l.bf16 %v1033_v11  ;;  %v11130_v2 = vpop.f32.mrf.mxu1  ;;  %v1801_v42 = vadd.f32 %v10691_v63, %v1736_v4 }
 0x256   : > { %v1166_v9 = vadd.f32 %v10551_v53, %v1101_v52  ;;  %v1993_v40 = vmax.f32 %v1801_v42, 0.0 }
 0x257   : > { %v1564_v48 = vpop.f32.mrf.mxu3 }
 0x258   : > { %v1358_v18 = vmax.f32 %v1166_v9, 0.0  ;;  %v1669_v3 = vpack.c.bf16 %v1564_v48, %v1564_v48  ;;  %v11135_v17 = vpop.f32.mrf.mxu2  ;;  %v10157_v9 = vld [vmem:[%s12868_s2 + $0xd0] sm:$0xff]  ;;  %9541 = vmatmul.msk.bf16.gmra.mxu2 %vm364_vm1, %v10806_v46 }
 0x259   : > { %v620_v34 = vpop.f32.mrf.mxu0  ;;  %12926 = vst [vmem:[#allocation56_spill] sm:$0xff] %v11135_v17  ;;  %3427 = vmatpush.bf16.msrb.mxu2 %v10157_v9  ;;  %v10177_v46 = vld [vmem:[%s12868_s2 + $0x170] sm:$0xff] }
 0x25a   : > { %v1737_v38 = vunpack.c.l.bf16 %v1669_v3  ;;  %v1394_v11 = vpack.c.bf16 %v1358_v18, %v1357_v56  ;;  %v1034_v14 = vpack.c.bf16 %v620_v34, %v620_v34  ;;  %4727 = vmatpush.bf16.msra.mxu0 %v10177_v46 }
 0x25c   : > { %v1802_v27 = vadd.f32 %v10691_v63, %v1737_v38  ;;  %1606 = vmatmul.bf16.gmra.mxu3 %v1394_v11  ;;  %2146 = vmatmul.bf16.gmra.mxu0 %v10794_v62  ;;  %v1102_v1 = vunpack.c.l.bf16 %v1034_v14  ;;  %v11142_v3 = vpop.f32.mrf.mxu1 }
 0x25d   : > { %12927 = vst [vmem:[#allocation57_spill] sm:$0xff] %v11142_v3 }
 0x25e   : > { %v1994_v60 = vmax.f32 %v1802_v27, 0.0  ;;  %v1167_v62 = vadd.f32 %v10551_v53, %v1102_v1 }
 0x25f   : > { %v1567_v52 = vpop.f32.mrf.mxu3 }
 0x260   : > { %v11140_v48 = vpack.c.bf16 %v1994_v60, %v1993_v40  ;;  %v1670_v56 = vpack.c.bf16 %v1567_v52, %v1567_v52  ;;  %v11150_v38 = vpop.f32.mrf.mxu2  ;;  %v1359_v11 = vmax.f32 %v1167_v62, 0.0 }
 0x261   : > { %v622_v4 = vpop.f32.mrf.mxu0  ;;  %12928 = vst [vmem:[#allocation58_spill] sm:$0xff] %v11150_v38 }
 0x262   : > { %v1035_v18 = vpack.c.bf16 %v622_v4, %v622_v4  ;;  %v1738_v14 = vunpack.c.l.bf16 %v1670_v56 }
 0x264   : > { %v1103_v34 = vunpack.c.l.bf16 %v1035_v18  ;;  %v1803_v9 = vadd.f32 %v10691_v63, %v1738_v14  ;;  %v11155_v37 = vpop.f32.mrf.mxu1 }
 0x266   : > { %v1168_v27 = vadd.f32 %v10551_v53, %v1103_v34  ;;  %v1995_v56 = vmax.f32 %v1803_v9, 0.0  ;;  %v10167_v9 = vld [vmem:[%s12868_s2 + $0x120] sm:$0xff] }
 0x267   : > { %v1569_v42 = vpop.f32.mrf.mxu3  ;;  %4077 = vmatpush.bf16.msrb.mxu3 %v10167_v9 }
 0x268   : > { %v1360_v40 = vmax.f32 %v1168_v27, 0.0  ;;  %v1671_v60 = vpack.c.bf16 %v1569_v42, %v1569_v42  ;;  %v11157_v3 = vpop.f32.mrf.mxu2  ;;  %9542 = vmatmul.msk.bf16.gmra.mxu2 %vm364_vm1, %v10831_v44 }
 0x269   : > { %v625_v52 = vpop.f32.mrf.mxu0  ;;  %12929 = vst [vmem:[#allocation59_spill] sm:$0xff] %v11157_v3 }
 0x26a   : > { %v1739_v1 = vunpack.c.l.bf16 %v1671_v60  ;;  %v1395_v4 = vpack.c.bf16 %v1360_v40, %v1359_v11  ;;  %v1036_v17 = vpack.c.bf16 %v625_v52, %v625_v52 }
 0x26c   : > { %v1804_v18 = vadd.f32 %v10691_v63, %v1739_v1  ;;  %1611 = vmatmul.bf16.gmra.mxu3 %v1395_v4  ;;  %2151 = vmatmul.bf16.gmra.mxu0 %v10817_v15  ;;  %v1104_v62 = vunpack.c.l.bf16 %v1036_v17  ;;  %v11167_v40 = vpop.f32.mrf.mxu1 }
 0x26e   : > { %v1996_v34 = vmax.f32 %v1804_v18, 0.0  ;;  %v1169_v14 = vadd.f32 %v10551_v53, %v1104_v62 }
 0x270   : > { %v11159_v27 = vpack.c.bf16 %v1996_v34, %v1995_v56  ;;  %v11169_v60 = vpop.f32.mrf.mxu2  ;;  %v1361_v17 = vmax.f32 %v1169_v14, 0.0 }
 0x271   : > { %v627_v42 = vpop.f32.mrf.mxu0  ;;  %12930 = vst [vmem:[#allocation60_spill] sm:$0xff] %v11169_v60  ;;  %v3003_v60 = vperm.slane %v10679_v10, 1 }
 0x272   : > { %v1037_v38 = vpack.c.bf16 %v627_v42, %v627_v42 }
 0x274   : > { %v1105_v11 = vunpack.c.l.bf16 %v1037_v38  ;;  %v11177_v34 = vpop.f32.mrf.mxu1 }
 0x276   : > { %v1170_v15 = vadd.f32 %v10551_v53, %v1105_v11 }
 0x278   : > { %v1362_v52 = vmax.f32 %v1170_v15, 0.0  ;;  %v11175_v31 = vpop.f32.mrf.mxu2  ;;  %9543 = vmatmul.msk.bf16.gmra.mxu2 %vm364_vm1, %v10858_v29 }
 0x279   : > { %v630_v1 = vpop.f32.mrf.mxu0  ;;  %12931 = vst [vmem:[#allocation61_spill] sm:$0xff] %v11175_v31 }
 0x27a   : > { %v1396_v38 = vpack.c.bf16 %v1362_v52, %v1361_v17  ;;  %v1038_v4 = vpack.c.bf16 %v630_v1, %v630_v1 }
 0x27c   : > { %1616 = vmatmul.bf16.gmra.mxu3 %v1396_v38  ;;  %2156 = vmatmul.bf16.gmra.mxu0 %v10844_v50  ;;  %v1106_v18 = vunpack.c.l.bf16 %v1038_v4  ;;  %v11185_v1 = vpop.f32.mrf.mxu1 }
 0x27e   : > { %v1171_v42 = vadd.f32 %v10551_v53, %v1106_v18 }
 0x280   : > { %v11183_v15 = vpop.f32.mrf.mxu2  ;;  %v1363_v17 = vmax.f32 %v1171_v42, 0.0 }
 0x281   : > { %v632_v56 = vpop.f32.mrf.mxu0  ;;  %12932 = vst [vmem:[#allocation62_spill] sm:$0xff] %v11183_v15 }
 0x282   : > { %v1039_v62 = vpack.c.bf16 %v632_v56, %v632_v56 }
 0x284   : > { %v1107_v14 = vunpack.c.l.bf16 %v1039_v62 }
 0x286   : > { %v1172_v11 = vadd.f32 %v10551_v53, %v1107_v14 }
 0x288   : > { %v1364_v52 = vmax.f32 %v1172_v11, 0.0  ;;  %v11188_v4 = vpop.f32.mrf.mxu2  ;;  %v11196_v11 = vpop.f32.mrf.mxu1  ;;  %9544 = vmatmul.msk.bf16.gmra.mxu2 %vm364_vm1, %v10882_v26 }
 0x289   : > { %v635_v50 = vpop.f32.mrf.mxu0  ;;  %12933 = vst [vmem:[#allocation63_spill] sm:$0xff] %v11188_v4 }
 0x28a   : > { %v1397_v9 = vpack.c.bf16 %v1364_v52, %v1363_v17  ;;  %v1040_v38 = vpack.c.bf16 %v635_v50, %v635_v50 }
 0x28c   : > { %1621 = vmatmul.bf16.gmra.mxu3 %v1397_v9  ;;  %2161 = vmatmul.bf16.gmra.mxu0 %v10868_v22  ;;  %v1108_v18 = vunpack.c.l.bf16 %v1040_v38 }
 0x28e   : > { %v1173_v42 = vadd.f32 %v10551_v53, %v1108_v18 }
 0x290   : > { %v11199_v17 = vpop.f32.mrf.mxu2  ;;  %v1365_v52 = vmax.f32 %v1173_v42, 0.0  ;;  %v11203_v18 = vpop.f32.mrf.mxu1 }
 0x291   : > { %v637_v56 = vpop.f32.mrf.mxu0  ;;  %12934 = vst [vmem:[#allocation64_spill] sm:$0xff] %v11199_v17 }
 0x292   : > { %v1041_v62 = vpack.c.bf16 %v637_v56, %v637_v56  ;;  %v2351_v56 = vperm.slane %v10544_v47, 1 }
 0x294   : > { %v1109_v14 = vunpack.c.l.bf16 %v1041_v62  ;;  %v11207_v62 = vunpack.c.l.bf16 %v2351_v56 }
 0x296   : > { %v1174_v22 = vadd.f32 %v10551_v53, %v1109_v14  ;;  %v10156_v53 = vld [vmem:[%s12868_s2 + $0xc8] sm:$0xff] }
 0x297   : > { %3428 = vmatpush.bf16.msrb.mxu2 %v10156_v53 }
 0x298   : > { %v1366_v50 = vmax.f32 %v1174_v22, 0.0  ;;  %v11205_v46 = vpop.f32.mrf.mxu2  ;;  %v11218_v56 = vpop.f32.mrf.mxu1  ;;  %9545 = vmatmul.msk.bf16.gmra.mxu2 %vm364_vm1, %v10912_v13  ;;  %v10176_v13 = vld [vmem:[%s12868_s2 + $0x168] sm:$0xff] }
 0x299   : > { %v2127_v9 = vpop.f32.mrf.mxu0  ;;  %12935 = vst [vmem:[#allocation65_spill] sm:$0xff] %v11205_v46  ;;  %4728 = vmatpush.bf16.msra.mxu0 %v10176_v13 }
 0x29a   : > { %v1398_v38 = vpack.c.bf16 %v1366_v50, %v1365_v52  ;;  %v2287_v4 = vpack.c.bf16 %v2127_v9, %v2127_v9 }
 0x29c   : > { %1626 = vmatmul.bf16.gmra.mxu3 %v1398_v38  ;;  %2166 = vmatmul.bf16.gmra.mxu0 %v10898_v61  ;;  %v2352_v44 = vunpack.c.l.bf16 %v2287_v4 }
 0x29e   : > { %v2417_v22 = vadd.f32 %v11207_v62, %v2352_v44 }
 0x2a0   : > { %v11216_v50 = vpop.f32.mrf.mxu2  ;;  %v2609_v4 = vmax.f32 %v2417_v22, 0.0  ;;  %v11223_v29 = vpop.f32.mrf.mxu1 }
 0x2a1   : > { %v2129_v42 = vpop.f32.mrf.mxu0  ;;  %12936 = vst [vmem:[#allocation66_spill] sm:$0xff] %v11216_v50 }
 0x2a2   : > { %v2288_v14 = vpack.c.bf16 %v2129_v42, %v2129_v42 }
 0x2a4   : > { %v2353_v52 = vunpack.c.l.bf16 %v2288_v14 }
 0x2a6   : > { %v2418_v61 = vadd.f32 %v11207_v62, %v2353_v52 }
 0x2a8   : > { %v2610_v9 = vmax.f32 %v2418_v61, 0.0  ;;  %v11221_v53 = vpop.f32.mrf.mxu2  ;;  %9546 = vmatmul.msk.bf16.gmra.mxu2 %vm364_vm1, %v10939_v41  ;;  %v10186_v41 = vld [vmem:[%s12868_s2 + $0x1b8] sm:$0xff] }
 0x2a9   : > { %v2132_v38 = vpop.f32.mrf.mxu0  ;;  %12937 = vst [vmem:[#allocation67_spill] sm:$0xff] %v11221_v53  ;;  %5378 = vmatpush.bf16.msra.mxu1 %v10186_v41 }
 0x2aa   : > { %v2673_v46 = vpack.c.bf16 %v2610_v9, %v2609_v4  ;;  %v2289_v17 = vpack.c.bf16 %v2132_v38, %v2132_v38 }
 0x2ac   : > { %2171 = vmatmul.bf16.gmra.mxu0 %v10925_v55  ;;  %2778 = vmatmul.bf16.vlgmr.msrb.gmra.mxu1 %v2673_v46  ;;  %v2354_v44 = vunpack.c.l.bf16 %v2289_v17  ;;  %v10166_v17 = vld [vmem:[%s12868_s2 + $0x118] sm:$0xff] }
 0x2ad   : > { %4078 = vmatpush.bf16.msrb.mxu3 %v10166_v17 }
 0x2ae   : > { %v2419_v52 = vadd.f32 %v11207_v62, %v2354_v44  ;;  %v11235_v44 = vpop.f32.mrf.mxu1 }
 0x2b0   : > { %v11229_v61 = vpop.f32.mrf.mxu2  ;;  %v2611_v4 = vmax.f32 %v2419_v52, 0.0 }
 0x2b1   : > { %v2134_v42 = vpop.f32.mrf.mxu0  ;;  %12938 = vst [vmem:[#allocation68_spill] sm:$0xff] %v11229_v61 }
 0x2b2   : > { %v2290_v14 = vpack.c.bf16 %v2134_v42, %v2134_v42 }
 0x2b4   : > { %v2355_v50 = vunpack.c.l.bf16 %v2290_v14 }
 0x2b6   : > { %v2420_v22 = vadd.f32 %v11207_v62, %v2355_v50 }
 0x2b8   : > { %v2612_v55 = vmax.f32 %v2420_v22, 0.0  ;;  %v11237_v26 = vpop.f32.mrf.mxu2  ;;  %9547 = vmatmul.msk.bf16.gmra.mxu2 %vm364_vm1, %v10966_v28 }
 0x2b9   : > { %v2137_v46 = vpop.f32.mrf.mxu0  ;;  %12939 = vst [vmem:[#allocation69_spill] sm:$0xff] %v11237_v26 }
 0x2ba   : > { %v2674_v9 = vpack.c.bf16 %v2612_v55, %v2611_v4  ;;  %v2291_v38 = vpack.c.bf16 %v2137_v46, %v2137_v46  ;;  %v11243_v55 = vpop.f32.mrf.mxu1 }
 0x2bc   : > { %2176 = vmatmul.bf16.gmra.mxu0 %v10952_v20  ;;  %2783 = vmatmul.bf16.gmra.mxu1 %v2674_v9  ;;  %v2356_v50 = vunpack.c.l.bf16 %v2291_v38 }
 0x2be   : > { %v2421_v52 = vadd.f32 %v11207_v62, %v2356_v50 }
 0x2c0   : > { %v11245_v17 = vpop.f32.mrf.mxu2  ;;  %v2613_v20 = vmax.f32 %v2421_v52, 0.0 }
 0x2c1   : > { %v2139_v42 = vpop.f32.mrf.mxu0  ;;  %12940 = vst [vmem:[#allocation70_spill] sm:$0xff] %v11245_v17 }
 0x2c2   : > { %v2292_v14 = vpack.c.bf16 %v2139_v42, %v2139_v42 }
 0x2c4   : > { %v2357_v22 = vunpack.c.l.bf16 %v2292_v14  ;;  %v11253_v14 = vpop.f32.mrf.mxu1 }
 0x2c6   : > { %v2422_v4 = vadd.f32 %v11207_v62, %v2357_v22 }
 0x2c8   : > { %v2614_v46 = vmax.f32 %v2422_v4, 0.0  ;;  %v11248_v38 = vpop.f32.mrf.mxu2  ;;  %9548 = vmatmul.msk.bf16.gmra.mxu2 %vm364_vm1, %v10990_v33 }
 0x2c9   : > { %v2142_v9 = vpop.f32.mrf.mxu0  ;;  %12941 = vst [vmem:[#allocation71_spill] sm:$0xff] %v11248_v38 }
 0x2ca   : > { %v2675_v61 = vpack.c.bf16 %v2614_v46, %v2613_v20  ;;  %v2293_v26 = vpack.c.bf16 %v2142_v9, %v2142_v9 }
 0x2cc   : > { %2181 = vmatmul.bf16.gmra.mxu0 %v10976_v43  ;;  %2788 = vmatmul.bf16.gmra.mxu1 %v2675_v61  ;;  %v2358_v50 = vunpack.c.l.bf16 %v2293_v26  ;;  %v11261_v38 = vpop.f32.mrf.mxu1 }
 0x2ce   : > { %v2423_v52 = vadd.f32 %v11207_v62, %v2358_v50 }
 0x2d0   : > { %v11259_v61 = vpop.f32.mrf.mxu2  ;;  %v2615_v26 = vmax.f32 %v2423_v52, 0.0 }
 0x2d1   : > { %v2144_v42 = vpop.f32.mrf.mxu0  ;;  %12942 = vst [vmem:[#allocation72_spill] sm:$0xff] %v11259_v61 }
 0x2d2   : > { %v2294_v22 = vpack.c.bf16 %v2144_v42, %v2144_v42  ;;  %v10155_v42 = vld [vmem:[%s12868_s2 + $0xc0] sm:$0xff] }
 0x2d3   : > { %3429 = vmatpush.bf16.msrb.mxu2 %v10155_v42 }
 0x2d4   : > { %v2359_v4 = vunpack.c.l.bf16 %v2294_v22 }
 0x2d6   : > { %v2424_v43 = vadd.f32 %v11207_v62, %v2359_v4 }
 0x2d8   : > { %v2616_v20 = vmax.f32 %v2424_v43, 0.0  ;;  %v11264_v13 = vpop.f32.mrf.mxu2  ;;  %9549 = vmatmul.msk.bf16.gmra.mxu2 %vm364_vm1, %v11017_v7  ;;  %v10175_v7 = vld [vmem:[%s12868_s2 + $0x160] sm:$0xff] }
 0x2d9   : > { %v2147_v46 = vpop.f32.mrf.mxu0  ;;  %12943 = vst [vmem:[#allocation73_spill] sm:$0xff] %v11264_v13  ;;  %4729 = vmatpush.bf16.msra.mxu0 %v10175_v7 }
 0x2da   : > { %v2676_v9 = vpack.c.bf16 %v2616_v20, %v2615_v26  ;;  %v2295_v17 = vpack.c.bf16 %v2147_v46, %v2147_v46 }
 0x2dc   : > { %2186 = vmatmul.bf16.gmra.mxu0 %v11003_v21  ;;  %2793 = vmatmul.bf16.gmra.mxu1 %v2676_v9  ;;  %v2360_v50 = vunpack.c.l.bf16 %v2295_v17  ;;  %v11275_v21 = vpop.f32.mrf.mxu1 }
 0x2de   : > { %v2425_v4 = vadd.f32 %v11207_v62, %v2360_v50 }
 0x2e0   : > { %v11278_v26 = vpop.f32.mrf.mxu2  ;;  %v2617_v20 = vmax.f32 %v2425_v4, 0.0 }
 0x2e1   : > { %v2149_v22 = vpop.f32.mrf.mxu0  ;;  %12944 = vst [vmem:[#allocation74_spill] sm:$0xff] %v11278_v26 }
 0x2e2   : > { %v2296_v52 = vpack.c.bf16 %v2149_v22, %v2149_v22 }
 0x2e4   : > { %v2361_v43 = vunpack.c.l.bf16 %v2296_v52  ;;  %v11281_v41 = vpop.f32.mrf.mxu1 }
 0x2e5   : > { %12945 = vst [vmem:[#allocation75_spill] sm:$0xff] %v11281_v41 }
 0x2e6   : > { %v2426_v17 = vadd.f32 %v11207_v62, %v2361_v43 }
 0x2e8   : > { %v2618_v46 = vmax.f32 %v2426_v17, 0.0  ;;  %v11283_v42 = vpop.f32.mrf.mxu2 }
 0x2e9   : > { %v2152_v9 = vpop.f32.mrf.mxu0  ;;  %12946 = vst [vmem:[#allocation76_spill] sm:$0xff] %v11283_v42 }
 0x2ea   : > { %v2677_v13 = vpack.c.bf16 %v2618_v46, %v2617_v20  ;;  %v2297_v61 = vpack.c.bf16 %v2152_v9, %v2152_v9 }
 0x2ec   : > { %2191 = vmatmul.bf16.gmra.mxu0 %v11030_v58  ;;  %2798 = vmatmul.bf16.gmra.mxu1 %v2677_v13  ;;  %v2362_v50 = vunpack.c.l.bf16 %v2297_v61  ;;  %v10165_v58 = vld [vmem:[%s12868_s2 + $0x110] sm:$0xff]  ;;  %v11292_v13 = vpop.f32.mrf.mxu1 }
 0x2ed   : > { %12947 = vst [vmem:[#allocation77_spill] sm:$0xff] %v11292_v13  ;;  %4079 = vmatpush.bf16.msrb.mxu3 %v10165_v58 }
 0x2ee   : > { %v2427_v52 = vadd.f32 %v11207_v62, %v2362_v50 }
 0x2f0   : > { %v2619_v17 = vmax.f32 %v2427_v52, 0.0  ;;  %v11294_v9 = vpop.f32.mrf.mxu2 }
 0x2f1   : > { %v2154_v28 = vpop.f32.mrf.mxu0  ;;  %12948 = vst [vmem:[#allocation78_spill] sm:$0xff] %v11294_v9 }
 0x2f2   : > { %v2298_v22 = vpack.c.bf16 %v2154_v28, %v2154_v28 }
 0x2f4   : > { %v2363_v43 = vunpack.c.l.bf16 %v2298_v22  ;;  %v11297_v52 = vpop.f32.mrf.mxu1 }
 0x2f5   : > { %12949 = vst [vmem:[#allocation79_spill] sm:$0xff] %v11297_v52 }
 0x2f6   : > { %v2428_v4 = vadd.f32 %v11207_v62, %v2363_v43 }
 0x2f8   : > { %v2620_v20 = vmax.f32 %v2428_v4, 0.0  ;;  %v11300_v42 = vpop.f32.mrf.mxu2 }
 0x2f9   : > { %v2157_v61 = vpop.f32.mrf.mxu0  ;;  %12950 = vst [vmem:[#allocation80_spill] sm:$0xff] %v11300_v42 }
 0x2fa   : > { %v2678_v46 = vpack.c.bf16 %v2620_v20, %v2619_v17  ;;  %v2299_v50 = vpack.c.bf16 %v2157_v61, %v2157_v61 }
 0x2fc   : > { %2196 = vmatmul.bf16.gmra.mxu0 %v11052_v23  ;;  %2803 = vmatmul.bf16.gmra.mxu1 %v2678_v46  ;;  %v2364_v33 = vunpack.c.l.bf16 %v2299_v50  ;;  %v11306_v50 = vpop.f32.mrf.mxu1 }
 0x2fd   : > { %12951 = vst [vmem:[#allocation81_spill] sm:$0xff] %v11306_v50 }
 0x2fe   : > { %v2429_v43 = vadd.f32 %v11207_v62, %v2364_v33  ;;  %v11310_v33 = vpop.f32.mrf.mxu3 }
 0x300   : > { %v2621_v20 = vmax.f32 %v2429_v43, 0.0 }
 0x301   : > { %v2159_v28 = vpop.f32.mrf.mxu0 }
 0x302   : > { %v2300_v22 = vpack.c.bf16 %v2159_v28, %v2159_v28  ;;  %v11308_v28 = vpop.f32.mrf.mxu2 }
 0x303   : > { %12952 = vst [vmem:[#allocation82_spill] sm:$0xff] %v11308_v28 }
 0x304   : > { %v2365_v4 = vunpack.c.l.bf16 %v2300_v22 }
 0x306   : > { %v2430_v17 = vadd.f32 %v11207_v62, %v2365_v4 }
 0x308   : > { %v2622_v58 = vmax.f32 %v2430_v17, 0.0 }
 0x309   : > { %v2162_v61 = vpop.f32.mrf.mxu0 }
 0x30a   : > { %v2679_v23 = vpack.c.bf16 %v2622_v58, %v2621_v20  ;;  %v2301_v46 = vpack.c.bf16 %v2162_v61, %v2162_v61  ;;  %v11317_v58 = vpop.f32.mrf.mxu1  ;;  %v11319_v28 = vpop.f32.mrf.mxu2 }
 0x30b   : > { %12953 = vst [vmem:[#allocation83_spill] sm:$0xff] %v11317_v58 }
 0x30c   : > { %2201 = vmatmul.bf16.gmra.mxu0 %v11071_v8  ;;  %2808 = vmatmul.bf16.gmra.mxu1 %v2679_v23  ;;  %v2366_v22 = vunpack.c.l.bf16 %v2301_v46  ;;  %12954 = vst [vmem:[#allocation84_spill] sm:$0xff] %v11319_v28  ;;  %v11321_v46 = vpop.f32.mrf.mxu3 }
 0x30e   : > { %v2431_v17 = vadd.f32 %v11207_v62, %v2366_v22  ;;  %v10185_v22 = vld [vmem:[%s12868_s2 + $0x1b0] sm:$0xff] }
 0x30f   : > { %5379 = vmatpush.bf16.msra.mxu1 %v10185_v22 }
 0x310   : > { %v2623_v61 = vmax.f32 %v2431_v17, 0.0 }
 0x311   : > { %v2164_v4 = vpop.f32.mrf.mxu0 }
 0x312   : > { %v2302_v43 = vpack.c.bf16 %v2164_v4, %v2164_v4  ;;  %v11327_v4 = vpop.f32.mrf.mxu1 }
 0x313   : > { %12955 = vst [vmem:[#allocation85_spill] sm:$0xff] %v11327_v4 }
 0x314   : > { %v2367_v20 = vunpack.c.l.bf16 %v2302_v43 }
 0x316   : > { %v2432_v8 = vadd.f32 %v11207_v62, %v2367_v20  ;;  %v11329_v20 = vpop.f32.mrf.mxu2 }
 0x317   : > { %12956 = vst [vmem:[#allocation86_spill] sm:$0xff] %v11329_v20  ;;  %v11341_v20 = vunpack.c.l.bf16 %v3003_v60 }
 0x318   : > { %v2624_v23 = vmax.f32 %v2432_v8, 0.0  ;;  %v11331_v8 = vpop.f32.mrf.mxu3 }
 0x319   : > { %v2167_v42 = vpop.f32.mrf.mxu0 }
 0x31a   : > { %v2680_v9 = vpack.c.bf16 %v2624_v23, %v2623_v61  ;;  %v2303_v26 = vpack.c.bf16 %v2167_v42, %v2167_v42 }
 0x31c   : > { %2206 = vmatmul.bf16.gmra.mxu0 %v11093_v35  ;;  %2813 = vmatmul.bf16.gmra.mxu1 %v2680_v9  ;;  %v2368_v7 = vunpack.c.l.bf16 %v2303_v26 }
 0x31e   : > { %v2433_v61 = vadd.f32 %v11207_v62, %v2368_v7  ;;  %v11337_v22 = vpop.f32.mrf.mxu2 }
 0x31f   : > { %12957 = vst [vmem:[#allocation87_spill] sm:$0xff] %v11337_v22 }
 0x320   : > { %v2625_v9 = vmax.f32 %v2433_v61, 0.0 }
 0x321   : > { %v2169_v43 = vpop.f32.mrf.mxu0 }
 0x322   : > { %v2304_v17 = vpack.c.bf16 %v2169_v43, %v2169_v43  ;;  %v11339_v43 = vpop.f32.mrf.mxu3 }
 0x324   : > { %v2369_v42 = vunpack.c.l.bf16 %v2304_v17 }
 0x326   : > { %v2434_v35 = vadd.f32 %v11207_v62, %v2369_v42  ;;  %v11347_v22 = vpop.f32.mrf.mxu2 }
 0x327   : > { %12958 = vst [vmem:[#allocation88_spill] sm:$0xff] %v11347_v22 }
 0x328   : > { %v2626_v26 = vmax.f32 %v2434_v35, 0.0 }
 0x329   : > { %v2172_v23 = vpop.f32.mrf.mxu0  ;;  %v2779_v28 = vpop.f32.mrf.mxu1 }
 0x32a   : > { %v2681_v53 = vpack.c.bf16 %v2626_v26, %v2625_v9  ;;  %v2305_v15 = vpack.c.bf16 %v2172_v23, %v2172_v23  ;;  %v2939_v31 = vpack.c.bf16 %v2779_v28, %v2779_v28 }
 0x32c   : > { %2211 = vmatmul.bf16.gmra.mxu0 %v11118_v30  ;;  %2818 = vmatmul.bf16.gmra.mxu1 %v2681_v53  ;;  %v2370_v7 = vunpack.c.l.bf16 %v2305_v15  ;;  %v3004_v17 = vunpack.c.l.bf16 %v2939_v31  ;;  %v11349_v15 = vpop.f32.mrf.mxu3 }
 0x32e   : > { %v2435_v9 = vadd.f32 %v11207_v62, %v2370_v7  ;;  %v3069_v28 = vadd.f32 %v11341_v20, %v3004_v17  ;;  %v10164_v7 = vld [vmem:[%s12868_s2 + $0x108] sm:$0xff] }
 0x32f   : > { %4080 = vmatpush.bf16.msrb.mxu3 %v10164_v7 }
 0x330   : > { %v2627_v60 = vmax.f32 %v2435_v9, 0.0  ;;  %v3261_v31 = vmax.f32 %v3069_v28, 0.0  ;;  %v11355_v28 = vpop.f32.mrf.mxu2 }
 0x331   : > { %v2174_v61 = vpop.f32.mrf.mxu0  ;;  %v2781_v42 = vpop.f32.mrf.mxu1  ;;  %12959 = vst [vmem:[#allocation89_spill] sm:$0xff] %v11355_v28 }
 0x332   : > { %v2306_v35 = vpack.c.bf16 %v2174_v61, %v2174_v61  ;;  %v2940_v3 = vpack.c.bf16 %v2781_v42, %v2781_v42 }
 0x334   : > { %v2371_v26 = vunpack.c.l.bf16 %v2306_v35  ;;  %v3005_v23 = vunpack.c.l.bf16 %v2940_v3  ;;  %v11357_v22 = vpop.f32.mrf.mxu3 }
 0x336   : > { %v2436_v30 = vadd.f32 %v11207_v62, %v2371_v26  ;;  %v3070_v53 = vadd.f32 %v11341_v20, %v3005_v23 }
 0x338   : > { %v2628_v4 = vmax.f32 %v2436_v30, 0.0  ;;  %v3262_v58 = vmax.f32 %v3070_v53, 0.0 }
 0x339   : > { %v2177_v61 = vpop.f32.mrf.mxu0  ;;  %v2784_v17 = vpop.f32.mrf.mxu1 }
 0x33a   : > { %v3325_v42 = vpack.c.bf16 %v3262_v58, %v3261_v31  ;;  %v2682_v3 = vpack.c.bf16 %v2628_v4, %v2627_v60  ;;  %v2307_v35 = vpack.c.bf16 %v2177_v61, %v2177_v61  ;;  %v2941_v26 = vpack.c.bf16 %v2784_v17, %v2784_v17 }
 0x33c   : > { %2216 = vmatmul.bf16.gmra.mxu0 %v11140_v48  ;;  %2823 = vmatmul.bf16.gmra.mxu1 %v2682_v3  ;;  %v2372_v23 = vunpack.c.l.bf16 %v2307_v35  ;;  %v3006_v9 = vunpack.c.l.bf16 %v2941_v26 }
 0x33d   : > { %3430 = vmatmul.bf16.vlgmr.msrb.gmra.mxu2 %v3325_v42 }
 0x33e   : > { %v2437_v58 = vadd.f32 %v11207_v62, %v2372_v23  ;;  %v3071_v4 = vadd.f32 %v11341_v20, %v3006_v9  ;;  %v11365_v23 = vpop.f32.mrf.mxu2 }
 0x33f   : > { %12960 = vst [vmem:[#allocation90_spill] sm:$0xff] %v11365_v23 }
 0x340   : > { %v2629_v61 = vmax.f32 %v2437_v58, 0.0  ;;  %v3263_v17 = vmax.f32 %v3071_v4, 0.0 }
 0x341   : > { %v2179_v30 = vpop.f32.mrf.mxu0  ;;  %v2786_v53 = vpop.f32.mrf.mxu1 }
 0x342   : > { %v2308_v50 = vpack.c.bf16 %v2179_v30, %v2179_v30  ;;  %v2942_v52 = vpack.c.bf16 %v2786_v53, %v2786_v53  ;;  %v1673_v30 = vpack.c.bf16 %v11321_v46, %v11321_v46  ;;  %v10174_v46 = vld [vmem:[%s12868_s2 + $0x158] sm:$0xff] }
 0x343   : > { %4730 = vmatpush.bf16.msra.mxu0 %v10174_v46 }
 0x344   : > { %v2373_v60 = vunpack.c.l.bf16 %v2308_v50  ;;  %v3007_v31 = vunpack.c.l.bf16 %v2942_v52  ;;  %v1672_v52 = vpack.c.bf16 %v11310_v33, %v11310_v33  ;;  %v11369_v50 = vpop.f32.mrf.mxu3  ;;  %v1741_v58 = vunpack.c.l.bf16 %v1673_v30 }
 0x346   : > { %v2438_v48 = vadd.f32 %v11207_v62, %v2373_v60  ;;  %v3072_v7 = vadd.f32 %v11341_v20, %v3007_v31  ;;  %v1740_v4 = vunpack.c.l.bf16 %v1672_v52  ;;  %v1806_v33 = vadd.f32 %v10691_v63, %v1741_v58  ;;  %v11379_v30 = vpop.f32.mrf.mxu2 }
 0x347   : > { %12961 = vst [vmem:[#allocation91_spill] sm:$0xff] %v11379_v30 }
 0x348   : > { %v2630_v42 = vmax.f32 %v2438_v48, 0.0  ;;  %v3264_v3 = vmax.f32 %v3072_v7, 0.0 }
 0x349   : > { %v2182_v35 = vpop.f32.mrf.mxu0  ;;  %v2789_v26 = vpop.f32.mrf.mxu1 }
 0x34a   : > { %v2683_v53 = vpack.c.bf16 %v2630_v42, %v2629_v61  ;;  %v3326_v28 = vpack.c.bf16 %v3264_v3, %v3263_v17  ;;  %v2309_v9 = vpack.c.bf16 %v2182_v35, %v2182_v35  ;;  %v2943_v60 = vpack.c.bf16 %v2789_v26, %v2789_v26 }
 0x34b   : > { %v1805_v3 = vadd.f32 %v10691_v63, %v1740_v4 }
 0x34c   : > { %2221 = vmatmul.bf16.gmra.mxu0 %v11159_v27  ;;  %2828 = vmatmul.bf16.gmra.mxu1 %v2683_v53  ;;  %v2374_v31 = vunpack.c.l.bf16 %v2309_v9  ;;  %v3008_v48 = vunpack.c.l.bf16 %v2943_v60  ;;  %v1998_v53 = vmax.f32 %v1806_v33, 0.0  ;;  %v11381_v52 = vpop.f32.mrf.mxu3  ;;  %v1674_v33 = vpack.c.bf16 %v11331_v8, %v11331_v8 }
 0x34d   : > { %3435 = vmatmul.bf16.gmra.mxu2 %v3326_v28  ;;  %v1997_v58 = vmax.f32 %v1805_v3, 0.0 }
 0x34e   : > { %v2439_v27 = vadd.f32 %v11207_v62, %v2374_v31  ;;  %v3073_v28 = vadd.f32 %v11341_v20, %v3008_v48  ;;  %v1675_v48 = vpack.c.bf16 %v11339_v43, %v11339_v43  ;;  %v10184_v43 = vld [vmem:[%s12868_s2 + $0x1a8] sm:$0xff] }
 0x34f   : > { %5380 = vmatpush.bf16.msra.mxu1 %v10184_v43 }
 0x350   : > { %v3265_v46 = vmax.f32 %v3073_v28, 0.0  ;;  %v1743_v3 = vunpack.c.l.bf16 %v1675_v48  ;;  %v1742_v28 = vunpack.c.l.bf16 %v1674_v33 }
 0x351   : > { %v2184_v7 = vpop.f32.mrf.mxu0  ;;  %v2791_v61 = vpop.f32.mrf.mxu1 }
 0x352   : > { %v2310_v17 = vpack.c.bf16 %v2184_v7, %v2184_v7  ;;  %v2944_v42 = vpack.c.bf16 %v2791_v61, %v2791_v61  ;;  %v2631_v7 = vmax.f32 %v2439_v27, 0.0  ;;  %v11389_v27 = vpop.f32.mrf.mxu2  ;;  %v1808_v8 = vadd.f32 %v10691_v63, %v1743_v3 }
 0x353   : > { %12962 = vst [vmem:[#allocation92_spill] sm:$0xff] %v11389_v27 }
 0x354   : > { %v2375_v35 = vunpack.c.l.bf16 %v2310_v17  ;;  %v3009_v26 = vunpack.c.l.bf16 %v2944_v42  ;;  %v2041_v17 = vpack.c.bf16 %v1998_v53, %v1997_v58 }
 0x356   : > { %v2440_v9 = vadd.f32 %v11207_v62, %v2375_v35  ;;  %v3074_v60 = vadd.f32 %v11341_v20, %v3009_v26  ;;  %v11391_v26 = vpop.f32.mrf.mxu3 }
 0x358   : > { %v2632_v61 = vmax.f32 %v2440_v9, 0.0  ;;  %v3266_v4 = vmax.f32 %v3074_v60, 0.0 }
 0x359   : > { %v2187_v23 = vpop.f32.mrf.mxu0  ;;  %v2794_v31 = vpop.f32.mrf.mxu1 }
 0x35a   : > { %v2684_v42 = vpack.c.bf16 %v2632_v61, %v2631_v7  ;;  %v3327_v30 = vpack.c.bf16 %v3266_v4, %v3265_v46  ;;  %v2311_v13 = vpack.c.bf16 %v2187_v23, %v2187_v23  ;;  %v2945_v35 = vpack.c.bf16 %v2794_v31, %v2794_v31 }
 0x35b   : > { %v2000_v31 = vmax.f32 %v1808_v8, 0.0 }
 0x35c   : > { %2226 = vmatmul.bf16.gmra.mxu0 %v2041_v17  ;;  %2833 = vmatmul.bf16.gmra.mxu1 %v2684_v42  ;;  %v2376_v9 = vunpack.c.l.bf16 %v2311_v13  ;;  %v3010_v60 = vunpack.c.l.bf16 %v2945_v35 }
 0x35d   : > { %3440 = vmatmul.bf16.gmra.mxu2 %v3327_v30  ;;  %v1807_v30 = vadd.f32 %v10691_v63, %v1742_v28 }
 0x35e   : > { %v2441_v46 = vadd.f32 %v11207_v62, %v2376_v9  ;;  %v3075_v61 = vadd.f32 %v11341_v20, %v3010_v60  ;;  %v1677_v9 = vpack.c.bf16 %v11357_v22, %v11357_v22  ;;  %v11406_v60 = vpop.f32.mrf.mxu3  ;;  %v10194_v22 = vld [vmem:[%s12868_s2 + $0x1f8] sm:$0xff] }
 0x35f   : > { %v1999_v42 = vmax.f32 %v1807_v30, 0.0  ;;  %6030 = vmatpush.bf16.msra.mxu2 %v10194_v22 }
 0x360   : > { %v2633_v33 = vmax.f32 %v2441_v46, 0.0  ;;  %v3267_v35 = vmax.f32 %v3075_v61, 0.0  ;;  %v1745_v61 = vunpack.c.l.bf16 %v1677_v9 }
 0x361   : > { %v2189_v53 = vpop.f32.mrf.mxu0  ;;  %v2796_v58 = vpop.f32.mrf.mxu1 }
 0x362   : > { %v2312_v23 = vpack.c.bf16 %v2189_v53, %v2189_v53  ;;  %v2946_v7 = vpack.c.bf16 %v2796_v58, %v2796_v58  ;;  %v11402_v58 = vpop.f32.mrf.mxu2 }
 0x363   : > { %12963 = vst [vmem:[#allocation93_spill] sm:$0xff] %v11402_v58 }
 0x364   : > { %v2377_v4 = vunpack.c.l.bf16 %v2312_v23  ;;  %v3011_v13 = vunpack.c.l.bf16 %v2946_v7  ;;  %v2042_v23 = vpack.c.bf16 %v2000_v31, %v1999_v42  ;;  %v1810_v42 = vadd.f32 %v10691_v63, %v1745_v61 }
 0x366   : > { %v2442_v48 = vadd.f32 %v11207_v62, %v2377_v4  ;;  %v3076_v17 = vadd.f32 %v11341_v20, %v3011_v13  ;;  %v1676_v4 = vpack.c.bf16 %v11349_v15, %v11349_v15 }
 0x368   : > { %v2634_v3 = vmax.f32 %v2442_v48, 0.0  ;;  %v3268_v53 = vmax.f32 %v3076_v17, 0.0  ;;  %v1744_v13 = vunpack.c.l.bf16 %v1676_v4 }
 0x369   : > { %v2192_v43 = vpop.f32.mrf.mxu0  ;;  %v2799_v28 = vpop.f32.mrf.mxu1 }
 0x36a   : > { %v2685_v8 = vpack.c.bf16 %v2634_v3, %v2633_v33  ;;  %v3328_v7 = vpack.c.bf16 %v3268_v53, %v3267_v35  ;;  %v2313_v30 = vpack.c.bf16 %v2192_v43, %v2192_v43  ;;  %v2947_v46 = vpack.c.bf16 %v2799_v28, %v2799_v28  ;;  %v11414_v15 = vpop.f32.mrf.mxu2  ;;  %v11417_v53 = vpop.f32.mrf.mxu3 }
 0x36b   : > { %12964 = vst [vmem:[#allocation94_spill] sm:$0xff] %v11414_v15  ;;  %v1809_v3 = vadd.f32 %v10691_v63, %v1744_v13  ;;  %v10163_v13 = vld [vmem:[%s12868_s2 + $0x100] sm:$0xff] }
 0x36c   : > { %2231 = vmatmul.bf16.gmra.mxu0 %v2042_v23  ;;  %2838 = vmatmul.bf16.gmra.mxu1 %v2685_v8  ;;  %v2378_v48 = vunpack.c.l.bf16 %v2313_v30  ;;  %v3012_v17 = vunpack.c.l.bf16 %v2947_v46  ;;  %v2002_v8 = vmax.f32 %v1810_v42, 0.0 }
 0x36d   : > { %3445 = vmatmul.bf16.gmra.mxu2 %v3328_v7  ;;  %4081 = vmatpush.bf16.msrb.mxu3 %v10163_v13 }
 0x36e   : > { %v2443_v43 = vadd.f32 %v11207_v62, %v2378_v48  ;;  %v3077_v28 = vadd.f32 %v11341_v20, %v3012_v17  ;;  %v1679_v17 = vpack.c.bf16 %v11381_v52, %v11381_v52 }
 0x370   : > { %v2635_v30 = vmax.f32 %v2443_v43, 0.0  ;;  %v3269_v46 = vmax.f32 %v3077_v28, 0.0 }
 0x371   : > { %v2194_v58 = vpop.f32.mrf.mxu0  ;;  %v2801_v31 = vpop.f32.mrf.mxu1 }
 0x372   : > { %v2314_v33 = vpack.c.bf16 %v2194_v58, %v2194_v58  ;;  %v2948_v35 = vpack.c.bf16 %v2801_v31, %v2801_v31  ;;  %v2001_v58 = vmax.f32 %v1809_v3, 0.0  ;;  %v1678_v3 = vpack.c.bf16 %v11369_v50, %v11369_v50 }
 0x374   : > { %v2379_v9 = vunpack.c.l.bf16 %v2314_v33  ;;  %v3013_v23 = vunpack.c.l.bf16 %v2948_v35  ;;  %v2043_v33 = vpack.c.bf16 %v2002_v8, %v2001_v58 }
 0x376   : > { %v2444_v7 = vadd.f32 %v11207_v62, %v2379_v9  ;;  %v3078_v4 = vadd.f32 %v11341_v20, %v3013_v23  ;;  %v11430_v9 = vpop.f32.mrf.mxu2  ;;  %v1747_v23 = vunpack.c.l.bf16 %v1679_v17 }
 0x377   : > { %12965 = vst [vmem:[#allocation95_spill] sm:$0xff] %v11430_v9 }
 0x378   : > { %v2636_v61 = vmax.f32 %v2444_v7, 0.0  ;;  %v3270_v22 = vmax.f32 %v3078_v4, 0.0  ;;  %v11432_v7 = vpop.f32.mrf.mxu3  ;;  %v1746_v4 = vunpack.c.l.bf16 %v1678_v3 }
 0x379   : > { %v2197_v31 = vpop.f32.mrf.mxu0  ;;  %v2804_v48 = vpop.f32.mrf.mxu1 }
 0x37a   : > { %v2686_v42 = vpack.c.bf16 %v2636_v61, %v2635_v30  ;;  %v3329_v35 = vpack.c.bf16 %v3270_v22, %v3269_v46  ;;  %v2315_v43 = vpack.c.bf16 %v2197_v31, %v2197_v31  ;;  %v2949_v28 = vpack.c.bf16 %v2804_v48, %v2804_v48 }
 0x37b   : > { %v1812_v30 = vadd.f32 %v10691_v63, %v1747_v23  ;;  %v1811_v50 = vadd.f32 %v10691_v63, %v1746_v4 }
 0x37c   : > { %2236 = vmatmul.bf16.gmra.mxu0 %v2043_v33  ;;  %2843 = vmatmul.bf16.gmra.mxu1 %v2686_v42  ;;  %v2380_v15 = vunpack.c.l.bf16 %v2315_v43  ;;  %v3014_v52 = vunpack.c.l.bf16 %v2949_v28 }
 0x37d   : > { %3450 = vmatmul.bf16.gmra.mxu2 %v3329_v35  ;;  %v2004_v17 = vmax.f32 %v1812_v30, 0.0  ;;  %v2003_v3 = vmax.f32 %v1811_v50, 0.0 }
 0x37e   : > { %v2445_v22 = vadd.f32 %v11207_v62, %v2380_v15  ;;  %v3079_v13 = vadd.f32 %v11341_v20, %v3014_v52  ;;  %v11440_v35 = vpop.f32.mrf.mxu2  ;;  %v1681_v52 = vpack.c.bf16 %v11406_v60, %v11406_v60  ;;  %v10173_v60 = vld [vmem:[%s12868_s2 + $0x150] sm:$0xff] }
 0x37f   : > { %12966 = vst [vmem:[#allocation96_spill] sm:$0xff] %v11440_v35  ;;  %4731 = vmatpush.bf16.msra.mxu0 %v10173_v60 }
 0x380   : > { %v11442_v43 = vpop.f32.mrf.mxu3  ;;  %v2637_v28 = vmax.f32 %v2445_v22, 0.0  ;;  %v3271_v23 = vmax.f32 %v3079_v13, 0.0  ;;  %v1749_v50 = vunpack.c.l.bf16 %v1681_v52 }
 0x381   : > { %v2199_v8 = vpop.f32.mrf.mxu0  ;;  %v2806_v58 = vpop.f32.mrf.mxu1 }
 0x382   : > { %v2316_v46 = vpack.c.bf16 %v2199_v8, %v2199_v8  ;;  %v2950_v61 = vpack.c.bf16 %v2806_v58, %v2806_v58 }
 0x384   : > { %v2381_v31 = vunpack.c.l.bf16 %v2316_v46  ;;  %v3015_v48 = vunpack.c.l.bf16 %v2950_v61  ;;  %v2044_v46 = vpack.c.bf16 %v2004_v17, %v2003_v3 }
 0x386   : > { %v2446_v33 = vadd.f32 %v11207_v62, %v2381_v31  ;;  %v3080_v42 = vadd.f32 %v11341_v20, %v3015_v48  ;;  %v1680_v31 = vpack.c.bf16 %v11391_v26, %v11391_v26 }
 0x388   : > { %v2638_v8 = vmax.f32 %v2446_v33, 0.0  ;;  %v3272_v4 = vmax.f32 %v3080_v42, 0.0  ;;  %v1748_v22 = vunpack.c.l.bf16 %v1680_v31  ;;  %v11448_v42 = vpop.f32.mrf.mxu2  ;;  %v11454_v26 = vpop.f32.mrf.mxu3 }
 0x389   : > { %v2202_v58 = vpop.f32.mrf.mxu0  ;;  %v2809_v15 = vpop.f32.mrf.mxu1  ;;  %12967 = vst [vmem:[#allocation97_spill] sm:$0xff] %v11448_v42 }
 0x38a   : > { %v2687_v30 = vpack.c.bf16 %v2638_v8, %v2637_v28  ;;  %v3330_v61 = vpack.c.bf16 %v3272_v4, %v3271_v23  ;;  %v2317_v48 = vpack.c.bf16 %v2202_v58, %v2202_v58  ;;  %v2951_v35 = vpack.c.bf16 %v2809_v15, %v2809_v15 }
 0x38b   : > { %v1814_v28 = vadd.f32 %v10691_v63, %v1749_v50  ;;  %v1813_v4 = vadd.f32 %v10691_v63, %v1748_v22  ;;  %v1683_v22 = vpack.c.bf16 %v11432_v7, %v11432_v7  ;;  %v10183_v7 = vld [vmem:[%s12868_s2 + $0x1a0] sm:$0xff] }
 0x38c   : > { %2241 = vmatmul.bf16.gmra.mxu0 %v2044_v46  ;;  %2848 = vmatmul.bf16.gmra.mxu1 %v2687_v30  ;;  %v2382_v13 = vunpack.c.l.bf16 %v2317_v48  ;;  %v3016_v33 = vunpack.c.l.bf16 %v2951_v35 }
 0x38d   : > { %3455 = vmatmul.bf16.gmra.mxu2 %v3330_v61  ;;  %v2006_v46 = vmax.f32 %v1814_v28, 0.0  ;;  %v2005_v31 = vmax.f32 %v1813_v4, 0.0  ;;  %v1682_v28 = vpack.c.bf16 %v11417_v53, %v11417_v53  ;;  %5381 = vmatpush.bf16.msra.mxu1 %v10183_v7 }
 0x38e   : > { %v2447_v58 = vadd.f32 %v11207_v62, %v2382_v13  ;;  %v3081_v35 = vadd.f32 %v11341_v20, %v3016_v33 }
 0x38f   : > { %v2045_v33 = vpack.c.bf16 %v2006_v46, %v2005_v31 }
 0x390   : > { %v2639_v48 = vmax.f32 %v2447_v58, 0.0  ;;  %v3273_v50 = vmax.f32 %v3081_v35, 0.0  ;;  %v11463_v13 = vpop.f32.mrf.mxu2  ;;  %v1751_v35 = vunpack.c.l.bf16 %v1683_v22 }
 0x391   : > { %v2204_v17 = vpop.f32.mrf.mxu0  ;;  %v2811_v3 = vpop.f32.mrf.mxu1  ;;  %12968 = vst [vmem:[#allocation98_spill] sm:$0xff] %v11463_v13 }
 0x392   : > { %v2318_v23 = vpack.c.bf16 %v2204_v17, %v2204_v17  ;;  %v2952_v8 = vpack.c.bf16 %v2811_v3, %v2811_v3  ;;  %v1816_v31 = vadd.f32 %v10691_v63, %v1751_v35 }
 0x394   : > { %v2383_v15 = vunpack.c.l.bf16 %v2318_v23  ;;  %v3017_v52 = vunpack.c.l.bf16 %v2952_v8 }
 0x396   : > { %v2448_v30 = vadd.f32 %v11207_v62, %v2383_v15  ;;  %v3082_v61 = vadd.f32 %v11341_v20, %v3017_v52  ;;  %v11467_v15 = vpop.f32.mrf.mxu3  ;;  %v1750_v52 = vunpack.c.l.bf16 %v1682_v28 }
 0x398   : > { %v2640_v42 = vmax.f32 %v2448_v30, 0.0  ;;  %v3274_v17 = vmax.f32 %v3082_v61, 0.0 }
 0x399   : > { %v2207_v3 = vpop.f32.mrf.mxu0  ;;  %v2814_v60 = vpop.f32.mrf.mxu1 }
 0x39a   : > { %v2688_v23 = vpack.c.bf16 %v2640_v42, %v2639_v48  ;;  %v3331_v8 = vpack.c.bf16 %v3274_v17, %v3273_v50  ;;  %v2319_v4 = vpack.c.bf16 %v2207_v3, %v2207_v3  ;;  %v2953_v58 = vpack.c.bf16 %v2814_v60, %v2814_v60  ;;  %v11476_v60 = vpop.f32.mrf.mxu2 }
 0x39b   : > { %v1815_v50 = vadd.f32 %v10691_v63, %v1750_v52  ;;  %12969 = vst [vmem:[#allocation99_spill] sm:$0xff] %v11476_v60 }
 0x39c   : > { %2246 = vmatmul.bf16.gmra.mxu0 %v2045_v33  ;;  %2853 = vmatmul.bf16.gmra.mxu1 %v2688_v23  ;;  %v2384_v30 = vunpack.c.l.bf16 %v2319_v4  ;;  %v3018_v61 = vunpack.c.l.bf16 %v2953_v58  ;;  %v2008_v23 = vmax.f32 %v1816_v31, 0.0  ;;  %v1684_v31 = vpack.c.bf16 %v11442_v43, %v11442_v43 }
 0x39d   : > { %3460 = vmatmul.bf16.gmra.mxu2 %v3331_v8  ;;  %v2007_v58 = vmax.f32 %v1815_v50, 0.0 }
 0x39e   : > { %v2449_v17 = vadd.f32 %v11207_v62, %v2384_v30  ;;  %v3083_v3 = vadd.f32 %v11341_v20, %v3018_v61  ;;  %v1609_v8 = vpop.f32.mrf.mxu3  ;;  %v1685_v30 = vpack.c.bf16 %v11454_v26, %v11454_v26 }
 0x39f   : > { %v2046_v61 = vpack.c.bf16 %v2008_v23, %v2007_v58  ;;  %v10193_v58 = vld [vmem:[%s12868_s2 + $0x1f0] sm:$0xff] }
 0x3a0   : > { %v2641_v35 = vmax.f32 %v2449_v17, 0.0  ;;  %v1753_v50 = vunpack.c.l.bf16 %v1685_v30  ;;  %6031 = vmatpush.bf16.msra.mxu2 %v10193_v58 }
 0x3a1   : > { %v2209_v42 = vpop.f32.mrf.mxu0  ;;  %v2816_v46 = vpop.f32.mrf.mxu1 }
 0x3a2   : > { %v2320_v53 = vpack.c.bf16 %v2209_v42, %v2209_v42  ;;  %v2954_v48 = vpack.c.bf16 %v2816_v46, %v2816_v46  ;;  %v3275_v42 = vmax.f32 %v3083_v3, 0.0  ;;  %v11484_v17 = vpop.f32.mrf.mxu2  ;;  %v1752_v3 = vunpack.c.l.bf16 %v1684_v31 }
 0x3a3   : > { %12970 = vst [vmem:[#allocation100_spill] sm:$0xff] %v11484_v17  ;;  %v1818_v43 = vadd.f32 %v10691_v63, %v1753_v50  ;;  %v1687_v17 = vpack.c.bf16 %v1609_v8, %v1609_v8 }
 0x3a4   : > { %v2385_v22 = vunpack.c.l.bf16 %v2320_v53  ;;  %v3019_v33 = vunpack.c.l.bf16 %v2954_v48 }
 0x3a5   : > { %v2010_v30 = vmax.f32 %v1818_v43, 0.0  ;;  %v1686_v43 = vpack.c.bf16 %v11467_v15, %v11467_v15  ;;  %v3655_v15 = vperm.slane %v10544_v47, 2 }
 0x3a6   : > { %v2450_v28 = vadd.f32 %v11207_v62, %v2385_v22  ;;  %v3084_v4 = vadd.f32 %v11341_v20, %v3019_v33  ;;  %v11486_v33 = vpop.f32.mrf.mxu3 }
 0x3a8   : > { %v2642_v7 = vmax.f32 %v2450_v28, 0.0  ;;  %v3276_v46 = vmax.f32 %v3084_v4, 0.0 }
 0x3a9   : > { %v2212_v52 = vpop.f32.mrf.mxu0  ;;  %v2819_v13 = vpop.f32.mrf.mxu1 }
 0x3aa   : > { %v2689_v60 = vpack.c.bf16 %v2642_v7, %v2641_v35  ;;  %v3332_v53 = vpack.c.bf16 %v3276_v46, %v3275_v42  ;;  %v2321_v48 = vpack.c.bf16 %v2212_v52, %v2212_v52  ;;  %v2955_v22 = vpack.c.bf16 %v2819_v13, %v2819_v13  ;;  %v11497_v50 = vpop.f32.mrf.mxu2 }
 0x3ab   : > { %12971 = vst [vmem:[#allocation101_spill] sm:$0xff] %v11497_v50 }
 0x3ac   : > { %2251 = vmatmul.bf16.gmra.mxu0 %v2046_v61  ;;  %2858 = vmatmul.bf16.gmra.mxu1 %v2689_v60  ;;  %v2386_v28 = vunpack.c.l.bf16 %v2321_v48  ;;  %v3020_v4 = vunpack.c.l.bf16 %v2955_v22  ;;  %v1817_v60 = vadd.f32 %v10691_v63, %v1752_v3 }
 0x3ad   : > { %3465 = vmatmul.bf16.gmra.mxu2 %v3332_v53 }
 0x3ae   : > { %v2451_v42 = vadd.f32 %v11207_v62, %v2386_v28  ;;  %v3085_v7 = vadd.f32 %v11341_v20, %v3020_v4  ;;  %v2009_v31 = vmax.f32 %v1817_v60, 0.0  ;;  %v1614_v28 = vpop.f32.mrf.mxu3  ;;  %v1755_v60 = vunpack.c.l.bf16 %v1687_v17 }
 0x3b0   : > { %v2643_v48 = vmax.f32 %v2451_v42, 0.0  ;;  %v3277_v22 = vmax.f32 %v3085_v7, 0.0  ;;  %v2047_v9 = vpack.c.bf16 %v2010_v30, %v2009_v31  ;;  %v1754_v42 = vunpack.c.l.bf16 %v1686_v43 }
 0x3b1   : > { %v2214_v26 = vpop.f32.mrf.mxu0  ;;  %v2821_v23 = vpop.f32.mrf.mxu1  ;;  %v1820_v8 = vadd.f32 %v10691_v63, %v1755_v60 }
 0x3b2   : > { %v2322_v13 = vpack.c.bf16 %v2214_v26, %v2214_v26  ;;  %v2956_v35 = vpack.c.bf16 %v2821_v23, %v2821_v23 }
 0x3b4   : > { %v2387_v46 = vunpack.c.l.bf16 %v2322_v13  ;;  %v3021_v52 = vunpack.c.l.bf16 %v2956_v35 }
 0x3b6   : > { %v2452_v61 = vadd.f32 %v11207_v62, %v2387_v46  ;;  %v3086_v53 = vadd.f32 %v11341_v20, %v3021_v52 }
 0x3b8   : > { %v2644_v26 = vmax.f32 %v2452_v61, 0.0  ;;  %v3278_v23 = vmax.f32 %v3086_v53, 0.0 }
 0x3b9   : > { %v2217_v3 = vpop.f32.mrf.mxu0  ;;  %v2824_v58 = vpop.f32.mrf.mxu1 }
 0x3ba   : > { %v2690_v4 = vpack.c.bf16 %v2644_v26, %v2643_v48  ;;  %v3333_v13 = vpack.c.bf16 %v3278_v23, %v3277_v22  ;;  %v2323_v35 = vpack.c.bf16 %v2217_v3, %v2217_v3  ;;  %v2957_v46 = vpack.c.bf16 %v2824_v58, %v2824_v58  ;;  %v11504_v26 = vpop.f32.mrf.mxu3 }
 0x3bb   : > { %v1819_v48 = vadd.f32 %v10691_v63, %v1754_v42  ;;  %v2012_v58 = vmax.f32 %v1820_v8, 0.0 }
 0x3bc   : > { %2256 = vmatmul.bf16.gmra.mxu0 %v2047_v9  ;;  %2863 = vmatmul.bf16.gmra.mxu1 %v2690_v4  ;;  %v2388_v7 = vunpack.c.l.bf16 %v2323_v35  ;;  %v3022_v52 = vunpack.c.l.bf16 %v2957_v46  ;;  %v11510_v35 = vunpack.c.l.bf16 %v3655_v15 }
 0x3bd   : > { %3470 = vmatmul.bf16.gmra.mxu2 %v3333_v13  ;;  %v2011_v43 = vmax.f32 %v1819_v48, 0.0 }
 0x3be   : > { %v2453_v9 = vadd.f32 %v11207_v62, %v2388_v7  ;;  %v3087_v17 = vadd.f32 %v11341_v20, %v3022_v52  ;;  %v1689_v52 = vpack.c.bf16 %v1614_v28, %v1614_v28 }
 0x3c0   : > { %v3431_v61 = vpop.f32.mrf.mxu2  ;;  %v2645_v46 = vmax.f32 %v2453_v9, 0.0  ;;  %v3279_v60 = vmax.f32 %v3087_v17, 0.0  ;;  %v1757_v17 = vunpack.c.l.bf16 %v1689_v52 }
 0x3c1   : > { %v2219_v53 = vpop.f32.mrf.mxu0  ;;  %v2826_v50 = vpop.f32.mrf.mxu1  ;;  %v3591_v22 = vpack.c.bf16 %v3431_v61, %v3431_v61 }
 0x3c2   : > { %v2324_v30 = vpack.c.bf16 %v2219_v53, %v2219_v53  ;;  %v2958_v31 = vpack.c.bf16 %v2826_v50, %v2826_v50 }
 0x3c3   : > { %v3656_v50 = vunpack.c.l.bf16 %v3591_v22 }
 0x3c4   : > { %v2389_v23 = vunpack.c.l.bf16 %v2324_v30  ;;  %v3023_v3 = vunpack.c.l.bf16 %v2958_v31  ;;  %v2048_v30 = vpack.c.bf16 %v2012_v58, %v2011_v43 }
 0x3c5   : > { %v3721_v48 = vadd.f32 %v11510_v35, %v3656_v50 }
 0x3c6   : > { %v2454_v4 = vadd.f32 %v11207_v62, %v2389_v23  ;;  %v3088_v13 = vadd.f32 %v11341_v20, %v3023_v3  ;;  %v1688_v23 = vpack.c.bf16 %v11486_v33, %v11486_v33  ;;  %v10172_v33 = vld [vmem:[%s12868_s2 + $0x148] sm:$0xff] }
 0x3c7   : > { %v3913_v28 = vmax.f32 %v3721_v48, 0.0  ;;  %4732 = vmatpush.bf16.msra.mxu0 %v10172_v33 }
 0x3c8   : > { %v2646_v42 = vmax.f32 %v2454_v4, 0.0  ;;  %v3280_v61 = vmax.f32 %v3088_v13, 0.0  ;;  %v3433_v53 = vpop.f32.mrf.mxu2  ;;  %v1619_v4 = vpop.f32.mrf.mxu3  ;;  %v1756_v13 = vunpack.c.l.bf16 %v1688_v23 }
 0x3c9   : > { %v3592_v27 = vpack.c.bf16 %v3433_v53, %v3433_v53  ;;  %v2222_v7 = vpop.f32.mrf.mxu0  ;;  %v2829_v41 = vpop.f32.mrf.mxu1 }
 0x3ca   : > { %v2691_v31 = vpack.c.bf16 %v2646_v42, %v2645_v46  ;;  %v3334_v8 = vpack.c.bf16 %v3280_v61, %v3279_v60  ;;  %v2325_v15 = vpack.c.bf16 %v2222_v7, %v2222_v7  ;;  %v2959_v3 = vpack.c.bf16 %v2829_v41, %v2829_v41 }
 0x3cb   : > { %v3657_v22 = vunpack.c.l.bf16 %v3592_v27  ;;  %v1822_v42 = vadd.f32 %v10691_v63, %v1757_v17  ;;  %v1821_v7 = vadd.f32 %v10691_v63, %v1756_v13 }
 0x3cc   : > { %2261 = vmatmul.bf16.gmra.mxu0 %v2048_v30  ;;  %2868 = vmatmul.bf16.gmra.mxu1 %v2691_v31  ;;  %v2390_v43 = vunpack.c.l.bf16 %v2325_v15  ;;  %v3024_v46 = vunpack.c.l.bf16 %v2959_v3 }
 0x3cd   : > { %v3722_v9 = vadd.f32 %v11510_v35, %v3657_v22  ;;  %3475 = vmatmul.bf16.gmra.mxu2 %v3334_v8  ;;  %v2014_v48 = vmax.f32 %v1822_v42, 0.0  ;;  %v2013_v3 = vmax.f32 %v1821_v7, 0.0 }
 0x3ce   : > { %v2455_v30 = vadd.f32 %v11207_v62, %v2390_v43  ;;  %v3089_v31 = vadd.f32 %v11341_v20, %v3024_v46  ;;  %v1691_v46 = vpack.c.bf16 %v1619_v4, %v1619_v4 }
 0x3cf   : > { %v3914_v58 = vmax.f32 %v3722_v9, 0.0 }
 0x3d0   : > { %v3436_v60 = vpop.f32.mrf.mxu2  ;;  %v11525_v17 = vpop.f32.mrf.mxu3 }
 0x3d1   : > { %v3977_v27 = vpack.c.bf16 %v3914_v58, %v3913_v28  ;;  %v2224_v50 = vpop.f32.mrf.mxu0  ;;  %v2831_v41 = vpop.f32.mrf.mxu1  ;;  %v3593_v52 = vpack.c.bf16 %v3436_v60, %v3436_v60  ;;  %v2647_v28 = vmax.f32 %v2455_v30, 0.0  ;;  %v3281_v58 = vmax.f32 %v3089_v31, 0.0 }
 0x3d2   : > { %v2326_v61 = vpack.c.bf16 %v2224_v50, %v2224_v50  ;;  %v2960_v53 = vpack.c.bf16 %v2831_v41, %v2831_v41  ;;  %v2049_v41 = vpack.c.bf16 %v2014_v48, %v2013_v3  ;;  %v1759_v31 = vunpack.c.l.bf16 %v1691_v46 }
 0x3d3   : > { %4082 = vmatmul.bf16.vlgmr.msrb.gmra.mxu3 %v3977_v27  ;;  %v3658_v9 = vunpack.c.l.bf16 %v3593_v52 }
 0x3d4   : > { %v2391_v8 = vunpack.c.l.bf16 %v2326_v61  ;;  %v3025_v23 = vunpack.c.l.bf16 %v2960_v53  ;;  %v1690_v53 = vpack.c.bf16 %v11504_v26, %v11504_v26  ;;  %v10182_v26 = vld [vmem:[%s12868_s2 + $0x198] sm:$0xff] }
 0x3d5   : > { %v3723_v7 = vadd.f32 %v11510_v35, %v3658_v9  ;;  %5382 = vmatpush.bf16.msra.mxu1 %v10182_v26 }
 0x3d6   : > { %v2456_v22 = vadd.f32 %v11207_v62, %v2391_v8  ;;  %v3090_v15 = vadd.f32 %v11341_v20, %v3025_v23 }
 0x3d8   : > { %v2648_v13 = vmax.f32 %v2456_v22, 0.0  ;;  %v3282_v60 = vmax.f32 %v3090_v15, 0.0  ;;  %v3438_v33 = vpop.f32.mrf.mxu2  ;;  %v1758_v22 = vunpack.c.l.bf16 %v1690_v53  ;;  %v3915_v15 = vmax.f32 %v3723_v7, 0.0 }
 0x3d9   : > { %v3594_v27 = vpack.c.bf16 %v3438_v33, %v3438_v33  ;;  %v2227_v43 = vpop.f32.mrf.mxu0  ;;  %v2834_v50 = vpop.f32.mrf.mxu1 }
 0x3da   : > { %v2692_v61 = vpack.c.bf16 %v2648_v13, %v2647_v28  ;;  %v3335_v42 = vpack.c.bf16 %v3282_v60, %v3281_v58  ;;  %v2327_v8 = vpack.c.bf16 %v2227_v43, %v2227_v43  ;;  %v2961_v23 = vpack.c.bf16 %v2834_v50, %v2834_v50  ;;  %v1624_v50 = vpop.f32.mrf.mxu3 }
 0x3db   : > { %v3659_v52 = vunpack.c.l.bf16 %v3594_v27  ;;  %v1824_v60 = vadd.f32 %v10691_v63, %v1759_v31  ;;  %v1823_v43 = vadd.f32 %v10691_v63, %v1758_v22 }
 0x3dc   : > { %2266 = vmatmul.bf16.gmra.mxu0 %v2049_v41  ;;  %2873 = vmatmul.bf16.gmra.mxu1 %v2692_v61  ;;  %v2392_v48 = vunpack.c.l.bf16 %v2327_v8  ;;  %v3026_v3 = vunpack.c.l.bf16 %v2961_v23 }
 0x3dd   : > { %v3724_v30 = vadd.f32 %v11510_v35, %v3659_v52  ;;  %3480 = vmatmul.bf16.gmra.mxu2 %v3335_v42  ;;  %v2016_v7 = vmax.f32 %v1824_v60, 0.0  ;;  %v2015_v23 = vmax.f32 %v1823_v43, 0.0  ;;  %v1692_v60 = vpack.c.bf16 %v11525_v17, %v11525_v17  ;;  %v10192_v17 = vld [vmem:[%s12868_s2 + $0x1e8] sm:$0xff] }
 0x3de   : > { %v2457_v41 = vadd.f32 %v11207_v62, %v2392_v48  ;;  %v3091_v61 = vadd.f32 %v11341_v20, %v3026_v3  ;;  %v1693_v48 = vpack.c.bf16 %v1624_v50, %v1624_v50  ;;  %6032 = vmatpush.bf16.msra.mxu2 %v10192_v17 }
 0x3df   : > { %v3916_v4 = vmax.f32 %v3724_v30, 0.0 }
 0x3e0   : > { %v3441_v28 = vpop.f32.mrf.mxu2  ;;  %v2649_v31 = vmax.f32 %v2457_v41, 0.0 }
 0x3e1   : > { %v2229_v9 = vpop.f32.mrf.mxu0  ;;  %v2836_v58 = vpop.f32.mrf.mxu1  ;;  %v3978_v13 = vpack.c.bf16 %v3916_v4, %v3915_v15  ;;  %v3595_v46 = vpack.c.bf16 %v3441_v28, %v3441_v28  ;;  %v3283_v15 = vmax.f32 %v3091_v61, 0.0 }
 0x3e2   : > { %v2328_v33 = vpack.c.bf16 %v2229_v9, %v2229_v9  ;;  %v2962_v27 = vpack.c.bf16 %v2836_v58, %v2836_v58  ;;  %v1627_v41 = vpop.f32.mrf.mxu3 }
 0x3e3   : > { %4087 = vmatmul.bf16.gmra.mxu3 %v3978_v13  ;;  %v3660_v30 = vunpack.c.l.bf16 %v3595_v46  ;;  %v2050_v13 = vpack.c.bf16 %v2016_v7, %v2015_v23 }
 0x3e4   : > { %v2393_v42 = vunpack.c.l.bf16 %v2328_v33  ;;  %v3027_v53 = vunpack.c.l.bf16 %v2962_v27 }
 0x3e5   : > { %v3725_v27 = vadd.f32 %v11510_v35, %v3660_v30 }
 0x3e6   : > { %v2458_v52 = vadd.f32 %v11207_v62, %v2393_v42  ;;  %v3092_v8 = vadd.f32 %v11341_v20, %v3027_v53  ;;  %v1761_v53 = vunpack.c.l.bf16 %v1693_v48 }
 0x3e7   : > { %v3917_v50 = vmax.f32 %v3725_v27, 0.0 }
 0x3e8   : > { %v2650_v4 = vmax.f32 %v2458_v52, 0.0  ;;  %v3284_v22 = vmax.f32 %v3092_v8, 0.0  ;;  %v3443_v26 = vpop.f32.mrf.mxu2  ;;  %v1760_v52 = vunpack.c.l.bf16 %v1692_v60 }
 0x3e9   : > { %v3596_v28 = vpack.c.bf16 %v3443_v26, %v3443_v26  ;;  %v2232_v9 = vpop.f32.mrf.mxu0  ;;  %v2839_v58 = vpop.f32.mrf.mxu1 }
 0x3ea   : > { %v2693_v3 = vpack.c.bf16 %v2650_v4, %v2649_v31  ;;  %v3336_v33 = vpack.c.bf16 %v3284_v22, %v3283_v15  ;;  %v2329_v43 = vpack.c.bf16 %v2232_v9, %v2232_v9  ;;  %v2963_v46 = vpack.c.bf16 %v2839_v58, %v2839_v58 }
 0x3eb   : > { %v3661_v42 = vunpack.c.l.bf16 %v3596_v28  ;;  %v1826_v22 = vadd.f32 %v10691_v63, %v1761_v53  ;;  %v1825_v9 = vadd.f32 %v10691_v63, %v1760_v52 }
 0x3ec   : > { %2271 = vmatmul.bf16.gmra.mxu0 %v2050_v13  ;;  %2878 = vmatmul.bf16.gmra.mxu1 %v2693_v3  ;;  %v2394_v8 = vunpack.c.l.bf16 %v2329_v43  ;;  %v3028_v23 = vunpack.c.l.bf16 %v2963_v46  ;;  %v1629_v46 = vpop.f32.mrf.mxu3 }
 0x3ed   : > { %v3726_v61 = vadd.f32 %v11510_v35, %v3661_v42  ;;  %3485 = vmatmul.bf16.gmra.mxu2 %v3336_v33  ;;  %v2018_v60 = vmax.f32 %v1826_v22, 0.0  ;;  %v2017_v43 = vmax.f32 %v1825_v9, 0.0  ;;  %v1694_v22 = vpack.c.bf16 %v1627_v41, %v1627_v41 }
 0x3ee   : > { %v2459_v48 = vadd.f32 %v11207_v62, %v2394_v8  ;;  %v3093_v13 = vadd.f32 %v11341_v20, %v3028_v23 }
 0x3ef   : > { %v3918_v7 = vmax.f32 %v3726_v61, 0.0  ;;  %v2051_v23 = vpack.c.bf16 %v2018_v60, %v2017_v43 }
 0x3f0   : > { %v3446_v31 = vpop.f32.mrf.mxu2  ;;  %v2651_v53 = vmax.f32 %v2459_v48, 0.0 }
 0x3f1   : > { %v2234_v30 = vpop.f32.mrf.mxu0  ;;  %v2841_v15 = vpop.f32.mrf.mxu1  ;;  %v3979_v4 = vpack.c.bf16 %v3918_v7, %v3917_v50  ;;  %v3597_v58 = vpack.c.bf16 %v3446_v31, %v3446_v31  ;;  %v3285_v50 = vmax.f32 %v3093_v13, 0.0  ;;  %v1762_v13 = vunpack.c.l.bf16 %v1694_v22 }
 0x3f2   : > { %v2330_v26 = vpack.c.bf16 %v2234_v30, %v2234_v30  ;;  %v2964_v28 = vpack.c.bf16 %v2841_v15, %v2841_v15  ;;  %v1695_v15 = vpack.c.bf16 %v1629_v46, %v1629_v46 }
 0x3f3   : > { %4092 = vmatmul.bf16.gmra.mxu3 %v3979_v4  ;;  %v3662_v61 = vunpack.c.l.bf16 %v3597_v58 }
 0x3f4   : > { %v2395_v3 = vunpack.c.l.bf16 %v2330_v26  ;;  %v3029_v33 = vunpack.c.l.bf16 %v2964_v28  ;;  %v1763_v48 = vunpack.c.l.bf16 %v1695_v15 }
 0x3f5   : > { %v3727_v28 = vadd.f32 %v11510_v35, %v3662_v61 }
 0x3f6   : > { %v2460_v27 = vadd.f32 %v11207_v62, %v2395_v3  ;;  %v3094_v42 = vadd.f32 %v11341_v20, %v3029_v33  ;;  %v1828_v61 = vadd.f32 %v10691_v63, %v1763_v48 }
 0x3f8   : > { %v2652_v7 = vmax.f32 %v2460_v27, 0.0  ;;  %v3286_v52 = vmax.f32 %v3094_v42, 0.0  ;;  %v3448_v31 = vpop.f32.mrf.mxu2  ;;  %v3919_v27 = vmax.f32 %v3727_v28, 0.0 }
 0x3f9   : > { %v3598_v17 = vpack.c.bf16 %v3448_v31, %v3448_v31  ;;  %v2237_v30 = vpop.f32.mrf.mxu0  ;;  %v2844_v8 = vpop.f32.mrf.mxu1 }
 0x3fa   : > { %v2694_v4 = vpack.c.bf16 %v2652_v7, %v2651_v53  ;;  %v3337_v26 = vpack.c.bf16 %v3286_v52, %v3285_v50  ;;  %v2331_v33 = vpack.c.bf16 %v2237_v30, %v2237_v30  ;;  %v2965_v9 = vpack.c.bf16 %v2844_v8, %v2844_v8 }
 0x3fb   : > { %v3663_v3 = vunpack.c.l.bf16 %v3598_v17  ;;  %v1827_v52 = vadd.f32 %v10691_v63, %v1762_v13 }
 0x3fc   : > { %2276 = vmatmul.bf16.gmra.mxu0 %v2051_v23  ;;  %2883 = vmatmul.bf16.gmra.mxu1 %v2694_v4  ;;  %v2396_v31 = vunpack.c.l.bf16 %v2331_v33  ;;  %v3030_v46 = vunpack.c.l.bf16 %v2965_v9  ;;  %v2020_v4 = vmax.f32 %v1828_v61, 0.0  ;;  %v10202_v33 = vld [vmem:[%s12868_s2 + $0x238] sm:$0xff] }
 0x3fd   : > { %v3728_v58 = vadd.f32 %v11510_v35, %v3663_v3  ;;  %3490 = vmatmul.bf16.gmra.mxu2 %v3337_v26  ;;  %v2019_v28 = vmax.f32 %v1827_v52, 0.0  ;;  %6685 = vmatpush.bf16.msra.mxu3 %v10202_v33 }
 0x3fe   : > { %v2461_v30 = vadd.f32 %v11207_v62, %v2396_v31  ;;  %v3095_v8 = vadd.f32 %v11341_v20, %v3030_v46 }
 0x3ff   : > { %v3920_v42 = vmax.f32 %v3728_v58, 0.0  ;;  %v2052_v46 = vpack.c.bf16 %v2020_v4, %v2019_v28 }
 0x400   : > { %v3451_v60 = vpop.f32.mrf.mxu2  ;;  %v2653_v63 = vmax.f32 %v2461_v30, 0.0  ;;  %v3287_v9 = vmax.f32 %v3095_v8, 0.0 }
 0x401   : > { %v2239_v43 = vpop.f32.mrf.mxu0  ;;  %v2846_v53 = vpop.f32.mrf.mxu1  ;;  %v3980_v41 = vpack.c.bf16 %v3920_v42, %v3919_v27  ;;  %v3599_v17 = vpack.c.bf16 %v3451_v60, %v3451_v60 }
 0x402   : > { %v2332_v50 = vpack.c.bf16 %v2239_v43, %v2239_v43  ;;  %v2966_v7 = vpack.c.bf16 %v2846_v53, %v2846_v53 }
 0x403   : > { %4097 = vmatmul.bf16.gmra.mxu3 %v3980_v41  ;;  %v3664_v3 = vunpack.c.l.bf16 %v3599_v17 }
 0x404   : > { %v2397_v15 = vunpack.c.l.bf16 %v2332_v50  ;;  %v3031_v23 = vunpack.c.l.bf16 %v2966_v7 }
 0x405   : > { %v3729_v53 = vadd.f32 %v11510_v35, %v3664_v3 }
 0x406   : > { %v2462_v26 = vadd.f32 %v11207_v62, %v2397_v15  ;;  %v3096_v22 = vadd.f32 %v11341_v20, %v3031_v23  ;;  %v10171_v23 = vld [vmem:[%s12868_s2 + $0x140] sm:$0xff] }
 0x407   : > { %v3921_v52 = vmax.f32 %v3729_v53, 0.0  ;;  %4733 = vmatpush.bf16.msra.mxu0 %v10171_v23 }
 0x408   : > { %v2654_v58 = vmax.f32 %v2462_v26, 0.0  ;;  %v3288_v48 = vmax.f32 %v3096_v22, 0.0  ;;  %v3453_v13 = vpop.f32.mrf.mxu2 }
 0x409   : > { %v3600_v27 = vpack.c.bf16 %v3453_v13, %v3453_v13  ;;  %v2242_v42 = vpop.f32.mrf.mxu0  ;;  %v2849_v31 = vpop.f32.mrf.mxu1 }
 0x40a   : > { %v2695_v60 = vpack.c.bf16 %v2654_v58, %v2653_v63  ;;  %v3338_v43 = vpack.c.bf16 %v3288_v48, %v3287_v9  ;;  %v2333_v61 = vpack.c.bf16 %v2242_v42, %v2242_v42  ;;  %v2967_v50 = vpack.c.bf16 %v2849_v31, %v2849_v31 }
 0x40b   : > { %v3665_v41 = vunpack.c.l.bf16 %v3600_v27 }
 0x40c   : > { %2281 = vmatmul.bf16.gmra.mxu0 %v2052_v46  ;;  %2888 = vmatmul.bf16.gmra.mxu1 %v2695_v60  ;;  %v2398_v30 = vunpack.c.l.bf16 %v2333_v61  ;;  %v3032_v8 = vunpack.c.l.bf16 %v2967_v50 }
 0x40d   : > { %v3730_v7 = vadd.f32 %v11510_v35, %v3665_v41  ;;  %3495 = vmatmul.bf16.gmra.mxu2 %v3338_v43 }
 0x40e   : > { %v2463_v63 = vadd.f32 %v11207_v62, %v2398_v30  ;;  %v3097_v9 = vadd.f32 %v11341_v20, %v3032_v8 }
 0x40f   : > { %v3922_v17 = vmax.f32 %v3730_v7, 0.0 }
 0x410   : > { %v3456_v15 = vpop.f32.mrf.mxu2  ;;  %v2655_v31 = vmax.f32 %v2463_v63, 0.0  ;;  %v3289_v46 = vmax.f32 %v3097_v9, 0.0 }
 0x411   : > { %v2244_v4 = vpop.f32.mrf.mxu0  ;;  %v2851_v26 = vpop.f32.mrf.mxu1  ;;  %v3981_v22 = vpack.c.bf16 %v3922_v17, %v3921_v52  ;;  %v3601_v33 = vpack.c.bf16 %v3456_v15, %v3456_v15 }
 0x412   : > { %v2334_v28 = vpack.c.bf16 %v2244_v4, %v2244_v4  ;;  %v2968_v3 = vpack.c.bf16 %v2851_v26, %v2851_v26 }
 0x413   : > { %4102 = vmatmul.bf16.gmra.mxu3 %v3981_v22  ;;  %v3666_v42 = vunpack.c.l.bf16 %v3601_v33  ;;  %v10181_v33 = vld [vmem:[%s12868_s2 + $0x190] sm:$0xff] }
 0x414   : > { %v2399_v58 = vunpack.c.l.bf16 %v2334_v28  ;;  %v3033_v48 = vunpack.c.l.bf16 %v2968_v3  ;;  %5383 = vmatpush.bf16.msra.mxu1 %v10181_v33 }
 0x415   : > { %v3731_v17 = vadd.f32 %v11510_v35, %v3666_v42 }
 0x416   : > { %v2464_v13 = vadd.f32 %v11207_v62, %v2399_v58  ;;  %v3098_v27 = vadd.f32 %v11341_v20, %v3033_v48 }
 0x417   : > { %v3923_v4 = vmax.f32 %v3731_v17, 0.0 }
 0x418   : > { %v2656_v60 = vmax.f32 %v2464_v13, 0.0  ;;  %v3290_v43 = vmax.f32 %v3098_v27, 0.0  ;;  %v3458_v53 = vpop.f32.mrf.mxu2 }
 0x419   : > { %v3602_v41 = vpack.c.bf16 %v3458_v53, %v3458_v53  ;;  %v2247_v61 = vpop.f32.mrf.mxu0  ;;  %v2854_v50 = vpop.f32.mrf.mxu1 }
 0x41a   : > { %v2696_v7 = vpack.c.bf16 %v2656_v60, %v2655_v31  ;;  %v3339_v52 = vpack.c.bf16 %v3290_v43, %v3289_v46  ;;  %v2335_v8 = vpack.c.bf16 %v2247_v61, %v2247_v61  ;;  %v2969_v15 = vpack.c.bf16 %v2854_v50, %v2854_v50 }
 0x41b   : > { %v3667_v30 = vunpack.c.l.bf16 %v3602_v41 }
 0x41c   : > { %2893 = vmatmul.bf16.gmra.mxu1 %v2696_v7  ;;  %v2400_v22 = vunpack.c.l.bf16 %v2335_v8  ;;  %v3034_v28 = vunpack.c.l.bf16 %v2969_v15 }
 0x41d   : > { %v3732_v23 = vadd.f32 %v11510_v35, %v3667_v30  ;;  %3500 = vmatmul.bf16.gmra.mxu2 %v3339_v52 }
 0x41e   : > { %v2465_v42 = vadd.f32 %v11207_v62, %v2400_v22  ;;  %v3099_v31 = vadd.f32 %v11341_v20, %v3034_v28 }
 0x41f   : > { %v3924_v26 = vmax.f32 %v3732_v23, 0.0 }
 0x420   : > { %v3461_v3 = vpop.f32.mrf.mxu2  ;;  %v2657_v61 = vmax.f32 %v2465_v42, 0.0  ;;  %v3291_v50 = vmax.f32 %v3099_v31, 0.0 }
 0x421   : > { %v2249_v63 = vpop.f32.mrf.mxu0  ;;  %v2856_v9 = vpop.f32.mrf.mxu1  ;;  %v3982_v58 = vpack.c.bf16 %v3924_v26, %v3923_v4  ;;  %v3603_v27 = vpack.c.bf16 %v3461_v3, %v3461_v3 }
 0x422   : > { %v2336_v48 = vpack.c.bf16 %v2249_v63, %v2249_v63  ;;  %v2970_v13 = vpack.c.bf16 %v2856_v9, %v2856_v9 }
 0x423   : > { %4107 = vmatmul.bf16.gmra.mxu3 %v3982_v58  ;;  %v3668_v41 = vunpack.c.l.bf16 %v3603_v27  ;;  %v10191_v27 = vld [vmem:[%s12868_s2 + $0x1e0] sm:$0xff] }
 0x424   : > { %v2401_v46 = vunpack.c.l.bf16 %v2336_v48  ;;  %v3035_v60 = vunpack.c.l.bf16 %v2970_v13  ;;  %6033 = vmatpush.bf16.msra.mxu2 %v10191_v27 }
 0x425   : > { %v3733_v26 = vadd.f32 %v11510_v35, %v3668_v41 }
 0x426   : > { %v2466_v43 = vadd.f32 %v11207_v62, %v2401_v46  ;;  %v3100_v53 = vadd.f32 %v11341_v20, %v3035_v60 }
 0x427   : > { %v3925_v63 = vmax.f32 %v3733_v26, 0.0 }
 0x428   : > { %v2658_v7 = vmax.f32 %v2466_v43, 0.0  ;;  %v3292_v52 = vmax.f32 %v3100_v53, 0.0  ;;  %v3463_v17 = vpop.f32.mrf.mxu2 }
 0x429   : > { %v3604_v30 = vpack.c.bf16 %v3463_v17, %v3463_v17  ;;  %v2252_v8 = vpop.f32.mrf.mxu0  ;;  %v2859_v15 = vpop.f32.mrf.mxu1 }
 0x42a   : > { %v2697_v23 = vpack.c.bf16 %v2658_v7, %v2657_v61  ;;  %v3340_v4 = vpack.c.bf16 %v3292_v52, %v3291_v50  ;;  %v2337_v28 = vpack.c.bf16 %v2252_v8, %v2252_v8  ;;  %v2971_v3 = vpack.c.bf16 %v2859_v15, %v2859_v15 }
 0x42b   : > { %v3669_v22 = vunpack.c.l.bf16 %v3604_v30 }
 0x42c   : > { %2898 = vmatmul.bf16.gmra.mxu1 %v2697_v23  ;;  %v2402_v58 = vunpack.c.l.bf16 %v2337_v28  ;;  %v3036_v48 = vunpack.c.l.bf16 %v2971_v3 }
 0x42d   : > { %v3734_v33 = vadd.f32 %v11510_v35, %v3669_v22  ;;  %3505 = vmatmul.bf16.gmra.mxu2 %v3340_v4 }
 0x42e   : > { %v2467_v41 = vadd.f32 %v11207_v62, %v2402_v58  ;;  %v3101_v61 = vadd.f32 %v11341_v20, %v3036_v48 }
 0x42f   : > { %v3926_v9 = vmax.f32 %v3734_v33, 0.0 }
 0x430   : > { %v3466_v13 = vpop.f32.mrf.mxu2  ;;  %v2659_v8 = vmax.f32 %v2467_v41, 0.0  ;;  %v3293_v15 = vmax.f32 %v3101_v61, 0.0 }
 0x431   : > { %v2254_v42 = vpop.f32.mrf.mxu0  ;;  %v2861_v31 = vpop.f32.mrf.mxu1  ;;  %v3983_v46 = vpack.c.bf16 %v3926_v9, %v3925_v63  ;;  %v3605_v53 = vpack.c.bf16 %v3466_v13, %v3466_v13 }
 0x432   : > { %v2338_v60 = vpack.c.bf16 %v2254_v42, %v2254_v42  ;;  %v2972_v43 = vpack.c.bf16 %v2861_v31, %v2861_v31 }
 0x433   : > { %4112 = vmatmul.bf16.gmra.mxu3 %v3983_v46  ;;  %v3670_v30 = vunpack.c.l.bf16 %v3605_v53 }
 0x434   : > { %v2403_v50 = vunpack.c.l.bf16 %v2338_v60  ;;  %v3037_v7 = vunpack.c.l.bf16 %v2972_v43 }
 0x435   : > { %v3735_v9 = vadd.f32 %v11510_v35, %v3670_v30 }
 0x436   : > { %v2468_v52 = vadd.f32 %v11207_v62, %v2403_v50  ;;  %v3102_v17 = vadd.f32 %v11341_v20, %v3037_v7 }
 0x437   : > { %v3927_v42 = vmax.f32 %v3735_v9, 0.0 }
 0x438   : > { %v2660_v23 = vmax.f32 %v2468_v52, 0.0  ;;  %v3294_v4 = vmax.f32 %v3102_v17, 0.0  ;;  %v3468_v26 = vpop.f32.mrf.mxu2 }
 0x439   : > { %v3606_v22 = vpack.c.bf16 %v3468_v26, %v3468_v26  ;;  %v2257_v28 = vpop.f32.mrf.mxu0  ;;  %v2864_v3 = vpop.f32.mrf.mxu1 }
 0x43a   : > { %v2698_v33 = vpack.c.bf16 %v2660_v23, %v2659_v8  ;;  %v3341_v63 = vpack.c.bf16 %v3294_v4, %v3293_v15  ;;  %v2339_v48 = vpack.c.bf16 %v2257_v28, %v2257_v28  ;;  %v2973_v13 = vpack.c.bf16 %v2864_v3, %v2864_v3 }
 0x43b   : > { %v3671_v58 = vunpack.c.l.bf16 %v3606_v22 }
 0x43c   : > { %2903 = vmatmul.bf16.gmra.mxu1 %v2698_v33  ;;  %v2404_v46 = vunpack.c.l.bf16 %v2339_v48  ;;  %v3038_v60 = vunpack.c.l.bf16 %v2973_v13  ;;  %v10201_v13 = vld [vmem:[%s12868_s2 + $0x230] sm:$0xff] }
 0x43d   : > { %v3736_v27 = vadd.f32 %v11510_v35, %v3671_v58  ;;  %3510 = vmatmul.bf16.gmra.mxu2 %v3341_v63  ;;  %6686 = vmatpush.bf16.msra.mxu3 %v10201_v13 }
 0x43e   : > { %v2469_v17 = vadd.f32 %v11207_v62, %v2404_v46  ;;  %v3103_v30 = vadd.f32 %v11341_v20, %v3038_v60 }
 0x43f   : > { %v3928_v31 = vmax.f32 %v3736_v27, 0.0 }
 0x440   : > { %v3471_v43 = vpop.f32.mrf.mxu2  ;;  %v2661_v22 = vmax.f32 %v2469_v17, 0.0  ;;  %v3295_v28 = vmax.f32 %v3103_v30, 0.0 }
 0x441   : > { %v2259_v53 = vpop.f32.mrf.mxu0  ;;  %v2866_v41 = vpop.f32.mrf.mxu1  ;;  %v3984_v61 = vpack.c.bf16 %v3928_v31, %v3927_v42  ;;  %v3607_v52 = vpack.c.bf16 %v3471_v43, %v3471_v43 }
 0x442   : > { %v2340_v50 = vpack.c.bf16 %v2259_v53, %v2259_v53  ;;  %v2974_v7 = vpack.c.bf16 %v2866_v41, %v2866_v41 }
 0x443   : > { %4117 = vmatmul.bf16.gmra.mxu3 %v3984_v61  ;;  %v3672_v26 = vunpack.c.l.bf16 %v3607_v52 }
 0x444   : > { %v2405_v8 = vunpack.c.l.bf16 %v2340_v50  ;;  %v3039_v15 = vunpack.c.l.bf16 %v2974_v7 }
 0x445   : > { %v3737_v31 = vadd.f32 %v11510_v35, %v3672_v26 }
 0x446   : > { %v2470_v23 = vadd.f32 %v11207_v62, %v2405_v8  ;;  %v3104_v4 = vadd.f32 %v11341_v20, %v3039_v15 }
 0x447   : > { %v3929_v41 = vmax.f32 %v3737_v31, 0.0 }
 0x448   : > { %v2662_v3 = vmax.f32 %v2470_v23, 0.0  ;;  %v3296_v33 = vmax.f32 %v3104_v4, 0.0  ;;  %v3473_v63 = vpop.f32.mrf.mxu2 }
 0x449   : > { %v3608_v9 = vpack.c.bf16 %v3473_v63, %v3473_v63  ;;  %v2262_v58 = vpop.f32.mrf.mxu0  ;;  %v2869_v48 = vpop.f32.mrf.mxu1 }
 0x44a   : > { %v2699_v27 = vpack.c.bf16 %v2662_v3, %v2661_v22  ;;  %v3342_v42 = vpack.c.bf16 %v3296_v33, %v3295_v28  ;;  %v2341_v60 = vpack.c.bf16 %v2262_v58, %v2262_v58  ;;  %v2975_v43 = vpack.c.bf16 %v2869_v48, %v2869_v48 }
 0x44b   : > { %v3673_v46 = vunpack.c.l.bf16 %v3608_v9 }
 0x44c   : > { %2908 = vmatmul.bf16.gmra.mxu1 %v2699_v27  ;;  %v2406_v50 = vunpack.c.l.bf16 %v2341_v60  ;;  %v3040_v7 = vunpack.c.l.bf16 %v2975_v43 }
 0x44d   : > { %v3738_v53 = vadd.f32 %v11510_v35, %v3673_v46  ;;  %3515 = vmatmul.bf16.gmra.mxu2 %v3342_v42 }
 0x44e   : > { %v2471_v26 = vadd.f32 %v11207_v62, %v2406_v50  ;;  %v3105_v22 = vadd.f32 %v11341_v20, %v3040_v7 }
 0x44f   : > { %v3930_v61 = vmax.f32 %v3738_v53, 0.0 }
 0x450   : > { %v3476_v52 = vpop.f32.mrf.mxu2  ;;  %v2663_v13 = vmax.f32 %v2471_v26, 0.0  ;;  %v3297_v27 = vmax.f32 %v3105_v22, 0.0 }
 0x451   : > { %v2264_v17 = vpop.f32.mrf.mxu0  ;;  %v2871_v30 = vpop.f32.mrf.mxu1  ;;  %v3985_v8 = vpack.c.bf16 %v3930_v61, %v3929_v41  ;;  %v3609_v4 = vpack.c.bf16 %v3476_v52, %v3476_v52  ;;  %v4307_v41 = vperm.slane %v10679_v10, 2 }
 0x452   : > { %v2342_v15 = vpack.c.bf16 %v2264_v17, %v2264_v17  ;;  %v2976_v23 = vpack.c.bf16 %v2871_v30, %v2871_v30 }
 0x453   : > { %4122 = vmatmul.bf16.gmra.mxu3 %v3985_v8  ;;  %v3674_v58 = vunpack.c.l.bf16 %v3609_v4 }
 0x454   : > { %v2407_v28 = vunpack.c.l.bf16 %v2342_v15  ;;  %v3041_v3 = vunpack.c.l.bf16 %v2976_v23  ;;  %v11610_v15 = vunpack.c.l.bf16 %v4307_v41 }
 0x455   : > { %v3739_v7 = vadd.f32 %v11510_v35, %v3674_v58 }
 0x456   : > { %v2472_v33 = vadd.f32 %v11207_v62, %v2407_v28  ;;  %v3106_v63 = vadd.f32 %v11341_v20, %v3041_v3  ;;  %v4083_v9 = vpop.f32.mrf.mxu3 }
 0x457   : > { %v4084_v48 = vadd.f32 %v4083_v9, %v10622_v36  ;;  %v3931_v4 = vmax.f32 %v3739_v7, 0.0  ;;  %v10180_v9 = vld [vmem:[%s12868_s2 + $0x188] sm:$0xff] }
 0x458   : > { %v2664_v42 = vmax.f32 %v2472_v33, 0.0  ;;  %v3298_v31 = vmax.f32 %v3106_v63, 0.0  ;;  %v3478_v46 = vpop.f32.mrf.mxu2  ;;  %5384 = vmatpush.bf16.msra.mxu1 %v10180_v9 }
 0x459   : > { %v3610_v60 = vpack.c.bf16 %v3478_v46, %v3478_v46  ;;  %v2267_v43 = vpop.f32.mrf.mxu0  ;;  %v2874_v53 = vpop.f32.mrf.mxu1  ;;  %v4243_v52 = vpack.c.bf16 %v4084_v48, %v4084_v48 }
 0x45a   : > { %v2700_v61 = vpack.c.bf16 %v2664_v42, %v2663_v13  ;;  %v3343_v50 = vpack.c.bf16 %v3298_v31, %v3297_v27  ;;  %v2343_v30 = vpack.c.bf16 %v2267_v43, %v2267_v43  ;;  %v2977_v8 = vpack.c.bf16 %v2874_v53, %v2874_v53 }
 0x45b   : > { %v3675_v17 = vunpack.c.l.bf16 %v3610_v60  ;;  %v4308_v26 = vunpack.c.l.bf16 %v4243_v52 }
 0x45c   : > { %2913 = vmatmul.bf16.gmra.mxu1 %v2700_v61  ;;  %v2408_v3 = vunpack.c.l.bf16 %v2343_v30  ;;  %v3042_v33 = vunpack.c.l.bf16 %v2977_v8 }
 0x45d   : > { %v3740_v36 = vadd.f32 %v11510_v35, %v3675_v17  ;;  %3520 = vmatmul.bf16.gmra.mxu2 %v3343_v50  ;;  %v4373_v46 = vadd.f32 %v11610_v15, %v4308_v26 }
 0x45e   : > { %v4085_v23 = vpop.f32.mrf.mxu3  ;;  %v3107_v53 = vadd.f32 %v11341_v20, %v3042_v33 }
 0x45f   : > { %v3932_v22 = vmax.f32 %v3740_v36, 0.0  ;;  %v4086_v28 = vadd.f32 %v4085_v23, %v10632_v51  ;;  %v2473_v51 = vadd.f32 %v11207_v62, %v2408_v3  ;;  %v4565_v30 = vmax.f32 %v4373_v46, 0.0 }
 0x460   : > { %v3481_v63 = vpop.f32.mrf.mxu2  ;;  %v3299_v26 = vmax.f32 %v3107_v53, 0.0 }
 0x461   : > { %v4244_v58 = vpack.c.bf16 %v4086_v28, %v4086_v28  ;;  %v2269_v48 = vpop.f32.mrf.mxu0  ;;  %v2876_v13 = vpop.f32.mrf.mxu1  ;;  %v3986_v27 = vpack.c.bf16 %v3932_v22, %v3931_v4  ;;  %v3611_v43 = vpack.c.bf16 %v3481_v63, %v3481_v63  ;;  %v2665_v4 = vmax.f32 %v2473_v51, 0.0 }
 0x462   : > { %v2344_v42 = vpack.c.bf16 %v2269_v48, %v2269_v48  ;;  %v2978_v31 = vpack.c.bf16 %v2876_v13, %v2876_v13 }
 0x463   : > { %v4309_v60 = vunpack.c.l.bf16 %v4244_v58  ;;  %4127 = vmatmul.bf16.gmra.mxu3 %v3986_v27  ;;  %v3676_v36 = vunpack.c.l.bf16 %v3611_v43 }
 0x464   : > { %v2409_v41 = vunpack.c.l.bf16 %v2344_v42  ;;  %v3043_v61 = vunpack.c.l.bf16 %v2978_v31 }
 0x465   : > { %v4374_v50 = vadd.f32 %v11610_v15, %v4309_v60  ;;  %v3741_v27 = vadd.f32 %v11510_v35, %v3676_v36 }
 0x466   : > { %v2474_v7 = vadd.f32 %v11207_v62, %v2409_v41  ;;  %v3108_v52 = vadd.f32 %v11341_v20, %v3043_v61  ;;  %v4088_v17 = vpop.f32.mrf.mxu3 }
 0x467   : > { %v4566_v8 = vmax.f32 %v4374_v50, 0.0  ;;  %v4089_v23 = vadd.f32 %v4088_v17, %v10643_v0  ;;  %v3933_v51 = vmax.f32 %v3741_v27, 0.0  ;;  %v10190_v17 = vld [vmem:[%s12868_s2 + $0x1d8] sm:$0xff] }
 0x468   : > { %v2666_v22 = vmax.f32 %v2474_v7, 0.0  ;;  %v3300_v28 = vmax.f32 %v3108_v52, 0.0  ;;  %v3483_v3 = vpop.f32.mrf.mxu2  ;;  %6034 = vmatpush.bf16.msra.mxu2 %v10190_v17 }
 0x469   : > { %v4629_v33 = vpack.c.bf16 %v4566_v8, %v4565_v30  ;;  %v3612_v63 = vpack.c.bf16 %v3483_v3, %v3483_v3  ;;  %v2272_v9 = vpop.f32.mrf.mxu0  ;;  %v2879_v58 = vpop.f32.mrf.mxu1  ;;  %v4245_v42 = vpack.c.bf16 %v4089_v23, %v4089_v23 }
 0x46a   : > { %v2701_v48 = vpack.c.bf16 %v2666_v22, %v2665_v4  ;;  %v3344_v13 = vpack.c.bf16 %v3300_v28, %v3299_v26  ;;  %v2345_v46 = vpack.c.bf16 %v2272_v9, %v2272_v9  ;;  %v2979_v60 = vpack.c.bf16 %v2879_v58, %v2879_v58 }
 0x46b   : > { %v3677_v31 = vunpack.c.l.bf16 %v3612_v63  ;;  %4734 = vmatmul.bf16.vlgmr.msra.gmra.mxu0 %v4629_v33  ;;  %v4310_v53 = vunpack.c.l.bf16 %v4245_v42 }
 0x46c   : > { %2918 = vmatmul.bf16.gmra.mxu1 %v2701_v48  ;;  %v2410_v50 = vunpack.c.l.bf16 %v2345_v46  ;;  %v3044_v7 = vunpack.c.l.bf16 %v2979_v60 }
 0x46d   : > { %v3742_v0 = vadd.f32 %v11510_v35, %v3677_v31  ;;  %3525 = vmatmul.bf16.gmra.mxu2 %v3344_v13  ;;  %v4375_v22 = vadd.f32 %v11610_v15, %v4310_v53 }
 0x46e   : > { %v4090_v43 = vpop.f32.mrf.mxu3  ;;  %v3109_v33 = vadd.f32 %v11341_v20, %v3044_v7 }
 0x46f   : > { %v3934_v41 = vmax.f32 %v3742_v0, 0.0  ;;  %v4091_v61 = vadd.f32 %v4090_v43, %v10655_v16  ;;  %v2475_v16 = vadd.f32 %v11207_v62, %v2410_v50  ;;  %v4567_v42 = vmax.f32 %v4375_v22, 0.0 }
 0x470   : > { %v3486_v52 = vpop.f32.mrf.mxu2  ;;  %v3301_v43 = vmax.f32 %v3109_v33, 0.0 }
 0x471   : > { %v4246_v30 = vpack.c.bf16 %v4091_v61, %v4091_v61  ;;  %v2274_v8 = vpop.f32.mrf.mxu0  ;;  %v2881_v36 = vpop.f32.mrf.mxu1  ;;  %v3987_v23 = vpack.c.bf16 %v3934_v41, %v3933_v51  ;;  %v3613_v3 = vpack.c.bf16 %v3486_v52, %v3486_v52  ;;  %v2667_v0 = vmax.f32 %v2475_v16, 0.0 }
 0x472   : > { %v2346_v4 = vpack.c.bf16 %v2274_v8, %v2274_v8  ;;  %v2980_v26 = vpack.c.bf16 %v2881_v36, %v2881_v36 }
 0x473   : > { %v4311_v28 = vunpack.c.l.bf16 %v4246_v30  ;;  %4132 = vmatmul.bf16.gmra.mxu3 %v3987_v23  ;;  %v3678_v46 = vunpack.c.l.bf16 %v3613_v3 }
 0x474   : > { %v2411_v63 = vunpack.c.l.bf16 %v2346_v4  ;;  %v3045_v9 = vunpack.c.l.bf16 %v2980_v26 }
 0x475   : > { %v4376_v58 = vadd.f32 %v11610_v15, %v4311_v28  ;;  %v3743_v8 = vadd.f32 %v11510_v35, %v3678_v46 }
 0x476   : > { %v2476_v48 = vadd.f32 %v11207_v62, %v2411_v63  ;;  %v3110_v13 = vadd.f32 %v11341_v20, %v3045_v9  ;;  %v4093_v27 = vpop.f32.mrf.mxu3 }
 0x477   : > { %v4568_v31 = vmax.f32 %v4376_v58, 0.0  ;;  %v4094_v60 = vadd.f32 %v4093_v27, %v10662_v24  ;;  %v3935_v28 = vmax.f32 %v3743_v8, 0.0 }
 0x478   : > { %v2668_v51 = vmax.f32 %v2476_v48, 0.0  ;;  %v3302_v53 = vmax.f32 %v3110_v13, 0.0  ;;  %v3488_v41 = vpop.f32.mrf.mxu2 }
 0x479   : > { %v3614_v61 = vpack.c.bf16 %v3488_v41, %v3488_v41  ;;  %v2277_v50 = vpop.f32.mrf.mxu0  ;;  %v2884_v7 = vpop.f32.mrf.mxu1  ;;  %v4630_v52 = vpack.c.bf16 %v4568_v31, %v4567_v42  ;;  %v4247_v36 = vpack.c.bf16 %v4094_v60, %v4094_v60 }
 0x47a   : > { %v2702_v17 = vpack.c.bf16 %v2668_v51, %v2667_v0  ;;  %v3345_v30 = vpack.c.bf16 %v3302_v53, %v3301_v43  ;;  %v2347_v4 = vpack.c.bf16 %v2277_v50, %v2277_v50  ;;  %v2981_v26 = vpack.c.bf16 %v2884_v7, %v2884_v7 }
 0x47b   : > { %v3679_v23 = vunpack.c.l.bf16 %v3614_v61  ;;  %4739 = vmatmul.bf16.gmra.mxu0 %v4630_v52  ;;  %v4312_v3 = vunpack.c.l.bf16 %v4247_v36 }
 0x47c   : > { %2923 = vmatmul.bf16.gmra.mxu1 %v2702_v17  ;;  %v2412_v63 = vunpack.c.l.bf16 %v2347_v4  ;;  %v3046_v9 = vunpack.c.l.bf16 %v2981_v26 }
 0x47d   : > { %v3744_v24 = vadd.f32 %v11510_v35, %v3679_v23  ;;  %3530 = vmatmul.bf16.gmra.mxu2 %v3345_v30  ;;  %v4377_v60 = vadd.f32 %v11610_v15, %v4312_v3  ;;  %v10200_v23 = vld [vmem:[%s12868_s2 + $0x228] sm:$0xff] }
 0x47e   : > { %v4095_v22 = vpop.f32.mrf.mxu3  ;;  %v2477_v51 = vadd.f32 %v11207_v62, %v2412_v63  ;;  %v3111_v53 = vadd.f32 %v11341_v20, %v3046_v9  ;;  %6687 = vmatpush.bf16.msra.mxu3 %v10200_v23 }
 0x47f   : > { %v3936_v16 = vmax.f32 %v3744_v24, 0.0  ;;  %v4096_v33 = vadd.f32 %v4095_v22, %v10674_v39  ;;  %v4569_v17 = vmax.f32 %v4377_v60, 0.0 }
 0x480   : > { %v3491_v58 = vpop.f32.mrf.mxu2  ;;  %v2669_v4 = vmax.f32 %v2477_v51, 0.0  ;;  %v3303_v26 = vmax.f32 %v3111_v53, 0.0 }
 0x481   : > { %v4248_v48 = vpack.c.bf16 %v4096_v33, %v4096_v33  ;;  %v2279_v13 = vpop.f32.mrf.mxu0  ;;  %v2886_v27 = vpop.f32.mrf.mxu1  ;;  %v3988_v42 = vpack.c.bf16 %v3936_v16, %v3935_v28  ;;  %v3615_v43 = vpack.c.bf16 %v3491_v58, %v3491_v58 }
 0x482   : > { %v2348_v31 = vpack.c.bf16 %v2279_v13, %v2279_v13  ;;  %v2982_v46 = vpack.c.bf16 %v2886_v27, %v2886_v27 }
 0x483   : > { %v4313_v0 = vunpack.c.l.bf16 %v4248_v48  ;;  %4137 = vmatmul.bf16.gmra.mxu3 %v3988_v42  ;;  %v3680_v8 = vunpack.c.l.bf16 %v3615_v43 }
 0x484   : > { %v2413_v41 = vunpack.c.l.bf16 %v2348_v31  ;;  %v3047_v39 = vunpack.c.l.bf16 %v2982_v46 }
 0x485   : > { %v4378_v61 = vadd.f32 %v11610_v15, %v4313_v0  ;;  %v3745_v48 = vadd.f32 %v11510_v35, %v3680_v8 }
 0x486   : > { %v2478_v50 = vadd.f32 %v11207_v62, %v2413_v41  ;;  %v3112_v7 = vadd.f32 %v11341_v20, %v3047_v39  ;;  %v4098_v52 = vpop.f32.mrf.mxu3 }
 0x487   : > { %v4570_v30 = vmax.f32 %v4378_v61, 0.0  ;;  %v4099_v36 = vadd.f32 %v4098_v52, %v10681_v54  ;;  %v3937_v60 = vmax.f32 %v3745_v48, 0.0 }
 0x488   : > { %v2670_v24 = vmax.f32 %v2478_v50, 0.0  ;;  %v3304_v22 = vmax.f32 %v3112_v7, 0.0  ;;  %v3493_v28 = vpop.f32.mrf.mxu2 }
 0x489   : > { %v3616_v3 = vpack.c.bf16 %v3493_v28, %v3493_v28  ;;  %v2282_v16 = vpop.f32.mrf.mxu0  ;;  %v2889_v33 = vpop.f32.mrf.mxu1  ;;  %v4631_v63 = vpack.c.bf16 %v4570_v30, %v4569_v17  ;;  %v4249_v13 = vpack.c.bf16 %v4099_v36, %v4099_v36 }
 0x48a   : > { %v2703_v9 = vpack.c.bf16 %v2670_v24, %v2669_v4  ;;  %v3346_v58 = vpack.c.bf16 %v3304_v22, %v3303_v26  ;;  %v2349_v27 = vpack.c.bf16 %v2282_v16, %v2282_v16  ;;  %v2983_v42 = vpack.c.bf16 %v2889_v33, %v2889_v33 }
 0x48b   : > { %v3681_v54 = vunpack.c.l.bf16 %v3616_v3  ;;  %4744 = vmatmul.bf16.gmra.mxu0 %v4631_v63  ;;  %v4314_v0 = vunpack.c.l.bf16 %v4249_v13 }
 0x48c   : > { %2928 = vmatmul.bf16.gmra.mxu1 %v2703_v9  ;;  %v2414_v53 = vunpack.c.l.bf16 %v2349_v27  ;;  %v3048_v41 = vunpack.c.l.bf16 %v2983_v42 }
 0x48d   : > { %v3746_v31 = vadd.f32 %v11510_v35, %v3681_v54  ;;  %3535 = vmatmul.bf16.gmra.mxu2 %v3346_v58  ;;  %v4379_v8 = vadd.f32 %v11610_v15, %v4314_v0 }
 0x48e   : > { %v4100_v46 = vpop.f32.mrf.mxu3  ;;  %v2479_v4 = vadd.f32 %v11207_v62, %v2414_v53  ;;  %v3113_v26 = vadd.f32 %v11341_v20, %v3048_v41 }
 0x48f   : > { %v3938_v43 = vmax.f32 %v3746_v31, 0.0  ;;  %v4101_v51 = vadd.f32 %v4100_v46, %v10696_v12  ;;  %v4571_v33 = vmax.f32 %v4379_v8, 0.0  ;;  %v10179_v8 = vld [vmem:[%s12868_s2 + $0x180] sm:$0xff] }
 0x490   : > { %v3496_v39 = vpop.f32.mrf.mxu2  ;;  %v2671_v48 = vmax.f32 %v2479_v4, 0.0  ;;  %v3305_v13 = vmax.f32 %v3113_v26, 0.0  ;;  %5385 = vmatpush.bf16.msra.mxu1 %v10179_v8 }
 0x491   : > { %v4250_v61 = vpack.c.bf16 %v4101_v51, %v4101_v51  ;;  %v2284_v50 = vpop.f32.mrf.mxu0  ;;  %v2891_v7 = vpop.f32.mrf.mxu1  ;;  %v3989_v52 = vpack.c.bf16 %v3938_v43, %v3937_v60  ;;  %v3617_v23 = vpack.c.bf16 %v3496_v39, %v3496_v39 }
 0x492   : > { %v2350_v17 = vpack.c.bf16 %v2284_v50, %v2284_v50  ;;  %v2984_v30 = vpack.c.bf16 %v2891_v7, %v2891_v7 }
 0x493   : > { %v4315_v36 = vunpack.c.l.bf16 %v4250_v61  ;;  %4142 = vmatmul.bf16.gmra.mxu3 %v3989_v52  ;;  %v3682_v9 = vunpack.c.l.bf16 %v3617_v23 }
 0x494   : > { %v2415_v24 = vunpack.c.l.bf16 %v2350_v17  ;;  %v3049_v12 = vunpack.c.l.bf16 %v2984_v30 }
 0x495   : > { %v4380_v22 = vadd.f32 %v11610_v15, %v4315_v36 }
 0x496   : > { %v2480_v28 = vadd.f32 %v11207_v62, %v2415_v24  ;;  %v3114_v3 = vadd.f32 %v11341_v20, %v3049_v12  ;;  %v4103_v16 = vpop.f32.mrf.mxu3  ;;  %v3747_v62 = vadd.f32 %v11510_v35, %v3682_v9 }
 0x497   : > { %v4572_v63 = vmax.f32 %v4380_v22, 0.0  ;;  %v4104_v58 = vadd.f32 %v4103_v16, %v10707_v32 }
 0x498   : > { %v2672_v54 = vmax.f32 %v2480_v28, 0.0  ;;  %v3306_v27 = vmax.f32 %v3114_v3, 0.0  ;;  %v3498_v42 = vpop.f32.mrf.mxu2  ;;  %v3939_v61 = vmax.f32 %v3747_v62, 0.0 }
 0x499   : > { %v3618_v31 = vpack.c.bf16 %v3498_v42, %v3498_v42  ;;  %v2894_v46 = vpop.f32.mrf.mxu1  ;;  %v4632_v60 = vpack.c.bf16 %v4572_v63, %v4571_v33  ;;  %v4251_v51 = vpack.c.bf16 %v4104_v58, %v4104_v58 }
 0x49a   : > { %v2704_v0 = vpack.c.bf16 %v2672_v54, %v2671_v48  ;;  %v3347_v43 = vpack.c.bf16 %v3306_v27, %v3305_v13  ;;  %v2985_v41 = vpack.c.bf16 %v2894_v46, %v2894_v46 }
 0x49b   : > { %v3683_v53 = vunpack.c.l.bf16 %v3618_v31  ;;  %4749 = vmatmul.bf16.gmra.mxu0 %v4632_v60  ;;  %v4316_v50 = vunpack.c.l.bf16 %v4251_v51 }
 0x49c   : > { %2933 = vmatmul.bf16.gmra.mxu1 %v2704_v0  ;;  %v3050_v17 = vunpack.c.l.bf16 %v2985_v41 }
 0x49d   : > { %v3748_v39 = vadd.f32 %v11510_v35, %v3683_v53  ;;  %3540 = vmatmul.bf16.gmra.mxu2 %v3347_v43  ;;  %v4381_v24 = vadd.f32 %v11610_v15, %v4316_v50 }
 0x49e   : > { %v4105_v32 = vpop.f32.mrf.mxu3  ;;  %v3115_v28 = vadd.f32 %v11341_v20, %v3050_v17 }
 0x49f   : > { %v3940_v7 = vmax.f32 %v3748_v39, 0.0  ;;  %v4106_v52 = vadd.f32 %v4105_v32, %v10719_v59  ;;  %v4573_v63 = vmax.f32 %v4381_v24, 0.0 }
 0x4a0   : > { %v3501_v30 = vpop.f32.mrf.mxu2  ;;  %v3307_v13 = vmax.f32 %v3115_v28, 0.0 }
 0x4a1   : > { %v4252_v36 = vpack.c.bf16 %v4106_v52, %v4106_v52  ;;  %v2896_v23 = vpop.f32.mrf.mxu1  ;;  %v3990_v4 = vpack.c.bf16 %v3940_v7, %v3939_v61  ;;  %v3619_v22 = vpack.c.bf16 %v3501_v30, %v3501_v30  ;;  %v10189_v52 = vld [vmem:[%s12868_s2 + $0x1d0] sm:$0xff] }
 0x4a2   : > { %v2986_v26 = vpack.c.bf16 %v2896_v23, %v2896_v23  ;;  %6035 = vmatpush.bf16.msra.mxu2 %v10189_v52 }
 0x4a3   : > { %v4317_v12 = vunpack.c.l.bf16 %v4252_v36  ;;  %4147 = vmatmul.bf16.gmra.mxu3 %v3990_v4  ;;  %v3684_v58 = vunpack.c.l.bf16 %v3619_v22 }
 0x4a4   : > { %v3051_v3 = vunpack.c.l.bf16 %v2986_v26 }
 0x4a5   : > { %v4382_v59 = vadd.f32 %v11610_v15, %v4317_v12  ;;  %v3749_v0 = vadd.f32 %v11510_v35, %v3684_v58 }
 0x4a6   : > { %v3116_v16 = vadd.f32 %v11341_v20, %v3051_v3  ;;  %v4108_v33 = vpop.f32.mrf.mxu3 }
 0x4a7   : > { %v4574_v9 = vmax.f32 %v4382_v59, 0.0  ;;  %v4109_v48 = vadd.f32 %v4108_v33, %v10730_v19  ;;  %v3941_v39 = vmax.f32 %v3749_v0, 0.0 }
 0x4a8   : > { %v3308_v54 = vmax.f32 %v3116_v16, 0.0  ;;  %v3503_v27 = vpop.f32.mrf.mxu2 }
 0x4a9   : > { %v3620_v42 = vpack.c.bf16 %v3503_v27, %v3503_v27  ;;  %v2899_v31 = vpop.f32.mrf.mxu1  ;;  %v4633_v46 = vpack.c.bf16 %v4574_v9, %v4573_v63  ;;  %v4253_v43 = vpack.c.bf16 %v4109_v48, %v4109_v48 }
 0x4aa   : > { %v3348_v60 = vpack.c.bf16 %v3308_v54, %v3307_v13  ;;  %v2987_v51 = vpack.c.bf16 %v2899_v31, %v2899_v31 }
 0x4ab   : > { %v3685_v62 = vunpack.c.l.bf16 %v3620_v42  ;;  %4754 = vmatmul.bf16.gmra.mxu0 %v4633_v46  ;;  %v4318_v32 = vunpack.c.l.bf16 %v4253_v43 }
 0x4ac   : > { %v3052_v50 = vunpack.c.l.bf16 %v2987_v51 }
 0x4ad   : > { %v3750_v53 = vadd.f32 %v11510_v35, %v3685_v62  ;;  %3545 = vmatmul.bf16.gmra.mxu2 %v3348_v60  ;;  %v4383_v23 = vadd.f32 %v11610_v15, %v4318_v32 }
 0x4ae   : > { %v4110_v41 = vpop.f32.mrf.mxu3  ;;  %v3117_v24 = vadd.f32 %v11341_v20, %v3052_v50 }
 0x4af   : > { %v3942_v19 = vmax.f32 %v3750_v53, 0.0  ;;  %v4111_v61 = vadd.f32 %v4110_v41, %v10742_v49  ;;  %v4575_v3 = vmax.f32 %v4383_v23, 0.0  ;;  %v12972_v53 = vld [vmem:[#allocation5_spill] sm:$0xff] }
 0x4b0   : > { %v3506_v7 = vpop.f32.mrf.mxu2  ;;  %v3309_v63 = vmax.f32 %v3117_v24, 0.0 }
 0x4b1   : > { %v4254_v17 = vpack.c.bf16 %v4111_v61, %v4111_v61  ;;  %v2901_v30 = vpop.f32.mrf.mxu1  ;;  %v3991_v8 = vpack.c.bf16 %v3942_v19, %v3941_v39  ;;  %v3621_v26 = vpack.c.bf16 %v3506_v7, %v3506_v7 }
 0x4b2   : > { %v2988_v36 = vpack.c.bf16 %v2901_v30, %v2901_v30 }
 0x4b3   : > { %v4319_v4 = vunpack.c.l.bf16 %v4254_v17  ;;  %4152 = vmatmul.bf16.gmra.mxu3 %v3991_v8  ;;  %v3686_v16 = vunpack.c.l.bf16 %v3621_v26 }
 0x4b4   : > { %v3053_v12 = vunpack.c.l.bf16 %v2988_v36 }
 0x4b5   : > { %v4384_v49 = vadd.f32 %v11610_v15, %v4319_v4  ;;  %v3751_v42 = vadd.f32 %v11510_v35, %v3686_v16 }
 0x4b6   : > { %v3118_v22 = vadd.f32 %v11341_v20, %v3053_v12  ;;  %v4113_v28 = vpop.f32.mrf.mxu3 }
 0x4b7   : > { %v4576_v59 = vmax.f32 %v4384_v49, 0.0  ;;  %v4114_v33 = vadd.f32 %v4113_v28, %v10753_v6  ;;  %v3943_v62 = vmax.f32 %v3751_v42, 0.0 }
 0x4b8   : > { %v3310_v9 = vmax.f32 %v3118_v22, 0.0  ;;  %v3508_v58 = vpop.f32.mrf.mxu2  ;;  %v12973_v22 = vld [vmem:[#allocation6_spill] sm:$0xff] }
 0x4b9   : > { %v3622_v48 = vpack.c.bf16 %v3508_v58, %v3508_v58  ;;  %v2904_v13 = vpop.f32.mrf.mxu1  ;;  %v4634_v54 = vpack.c.bf16 %v4576_v59, %v4575_v3  ;;  %v4255_v31 = vpack.c.bf16 %v4114_v33, %v4114_v33  ;;  %v10199_v3 = vld [vmem:[%s12868_s2 + $0x220] sm:$0xff] }
 0x4ba   : > { %v3349_v27 = vpack.c.bf16 %v3310_v9, %v3309_v63  ;;  %v2989_v60 = vpack.c.bf16 %v2904_v13, %v2904_v13  ;;  %6688 = vmatpush.bf16.msra.mxu3 %v10199_v3 }
 0x4bb   : > { %v3687_v46 = vunpack.c.l.bf16 %v3622_v48  ;;  %4759 = vmatmul.bf16.gmra.mxu0 %v4634_v54  ;;  %v4320_v51 = vunpack.c.l.bf16 %v4255_v31 }
 0x4bc   : > { %v3054_v39 = vunpack.c.l.bf16 %v2989_v60 }
 0x4bd   : > { %v3752_v0 = vadd.f32 %v11510_v35, %v3687_v46  ;;  %3550 = vmatmul.bf16.gmra.mxu2 %v3349_v27  ;;  %v4385_v52 = vadd.f32 %v11610_v15, %v4320_v51 }
 0x4be   : > { %v4115_v43 = vpop.f32.mrf.mxu3  ;;  %v3119_v8 = vadd.f32 %v11341_v20, %v3054_v39 }
 0x4bf   : > { %v3944_v6 = vmax.f32 %v3752_v0, 0.0  ;;  %v4116_v41 = vadd.f32 %v4115_v43, %v12972_v53  ;;  %v4577_v24 = vmax.f32 %v4385_v52, 0.0 }
 0x4c0   : > { %v3511_v32 = vpop.f32.mrf.mxu2  ;;  %v3311_v59 = vmax.f32 %v3119_v8, 0.0 }
 0x4c1   : > { %v4256_v19 = vpack.c.bf16 %v4116_v41, %v4116_v41  ;;  %v2906_v61 = vpop.f32.mrf.mxu1  ;;  %v3992_v50 = vpack.c.bf16 %v3944_v6, %v3943_v62  ;;  %v3623_v30 = vpack.c.bf16 %v3511_v32, %v3511_v32  ;;  %v12974_v62 = vld [vmem:[#allocation7_spill] sm:$0xff]  ;;  %v10210_v41 = vld [vmem:[%s12868_s2 + $0x278] sm:$0xff] }
 0x4c2   : > { %v2990_v7 = vpack.c.bf16 %v2906_v61, %v2906_v61  ;;  %7564 = vmatpush.bf16.msrb.mxu0 %v10210_v41 }
 0x4c3   : > { %v4321_v17 = vunpack.c.l.bf16 %v4256_v19  ;;  %4157 = vmatmul.bf16.gmra.mxu3 %v3992_v50  ;;  %v3688_v49 = vunpack.c.l.bf16 %v3623_v30 }
 0x4c4   : > { %v3055_v36 = vunpack.c.l.bf16 %v2990_v7 }
 0x4c5   : > { %v4386_v23 = vadd.f32 %v11610_v15, %v4321_v17  ;;  %v3753_v13 = vadd.f32 %v11510_v35, %v3688_v49 }
 0x4c6   : > { %v3120_v4 = vadd.f32 %v11341_v20, %v3055_v36  ;;  %v4118_v26 = vpop.f32.mrf.mxu3 }
 0x4c7   : > { %v4578_v12 = vmax.f32 %v4386_v23, 0.0  ;;  %v4119_v28 = vadd.f32 %v4118_v26, %v12973_v22  ;;  %v3945_v60 = vmax.f32 %v3753_v13, 0.0 }
 0x4c8   : > { %v3312_v16 = vmax.f32 %v3120_v4, 0.0  ;;  %v3513_v33 = vpop.f32.mrf.mxu2 }
 0x4c9   : > { %v3624_v63 = vpack.c.bf16 %v3513_v33, %v3513_v33  ;;  %v2909_v9 = vpop.f32.mrf.mxu1  ;;  %v4635_v58 = vpack.c.bf16 %v4578_v12, %v4577_v24  ;;  %v4257_v54 = vpack.c.bf16 %v4119_v28, %v4119_v28  ;;  %v12975_v12 = vld [vmem:[#allocation8_spill] sm:$0xff] }
 0x4ca   : > { %v3350_v48 = vpack.c.bf16 %v3312_v16, %v3311_v59  ;;  %v2991_v42 = vpack.c.bf16 %v2909_v9, %v2909_v9 }
 0x4cb   : > { %v3689_v27 = vunpack.c.l.bf16 %v3624_v63  ;;  %4764 = vmatmul.bf16.gmra.mxu0 %v4635_v58  ;;  %v4322_v0 = vunpack.c.l.bf16 %v4257_v54 }
 0x4cc   : > { %v3056_v6 = vunpack.c.l.bf16 %v2991_v42 }
 0x4cd   : > { %v3754_v31 = vadd.f32 %v11510_v35, %v3689_v27  ;;  %3555 = vmatmul.bf16.gmra.mxu2 %v3350_v48  ;;  %v4387_v50 = vadd.f32 %v11610_v15, %v4322_v0 }
 0x4ce   : > { %v4120_v46 = vpop.f32.mrf.mxu3  ;;  %v3121_v17 = vadd.f32 %v11341_v20, %v3056_v6 }
 0x4cf   : > { %v3946_v43 = vmax.f32 %v3754_v31, 0.0  ;;  %v4121_v51 = vadd.f32 %v4120_v46, %v12974_v62  ;;  %v4579_v4 = vmax.f32 %v4387_v50, 0.0 }
 0x4d0   : > { %v3516_v53 = vpop.f32.mrf.mxu2  ;;  %v3313_v22 = vmax.f32 %v3121_v17, 0.0 }
 0x4d1   : > { %v4258_v39 = vpack.c.bf16 %v4121_v51, %v4121_v51  ;;  %v2911_v32 = vpop.f32.mrf.mxu1  ;;  %v3993_v19 = vpack.c.bf16 %v3946_v43, %v3945_v60  ;;  %v3625_v52 = vpack.c.bf16 %v3516_v53, %v3516_v53  ;;  %v12976_v60 = vld [vmem:[#allocation9_spill] sm:$0xff] }
 0x4d2   : > { %v2992_v61 = vpack.c.bf16 %v2911_v32, %v2911_v32 }
 0x4d3   : > { %v4323_v7 = vunpack.c.l.bf16 %v4258_v39  ;;  %4162 = vmatmul.bf16.gmra.mxu3 %v3993_v19  ;;  %v3690_v24 = vunpack.c.l.bf16 %v3625_v52 }
 0x4d4   : > { %v3057_v30 = vunpack.c.l.bf16 %v2992_v61 }
 0x4d5   : > { %v4388_v8 = vadd.f32 %v11610_v15, %v4323_v7  ;;  %v3755_v9 = vadd.f32 %v11510_v35, %v3690_v24 }
 0x4d6   : > { %v3122_v36 = vadd.f32 %v11341_v20, %v3057_v30  ;;  %v4123_v23 = vpop.f32.mrf.mxu3 }
 0x4d7   : > { %v4580_v26 = vmax.f32 %v4388_v8, 0.0  ;;  %v4124_v49 = vadd.f32 %v4123_v23, %v12975_v12  ;;  %v3947_v42 = vmax.f32 %v3755_v9, 0.0 }
 0x4d8   : > { %v3314_v28 = vmax.f32 %v3122_v36, 0.0  ;;  %v3518_v3 = vpop.f32.mrf.mxu2 }
 0x4d9   : > { %v3626_v59 = vpack.c.bf16 %v3518_v3, %v3518_v3  ;;  %v2914_v16 = vpop.f32.mrf.mxu1  ;;  %v4636_v33 = vpack.c.bf16 %v4580_v26, %v4579_v4  ;;  %v4259_v58 = vpack.c.bf16 %v4124_v49, %v4124_v49  ;;  %v12977_v26 = vld [vmem:[#allocation10_spill] sm:$0xff] }
 0x4da   : > { %v3351_v63 = vpack.c.bf16 %v3314_v28, %v3313_v22  ;;  %v2993_v13 = vpack.c.bf16 %v2914_v16, %v2914_v16  ;;  %v4959_v16 = vperm.slane %v10544_v47, 3 }
 0x4db   : > { %v3691_v48 = vunpack.c.l.bf16 %v3626_v59  ;;  %4769 = vmatmul.bf16.gmra.mxu0 %v4636_v33  ;;  %v4324_v31 = vunpack.c.l.bf16 %v4259_v58 }
 0x4dc   : > { %v3058_v43 = vunpack.c.l.bf16 %v2993_v13 }
 0x4dd   : > { %v3756_v54 = vadd.f32 %v11510_v35, %v3691_v48  ;;  %3560 = vmatmul.bf16.gmra.mxu2 %v3351_v63  ;;  %v4389_v39 = vadd.f32 %v11610_v15, %v4324_v31 }
 0x4de   : > { %v4125_v27 = vpop.f32.mrf.mxu3  ;;  %v3123_v61 = vadd.f32 %v11341_v20, %v3058_v43 }
 0x4df   : > { %v3948_v46 = vmax.f32 %v3756_v54, 0.0  ;;  %v4126_v0 = vadd.f32 %v4125_v27, %v12976_v60  ;;  %v4581_v30 = vmax.f32 %v4389_v39, 0.0  ;;  %v11714_v27 = vunpack.c.l.bf16 %v4959_v16  ;;  %v12978_v60 = vld [vmem:[#allocation12_spill] sm:$0xff] }
 0x4e0   : > { %v3521_v62 = vpop.f32.mrf.mxu2  ;;  %v3315_v23 = vmax.f32 %v3123_v61, 0.0 }
 0x4e1   : > { %v4260_v51 = vpack.c.bf16 %v4126_v0, %v4126_v0  ;;  %v2916_v6 = vpop.f32.mrf.mxu1  ;;  %v3994_v53 = vpack.c.bf16 %v3948_v46, %v3947_v42  ;;  %v3627_v19 = vpack.c.bf16 %v3521_v62, %v3521_v62 }
 0x4e2   : > { %v2994_v41 = vpack.c.bf16 %v2916_v6, %v2916_v6  ;;  %v10188_v6 = vld [vmem:[%s12868_s2 + $0x1c8] sm:$0xff] }
 0x4e3   : > { %v4325_v32 = vunpack.c.l.bf16 %v4260_v51  ;;  %4167 = vmatmul.bf16.gmra.mxu3 %v3994_v53  ;;  %v3692_v36 = vunpack.c.l.bf16 %v3627_v19  ;;  %6036 = vmatpush.bf16.msra.mxu2 %v10188_v6 }
 0x4e4   : > { %v3059_v50 = vunpack.c.l.bf16 %v2994_v41 }
 0x4e5   : > { %v4390_v7 = vadd.f32 %v11610_v15, %v4325_v32  ;;  %v3757_v63 = vadd.f32 %v11510_v35, %v3692_v36 }
 0x4e6   : > { %v3124_v52 = vadd.f32 %v11341_v20, %v3059_v50  ;;  %v4128_v17 = vpop.f32.mrf.mxu3 }
 0x4e7   : > { %v4582_v8 = vmax.f32 %v4390_v7, 0.0  ;;  %v4129_v24 = vadd.f32 %v4128_v17, %v12977_v26  ;;  %v3949_v31 = vmax.f32 %v3757_v63, 0.0 }
 0x4e8   : > { %v3316_v4 = vmax.f32 %v3124_v52, 0.0  ;;  %v3523_v12 = vpop.f32.mrf.mxu2  ;;  %v4735_v49 = vpop.f32.mrf.mxu0 }
 0x4e9   : > { %v3628_v22 = vpack.c.bf16 %v3523_v12, %v3523_v12  ;;  %v2919_v28 = vpop.f32.mrf.mxu1  ;;  %v4637_v3 = vpack.c.bf16 %v4582_v8, %v4581_v30  ;;  %v4895_v59 = vpack.c.bf16 %v4735_v49, %v4735_v49  ;;  %v4261_v58 = vpack.c.bf16 %v4129_v24, %v4129_v24 }
 0x4ea   : > { %v3352_v33 = vpack.c.bf16 %v3316_v4, %v3315_v23  ;;  %v2995_v48 = vpack.c.bf16 %v2919_v28, %v2919_v28  ;;  %v12979_v28 = vld [vmem:[#allocation14_spill] sm:$0xff] }
 0x4eb   : > { %v3693_v9 = vunpack.c.l.bf16 %v3628_v22  ;;  %4774 = vmatmul.bf16.gmra.mxu0 %v4637_v3  ;;  %v4960_v54 = vunpack.c.l.bf16 %v4895_v59  ;;  %v4326_v43 = vunpack.c.l.bf16 %v4261_v58 }
 0x4ec   : > { %v3060_v47 = vunpack.c.l.bf16 %v2995_v48 }
 0x4ed   : > { %v3758_v13 = vadd.f32 %v11510_v35, %v3693_v9  ;;  %3565 = vmatmul.bf16.gmra.mxu2 %v3352_v33  ;;  %v5025_v19 = vadd.f32 %v11714_v27, %v4960_v54  ;;  %v4391_v17 = vadd.f32 %v11610_v15, %v4326_v43 }
 0x4ee   : > { %v4130_v42 = vpop.f32.mrf.mxu3  ;;  %v3125_v30 = vadd.f32 %v11341_v20, %v3060_v47 }
 0x4ef   : > { %v3950_v46 = vmax.f32 %v3758_v13, 0.0  ;;  %v4131_v0 = vadd.f32 %v4130_v42, %v12978_v60  ;;  %v5217_v4 = vmax.f32 %v5025_v19, 0.0  ;;  %v4583_v59 = vmax.f32 %v4391_v17, 0.0 }
 0x4f0   : > { %v3526_v62 = vpop.f32.mrf.mxu2  ;;  %v4737_v51 = vpop.f32.mrf.mxu0  ;;  %v3317_v16 = vmax.f32 %v3125_v30, 0.0 }
 0x4f1   : > { %v4262_v53 = vpack.c.bf16 %v4131_v0, %v4131_v0  ;;  %v4896_v41 = vpack.c.bf16 %v4737_v51, %v4737_v51  ;;  %v2921_v39 = vpop.f32.mrf.mxu1  ;;  %v3995_v32 = vpack.c.bf16 %v3950_v46, %v3949_v31  ;;  %v3629_v7 = vpack.c.bf16 %v3526_v62, %v3526_v62 }
 0x4f2   : > { %v2996_v61 = vpack.c.bf16 %v2921_v39, %v2921_v39 }
 0x4f3   : > { %v4327_v50 = vunpack.c.l.bf16 %v4262_v53  ;;  %v4961_v52 = vunpack.c.l.bf16 %v4896_v41  ;;  %4172 = vmatmul.bf16.gmra.mxu3 %v3995_v32  ;;  %v3694_v49 = vunpack.c.l.bf16 %v3629_v7  ;;  %v12980_v41 = vld [vmem:[#allocation16_spill] sm:$0xff] }
 0x4f4   : > { %v3061_v8 = vunpack.c.l.bf16 %v2996_v61 }
 0x4f5   : > { %v4392_v36 = vadd.f32 %v11610_v15, %v4327_v50  ;;  %v5026_v23 = vadd.f32 %v11714_v27, %v4961_v52  ;;  %v3759_v46 = vadd.f32 %v11510_v35, %v3694_v49 }
 0x4f6   : > { %v3126_v26 = vadd.f32 %v11341_v20, %v3061_v8  ;;  %v4133_v24 = vpop.f32.mrf.mxu3 }
 0x4f7   : > { %v4584_v12 = vmax.f32 %v4392_v36, 0.0  ;;  %v5218_v22 = vmax.f32 %v5026_v23, 0.0  ;;  %v4134_v3 = vadd.f32 %v4133_v24, %v12979_v28  ;;  %v3951_v6 = vmax.f32 %v3759_v46, 0.0 }
 0x4f8   : > { %v3318_v33 = vmax.f32 %v3126_v26, 0.0  ;;  %v3528_v63 = vpop.f32.mrf.mxu2  ;;  %v4740_v9 = vpop.f32.mrf.mxu0 }
 0x4f9   : > { %v5281_v58 = vpack.c.bf16 %v5218_v22, %v5217_v4  ;;  %v3630_v48 = vpack.c.bf16 %v3528_v63, %v3528_v63  ;;  %v2924_v13 = vpop.f32.mrf.mxu1  ;;  %v4263_v54 = vpack.c.bf16 %v4134_v3, %v4134_v3  ;;  %v4638_v42 = vpack.c.bf16 %v4584_v12, %v4583_v59 }
 0x4fa   : > { %v3353_v31 = vpack.c.bf16 %v3318_v33, %v3317_v16  ;;  %v4897_v0 = vpack.c.bf16 %v4740_v9, %v4740_v9  ;;  %v2997_v43 = vpack.c.bf16 %v2924_v13, %v2924_v13  ;;  %v10198_v13 = vld [vmem:[%s12868_s2 + $0x218] sm:$0xff] }
 0x4fb   : > { %v3695_v60 = vunpack.c.l.bf16 %v3630_v48  ;;  %5386 = vmatmul.bf16.vlgmr.msra.gmra.mxu1 %v5281_v58  ;;  %4779 = vmatmul.bf16.gmra.mxu0 %v4638_v42  ;;  %v4328_v62 = vunpack.c.l.bf16 %v4263_v54  ;;  %v12981_v58 = vld [vmem:[#allocation18_spill] sm:$0xff] }
 0x4fc   : > { %v4962_v32 = vunpack.c.l.bf16 %v4897_v0  ;;  %v3062_v19 = vunpack.c.l.bf16 %v2997_v43  ;;  %6689 = vmatpush.bf16.msra.mxu3 %v10198_v13 }
 0x4fd   : > { %v3760_v47 = vadd.f32 %v11510_v35, %v3695_v60  ;;  %3570 = vmatmul.bf16.gmra.mxu2 %v3353_v31  ;;  %v4393_v8 = vadd.f32 %v11610_v15, %v4328_v62 }
 0x4fe   : > { %v4135_v51 = vpop.f32.mrf.mxu3  ;;  %v5027_v24 = vadd.f32 %v11714_v27, %v4962_v32  ;;  %v3127_v12 = vadd.f32 %v11341_v20, %v3062_v19 }
 0x4ff   : > { %v3952_v53 = vmax.f32 %v3760_v47, 0.0  ;;  %v4136_v39 = vadd.f32 %v4135_v51, %v12980_v41  ;;  %v4585_v3 = vmax.f32 %v4393_v8, 0.0  ;;  %v10209_v8 = vld [vmem:[%s12868_s2 + $0x270] sm:$0xff] }
 0x500   : > { %v3531_v61 = vpop.f32.mrf.mxu2  ;;  %v4742_v50 = vpop.f32.mrf.mxu0  ;;  %v5219_v54 = vmax.f32 %v5027_v24, 0.0  ;;  %v3319_v42 = vmax.f32 %v3127_v12, 0.0  ;;  %7565 = vmatpush.bf16.msrb.mxu0 %v10209_v8 }
 0x501   : > { %v4264_v7 = vpack.c.bf16 %v4136_v39, %v4136_v39  ;;  %v4898_v52 = vpack.c.bf16 %v4742_v50, %v4742_v50  ;;  %v2926_v17 = vpop.f32.mrf.mxu1  ;;  %v3996_v30 = vpack.c.bf16 %v3952_v53, %v3951_v6  ;;  %v3631_v4 = vpack.c.bf16 %v3531_v61, %v3531_v61 }
 0x502   : > { %v2998_v36 = vpack.c.bf16 %v2926_v17, %v2926_v17  ;;  %v12982_v17 = vld [vmem:[#allocation20_spill] sm:$0xff] }
 0x503   : > { %v4329_v23 = vunpack.c.l.bf16 %v4264_v7  ;;  %v4963_v26 = vunpack.c.l.bf16 %v4898_v52  ;;  %4177 = vmatmul.bf16.gmra.mxu3 %v3996_v30  ;;  %v3696_v63 = vunpack.c.l.bf16 %v3631_v4 }
 0x504   : > { %v3063_v49 = vunpack.c.l.bf16 %v2998_v36 }
 0x505   : > { %v4394_v22 = vadd.f32 %v11610_v15, %v4329_v23  ;;  %v5028_v28 = vadd.f32 %v11714_v27, %v4963_v26  ;;  %v3761_v53 = vadd.f32 %v11510_v35, %v3696_v63 }
 0x506   : > { %v3128_v59 = vadd.f32 %v11341_v20, %v3063_v49  ;;  %v4138_v16 = vpop.f32.mrf.mxu3 }
 0x507   : > { %v4586_v33 = vmax.f32 %v4394_v22, 0.0  ;;  %v5220_v9 = vmax.f32 %v5028_v28, 0.0  ;;  %v4139_v48 = vadd.f32 %v4138_v16, %v12981_v58  ;;  %v3953_v7 = vmax.f32 %v3761_v53, 0.0 }
 0x508   : > { %v3320_v31 = vmax.f32 %v3128_v59, 0.0  ;;  %v3533_v46 = vpop.f32.mrf.mxu2  ;;  %v4745_v60 = vpop.f32.mrf.mxu0 }
 0x509   : > { %v3632_v0 = vpack.c.bf16 %v3533_v46, %v3533_v46  ;;  %v2929_v43 = vpop.f32.mrf.mxu1  ;;  %v4639_v47 = vpack.c.bf16 %v4586_v33, %v4585_v3  ;;  %v4265_v62 = vpack.c.bf16 %v4139_v48, %v4139_v48  ;;  %v5282_v51 = vpack.c.bf16 %v5220_v9, %v5219_v54 }
 0x50a   : > { %v3354_v6 = vpack.c.bf16 %v3320_v31, %v3319_v42  ;;  %v4899_v39 = vpack.c.bf16 %v4745_v60, %v4745_v60  ;;  %v2999_v32 = vpack.c.bf16 %v2929_v43, %v2929_v43  ;;  %v12983_v43 = vld [vmem:[#allocation22_spill] sm:$0xff] }
 0x50b   : > { %v3697_v41 = vunpack.c.l.bf16 %v3632_v0  ;;  %4784 = vmatmul.bf16.gmra.mxu0 %v4639_v47  ;;  %5391 = vmatmul.bf16.gmra.mxu1 %v5282_v51  ;;  %v4330_v61 = vunpack.c.l.bf16 %v4265_v62 }
 0x50c   : > { %v4964_v36 = vunpack.c.l.bf16 %v4899_v39  ;;  %v3064_v23 = vunpack.c.l.bf16 %v2999_v32 }
 0x50d   : > { %v3762_v19 = vadd.f32 %v11510_v35, %v3697_v41  ;;  %3575 = vmatmul.bf16.gmra.mxu2 %v3354_v6  ;;  %v4395_v28 = vadd.f32 %v11610_v15, %v4330_v61 }
 0x50e   : > { %v4140_v50 = vpop.f32.mrf.mxu3  ;;  %v5029_v63 = vadd.f32 %v11714_v27, %v4964_v36  ;;  %v3129_v9 = vadd.f32 %v11341_v20, %v3064_v23 }
 0x50f   : > { %v3954_v52 = vmax.f32 %v3762_v19, 0.0  ;;  %v4141_v30 = vadd.f32 %v4140_v50, %v12982_v17  ;;  %v4587_v54 = vmax.f32 %v4395_v28, 0.0 }
 0x510   : > { %v3536_v4 = vpop.f32.mrf.mxu2  ;;  %v4747_v26 = vpop.f32.mrf.mxu0  ;;  %v5221_v62 = vmax.f32 %v5029_v63, 0.0  ;;  %v3321_v51 = vmax.f32 %v3129_v9, 0.0 }
 0x511   : > { %v4266_v24 = vpack.c.bf16 %v4141_v30, %v4141_v30  ;;  %v4900_v12 = vpack.c.bf16 %v4747_v26, %v4747_v26  ;;  %v2931_v49 = vpop.f32.mrf.mxu1  ;;  %v3997_v22 = vpack.c.bf16 %v3954_v52, %v3953_v7  ;;  %v3633_v16 = vpack.c.bf16 %v3536_v4, %v3536_v4 }
 0x512   : > { %v3000_v3 = vpack.c.bf16 %v2931_v49, %v2931_v49 }
 0x513   : > { %v4331_v59 = vunpack.c.l.bf16 %v4266_v24  ;;  %v4965_v33 = vunpack.c.l.bf16 %v4900_v12  ;;  %4182 = vmatmul.bf16.gmra.mxu3 %v3997_v22  ;;  %v3698_v60 = vunpack.c.l.bf16 %v3633_v16  ;;  %v12984_v12 = vld [vmem:[#allocation24_spill] sm:$0xff] }
 0x514   : > { %v3065_v58 = vunpack.c.l.bf16 %v3000_v3 }
 0x515   : > { %v4396_v48 = vadd.f32 %v11610_v15, %v4331_v59  ;;  %v5030_v13 = vadd.f32 %v11714_v27, %v4965_v33  ;;  %v3763_v52 = vadd.f32 %v11510_v35, %v3698_v60 }
 0x516   : > { %v3130_v42 = vadd.f32 %v11341_v20, %v3065_v58  ;;  %v4143_v31 = vpop.f32.mrf.mxu3 }
 0x517   : > { %v4588_v46 = vmax.f32 %v4396_v48, 0.0  ;;  %v5222_v0 = vmax.f32 %v5030_v13, 0.0  ;;  %v4144_v47 = vadd.f32 %v4143_v31, %v12983_v43  ;;  %v3955_v26 = vmax.f32 %v3763_v52, 0.0 }
 0x518   : > { %v3322_v6 = vmax.f32 %v3130_v42, 0.0  ;;  %v3538_v53 = vpop.f32.mrf.mxu2  ;;  %v4750_v41 = vpop.f32.mrf.mxu0 }
 0x519   : > { %v3634_v39 = vpack.c.bf16 %v3538_v53, %v3538_v53  ;;  %v2934_v32 = vpop.f32.mrf.mxu1  ;;  %v4640_v19 = vpack.c.bf16 %v4588_v46, %v4587_v54  ;;  %v4267_v61 = vpack.c.bf16 %v4144_v47, %v4144_v47  ;;  %v5283_v50 = vpack.c.bf16 %v5222_v0, %v5221_v62 }
 0x51a   : > { %v3355_v7 = vpack.c.bf16 %v3322_v6, %v3321_v51  ;;  %v4901_v30 = vpack.c.bf16 %v4750_v41, %v4750_v41  ;;  %v3001_v8 = vpack.c.bf16 %v2934_v32, %v2934_v32 }
 0x51b   : > { %v3699_v17 = vunpack.c.l.bf16 %v3634_v39  ;;  %4789 = vmatmul.bf16.gmra.mxu0 %v4640_v19  ;;  %5396 = vmatmul.bf16.gmra.mxu1 %v5283_v50  ;;  %v4332_v23 = vunpack.c.l.bf16 %v4267_v61  ;;  %v12985_v39 = vld [vmem:[#allocation26_spill] sm:$0xff] }
 0x51c   : > { %v4966_v22 = vunpack.c.l.bf16 %v4901_v30  ;;  %v3066_v28 = vunpack.c.l.bf16 %v3001_v8 }
 0x51d   : > { %v3764_v36 = vadd.f32 %v11510_v35, %v3699_v17  ;;  %3580 = vmatmul.bf16.gmra.mxu2 %v3355_v7  ;;  %v4397_v58 = vadd.f32 %v11610_v15, %v4332_v23 }
 0x51e   : > { %v4145_v4 = vpop.f32.mrf.mxu3  ;;  %v5031_v31 = vadd.f32 %v11714_v27, %v4966_v22  ;;  %v3131_v46 = vadd.f32 %v11341_v20, %v3066_v28 }
 0x51f   : > { %v3956_v24 = vmax.f32 %v3764_v36, 0.0  ;;  %v4146_v49 = vadd.f32 %v4145_v4, %v12984_v12  ;;  %v4589_v47 = vmax.f32 %v4397_v58, 0.0 }
 0x520   : > { %v3541_v3 = vpop.f32.mrf.mxu2  ;;  %v4752_v59 = vpop.f32.mrf.mxu0  ;;  %v5223_v19 = vmax.f32 %v5031_v31, 0.0  ;;  %v3323_v61 = vmax.f32 %v3131_v46, 0.0 }
 0x521   : > { %v4268_v16 = vpack.c.bf16 %v4146_v49, %v4146_v49  ;;  %v4902_v33 = vpack.c.bf16 %v4752_v59, %v4752_v59  ;;  %v2936_v63 = vpop.f32.mrf.mxu1  ;;  %v3998_v9 = vpack.c.bf16 %v3956_v24, %v3955_v26  ;;  %v3635_v54 = vpack.c.bf16 %v3541_v3, %v3541_v3  ;;  %v12986_v3 = vld [vmem:[#allocation28_spill] sm:$0xff] }
 0x522   : > { %v3002_v48 = vpack.c.bf16 %v2936_v63, %v2936_v63 }
 0x523   : > { %v4333_v13 = vunpack.c.l.bf16 %v4268_v16  ;;  %v4967_v42 = vunpack.c.l.bf16 %v4902_v33  ;;  %4187 = vmatmul.bf16.gmra.mxu3 %v3998_v9  ;;  %v3700_v53 = vunpack.c.l.bf16 %v3635_v54  ;;  %v10187_v16 = vld [vmem:[%s12868_s2 + $0x1c0] sm:$0xff] }
 0x524   : > { %v3067_v60 = vunpack.c.l.bf16 %v3002_v48  ;;  %6037 = vmatpush.bf16.msra.mxu2 %v10187_v16 }
 0x525   : > { %v4398_v0 = vadd.f32 %v11610_v15, %v4333_v13  ;;  %v5032_v43 = vadd.f32 %v11714_v27, %v4967_v42  ;;  %v3765_v4 = vadd.f32 %v11510_v35, %v3700_v53 }
 0x526   : > { %v3132_v62 = vadd.f32 %v11341_v20, %v3067_v60  ;;  %v4148_v51 = vpop.f32.mrf.mxu3 }
 0x527   : > { %v4590_v6 = vmax.f32 %v4398_v0, 0.0  ;;  %v5224_v41 = vmax.f32 %v5032_v43, 0.0  ;;  %v4149_v32 = vadd.f32 %v4148_v51, %v12985_v39  ;;  %v3957_v22 = vmax.f32 %v3765_v4, 0.0 }
 0x528   : > { %v3324_v50 = vmax.f32 %v3132_v62, 0.0  ;;  %v3543_v7 = vpop.f32.mrf.mxu2  ;;  %v4755_v52 = vpop.f32.mrf.mxu0 }
 0x529   : > { %v3636_v17 = vpack.c.bf16 %v3543_v7, %v3543_v7  ;;  %v4641_v30 = vpack.c.bf16 %v4590_v6, %v4589_v47  ;;  %v4269_v8 = vpack.c.bf16 %v4149_v32, %v4149_v32  ;;  %v5284_v36 = vpack.c.bf16 %v5224_v41, %v5223_v19  ;;  %v12987_v41 = vld [vmem:[#allocation30_spill] sm:$0xff] }
 0x52a   : > { %v3356_v23 = vpack.c.bf16 %v3324_v50, %v3323_v61  ;;  %v4903_v20 = vpack.c.bf16 %v4755_v52, %v4755_v52 }
 0x52b   : > { %v3701_v26 = vunpack.c.l.bf16 %v3636_v17  ;;  %4794 = vmatmul.bf16.gmra.mxu0 %v4641_v30  ;;  %5401 = vmatmul.bf16.gmra.mxu1 %v5284_v36  ;;  %v4334_v12 = vunpack.c.l.bf16 %v4269_v8 }
 0x52c   : > { %v4968_v33 = vunpack.c.l.bf16 %v4903_v20 }
 0x52d   : > { %v3766_v24 = vadd.f32 %v11510_v35, %v3701_v26  ;;  %3585 = vmatmul.bf16.gmra.mxu2 %v3356_v23  ;;  %v4399_v54 = vadd.f32 %v11610_v15, %v4334_v12  ;;  %v12988_v12 = vld [vmem:[#allocation32_spill] sm:$0xff] }
 0x52e   : > { %v4150_v49 = vpop.f32.mrf.mxu3  ;;  %v5033_v60 = vadd.f32 %v11714_v27, %v4968_v33 }
 0x52f   : > { %v3958_v28 = vmax.f32 %v3766_v24, 0.0  ;;  %v4151_v59 = vadd.f32 %v4150_v49, %v12986_v3  ;;  %v4591_v47 = vmax.f32 %v4399_v54, 0.0 }
 0x530   : > { %v3546_v63 = vpop.f32.mrf.mxu2  ;;  %v4757_v9 = vpop.f32.mrf.mxu0  ;;  %v5225_v32 = vmax.f32 %v5033_v60, 0.0 }
 0x531   : > { %v4270_v58 = vpack.c.bf16 %v4151_v59, %v4151_v59  ;;  %v4904_v48 = vpack.c.bf16 %v4757_v9, %v4757_v9  ;;  %v3999_v13 = vpack.c.bf16 %v3958_v28, %v3957_v22  ;;  %v3637_v31 = vpack.c.bf16 %v3546_v63, %v3546_v63 }
 0x533   : > { %v4335_v42 = vunpack.c.l.bf16 %v4270_v58  ;;  %v4969_v46 = vunpack.c.l.bf16 %v4904_v48  ;;  %4192 = vmatmul.bf16.gmra.mxu3 %v3999_v13  ;;  %v3702_v6 = vunpack.c.l.bf16 %v3637_v31 }
 0x535   : > { %v4400_v0 = vadd.f32 %v11610_v15, %v4335_v42  ;;  %v5034_v43 = vadd.f32 %v11714_v27, %v4969_v46  ;;  %v3767_v30 = vadd.f32 %v11510_v35, %v3702_v6 }
 0x536   : > { %v4153_v62 = vpop.f32.mrf.mxu3 }
 0x537   : > { %v4592_v51 = vmax.f32 %v4400_v0, 0.0  ;;  %v5226_v53 = vmax.f32 %v5034_v43, 0.0  ;;  %v4154_v39 = vadd.f32 %v4153_v62, %v12987_v41  ;;  %v3959_v20 = vmax.f32 %v3767_v30, 0.0 }
 0x538   : > { %v3548_v19 = vpop.f32.mrf.mxu2  ;;  %v4760_v61 = vpop.f32.mrf.mxu0 }
 0x539   : > { %v3638_v50 = vpack.c.bf16 %v3548_v19, %v3548_v19  ;;  %v4642_v7 = vpack.c.bf16 %v4592_v51, %v4591_v47  ;;  %v4271_v52 = vpack.c.bf16 %v4154_v39, %v4154_v39  ;;  %v5285_v17 = vpack.c.bf16 %v5226_v53, %v5225_v32  ;;  %v12989_v47 = vld [vmem:[#allocation34_spill] sm:$0xff]  ;;  %v10197_v51 = vld [vmem:[%s12868_s2 + $0x210] sm:$0xff] }
 0x53a   : > { %v4905_v36 = vpack.c.bf16 %v4760_v61, %v4760_v61  ;;  %6690 = vmatpush.bf16.msra.mxu3 %v10197_v51 }
 0x53b   : > { %v3703_v8 = vunpack.c.l.bf16 %v3638_v50  ;;  %4799 = vmatmul.bf16.gmra.mxu0 %v4642_v7  ;;  %5406 = vmatmul.bf16.gmra.mxu1 %v5285_v17  ;;  %v4336_v4 = vunpack.c.l.bf16 %v4271_v52 }
 0x53c   : > { %v4970_v22 = vunpack.c.l.bf16 %v4905_v36 }
 0x53d   : > { %v3768_v23 = vadd.f32 %v11510_v35, %v3703_v8  ;;  %v4401_v63 = vadd.f32 %v11610_v15, %v4336_v4  ;;  %v12990_v4 = vld [vmem:[#allocation36_spill] sm:$0xff] }
 0x53e   : > { %v4155_v26 = vpop.f32.mrf.mxu3  ;;  %v5035_v13 = vadd.f32 %v11714_v27, %v4970_v22 }
 0x53f   : > { %v3960_v24 = vmax.f32 %v3768_v23, 0.0  ;;  %v4156_v49 = vadd.f32 %v4155_v26, %v12988_v12  ;;  %v4593_v31 = vmax.f32 %v4401_v63, 0.0 }
 0x540   : > { %v3551_v28 = vpop.f32.mrf.mxu2  ;;  %v4762_v3 = vpop.f32.mrf.mxu0  ;;  %v5227_v6 = vmax.f32 %v5035_v13, 0.0 }
 0x541   : > { %v4272_v59 = vpack.c.bf16 %v4156_v49, %v4156_v49  ;;  %v4906_v16 = vpack.c.bf16 %v4762_v3, %v4762_v3  ;;  %v4000_v33 = vpack.c.bf16 %v3960_v24, %v3959_v20  ;;  %v3639_v58 = vpack.c.bf16 %v3551_v28, %v3551_v28  ;;  %v10208_v20 = vld [vmem:[%s12868_s2 + $0x268] sm:$0xff] }
 0x542   : > { %7566 = vmatpush.bf16.msrb.mxu0 %v10208_v20 }
 0x543   : > { %v4337_v9 = vunpack.c.l.bf16 %v4272_v59  ;;  %v4971_v48 = vunpack.c.l.bf16 %v4906_v16  ;;  %4197 = vmatmul.bf16.gmra.mxu3 %v4000_v33  ;;  %v3704_v0 = vunpack.c.l.bf16 %v3639_v58 }
 0x545   : > { %v4402_v54 = vadd.f32 %v11610_v15, %v4337_v9  ;;  %v5036_v42 = vadd.f32 %v11714_v27, %v4971_v48  ;;  %v3769_v50 = vadd.f32 %v11510_v35, %v3704_v0 }
 0x546   : > { %v4158_v46 = vpop.f32.mrf.mxu3 }
 0x547   : > { %v4594_v60 = vmax.f32 %v4402_v54, 0.0  ;;  %v5228_v43 = vmax.f32 %v5036_v42, 0.0  ;;  %v4159_v62 = vadd.f32 %v4158_v46, %v12989_v47  ;;  %v3961_v36 = vmax.f32 %v3769_v50, 0.0 }
 0x548   : > { %v3553_v53 = vpop.f32.mrf.mxu2  ;;  %v4765_v41 = vpop.f32.mrf.mxu0 }
 0x549   : > { %v3640_v39 = vpack.c.bf16 %v3553_v53, %v3553_v53  ;;  %v4643_v32 = vpack.c.bf16 %v4594_v60, %v4593_v31  ;;  %v4273_v19 = vpack.c.bf16 %v4159_v62, %v4159_v62  ;;  %v5286_v61 = vpack.c.bf16 %v5228_v43, %v5227_v6  ;;  %v12991_v60 = vld [vmem:[#allocation38_spill] sm:$0xff] }
 0x54a   : > { %v4907_v52 = vpack.c.bf16 %v4765_v41, %v4765_v41 }
 0x54b   : > { %v3705_v7 = vunpack.c.l.bf16 %v3640_v39  ;;  %4804 = vmatmul.bf16.gmra.mxu0 %v4643_v32  ;;  %5411 = vmatmul.bf16.gmra.mxu1 %v5286_v61  ;;  %v4338_v30 = vunpack.c.l.bf16 %v4273_v19 }
 0x54c   : > { %v4972_v24 = vunpack.c.l.bf16 %v4907_v52 }
 0x54d   : > { %v3770_v17 = vadd.f32 %v11510_v35, %v3705_v7  ;;  %v4403_v59 = vadd.f32 %v11610_v15, %v4338_v30  ;;  %v12992_v30 = vld [vmem:[#allocation40_spill] sm:$0xff] }
 0x54e   : > { %v4160_v8 = vpop.f32.mrf.mxu3  ;;  %v5037_v9 = vadd.f32 %v11714_v27, %v4972_v24 }
 0x54f   : > { %v3962_v23 = vmax.f32 %v3770_v17, 0.0  ;;  %v4161_v26 = vadd.f32 %v4160_v8, %v12990_v4  ;;  %v4595_v13 = vmax.f32 %v4403_v59, 0.0 }
 0x550   : > { %v3556_v12 = vpop.f32.mrf.mxu2  ;;  %v4767_v49 = vpop.f32.mrf.mxu0  ;;  %v5229_v43 = vmax.f32 %v5037_v9, 0.0 }
 0x551   : > { %v4274_v22 = vpack.c.bf16 %v4161_v26, %v4161_v26  ;;  %v4908_v28 = vpack.c.bf16 %v4767_v49, %v4767_v49  ;;  %v4001_v3 = vpack.c.bf16 %v3962_v23, %v3961_v36  ;;  %v3641_v33 = vpack.c.bf16 %v3556_v12, %v3556_v12  ;;  %v10218_v26 = vld [vmem:[%s12868_s2 + $0x2b8] sm:$0xff] }
 0x552   : > { %8024 = vmatpush.bf16.msrb.mxu1 %v10218_v26 }
 0x553   : > { %v4339_v16 = vunpack.c.l.bf16 %v4274_v22  ;;  %v4973_v63 = vunpack.c.l.bf16 %v4908_v28  ;;  %4202 = vmatmul.bf16.gmra.mxu3 %v4001_v3  ;;  %v3706_v31 = vunpack.c.l.bf16 %v3641_v33 }
 0x555   : > { %v4404_v58 = vadd.f32 %v11610_v15, %v4339_v16  ;;  %v5038_v48 = vadd.f32 %v11714_v27, %v4973_v63  ;;  %v3771_v39 = vadd.f32 %v11510_v35, %v3706_v31 }
 0x556   : > { %v4163_v54 = vpop.f32.mrf.mxu3 }
 0x557   : > { %v4596_v42 = vmax.f32 %v4404_v58, 0.0  ;;  %v5230_v46 = vmax.f32 %v5038_v48, 0.0  ;;  %v4164_v0 = vadd.f32 %v4163_v54, %v12991_v60  ;;  %v3963_v52 = vmax.f32 %v3771_v39, 0.0  ;;  %v12993_v54 = vld [vmem:[#allocation42_spill] sm:$0xff] }
 0x558   : > { %v3558_v47 = vpop.f32.mrf.mxu2  ;;  %v4770_v62 = vpop.f32.mrf.mxu0 }
 0x559   : > { %v3642_v51 = vpack.c.bf16 %v3558_v47, %v3558_v47  ;;  %v4644_v6 = vpack.c.bf16 %v4596_v42, %v4595_v13  ;;  %v4275_v53 = vpack.c.bf16 %v4164_v0, %v4164_v0  ;;  %v5287_v41 = vpack.c.bf16 %v5230_v46, %v5229_v43 }
 0x55a   : > { %v4909_v19 = vpack.c.bf16 %v4770_v62, %v4770_v62 }
 0x55b   : > { %v3707_v32 = vunpack.c.l.bf16 %v3642_v51  ;;  %4809 = vmatmul.bf16.gmra.mxu0 %v4644_v6  ;;  %5416 = vmatmul.bf16.gmra.mxu1 %v5287_v41  ;;  %v4340_v50 = vunpack.c.l.bf16 %v4275_v53 }
 0x55c   : > { %v4974_v36 = vunpack.c.l.bf16 %v4909_v19 }
 0x55d   : > { %v3772_v61 = vadd.f32 %v11510_v35, %v3707_v32  ;;  %v4405_v49 = vadd.f32 %v11610_v15, %v4340_v50 }
 0x55e   : > { %v4165_v7 = vpop.f32.mrf.mxu3  ;;  %v5039_v59 = vadd.f32 %v11714_v27, %v4974_v36 }
 0x55f   : > { %v3964_v17 = vmax.f32 %v3772_v61, 0.0  ;;  %v4166_v8 = vadd.f32 %v4165_v7, %v12992_v30  ;;  %v4597_v63 = vmax.f32 %v4405_v49, 0.0 }
 0x560   : > { %v3561_v23 = vpop.f32.mrf.mxu2  ;;  %v4772_v4 = vpop.f32.mrf.mxu0  ;;  %v5231_v31 = vmax.f32 %v5039_v59, 0.0 }
 0x561   : > { %v4276_v20 = vpack.c.bf16 %v4166_v8, %v4166_v8  ;;  %v4910_v24 = vpack.c.bf16 %v4772_v4, %v4772_v4  ;;  %v4002_v12 = vpack.c.bf16 %v3964_v17, %v3963_v52  ;;  %v3643_v28 = vpack.c.bf16 %v3561_v23, %v3561_v23 }
 0x563   : > { %v4341_v22 = vunpack.c.l.bf16 %v4276_v20  ;;  %v4975_v3 = vunpack.c.l.bf16 %v4910_v24  ;;  %4207 = vmatmul.bf16.gmra.mxu3 %v4002_v12  ;;  %v3708_v48 = vunpack.c.l.bf16 %v3643_v28 }
 0x565   : > { %v4406_v16 = vadd.f32 %v11610_v15, %v4341_v22  ;;  %v5040_v33 = vadd.f32 %v11714_v27, %v4975_v3  ;;  %v3773_v51 = vadd.f32 %v11510_v35, %v3708_v48 }
 0x566   : > { %v4168_v9 = vpop.f32.mrf.mxu3 }
 0x567   : > { %v4598_v58 = vmax.f32 %v4406_v16, 0.0  ;;  %v5232_v13 = vmax.f32 %v5040_v33, 0.0  ;;  %v4169_v42 = vadd.f32 %v4168_v9, %v12993_v54  ;;  %v3965_v19 = vmax.f32 %v3773_v51, 0.0  ;;  %v12994_v16 = vld [vmem:[#allocation45_spill] sm:$0xff] }
 0x568   : > { %v3563_v46 = vpop.f32.mrf.mxu2  ;;  %v4775_v60 = vpop.f32.mrf.mxu0 }
 0x569   : > { %v3644_v0 = vpack.c.bf16 %v3563_v46, %v3563_v46  ;;  %v4645_v43 = vpack.c.bf16 %v4598_v58, %v4597_v63  ;;  %v4277_v47 = vpack.c.bf16 %v4169_v42, %v4169_v42  ;;  %v5288_v62 = vpack.c.bf16 %v5232_v13, %v5231_v31 }
 0x56a   : > { %v4911_v53 = vpack.c.bf16 %v4775_v60, %v4775_v60  ;;  %v5611_v46 = vperm.slane %v10679_v10, 3 }
 0x56b   : > { %v3709_v6 = vunpack.c.l.bf16 %v3644_v0  ;;  %4814 = vmatmul.bf16.gmra.mxu0 %v4645_v43  ;;  %5421 = vmatmul.bf16.gmra.mxu1 %v5288_v62  ;;  %v4342_v39 = vunpack.c.l.bf16 %v4277_v47 }
 0x56c   : > { %v4976_v7 = vunpack.c.l.bf16 %v4911_v53  ;;  %v11818_v53 = vunpack.c.l.bf16 %v5611_v46 }
 0x56d   : > { %v3774_v41 = vadd.f32 %v11510_v35, %v3709_v6  ;;  %v4407_v23 = vadd.f32 %v11610_v15, %v4342_v39 }
 0x56e   : > { %v4170_v32 = vpop.f32.mrf.mxu3  ;;  %v5041_v24 = vadd.f32 %v11714_v27, %v4976_v7 }
 0x56f   : > { %v3966_v61 = vmax.f32 %v3774_v41, 0.0  ;;  %v4171_v50 = vadd.f32 %v4170_v32, %v11042_v25  ;;  %v4599_v22 = vmax.f32 %v4407_v23, 0.0 }
 0x570   : > { %v3566_v52 = vpop.f32.mrf.mxu2  ;;  %v4777_v17 = vpop.f32.mrf.mxu0  ;;  %v5233_v63 = vmax.f32 %v5041_v24, 0.0 }
 0x571   : > { %v4278_v30 = vpack.c.bf16 %v4171_v50, %v4171_v50  ;;  %v4912_v8 = vpack.c.bf16 %v4777_v17, %v4777_v17  ;;  %v4003_v36 = vpack.c.bf16 %v3966_v61, %v3965_v19  ;;  %v3645_v26 = vpack.c.bf16 %v3566_v52, %v3566_v52  ;;  %v12995_v19 = vld [vmem:[#allocation47_spill] sm:$0xff] }
 0x573   : > { %v4343_v4 = vunpack.c.l.bf16 %v4278_v30  ;;  %v4977_v20 = vunpack.c.l.bf16 %v4912_v8  ;;  %4212 = vmatmul.bf16.gmra.mxu3 %v4003_v36  ;;  %v3710_v3 = vunpack.c.l.bf16 %v3645_v26 }
 0x575   : > { %v4408_v12 = vadd.f32 %v11610_v15, %v4343_v4  ;;  %v5042_v49 = vadd.f32 %v11714_v27, %v4977_v20  ;;  %v3775_v0 = vadd.f32 %v11510_v35, %v3710_v3 }
 0x576   : > { %v4173_v25 = vpop.f32.mrf.mxu3 }
 0x577   : > { %v4600_v28 = vmax.f32 %v4408_v12, 0.0  ;;  %v5234_v59 = vmax.f32 %v5042_v49, 0.0  ;;  %v4174_v33 = vadd.f32 %v4173_v25, %v12994_v16  ;;  %v3967_v39 = vmax.f32 %v3775_v0, 0.0 }
 0x578   : > { %v3568_v9 = vpop.f32.mrf.mxu2  ;;  %v5387_v58 = vpop.f32.mrf.mxu1 }
 0x579   : > { %v3646_v48 = vpack.c.bf16 %v3568_v9, %v3568_v9  ;;  %v4780_v13 = vpop.f32.mrf.mxu0  ;;  %v4646_v54 = vpack.c.bf16 %v4600_v28, %v4599_v22  ;;  %v4279_v42 = vpack.c.bf16 %v4174_v33, %v4174_v33  ;;  %v5547_v31 = vpack.c.bf16 %v5387_v58, %v5387_v58  ;;  %v12996_v58 = vld [vmem:[#allocation49_spill] sm:$0xff] }
 0x57a   : > { %v5289_v60 = vpack.c.bf16 %v5234_v59, %v5233_v63  ;;  %v4913_v47 = vpack.c.bf16 %v4780_v13, %v4780_v13 }
 0x57b   : > { %v3711_v43 = vunpack.c.l.bf16 %v3646_v48  ;;  %4819 = vmatmul.bf16.gmra.mxu0 %v4646_v54  ;;  %v4344_v51 = vunpack.c.l.bf16 %v4279_v42  ;;  %v5612_v6 = vunpack.c.l.bf16 %v5547_v31  ;;  %v10196_v31 = vld [vmem:[%s12868_s2 + $0x208] sm:$0xff] }
 0x57c   : > { %5426 = vmatmul.bf16.gmra.mxu1 %v5289_v60  ;;  %v4978_v50 = vunpack.c.l.bf16 %v4913_v47  ;;  %6691 = vmatpush.bf16.msra.mxu3 %v10196_v31 }
 0x57d   : > { %v3776_v62 = vadd.f32 %v11510_v35, %v3711_v43  ;;  %v4409_v36 = vadd.f32 %v11610_v15, %v4344_v51  ;;  %v5677_v23 = vadd.f32 %v11818_v53, %v5612_v6 }
 0x57e   : > { %v4175_v41 = vpop.f32.mrf.mxu3  ;;  %v5043_v12 = vadd.f32 %v11714_v27, %v4978_v50 }
 0x57f   : > { %v3968_v32 = vmax.f32 %v3776_v62, 0.0  ;;  %v4176_v61 = vadd.f32 %v4175_v41, %v12995_v19  ;;  %v4601_v28 = vmax.f32 %v4409_v36, 0.0  ;;  %v5869_v3 = vmax.f32 %v5677_v23, 0.0  ;;  %v10207_v23 = vld [vmem:[%s12868_s2 + $0x260] sm:$0xff] }
 0x580   : > { %v3571_v10 = vpop.f32.mrf.mxu2  ;;  %v5389_v7 = vpop.f32.mrf.mxu1  ;;  %v5235_v13 = vmax.f32 %v5043_v12, 0.0  ;;  %7567 = vmatpush.bf16.msrb.mxu0 %v10207_v23 }
 0x581   : > { %v4280_v52 = vpack.c.bf16 %v4176_v61, %v4176_v61  ;;  %v4782_v17 = vpop.f32.mrf.mxu0  ;;  %v5548_v30 = vpack.c.bf16 %v5389_v7, %v5389_v7  ;;  %v4004_v8 = vpack.c.bf16 %v3968_v32, %v3967_v39  ;;  %v3647_v20 = vpack.c.bf16 %v3571_v10, %v3571_v10 }
 0x582   : > { %v4914_v4 = vpack.c.bf16 %v4782_v17, %v4782_v17 }
 0x583   : > { %v4345_v26 = vunpack.c.l.bf16 %v4280_v52  ;;  %v5613_v24 = vunpack.c.l.bf16 %v5548_v30  ;;  %4217 = vmatmul.bf16.gmra.mxu3 %v4004_v8  ;;  %v3712_v63 = vunpack.c.l.bf16 %v3647_v20  ;;  %v12997_v52 = vld [vmem:[#allocation51_spill] sm:$0xff] }
 0x584   : > { %v4979_v49 = vunpack.c.l.bf16 %v4914_v4 }
 0x585   : > { %v4410_v22 = vadd.f32 %v11610_v15, %v4345_v26  ;;  %v5678_v25 = vadd.f32 %v11818_v53, %v5613_v24  ;;  %v3777_v51 = vadd.f32 %v11510_v35, %v3712_v63 }
 0x586   : > { %v5044_v59 = vadd.f32 %v11714_v27, %v4979_v49  ;;  %v4178_v16 = vpop.f32.mrf.mxu3 }
 0x587   : > { %v4602_v33 = vmax.f32 %v4410_v22, 0.0  ;;  %v5870_v9 = vmax.f32 %v5678_v25, 0.0  ;;  %v4179_v48 = vadd.f32 %v4178_v16, %v12996_v58  ;;  %v3969_v50 = vmax.f32 %v3777_v51, 0.0 }
 0x588   : > { %v5236_v54 = vmax.f32 %v5044_v59, 0.0  ;;  %v3573_v42 = vpop.f32.mrf.mxu2  ;;  %v5392_v43 = vpop.f32.mrf.mxu1 }
 0x589   : > { %v5933_v46 = vpack.c.bf16 %v5870_v9, %v5869_v3  ;;  %v3648_v60 = vpack.c.bf16 %v3573_v42, %v3573_v42  ;;  %v4785_v0 = vpop.f32.mrf.mxu0  ;;  %v4647_v47 = vpack.c.bf16 %v4602_v33, %v4601_v28  ;;  %v4281_v6 = vpack.c.bf16 %v4179_v48, %v4179_v48 }
 0x58a   : > { %v5290_v62 = vpack.c.bf16 %v5236_v54, %v5235_v13  ;;  %v4915_v39 = vpack.c.bf16 %v4785_v0, %v4785_v0  ;;  %v5549_v32 = vpack.c.bf16 %v5392_v43, %v5392_v43 }
 0x58b   : > { %v3713_v41 = vunpack.c.l.bf16 %v3648_v60  ;;  %6038 = vmatmul.bf16.vlgmr.msra.gmra.mxu2 %v5933_v46  ;;  %4824 = vmatmul.bf16.gmra.mxu0 %v4647_v47  ;;  %v4346_v10 = vunpack.c.l.bf16 %v4281_v6 }
 0x58c   : > { %5431 = vmatmul.bf16.gmra.mxu1 %v5290_v62  ;;  %v4980_v30 = vunpack.c.l.bf16 %v4915_v39  ;;  %v5614_v8 = vunpack.c.l.bf16 %v5549_v32 }
 0x58d   : > { %v3778_v19 = vadd.f32 %v11510_v35, %v3713_v41  ;;  %v4411_v22 = vadd.f32 %v11610_v15, %v4346_v10 }
 0x58e   : > { %v4180_v61 = vpop.f32.mrf.mxu3  ;;  %v5045_v3 = vadd.f32 %v11714_v27, %v4980_v30  ;;  %v5679_v59 = vadd.f32 %v11818_v53, %v5614_v8 }
 0x58f   : > { %v3970_v7 = vmax.f32 %v3778_v19, 0.0  ;;  %v4181_v17 = vadd.f32 %v4180_v61, %v12997_v52  ;;  %v4603_v13 = vmax.f32 %v4411_v22, 0.0 }
 0x590   : > { %v3576_v36 = vpop.f32.mrf.mxu2  ;;  %v5394_v20 = vpop.f32.mrf.mxu1  ;;  %v5237_v46 = vmax.f32 %v5045_v3, 0.0  ;;  %v5871_v60 = vmax.f32 %v5679_v59, 0.0 }
 0x591   : > { %v4282_v4 = vpack.c.bf16 %v4181_v17, %v4181_v17  ;;  %v4787_v26 = vpop.f32.mrf.mxu0  ;;  %v4005_v24 = vpack.c.bf16 %v3970_v7, %v3969_v50  ;;  %v5550_v49 = vpack.c.bf16 %v5394_v20, %v5394_v20  ;;  %v3649_v28 = vpack.c.bf16 %v3576_v36, %v3576_v36  ;;  %v10217_v20 = vld [vmem:[%s12868_s2 + $0x2b0] sm:$0xff] }
 0x592   : > { %v4916_v12 = vpack.c.bf16 %v4787_v26, %v4787_v26  ;;  %8025 = vmatpush.bf16.msrb.mxu1 %v10217_v20 }
 0x593   : > { %v4347_v25 = vunpack.c.l.bf16 %v4282_v4  ;;  %4222 = vmatmul.bf16.gmra.mxu3 %v4005_v24  ;;  %v5615_v33 = vunpack.c.l.bf16 %v5550_v49  ;;  %v3714_v42 = vunpack.c.l.bf16 %v3649_v28 }
 0x594   : > { %v4981_v16 = vunpack.c.l.bf16 %v4916_v12 }
 0x595   : > { %v4412_v63 = vadd.f32 %v11610_v15, %v4347_v25  ;;  %v5680_v58 = vadd.f32 %v11818_v53, %v5615_v33  ;;  %v3779_v19 = vadd.f32 %v11510_v35, %v3714_v42 }
 0x596   : > { %v5046_v9 = vadd.f32 %v11714_v27, %v4981_v16  ;;  %v4183_v48 = vpop.f32.mrf.mxu3 }
 0x597   : > { %v4604_v54 = vmax.f32 %v4412_v63, 0.0  ;;  %v4184_v31 = vadd.f32 %v4183_v48, %v11095_v45  ;;  %v5872_v43 = vmax.f32 %v5680_v58, 0.0  ;;  %v3971_v17 = vmax.f32 %v3779_v19, 0.0 }
 0x598   : > { %v5238_v0 = vmax.f32 %v5046_v9, 0.0  ;;  %v3578_v47 = vpop.f32.mrf.mxu2  ;;  %v5397_v6 = vpop.f32.mrf.mxu1 }
 0x599   : > { %v3650_v62 = vpack.c.bf16 %v3578_v47, %v3578_v47  ;;  %v4790_v51 = vpop.f32.mrf.mxu0  ;;  %v4648_v41 = vpack.c.bf16 %v4604_v54, %v4603_v13  ;;  %v5934_v32 = vpack.c.bf16 %v5872_v43, %v5871_v60  ;;  %v4283_v61 = vpack.c.bf16 %v4184_v31, %v4184_v31 }
 0x59a   : > { %v5291_v39 = vpack.c.bf16 %v5238_v0, %v5237_v46  ;;  %v4917_v10 = vpack.c.bf16 %v4790_v51, %v4790_v51  ;;  %v5551_v7 = vpack.c.bf16 %v5397_v6, %v5397_v6 }
 0x59b   : > { %v3715_v50 = vunpack.c.l.bf16 %v3650_v62  ;;  %4829 = vmatmul.bf16.gmra.mxu0 %v4648_v41  ;;  %6043 = vmatmul.bf16.gmra.mxu2 %v5934_v32  ;;  %v4348_v30 = vunpack.c.l.bf16 %v4283_v61 }
 0x59c   : > { %5436 = vmatmul.bf16.gmra.mxu1 %v5291_v39  ;;  %v4982_v23 = vunpack.c.l.bf16 %v4917_v10  ;;  %v5616_v4 = vunpack.c.l.bf16 %v5551_v7 }
 0x59d   : > { %v3780_v45 = vadd.f32 %v11510_v35, %v3715_v50  ;;  %v4413_v3 = vadd.f32 %v11610_v15, %v4348_v30 }
 0x59e   : > { %v4185_v52 = vpop.f32.mrf.mxu3  ;;  %v5681_v33 = vadd.f32 %v11818_v53, %v5616_v4 }
 0x59f   : > { %v3972_v8 = vmax.f32 %v3780_v45, 0.0  ;;  %v4186_v36 = vadd.f32 %v4185_v52, %v11105_v57  ;;  %v5047_v57 = vadd.f32 %v11714_v27, %v4982_v23  ;;  %v4605_v42 = vmax.f32 %v4413_v3, 0.0 }
 0x5a0   : > { %v3581_v26 = vpop.f32.mrf.mxu2  ;;  %v5399_v49 = vpop.f32.mrf.mxu1  ;;  %v5873_v43 = vmax.f32 %v5681_v33, 0.0 }
 0x5a1   : > { %v4284_v24 = vpack.c.bf16 %v4186_v36, %v4186_v36  ;;  %v4792_v12 = vpop.f32.mrf.mxu0  ;;  %v4006_v22 = vpack.c.bf16 %v3972_v8, %v3971_v17  ;;  %v5552_v28 = vpack.c.bf16 %v5399_v49, %v5399_v49  ;;  %v3651_v16 = vpack.c.bf16 %v3581_v26, %v3581_v26 }
 0x5a2   : > { %v4918_v25 = vpack.c.bf16 %v4792_v12, %v4792_v12  ;;  %v5239_v0 = vmax.f32 %v5047_v57, 0.0 }
 0x5a3   : > { %v4349_v59 = vunpack.c.l.bf16 %v4284_v24  ;;  %4227 = vmatmul.bf16.gmra.mxu3 %v4006_v22  ;;  %v5617_v9 = vunpack.c.l.bf16 %v5552_v28  ;;  %v3716_v46 = vunpack.c.l.bf16 %v3651_v16 }
 0x5a4   : > { %v4983_v63 = vunpack.c.l.bf16 %v4918_v25 }
 0x5a5   : > { %v4414_v58 = vadd.f32 %v11610_v15, %v4349_v59  ;;  %v5682_v13 = vadd.f32 %v11818_v53, %v5617_v9  ;;  %v3781_v50 = vadd.f32 %v11510_v35, %v3716_v46  ;;  %v12998_v46 = vld [vmem:[#allocation57_spill] sm:$0xff] }
 0x5a6   : > { %v5048_v48 = vadd.f32 %v11714_v27, %v4983_v63  ;;  %v4188_v54 = vpop.f32.mrf.mxu3 }
 0x5a7   : > { %v4606_v31 = vmax.f32 %v4414_v58, 0.0  ;;  %v4189_v60 = vadd.f32 %v4188_v54, %v11120_v5  ;;  %v5874_v62 = vmax.f32 %v5682_v13, 0.0  ;;  %v3973_v30 = vmax.f32 %v3781_v50, 0.0 }
 0x5a8   : > { %v5240_v47 = vmax.f32 %v5048_v48, 0.0  ;;  %v3583_v51 = vpop.f32.mrf.mxu2  ;;  %v5402_v39 = vpop.f32.mrf.mxu1 }
 0x5a9   : > { %v3652_v6 = vpack.c.bf16 %v3583_v51, %v3583_v51  ;;  %v4795_v41 = vpop.f32.mrf.mxu0  ;;  %v4649_v32 = vpack.c.bf16 %v4606_v31, %v4605_v42  ;;  %v5935_v61 = vpack.c.bf16 %v5874_v62, %v5873_v43  ;;  %v4285_v10 = vpack.c.bf16 %v4189_v60, %v4189_v60 }
 0x5aa   : > { %v5292_v19 = vpack.c.bf16 %v5240_v47, %v5239_v0  ;;  %v4919_v45 = vpack.c.bf16 %v4795_v41, %v4795_v41  ;;  %v5553_v52 = vpack.c.bf16 %v5402_v39, %v5402_v39 }
 0x5ab   : > { %v3717_v7 = vunpack.c.l.bf16 %v3652_v6  ;;  %4834 = vmatmul.bf16.gmra.mxu0 %v4649_v32  ;;  %6048 = vmatmul.bf16.gmra.mxu2 %v5935_v61  ;;  %v4350_v8 = vunpack.c.l.bf16 %v4285_v10 }
 0x5ac   : > { %5441 = vmatmul.bf16.gmra.mxu1 %v5292_v19  ;;  %v4984_v4 = vunpack.c.l.bf16 %v4919_v45  ;;  %v5618_v26 = vunpack.c.l.bf16 %v5553_v52 }
 0x5ad   : > { %v3782_v5 = vadd.f32 %v11510_v35, %v3717_v7  ;;  %v4415_v3 = vadd.f32 %v11610_v15, %v4350_v8 }
 0x5ae   : > { %v4190_v17 = vpop.f32.mrf.mxu3  ;;  %v5049_v57 = vadd.f32 %v11714_v27, %v4984_v4  ;;  %v5683_v33 = vadd.f32 %v11818_v53, %v5618_v26 }
 0x5af   : > { %v3974_v36 = vmax.f32 %v3782_v5, 0.0  ;;  %v4191_v23 = vadd.f32 %v4190_v17, %v11130_v2  ;;  %v4607_v54 = vmax.f32 %v4415_v3, 0.0 }
 0x5b0   : > { %v3586_v20 = vpop.f32.mrf.mxu2  ;;  %v5404_v49 = vpop.f32.mrf.mxu1  ;;  %v5241_v0 = vmax.f32 %v5049_v57, 0.0  ;;  %v5875_v43 = vmax.f32 %v5683_v33, 0.0 }
 0x5b1   : > { %v4286_v24 = vpack.c.bf16 %v4191_v23, %v4191_v23  ;;  %v4797_v12 = vpop.f32.mrf.mxu0  ;;  %v4007_v22 = vpack.c.bf16 %v3974_v36, %v3973_v30  ;;  %v5554_v28 = vpack.c.bf16 %v5404_v49, %v5404_v49  ;;  %v3653_v16 = vpack.c.bf16 %v3586_v20, %v3586_v20 }
 0x5b2   : > { %v4920_v25 = vpack.c.bf16 %v4797_v12, %v4797_v12 }
 0x5b3   : > { %v4351_v59 = vunpack.c.l.bf16 %v4286_v24  ;;  %4232 = vmatmul.bf16.gmra.mxu3 %v4007_v22  ;;  %v5619_v2 = vunpack.c.l.bf16 %v5554_v28  ;;  %v3718_v31 = vunpack.c.l.bf16 %v3653_v16 }
 0x5b4   : > { %v4985_v63 = vunpack.c.l.bf16 %v4920_v25 }
 0x5b5   : > { %v4416_v9 = vadd.f32 %v11610_v15, %v4351_v59  ;;  %v5684_v48 = vadd.f32 %v11818_v53, %v5619_v2  ;;  %v3783_v50 = vadd.f32 %v11510_v35, %v3718_v31 }
 0x5b6   : > { %v5050_v58 = vadd.f32 %v11714_v27, %v4985_v63  ;;  %v4193_v13 = vpop.f32.mrf.mxu3 }
 0x5b7   : > { %v4608_v42 = vmax.f32 %v4416_v9, 0.0  ;;  %v4194_v60 = vadd.f32 %v4193_v13, %v12998_v46  ;;  %v5876_v62 = vmax.f32 %v5684_v48, 0.0  ;;  %v3975_v30 = vmax.f32 %v3783_v50, 0.0  ;;  %v10195_v46 = vld [vmem:[%s12868_s2 + $0x200] sm:$0xff]  ;;  %v10206_v50 = vld [vmem:[%s12868_s2 + $0x258] sm:$0xff] }
 0x5b8   : > { %v5242_v47 = vmax.f32 %v5050_v58, 0.0  ;;  %v3588_v51 = vpop.f32.mrf.mxu2  ;;  %v5407_v39 = vpop.f32.mrf.mxu1  ;;  %6692 = vmatpush.bf16.msra.mxu3 %v10195_v46  ;;  %7568 = vmatpush.bf16.msrb.mxu0 %v10206_v50 }
 0x5b9   : > { %v3654_v6 = vpack.c.bf16 %v3588_v51, %v3588_v51  ;;  %v4800_v41 = vpop.f32.mrf.mxu0  ;;  %v4650_v32 = vpack.c.bf16 %v4608_v42, %v4607_v54  ;;  %v5936_v61 = vpack.c.bf16 %v5876_v62, %v5875_v43  ;;  %v4287_v10 = vpack.c.bf16 %v4194_v60, %v4194_v60 }
 0x5ba   : > { %v5293_v19 = vpack.c.bf16 %v5242_v47, %v5241_v0  ;;  %v4921_v45 = vpack.c.bf16 %v4800_v41, %v4800_v41  ;;  %v5555_v52 = vpack.c.bf16 %v5407_v39, %v5407_v39 }
 0x5bb   : > { %v3719_v7 = vunpack.c.l.bf16 %v3654_v6  ;;  %4839 = vmatmul.bf16.gmra.mxu0 %v4650_v32  ;;  %6053 = vmatmul.bf16.gmra.mxu2 %v5936_v61  ;;  %v4352_v8 = vunpack.c.l.bf16 %v4287_v10 }
 0x5bc   : > { %5446 = vmatmul.bf16.gmra.mxu1 %v5293_v19  ;;  %v4986_v4 = vunpack.c.l.bf16 %v4921_v45  ;;  %v5620_v26 = vunpack.c.l.bf16 %v5555_v52 }
 0x5bd   : > { %v3784_v5 = vadd.f32 %v11510_v35, %v3719_v7  ;;  %v4417_v28 = vadd.f32 %v11610_v15, %v4352_v8 }
 0x5be   : > { %v4195_v17 = vpop.f32.mrf.mxu3  ;;  %v5051_v35 = vadd.f32 %v11714_v27, %v4986_v4  ;;  %v5685_v59 = vadd.f32 %v11818_v53, %v5620_v26 }
 0x5bf   : > { %v3976_v36 = vmax.f32 %v3784_v5, 0.0  ;;  %v4196_v23 = vadd.f32 %v4195_v17, %v11155_v37  ;;  %v4609_v9 = vmax.f32 %v4417_v28, 0.0 }
 0x5c0   : > { %v5409_v12 = vpop.f32.mrf.mxu1  ;;  %v5243_v13 = vmax.f32 %v5051_v35, 0.0  ;;  %v5877_v54 = vmax.f32 %v5685_v59, 0.0 }
 0x5c1   : > { %v4288_v20 = vpack.c.bf16 %v4196_v23, %v4196_v23  ;;  %v4802_v24 = vpop.f32.mrf.mxu0  ;;  %v4008_v49 = vpack.c.bf16 %v3976_v36, %v3975_v30  ;;  %v5556_v25 = vpack.c.bf16 %v5409_v12, %v5409_v12 }
 0x5c2   : > { %v4922_v22 = vpack.c.bf16 %v4802_v24, %v4802_v24 }
 0x5c3   : > { %v4353_v3 = vunpack.c.l.bf16 %v4288_v20  ;;  %4237 = vmatmul.bf16.gmra.mxu3 %v4008_v49  ;;  %v5621_v57 = vunpack.c.l.bf16 %v5556_v25 }
 0x5c4   : > { %v4987_v16 = vunpack.c.l.bf16 %v4922_v22 }
 0x5c5   : > { %v4418_v37 = vadd.f32 %v11610_v15, %v4353_v3  ;;  %v5686_v63 = vadd.f32 %v11818_v53, %v5621_v57 }
 0x5c6   : > { %v5052_v33 = vadd.f32 %v11714_v27, %v4987_v16  ;;  %v4198_v2 = vpop.f32.mrf.mxu3 }
 0x5c7   : > { %v4610_v58 = vmax.f32 %v4418_v37, 0.0  ;;  %v4199_v48 = vadd.f32 %v4198_v2, %v11167_v40  ;;  %v5878_v31 = vmax.f32 %v5686_v63, 0.0 }
 0x5c8   : > { %v5244_v42 = vmax.f32 %v5052_v33, 0.0  ;;  %v5412_v0 = vpop.f32.mrf.mxu1 }
 0x5c9   : > { %v4805_v60 = vpop.f32.mrf.mxu0  ;;  %v4651_v43 = vpack.c.bf16 %v4610_v58, %v4609_v9  ;;  %v5937_v62 = vpack.c.bf16 %v5878_v31, %v5877_v54  ;;  %v4289_v51 = vpack.c.bf16 %v4199_v48, %v4199_v48  ;;  %v5557_v41 = vpack.c.bf16 %v5412_v0, %v5412_v0 }
 0x5ca   : > { %v5294_v47 = vpack.c.bf16 %v5244_v42, %v5243_v13  ;;  %v4923_v6 = vpack.c.bf16 %v4805_v60, %v4805_v60  ;;  %v10216_v42 = vld [vmem:[%s12868_s2 + $0x2a8] sm:$0xff] }
 0x5cb   : > { %4844 = vmatmul.bf16.gmra.mxu0 %v4651_v43  ;;  %6058 = vmatmul.bf16.gmra.mxu2 %v5937_v62  ;;  %v4354_v39 = vunpack.c.l.bf16 %v4289_v51  ;;  %v5622_v61 = vunpack.c.l.bf16 %v5557_v41 }
 0x5cc   : > { %5451 = vmatmul.bf16.gmra.mxu1 %v5294_v47  ;;  %v4988_v19 = vunpack.c.l.bf16 %v4923_v6 }
 0x5cd   : > { %v4419_v17 = vadd.f32 %v11610_v15, %v4354_v39  ;;  %v5687_v36 = vadd.f32 %v11818_v53, %v5622_v61  ;;  %8026 = vmatpush.bf16.msrb.mxu1 %v10216_v42 }
 0x5ce   : > { %v4200_v40 = vpop.f32.mrf.mxu3  ;;  %v5053_v8 = vadd.f32 %v11714_v27, %v4988_v19 }
 0x5cf   : > { %v4201_v32 = vadd.f32 %v4200_v40, %v11177_v34  ;;  %v4611_v12 = vmax.f32 %v4419_v17, 0.0  ;;  %v5879_v28 = vmax.f32 %v5687_v36, 0.0 }
 0x5d0   : > { %v5414_v45 = vpop.f32.mrf.mxu1  ;;  %v5245_v25 = vmax.f32 %v5053_v8, 0.0 }
 0x5d1   : > { %v4290_v10 = vpack.c.bf16 %v4201_v32, %v4201_v32  ;;  %v4807_v7 = vpop.f32.mrf.mxu0  ;;  %v5558_v5 = vpack.c.bf16 %v5414_v45, %v5414_v45 }
 0x5d2   : > { %v4924_v52 = vpack.c.bf16 %v4807_v7, %v4807_v7 }
 0x5d3   : > { %v4355_v30 = vunpack.c.l.bf16 %v4290_v10  ;;  %v5623_v23 = vunpack.c.l.bf16 %v5558_v5 }
 0x5d4   : > { %v4989_v34 = vunpack.c.l.bf16 %v4924_v52 }
 0x5d5   : > { %v4420_v4 = vadd.f32 %v11610_v15, %v4355_v30  ;;  %v5688_v20 = vadd.f32 %v11818_v53, %v5623_v23 }
 0x5d6   : > { %v5054_v26 = vadd.f32 %v11714_v27, %v4989_v34  ;;  %v4203_v24 = vpop.f32.mrf.mxu3 }
 0x5d7   : > { %v4612_v49 = vmax.f32 %v4420_v4, 0.0  ;;  %v4204_v22 = vadd.f32 %v4203_v24, %v11185_v1  ;;  %v5880_v35 = vmax.f32 %v5688_v20, 0.0 }
 0x5d8   : > { %v5246_v3 = vmax.f32 %v5054_v26, 0.0  ;;  %v5417_v16 = vpop.f32.mrf.mxu1 }
 0x5d9   : > { %v4810_v59 = vpop.f32.mrf.mxu0  ;;  %v4652_v57 = vpack.c.bf16 %v4612_v49, %v4611_v12  ;;  %v5938_v33 = vpack.c.bf16 %v5880_v35, %v5879_v28  ;;  %v4291_v63 = vpack.c.bf16 %v4204_v22, %v4204_v22  ;;  %v5559_v9 = vpack.c.bf16 %v5417_v16, %v5417_v16 }
 0x5da   : > { %v5295_v37 = vpack.c.bf16 %v5246_v3, %v5245_v25  ;;  %v4925_v2 = vpack.c.bf16 %v4810_v59, %v4810_v59 }
 0x5db   : > { %4849 = vmatmul.bf16.gmra.mxu0 %v4652_v57  ;;  %6063 = vmatmul.bf16.gmra.mxu2 %v5938_v33  ;;  %v4356_v48 = vunpack.c.l.bf16 %v4291_v63  ;;  %v5624_v54 = vunpack.c.l.bf16 %v5559_v9 }
 0x5dc   : > { %5456 = vmatmul.bf16.gmra.mxu1 %v5295_v37  ;;  %v4990_v1 = vunpack.c.l.bf16 %v4925_v2 }
 0x5dd   : > { %v4421_v47 = vadd.f32 %v11610_v15, %v4356_v48  ;;  %v5689_v6 = vadd.f32 %v11818_v53, %v5624_v54  ;;  %v10226_v54 = vld [vmem:[%s12870_s4 + $0x38] sm:$0xff] }
 0x5de   : > { %v4205_v58 = vpop.f32.mrf.mxu3  ;;  %v5055_v51 = vadd.f32 %v11714_v27, %v4990_v1  ;;  %8967 = vmatpush.bf16.msrb.mxu2 %v10226_v54  ;;  %v10205_v54 = vld [vmem:[%s12868_s2 + $0x250] sm:$0xff] }
 0x5df   : > { %v4206_v13 = vadd.f32 %v4205_v58, %v11196_v11  ;;  %v4613_v61 = vmax.f32 %v4421_v47, 0.0  ;;  %v5881_v45 = vmax.f32 %v5689_v6, 0.0  ;;  %7569 = vmatpush.bf16.msrb.mxu0 %v10205_v54 }
 0x5e0   : > { %v5419_v60 = vpop.f32.mrf.mxu1  ;;  %v5247_v7 = vmax.f32 %v5055_v51, 0.0 }
 0x5e1   : > { %v4292_v31 = vpack.c.bf16 %v4206_v13, %v4206_v13  ;;  %v4812_v46 = vpop.f32.mrf.mxu0  ;;  %v5560_v43 = vpack.c.bf16 %v5419_v60, %v5419_v60 }
 0x5e2   : > { %v4926_v0 = vpack.c.bf16 %v4812_v46, %v4812_v46 }
 0x5e3   : > { %v4357_v62 = vunpack.c.l.bf16 %v4292_v31  ;;  %v5625_v41 = vunpack.c.l.bf16 %v5560_v43 }
 0x5e4   : > { %v4991_v11 = vunpack.c.l.bf16 %v4926_v0 }
 0x5e5   : > { %v4422_v40 = vadd.f32 %v11610_v15, %v4357_v62  ;;  %v5690_v32 = vadd.f32 %v11818_v53, %v5625_v41 }
 0x5e6   : > { %v5056_v39 = vadd.f32 %v11714_v27, %v4991_v11  ;;  %v4208_v19 = vpop.f32.mrf.mxu3 }
 0x5e7   : > { %v4614_v50 = vmax.f32 %v4422_v40, 0.0  ;;  %v4209_v10 = vadd.f32 %v4208_v19, %v11203_v18  ;;  %v5882_v5 = vmax.f32 %v5690_v32, 0.0 }
 0x5e8   : > { %v5248_v52 = vmax.f32 %v5056_v39, 0.0  ;;  %v5422_v30 = vpop.f32.mrf.mxu1 }
 0x5e9   : > { %v4815_v17 = vpop.f32.mrf.mxu0  ;;  %v4653_v8 = vpack.c.bf16 %v4614_v50, %v4613_v61  ;;  %v5939_v34 = vpack.c.bf16 %v5882_v5, %v5881_v45  ;;  %v4293_v23 = vpack.c.bf16 %v4209_v10, %v4209_v10  ;;  %v5561_v26 = vpack.c.bf16 %v5422_v30, %v5422_v30 }
 0x5ea   : > { %v5296_v36 = vpack.c.bf16 %v5248_v52, %v5247_v7  ;;  %v4927_v4 = vpack.c.bf16 %v4815_v17, %v4815_v17 }
 0x5eb   : > { %4854 = vmatmul.bf16.gmra.mxu0 %v4653_v8  ;;  %6068 = vmatmul.bf16.gmra.mxu2 %v5939_v34  ;;  %v4358_v24 = vunpack.c.l.bf16 %v4293_v23  ;;  %v5626_v49 = vunpack.c.l.bf16 %v5561_v26  ;;  %v351_v26 = vld [vmem:[%s12869_s3 + $0x8] sm:$0xf] }
 0x5ec   : > { %5461 = vmatmul.bf16.gmra.mxu1 %v5296_v36  ;;  %v4992_v18 = vunpack.c.l.bf16 %v4927_v4 }
 0x5ed   : > { %v4423_v59 = vadd.f32 %v11610_v15, %v4358_v24  ;;  %v5691_v37 = vadd.f32 %v11818_v53, %v5626_v49 }
 0x5ee   : > { %v4210_v20 = vpop.f32.mrf.mxu3  ;;  %v5057_v57 = vadd.f32 %v11714_v27, %v4992_v18 }
 0x5ef   : > { %v4211_v12 = vadd.f32 %v4210_v20, %v11218_v56  ;;  %v4615_v48 = vmax.f32 %v4423_v59, 0.0  ;;  %v5883_v31 = vmax.f32 %v5691_v37, 0.0 }
 0x5f0   : > { %v5424_v28 = vpop.f32.mrf.mxu1  ;;  %v5249_v42 = vmax.f32 %v5057_v57, 0.0 }
 0x5f1   : > { %v4294_v22 = vpack.c.bf16 %v4211_v12, %v4211_v12  ;;  %v4817_v25 = vpop.f32.mrf.mxu0  ;;  %v5562_v35 = vpack.c.bf16 %v5424_v28, %v5424_v28  ;;  %v11927_v28 = vld [vmem:[%s12870_s4 + $0x78] sm:$0xff] }
 0x5f2   : > { %v4928_v3 = vpack.c.bf16 %v4817_v25, %v4817_v25  ;;  %10236 = vmatpush.bf16.msrb.mxu3 %v11927_v28 }
 0x5f3   : > { %v4359_v16 = vunpack.c.l.bf16 %v4294_v22  ;;  %v5627_v63 = vunpack.c.l.bf16 %v5562_v35 }
 0x5f4   : > { %v4993_v33 = vunpack.c.l.bf16 %v4928_v3 }
 0x5f5   : > { %v4424_v2 = vadd.f32 %v11610_v15, %v4359_v16  ;;  %v5692_v9 = vadd.f32 %v11818_v53, %v5627_v63  ;;  %v11929_v16 = vpack.c.bf16 %v351_v26, %v351_v26 }
 0x5f6   : > { %v5058_v56 = vadd.f32 %v11714_v27, %v4993_v33  ;;  %v4213_v58 = vpop.f32.mrf.mxu3 }
 0x5f7   : > { %v4616_v13 = vmax.f32 %v4424_v2, 0.0  ;;  %v4214_v1 = vadd.f32 %v4213_v58, %v11223_v29  ;;  %v5884_v60 = vmax.f32 %v5692_v9, 0.0  ;;  %v11934_v2 = vpack.i.b16 %v11929_v16, %v11929_v16 }
 0x5f8   : > { %v5250_v46 = vmax.f32 %v5058_v56, 0.0 }
 0x5f9   : > { %v4820_v0 = vpop.f32.mrf.mxu0  ;;  %v5427_v43 = vpop.f32.mrf.mxu1  ;;  %v4654_v47 = vpack.c.bf16 %v4616_v13, %v4615_v48  ;;  %v5940_v51 = vpack.c.bf16 %v5884_v60, %v5883_v31  ;;  %v4295_v6 = vpack.c.bf16 %v4214_v1, %v4214_v1 }
 0x5fa   : > { %v5297_v62 = vpack.c.bf16 %v5250_v46, %v5249_v42  ;;  %v4929_v11 = vpack.c.bf16 %v4820_v0, %v4820_v0  ;;  %v5563_v41 = vpack.c.bf16 %v5427_v43, %v5427_v43  ;;  %v6266_v46 = vperm.slane %v11934_v2, 0 }
 0x5fb   : > { %4859 = vmatmul.bf16.gmra.mxu0 %v4654_v47  ;;  %6073 = vmatmul.bf16.gmra.mxu2 %v5940_v51  ;;  %v4360_v40 = vunpack.c.l.bf16 %v4295_v6 }
 0x5fc   : > { %5466 = vmatmul.bf16.gmra.mxu1 %v5297_v62  ;;  %v4994_v32 = vunpack.c.l.bf16 %v4929_v11  ;;  %v5628_v19 = vunpack.c.l.bf16 %v5563_v41 }
 0x5fd   : > { %v4425_v52 = vadd.f32 %v11610_v15, %v4360_v40 }
 0x5fe   : > { %v4215_v29 = vpop.f32.mrf.mxu3  ;;  %v5059_v17 = vadd.f32 %v11714_v27, %v4994_v32  ;;  %v5693_v30 = vadd.f32 %v11818_v53, %v5628_v19 }
 0x5ff   : > { %v4216_v39 = vadd.f32 %v4215_v29, %v11235_v44  ;;  %v4617_v20 = vmax.f32 %v4425_v52, 0.0 }
 0x600   : > { %v5251_v18 = vmax.f32 %v5059_v17, 0.0  ;;  %v5885_v49 = vmax.f32 %v5693_v30, 0.0 }
 0x601   : > { %v4296_v61 = vpack.c.bf16 %v4216_v39, %v4216_v39  ;;  %v4822_v50 = vpop.f32.mrf.mxu0  ;;  %v5429_v10 = vpop.f32.mrf.mxu1  ;;  %v11945_v39 = vunpack.c.l.bf16 %v6266_v46 }
 0x602   : > { %v4930_v7 = vpack.c.bf16 %v4822_v50, %v4822_v50  ;;  %v5564_v45 = vpack.c.bf16 %v5429_v10, %v5429_v10 }
 0x603   : > { %v4361_v5 = vunpack.c.l.bf16 %v4296_v61 }
 0x604   : > { %v4995_v8 = vunpack.c.l.bf16 %v4930_v7  ;;  %v5629_v36 = vunpack.c.l.bf16 %v5564_v45 }
 0x605   : > { %v4426_v34 = vadd.f32 %v11610_v15, %v4361_v5 }
 0x606   : > { %v5060_v44 = vadd.f32 %v11714_v27, %v4995_v8  ;;  %v5694_v23 = vadd.f32 %v11818_v53, %v5629_v36  ;;  %v4218_v4 = vpop.f32.mrf.mxu3 }
 0x607   : > { %v4618_v24 = vmax.f32 %v4426_v34, 0.0  ;;  %v4219_v12 = vadd.f32 %v4218_v4, %v11243_v55 }
 0x608   : > { %v5252_v22 = vmax.f32 %v5060_v44, 0.0  ;;  %v5886_v25 = vmax.f32 %v5694_v23, 0.0 }
 0x609   : > { %v4825_v3 = vpop.f32.mrf.mxu0  ;;  %v5432_v35 = vpop.f32.mrf.mxu1  ;;  %v4655_v59 = vpack.c.bf16 %v4618_v24, %v4617_v20  ;;  %v4297_v33 = vpack.c.bf16 %v4219_v12, %v4219_v12 }
 0x60a   : > { %v5298_v57 = vpack.c.bf16 %v5252_v22, %v5251_v18  ;;  %v5941_v37 = vpack.c.bf16 %v5886_v25, %v5885_v49  ;;  %v4931_v55 = vpack.c.bf16 %v4825_v3, %v4825_v3  ;;  %v5565_v63 = vpack.c.bf16 %v5432_v35, %v5432_v35 }
 0x60b   : > { %4864 = vmatmul.bf16.gmra.mxu0 %v4655_v59  ;;  %v4362_v58 = vunpack.c.l.bf16 %v4297_v33 }
 0x60c   : > { %5471 = vmatmul.bf16.gmra.mxu1 %v5298_v57  ;;  %6078 = vmatmul.bf16.gmra.mxu2 %v5941_v37  ;;  %v4996_v13 = vunpack.c.l.bf16 %v4931_v55  ;;  %v5630_v1 = vunpack.c.l.bf16 %v5565_v63  ;;  %v10215_v55 = vld [vmem:[%s12868_s2 + $0x2a0] sm:$0xff] }
 0x60d   : > { %v4427_v62 = vadd.f32 %v11610_v15, %v4362_v58  ;;  %8027 = vmatpush.bf16.msrb.mxu1 %v10215_v55 }
 0x60e   : > { %v4220_v56 = vpop.f32.mrf.mxu3  ;;  %v6039_v9 = vpop.f32.mrf.mxu2  ;;  %v5695_v6 = vadd.f32 %v11818_v53, %v5630_v1 }
 0x60f   : > { %v4221_v48 = vadd.f32 %v4220_v56, %v11253_v14  ;;  %v6199_v31 = vpack.c.bf16 %v6039_v9, %v6039_v9  ;;  %v5061_v14 = vadd.f32 %v11714_v27, %v4996_v13  ;;  %v4619_v10 = vmax.f32 %v4427_v62, 0.0 }
 0x610   : > { %v5887_v17 = vmax.f32 %v5695_v6, 0.0  ;;  %v12999_v6 = vld [vmem:[#allocation75_spill] sm:$0xff] }
 0x611   : > { %v4298_v42 = vpack.c.bf16 %v4221_v48, %v4221_v48  ;;  %v4827_v60 = vpop.f32.mrf.mxu0  ;;  %v5434_v0 = vpop.f32.mrf.mxu1  ;;  %v6267_v40 = vunpack.c.l.bf16 %v6199_v31  ;;  %v5253_v5 = vmax.f32 %v5061_v14, 0.0 }
 0x612   : > { %v4932_v43 = vpack.c.bf16 %v4827_v60, %v4827_v60  ;;  %v5566_v47 = vpack.c.bf16 %v5434_v0, %v5434_v0 }
 0x613   : > { %v4363_v51 = vunpack.c.l.bf16 %v4298_v42  ;;  %v6332_v36 = vadd.f32 %v11945_v39, %v6267_v40 }
 0x614   : > { %v4997_v11 = vunpack.c.l.bf16 %v4932_v43  ;;  %v5631_v41 = vunpack.c.l.bf16 %v5566_v47 }
 0x615   : > { %v4428_v29 = vadd.f32 %v11610_v15, %v4363_v51 }
 0x616   : > { %v5062_v32 = vadd.f32 %v11714_v27, %v4997_v11  ;;  %v5696_v19 = vadd.f32 %v11818_v53, %v5631_v41  ;;  %v4223_v61 = vpop.f32.mrf.mxu3  ;;  %v6041_v50 = vpop.f32.mrf.mxu2 }
 0x617   : > { %v4620_v7 = vmax.f32 %v4428_v29, 0.0  ;;  %v4224_v45 = vadd.f32 %v4223_v61, %v11261_v38  ;;  %v6200_v52 = vpack.c.bf16 %v6041_v50, %v6041_v50  ;;  %v6524_v38 = vmax.f32 %v6332_v36, 0.0 }
 0x618   : > { %v5254_v30 = vmax.f32 %v5062_v32, 0.0  ;;  %v5888_v8 = vmax.f32 %v5696_v19, 0.0 }
 0x619   : > { %v6268_v34 = vunpack.c.l.bf16 %v6200_v52  ;;  %v4830_v44 = vpop.f32.mrf.mxu0  ;;  %v5437_v23 = vpop.f32.mrf.mxu1  ;;  %v4656_v4 = vpack.c.bf16 %v4620_v7, %v4619_v10  ;;  %v4299_v24 = vpack.c.bf16 %v4224_v45, %v4224_v45 }
 0x61a   : > { %v5299_v26 = vpack.c.bf16 %v5254_v30, %v5253_v5  ;;  %v5942_v20 = vpack.c.bf16 %v5888_v8, %v5887_v17  ;;  %v4933_v18 = vpack.c.bf16 %v4830_v44, %v4830_v44  ;;  %v5567_v49 = vpack.c.bf16 %v5437_v23, %v5437_v23 }
 0x61b   : > { %v6333_v12 = vadd.f32 %v11945_v39, %v6268_v34  ;;  %4869 = vmatmul.bf16.gmra.mxu0 %v4656_v4  ;;  %v4364_v3 = vunpack.c.l.bf16 %v4299_v24 }
 0x61c   : > { %5476 = vmatmul.bf16.gmra.mxu1 %v5299_v26  ;;  %6083 = vmatmul.bf16.gmra.mxu2 %v5942_v20  ;;  %v4998_v57 = vunpack.c.l.bf16 %v4933_v18  ;;  %v5632_v37 = vunpack.c.l.bf16 %v5567_v49  ;;  %v13000_v20 = vld [vmem:[#allocation77_spill] sm:$0xff] }
 0x61d   : > { %v6525_v22 = vmax.f32 %v6333_v12, 0.0  ;;  %v4429_v13 = vadd.f32 %v11610_v15, %v4364_v3 }
 0x61e   : > { %v4225_v25 = vpop.f32.mrf.mxu3  ;;  %v6044_v33 = vpop.f32.mrf.mxu2  ;;  %v5697_v42 = vadd.f32 %v11818_v53, %v5632_v37 }
 0x61f   : > { %v6588_v35 = vpack.c.bf16 %v6525_v22, %v6524_v38  ;;  %v4226_v59 = vadd.f32 %v4225_v25, %v11275_v21  ;;  %v6201_v54 = vpack.c.bf16 %v6044_v33, %v6044_v33  ;;  %v5063_v21 = vadd.f32 %v11714_v27, %v4998_v57 }
 0x620   : > { %v4621_v62 = vmax.f32 %v4429_v13, 0.0  ;;  %v5889_v29 = vmax.f32 %v5697_v42, 0.0 }
 0x621   : > { %v4300_v63 = vpack.c.bf16 %v4226_v59, %v4226_v59  ;;  %v4832_v56 = vpop.f32.mrf.mxu0  ;;  %v5439_v9 = vpop.f32.mrf.mxu1  ;;  %6693 = vmatmul.bf16.vlgmr.msra.gmra.mxu3 %v6588_v35  ;;  %v6269_v14 = vunpack.c.l.bf16 %v6201_v54  ;;  %v5255_v41 = vmax.f32 %v5063_v21, 0.0 }
 0x622   : > { %v4934_v58 = vpack.c.bf16 %v4832_v56, %v4832_v56  ;;  %v5568_v48 = vpack.c.bf16 %v5439_v9, %v5439_v9 }
 0x623   : > { %v4365_v1 = vunpack.c.l.bf16 %v4300_v63  ;;  %v6334_v5 = vadd.f32 %v11945_v39, %v6269_v14 }
 0x624   : > { %v4999_v31 = vunpack.c.l.bf16 %v4934_v58  ;;  %v5633_v46 = vunpack.c.l.bf16 %v5568_v48 }
 0x625   : > { %v4430_v60 = vadd.f32 %v11610_v15, %v4365_v1  ;;  %v6526_v23 = vmax.f32 %v6334_v5, 0.0 }
 0x626   : > { %v5064_v0 = vadd.f32 %v11714_v27, %v4999_v31  ;;  %v5698_v43 = vadd.f32 %v11818_v53, %v5633_v46  ;;  %v4228_v47 = vpop.f32.mrf.mxu3  ;;  %v6046_v19 = vpop.f32.mrf.mxu2  ;;  %v13001_v31 = vld [vmem:[#allocation79_spill] sm:$0xff] }
 0x627   : > { %v4622_v51 = vmax.f32 %v4430_v60, 0.0  ;;  %v4229_v11 = vadd.f32 %v4228_v47, %v12999_v6  ;;  %v6202_v61 = vpack.c.bf16 %v6046_v19, %v6046_v19  ;;  %v10225_v60 = vld [vmem:[%s12870_s4 + $0x30] sm:$0xff] }
 0x628   : > { %v5256_v40 = vmax.f32 %v5064_v0, 0.0  ;;  %v5890_v32 = vmax.f32 %v5698_v43, 0.0  ;;  %8968 = vmatpush.bf16.msrb.mxu2 %v10225_v60 }
 0x629   : > { %v4835_v50 = vpop.f32.mrf.mxu0  ;;  %v5442_v10 = vpop.f32.mrf.mxu1  ;;  %v4657_v7 = vpack.c.bf16 %v4622_v51, %v4621_v62  ;;  %v4301_v17 = vpack.c.bf16 %v4229_v11, %v4229_v11  ;;  %v6270_v30 = vunpack.c.l.bf16 %v6202_v61 }
 0x62a   : > { %v5300_v45 = vpack.c.bf16 %v5256_v40, %v5255_v41  ;;  %v5943_v52 = vpack.c.bf16 %v5890_v32, %v5889_v29  ;;  %v4935_v8 = vpack.c.bf16 %v4835_v50, %v4835_v50  ;;  %v5569_v36 = vpack.c.bf16 %v5442_v10, %v5442_v10 }
 0x62b   : > { %4874 = vmatmul.bf16.gmra.mxu0 %v4657_v7  ;;  %v6335_v34 = vadd.f32 %v11945_v39, %v6270_v30  ;;  %v4366_v4 = vunpack.c.l.bf16 %v4301_v17  ;;  %v13002_v30 = vld [vmem:[#allocation81_spill] sm:$0xff] }
 0x62c   : > { %5481 = vmatmul.bf16.gmra.mxu1 %v5300_v45  ;;  %6088 = vmatmul.bf16.gmra.mxu2 %v5943_v52  ;;  %v5000_v12 = vunpack.c.l.bf16 %v4935_v8  ;;  %v5634_v18 = vunpack.c.l.bf16 %v5569_v36 }
 0x62d   : > { %v6527_v26 = vmax.f32 %v6335_v34, 0.0  ;;  %v4431_v57 = vadd.f32 %v11610_v15, %v4366_v4 }
 0x62e   : > { %v4230_v44 = vpop.f32.mrf.mxu3  ;;  %v6049_v49 = vpop.f32.mrf.mxu2  ;;  %v5065_v55 = vadd.f32 %v11714_v27, %v5000_v12  ;;  %v5699_v63 = vadd.f32 %v11818_v53, %v5634_v18 }
 0x62f   : > { %v4231_v24 = vadd.f32 %v4230_v44, %v13000_v20  ;;  %v6589_v3 = vpack.c.bf16 %v6527_v26, %v6526_v23  ;;  %v6203_v33 = vpack.c.bf16 %v6049_v49, %v6049_v49  ;;  %v4623_v54 = vmax.f32 %v4431_v57, 0.0 }
 0x630   : > { %v5257_v0 = vmax.f32 %v5065_v55, 0.0  ;;  %v5891_v43 = vmax.f32 %v5699_v63, 0.0 }
 0x631   : > { %v4302_v38 = vpack.c.bf16 %v4231_v24, %v4231_v24  ;;  %v4837_v22 = vpop.f32.mrf.mxu0  ;;  %v5444_v25 = vpop.f32.mrf.mxu1  ;;  %6698 = vmatmul.bf16.gmra.mxu3 %v6589_v3  ;;  %v6271_v42 = vunpack.c.l.bf16 %v6203_v33 }
 0x632   : > { %v4936_v35 = vpack.c.bf16 %v4837_v22, %v4837_v22  ;;  %v5570_v59 = vpack.c.bf16 %v5444_v25, %v5444_v25 }
 0x633   : > { %v4367_v37 = vunpack.c.l.bf16 %v4302_v38  ;;  %v6336_v32 = vadd.f32 %v11945_v39, %v6271_v42  ;;  %v11989_v42 = vld [vmem:[%s12870_s4 + $0x70] sm:$0xff] }
 0x634   : > { %v5001_v56 = vunpack.c.l.bf16 %v4936_v35  ;;  %v5635_v9 = vunpack.c.l.bf16 %v5570_v59  ;;  %10237 = vmatpush.bf16.msrb.mxu3 %v11989_v42 }
 0x635   : > { %v4432_v58 = vadd.f32 %v11610_v15, %v4367_v37  ;;  %v6528_v52 = vmax.f32 %v6336_v32, 0.0 }
 0x636   : > { %v5066_v48 = vadd.f32 %v11714_v27, %v5001_v56  ;;  %v5700_v13 = vadd.f32 %v11818_v53, %v5635_v9  ;;  %v4233_v1 = vpop.f32.mrf.mxu3  ;;  %v6051_v51 = vpop.f32.mrf.mxu2  ;;  %v13003_v9 = vld [vmem:[#allocation83_spill] sm:$0xff] }
 0x637   : > { %v4624_v21 = vmax.f32 %v4432_v58, 0.0  ;;  %v4234_v46 = vadd.f32 %v4233_v1, %v13001_v31  ;;  %v6204_v14 = vpack.c.bf16 %v6051_v51, %v6051_v51 }
 0x638   : > { %v5258_v47 = vmax.f32 %v5066_v48, 0.0  ;;  %v5892_v62 = vmax.f32 %v5700_v13, 0.0 }
 0x639   : > { %v4840_v6 = vpop.f32.mrf.mxu0  ;;  %v5447_v11 = vpop.f32.mrf.mxu1  ;;  %v4658_v41 = vpack.c.bf16 %v4624_v21, %v4623_v54  ;;  %v4303_v19 = vpack.c.bf16 %v4234_v46, %v4234_v46  ;;  %v6272_v61 = vunpack.c.l.bf16 %v6204_v14 }
 0x63a   : > { %v5301_v29 = vpack.c.bf16 %v5258_v47, %v5257_v0  ;;  %v5944_v40 = vpack.c.bf16 %v5892_v62, %v5891_v43  ;;  %v4937_v50 = vpack.c.bf16 %v4840_v6, %v4840_v6  ;;  %v5571_v10 = vpack.c.bf16 %v5447_v11, %v5447_v11 }
 0x63b   : > { %4879 = vmatmul.bf16.gmra.mxu0 %v4658_v41  ;;  %v6337_v7 = vadd.f32 %v11945_v39, %v6272_v61  ;;  %v4368_v5 = vunpack.c.l.bf16 %v4303_v19  ;;  %v13004_v61 = vld [vmem:[#allocation85_spill] sm:$0xff] }
 0x63c   : > { %5486 = vmatmul.bf16.gmra.mxu1 %v5301_v29  ;;  %6093 = vmatmul.bf16.gmra.mxu2 %v5944_v40  ;;  %v5002_v36 = vunpack.c.l.bf16 %v4937_v50  ;;  %v5636_v34 = vunpack.c.l.bf16 %v5571_v10 }
 0x63d   : > { %v6529_v17 = vmax.f32 %v6337_v7, 0.0  ;;  %v4433_v18 = vadd.f32 %v11610_v15, %v4368_v5 }
 0x63e   : > { %v4235_v45 = vpop.f32.mrf.mxu3  ;;  %v6054_v44 = vpop.f32.mrf.mxu2  ;;  %v5067_v22 = vadd.f32 %v11714_v27, %v5002_v36  ;;  %v5701_v25 = vadd.f32 %v11818_v53, %v5636_v34 }
 0x63f   : > { %v4236_v8 = vadd.f32 %v4235_v45, %v13002_v30  ;;  %v6590_v20 = vpack.c.bf16 %v6529_v17, %v6528_v52  ;;  %v6205_v38 = vpack.c.bf16 %v6054_v44, %v6054_v44  ;;  %v4625_v55 = vmax.f32 %v4433_v18, 0.0  ;;  %v10204_v52 = vld [vmem:[%s12868_s2 + $0x248] sm:$0xff] }
 0x640   : > { %v5259_v48 = vmax.f32 %v5067_v22, 0.0  ;;  %v5893_v13 = vmax.f32 %v5701_v25, 0.0  ;;  %7570 = vmatpush.bf16.msrb.mxu0 %v10204_v52 }
 0x641   : > { %v4304_v23 = vpack.c.bf16 %v4236_v8, %v4236_v8  ;;  %v4842_v4 = vpop.f32.mrf.mxu0  ;;  %v5449_v26 = vpop.f32.mrf.mxu1  ;;  %6703 = vmatmul.bf16.gmra.mxu3 %v6590_v20  ;;  %v6273_v56 = vunpack.c.l.bf16 %v6205_v38 }
 0x642   : > { %v4938_v24 = vpack.c.bf16 %v4842_v4, %v4842_v4  ;;  %v5572_v12 = vpack.c.bf16 %v5449_v26, %v5449_v26 }
 0x643   : > { %v4369_v49 = vunpack.c.l.bf16 %v4304_v23  ;;  %v6338_v62 = vadd.f32 %v11945_v39, %v6273_v56 }
 0x644   : > { %v5003_v3 = vunpack.c.l.bf16 %v4938_v24  ;;  %v5637_v35 = vunpack.c.l.bf16 %v5572_v12 }
 0x645   : > { %v4434_v59 = vadd.f32 %v11610_v15, %v4369_v49  ;;  %v6530_v40 = vmax.f32 %v6338_v62, 0.0 }
 0x646   : > { %v5068_v57 = vadd.f32 %v11714_v27, %v5003_v3  ;;  %v5702_v37 = vadd.f32 %v11818_v53, %v5637_v35  ;;  %v4238_v33 = vpop.f32.mrf.mxu3  ;;  %v6056_v21 = vpop.f32.mrf.mxu2 }
 0x647   : > { %v4626_v63 = vmax.f32 %v4434_v59, 0.0  ;;  %v4239_v58 = vadd.f32 %v4238_v33, %v13003_v9  ;;  %v6206_v31 = vpack.c.bf16 %v6056_v21, %v6056_v21 }
 0x648   : > { %v5260_v1 = vmax.f32 %v5068_v57, 0.0  ;;  %v5894_v54 = vmax.f32 %v5702_v37, 0.0 }
 0x649   : > { %v4845_v46 = vpop.f32.mrf.mxu0  ;;  %v5452_v60 = vpop.f32.mrf.mxu1  ;;  %v4659_v0 = vpack.c.bf16 %v4626_v63, %v4625_v55  ;;  %v4305_v51 = vpack.c.bf16 %v4239_v58, %v4239_v58  ;;  %v6274_v14 = vunpack.c.l.bf16 %v6206_v31 }
 0x64a   : > { %v5302_v43 = vpack.c.bf16 %v5260_v1, %v5259_v48  ;;  %v5945_v47 = vpack.c.bf16 %v5894_v54, %v5893_v13  ;;  %v4939_v6 = vpack.c.bf16 %v4845_v46, %v4845_v46  ;;  %v5573_v11 = vpack.c.bf16 %v5452_v60, %v5452_v60 }
 0x64b   : > { %4884 = vmatmul.bf16.gmra.mxu0 %v4659_v0  ;;  %v6339_v41 = vadd.f32 %v11945_v39, %v6274_v14  ;;  %v4370_v32 = vunpack.c.l.bf16 %v4305_v51 }
 0x64c   : > { %5491 = vmatmul.bf16.gmra.mxu1 %v5302_v43  ;;  %6098 = vmatmul.bf16.gmra.mxu2 %v5945_v47  ;;  %v5004_v10 = vunpack.c.l.bf16 %v4939_v6  ;;  %v5638_v7 = vunpack.c.l.bf16 %v5573_v11  ;;  %v10214_v47 = vld [vmem:[%s12868_s2 + $0x298] sm:$0xff] }
 0x64d   : > { %v6531_v19 = vmax.f32 %v6339_v41, 0.0  ;;  %v4435_v44 = vadd.f32 %v11610_v15, %v4370_v32  ;;  %8028 = vmatpush.bf16.msrb.mxu1 %v10214_v47 }
 0x64e   : > { %v4240_v29 = vpop.f32.mrf.mxu3  ;;  %v6059_v45 = vpop.f32.mrf.mxu2  ;;  %v5069_v26 = vadd.f32 %v11714_v27, %v5004_v10  ;;  %v5703_v20 = vadd.f32 %v11818_v53, %v5638_v7 }
 0x64f   : > { %v4241_v50 = vadd.f32 %v4240_v29, %v13004_v61  ;;  %v6591_v8 = vpack.c.bf16 %v6531_v19, %v6530_v40  ;;  %v6207_v4 = vpack.c.bf16 %v6059_v45, %v6059_v45  ;;  %v4627_v22 = vmax.f32 %v4435_v44, 0.0 }
 0x650   : > { %v5261_v35 = vmax.f32 %v5069_v26, 0.0  ;;  %v5895_v59 = vmax.f32 %v5703_v20, 0.0 }
 0x651   : > { %v4306_v5 = vpack.c.bf16 %v4241_v50, %v4241_v50  ;;  %v4847_v17 = vpop.f32.mrf.mxu0  ;;  %v5454_v30 = vpop.f32.mrf.mxu1  ;;  %6708 = vmatmul.bf16.gmra.mxu3 %v6591_v8  ;;  %v6275_v3 = vunpack.c.l.bf16 %v6207_v4 }
 0x652   : > { %v4940_v36 = vpack.c.bf16 %v4847_v17, %v4847_v17  ;;  %v5574_v34 = vpack.c.bf16 %v5454_v30, %v5454_v30 }
 0x653   : > { %v4371_v23 = vunpack.c.l.bf16 %v4306_v5 }
 0x654   : > { %v5005_v24 = vunpack.c.l.bf16 %v4940_v36  ;;  %v5639_v12 = vunpack.c.l.bf16 %v5574_v34 }
 0x655   : > { %v4436_v18 = vadd.f32 %v11610_v15, %v4371_v23  ;;  %v6340_v15 = vadd.f32 %v11945_v39, %v6275_v3 }
 0x656   : > { %v5070_v49 = vadd.f32 %v11714_v27, %v5005_v24  ;;  %v5704_v38 = vadd.f32 %v11818_v53, %v5639_v12  ;;  %v6061_v33 = vpop.f32.mrf.mxu2 }
 0x657   : > { %v4628_v25 = vmax.f32 %v4436_v18, 0.0  ;;  %v6208_v55 = vpack.c.bf16 %v6061_v33, %v6061_v33  ;;  %v6532_v31 = vmax.f32 %v6340_v15, 0.0  ;;  %v10224_v15 = vld [vmem:[%s12870_s4 + $0x28] sm:$0xff] }
 0x658   : > { %v5262_v57 = vmax.f32 %v5070_v49, 0.0  ;;  %v5896_v37 = vmax.f32 %v5704_v38, 0.0  ;;  %8969 = vmatpush.bf16.msrb.mxu2 %v10224_v15 }
 0x659   : > { %v4850_v63 = vpop.f32.mrf.mxu0  ;;  %v5457_v56 = vpop.f32.mrf.mxu1  ;;  %v4660_v9 = vpack.c.bf16 %v4628_v25, %v4627_v22  ;;  %v6276_v13 = vunpack.c.l.bf16 %v6208_v55 }
 0x65a   : > { %v5303_v58 = vpack.c.bf16 %v5262_v57, %v5261_v35  ;;  %v5946_v48 = vpack.c.bf16 %v5896_v37, %v5895_v59  ;;  %v4941_v1 = vpack.c.bf16 %v4850_v63, %v4850_v63  ;;  %v5575_v54 = vpack.c.bf16 %v5457_v56, %v5457_v56 }
 0x65b   : > { %4889 = vmatmul.bf16.gmra.mxu0 %v4660_v9  ;;  %v6341_v21 = vadd.f32 %v11945_v39, %v6276_v13 }
 0x65c   : > { %5496 = vmatmul.bf16.gmra.mxu1 %v5303_v58  ;;  %6103 = vmatmul.bf16.gmra.mxu2 %v5946_v48  ;;  %v5006_v60 = vunpack.c.l.bf16 %v4941_v1  ;;  %v5640_v0 = vunpack.c.l.bf16 %v5575_v54 }
 0x65d   : > { %v6533_v46 = vmax.f32 %v6341_v21, 0.0 }
 0x65e   : > { %v6064_v43 = vpop.f32.mrf.mxu2  ;;  %v5071_v29 = vadd.f32 %v11714_v27, %v5006_v60  ;;  %v5705_v40 = vadd.f32 %v11818_v53, %v5640_v0 }
 0x65f   : > { %v6592_v14 = vpack.c.bf16 %v6533_v46, %v6532_v31  ;;  %v6209_v41 = vpack.c.bf16 %v6064_v43, %v6064_v43 }
 0x660   : > { %v5263_v7 = vmax.f32 %v5071_v29, 0.0  ;;  %v5897_v45 = vmax.f32 %v5705_v40, 0.0 }
 0x661   : > { %v4852_v62 = vpop.f32.mrf.mxu0  ;;  %v5459_v51 = vpop.f32.mrf.mxu1  ;;  %6713 = vmatmul.bf16.gmra.mxu3 %v6592_v14  ;;  %v6277_v10 = vunpack.c.l.bf16 %v6209_v41 }
 0x662   : > { %v4942_v6 = vpack.c.bf16 %v4852_v62, %v4852_v62  ;;  %v5576_v11 = vpack.c.bf16 %v5459_v51, %v5459_v51 }
 0x663   : > { %v6342_v23 = vadd.f32 %v11945_v39, %v6277_v10 }
 0x664   : > { %v5007_v32 = vunpack.c.l.bf16 %v4942_v6  ;;  %v5641_v19 = vunpack.c.l.bf16 %v5576_v11 }
 0x665   : > { %v6534_v12 = vmax.f32 %v6342_v23, 0.0 }
 0x666   : > { %v5072_v61 = vadd.f32 %v11714_v27, %v5007_v32  ;;  %v5706_v50 = vadd.f32 %v11818_v53, %v5641_v19  ;;  %v6066_v17 = vpop.f32.mrf.mxu2 }
 0x667   : > { %v6210_v30 = vpack.c.bf16 %v6066_v17, %v6066_v17 }
 0x668   : > { %v5264_v52 = vmax.f32 %v5072_v61, 0.0  ;;  %v5898_v5 = vmax.f32 %v5706_v50, 0.0 }
 0x669   : > { %v4855_v8 = vpop.f32.mrf.mxu0  ;;  %v5462_v36 = vpop.f32.mrf.mxu1  ;;  %v6278_v4 = vunpack.c.l.bf16 %v6210_v30 }
 0x66a   : > { %v5304_v34 = vpack.c.bf16 %v5264_v52, %v5263_v7  ;;  %v5947_v44 = vpack.c.bf16 %v5898_v5, %v5897_v45  ;;  %v4943_v26 = vpack.c.bf16 %v4855_v8, %v4855_v8  ;;  %v5577_v20 = vpack.c.bf16 %v5462_v36, %v5462_v36 }
 0x66b   : > { %v6343_v24 = vadd.f32 %v11945_v39, %v6278_v4 }
 0x66c   : > { %5501 = vmatmul.bf16.gmra.mxu1 %v5304_v34  ;;  %6108 = vmatmul.bf16.gmra.mxu2 %v5947_v44  ;;  %v5008_v49 = vunpack.c.l.bf16 %v4943_v26  ;;  %v5642_v38 = vunpack.c.l.bf16 %v5577_v20 }
 0x66d   : > { %v6535_v18 = vmax.f32 %v6343_v24, 0.0 }
 0x66e   : > { %v6069_v22 = vpop.f32.mrf.mxu2  ;;  %v5073_v33 = vadd.f32 %v11714_v27, %v5008_v49  ;;  %v5707_v55 = vadd.f32 %v11818_v53, %v5642_v38 }
 0x66f   : > { %v6593_v35 = vpack.c.bf16 %v6535_v18, %v6534_v12  ;;  %v6211_v37 = vpack.c.bf16 %v6069_v22, %v6069_v22  ;;  %v10232_v12 = vld [vmem:[%s12870_s4 + $0x68] sm:$0xff] }
 0x670   : > { %v5265_v13 = vmax.f32 %v5073_v33, 0.0  ;;  %v5899_v1 = vmax.f32 %v5707_v55, 0.0  ;;  %10238 = vmatpush.bf16.msrb.mxu3 %v10232_v12 }
 0x671   : > { %v4857_v25 = vpop.f32.mrf.mxu0  ;;  %v5464_v3 = vpop.f32.mrf.mxu1  ;;  %6718 = vmatmul.bf16.gmra.mxu3 %v6593_v35  ;;  %v6279_v48 = vunpack.c.l.bf16 %v6211_v37 }
 0x672   : > { %v4944_v59 = vpack.c.bf16 %v4857_v25, %v4857_v25  ;;  %v5578_v57 = vpack.c.bf16 %v5464_v3, %v5464_v3 }
 0x673   : > { %v6344_v62 = vadd.f32 %v11945_v39, %v6279_v48 }
 0x674   : > { %v5009_v63 = vunpack.c.l.bf16 %v4944_v59  ;;  %v5643_v56 = vunpack.c.l.bf16 %v5578_v57 }
 0x675   : > { %v6536_v41 = vmax.f32 %v6344_v62, 0.0 }
 0x676   : > { %v5074_v9 = vadd.f32 %v11714_v27, %v5009_v63  ;;  %v5708_v58 = vadd.f32 %v11818_v53, %v5643_v56  ;;  %v6071_v31 = vpop.f32.mrf.mxu2 }
 0x677   : > { %v6212_v46 = vpack.c.bf16 %v6071_v31, %v6071_v31 }
 0x678   : > { %v5266_v54 = vmax.f32 %v5074_v9, 0.0  ;;  %v5900_v21 = vmax.f32 %v5708_v58, 0.0  ;;  %v10203_v58 = vld [vmem:[%s12868_s2 + $0x240] sm:$0xff] }
 0x679   : > { %v4860_v60 = vpop.f32.mrf.mxu0  ;;  %v5467_v0 = vpop.f32.mrf.mxu1  ;;  %v6280_v51 = vunpack.c.l.bf16 %v6212_v46  ;;  %7571 = vmatpush.bf16.msrb.mxu0 %v10203_v58 }
 0x67a   : > { %v5305_v43 = vpack.c.bf16 %v5266_v54, %v5265_v13  ;;  %v5948_v47 = vpack.c.bf16 %v5900_v21, %v5899_v1  ;;  %v4945_v14 = vpack.c.bf16 %v4860_v60, %v4860_v60  ;;  %v5579_v6 = vpack.c.bf16 %v5467_v0, %v5467_v0 }
 0x67b   : > { %v6345_v11 = vadd.f32 %v11945_v39, %v6280_v51 }
 0x67c   : > { %5506 = vmatmul.bf16.gmra.mxu1 %v5305_v43  ;;  %6113 = vmatmul.bf16.gmra.mxu2 %v5948_v47  ;;  %v5010_v40 = vunpack.c.l.bf16 %v4945_v14  ;;  %v5644_v32 = vunpack.c.l.bf16 %v5579_v6 }
 0x67d   : > { %v6537_v29 = vmax.f32 %v6345_v11, 0.0  ;;  %9136 = vmatpush.bf16.msra.mxu0 %v11927_v28 }
 0x67e   : > { %v6074_v19 = vpop.f32.mrf.mxu2  ;;  %v5075_v5 = vadd.f32 %v11714_v27, %v5010_v40  ;;  %v5709_v17 = vadd.f32 %v11818_v53, %v5644_v32 }
 0x67f   : > { %v6594_v10 = vpack.c.bf16 %v6537_v29, %v6536_v41  ;;  %v6213_v52 = vpack.c.bf16 %v6074_v19, %v6074_v19 }
 0x680   : > { %v5267_v23 = vmax.f32 %v5075_v5, 0.0  ;;  %v5901_v4 = vmax.f32 %v5709_v17, 0.0 }
 0x681   : > { %v4862_v61 = vpop.f32.mrf.mxu0  ;;  %v5469_v50 = vpop.f32.mrf.mxu1  ;;  %6723 = vmatmul.bf16.gmra.mxu3 %v6594_v10  ;;  %v6281_v44 = vunpack.c.l.bf16 %v6213_v52  ;;  %9137 = vmatpush.bf16.msra.mxu0 %v11989_v42  ;;  %v6918_v10 = vshrl.u32 %v11929_v16, 16  ;;  %v10213_v16 = vld [vmem:[%s12868_s2 + $0x290] sm:$0xff] }
 0x682   : > { %v4946_v7 = vpack.c.bf16 %v4862_v61, %v4862_v61  ;;  %v5580_v45 = vpack.c.bf16 %v5469_v50, %v5469_v50  ;;  %8029 = vmatpush.bf16.msrb.mxu1 %v10213_v16 }
 0x683   : > { %v6346_v3 = vadd.f32 %v11945_v39, %v6281_v44  ;;  %v12045_v17 = vpack.i.b16 %v6918_v10, %v6918_v10 }
 0x684   : > { %v5011_v30 = vunpack.c.l.bf16 %v4946_v7  ;;  %v5645_v8 = vunpack.c.l.bf16 %v5580_v45 }
 0x685   : > { %v6538_v33 = vmax.f32 %v6346_v3, 0.0  ;;  %9138 = vmatpush.bf16.msra.mxu0 %v10232_v12 }
 0x686   : > { %v5076_v36 = vadd.f32 %v11714_v27, %v5011_v30  ;;  %v5710_v34 = vadd.f32 %v11818_v53, %v5645_v8  ;;  %v6076_v24 = vpop.f32.mrf.mxu2 }
 0x687   : > { %v6214_v18 = vpack.c.bf16 %v6076_v24, %v6076_v24  ;;  %v6921_v24 = vperm.slane %v12045_v17, 0 }
 0x688   : > { %v5268_v26 = vmax.f32 %v5076_v36, 0.0  ;;  %v5902_v20 = vmax.f32 %v5710_v34, 0.0 }
 0x689   : > { %v4865_v49 = vpop.f32.mrf.mxu0  ;;  %v5472_v38 = vpop.f32.mrf.mxu1  ;;  %v6282_v35 = vunpack.c.l.bf16 %v6214_v18 }
 0x68a   : > { %v5306_v22 = vpack.c.bf16 %v5268_v26, %v5267_v23  ;;  %v5949_v25 = vpack.c.bf16 %v5902_v20, %v5901_v4  ;;  %v4947_v59 = vpack.c.bf16 %v4865_v49, %v4865_v49  ;;  %v5581_v57 = vpack.c.bf16 %v5472_v38, %v5472_v38 }
 0x68b   : > { %v6347_v37 = vadd.f32 %v11945_v39, %v6282_v35 }
 0x68c   : > { %5511 = vmatmul.bf16.gmra.mxu1 %v5306_v22  ;;  %6118 = vmatmul.bf16.gmra.mxu2 %v5949_v25  ;;  %v5012_v63 = vunpack.c.l.bf16 %v4947_v59  ;;  %v5646_v56 = vunpack.c.l.bf16 %v5581_v57 }
 0x68d   : > { %v6539_v55 = vmax.f32 %v6347_v37, 0.0  ;;  %v12055_v37 = vunpack.c.l.bf16 %v6921_v24 }
 0x68e   : > { %v5077_v31 = vadd.f32 %v11714_v27, %v5012_v63  ;;  %v5711_v46 = vadd.f32 %v11818_v53, %v5646_v56 }
 0x68f   : > { %v6079_v9 = vpop.f32.mrf.mxu2  ;;  %v6595_v13 = vpack.c.bf16 %v6539_v55, %v6538_v33 }
 0x690   : > { %v6215_v21 = vpack.c.bf16 %v6079_v9, %v6079_v9  ;;  %v5269_v51 = vmax.f32 %v5077_v31, 0.0  ;;  %v5903_v14 = vmax.f32 %v5711_v46, 0.0 }
 0x691   : > { %v4867_v48 = vpop.f32.mrf.mxu0  ;;  %v5474_v15 = vpop.f32.mrf.mxu1  ;;  %6728 = vmatmul.bf16.gmra.mxu3 %v6595_v13 }
 0x692   : > { %v4948_v1 = vpack.c.bf16 %v4867_v48, %v4867_v48  ;;  %v5582_v54 = vpack.c.bf16 %v5474_v15, %v5474_v15  ;;  %v6283_v62 = vunpack.c.l.bf16 %v6215_v21 }
 0x694   : > { %v5013_v60 = vunpack.c.l.bf16 %v4948_v1  ;;  %v5647_v0 = vunpack.c.l.bf16 %v5582_v54  ;;  %v6348_v61 = vadd.f32 %v11945_v39, %v6283_v62 }
 0x696   : > { %v5078_v43 = vadd.f32 %v11714_v27, %v5013_v60  ;;  %v5712_v47 = vadd.f32 %v11818_v53, %v5647_v0  ;;  %v6540_v52 = vmax.f32 %v6348_v61, 0.0 }
 0x697   : > { %v6081_v41 = vpop.f32.mrf.mxu2 }
 0x698   : > { %v5270_v6 = vmax.f32 %v5078_v43, 0.0  ;;  %v5904_v11 = vmax.f32 %v5712_v47, 0.0  ;;  %v6216_v29 = vpack.c.bf16 %v6081_v41, %v6081_v41 }
 0x699   : > { %v4870_v28 = vpop.f32.mrf.mxu0  ;;  %v5477_v40 = vpop.f32.mrf.mxu1 }
 0x69a   : > { %v5307_v32 = vpack.c.bf16 %v5270_v6, %v5269_v51  ;;  %v5950_v19 = vpack.c.bf16 %v5904_v11, %v5903_v14  ;;  %v6284_v50 = vunpack.c.l.bf16 %v6216_v29  ;;  %v4949_v7 = vpack.c.bf16 %v4870_v28, %v4870_v28 }
 0x69b   : > { %v5583_v45 = vpack.c.bf16 %v5477_v40, %v5477_v40 }
 0x69c   : > { %5516 = vmatmul.bf16.gmra.mxu1 %v5307_v32  ;;  %v6349_v42 = vadd.f32 %v11945_v39, %v6284_v50  ;;  %6123 = vmatmul.bf16.gmra.mxu2 %v5950_v19  ;;  %v5014_v30 = vunpack.c.l.bf16 %v4949_v7 }
 0x69d   : > { %v5648_v8 = vunpack.c.l.bf16 %v5583_v45 }
 0x69e   : > { %v6541_v5 = vmax.f32 %v6349_v42, 0.0  ;;  %v5079_v12 = vadd.f32 %v11714_v27, %v5014_v30 }
 0x69f   : > { %v6084_v36 = vpop.f32.mrf.mxu2  ;;  %v5713_v18 = vadd.f32 %v11818_v53, %v5648_v8 }
 0x6a0   : > { %v6596_v23 = vpack.c.bf16 %v6541_v5, %v6540_v52  ;;  %v6217_v20 = vpack.c.bf16 %v6084_v36, %v6084_v36  ;;  %v5271_v33 = vmax.f32 %v5079_v12, 0.0 }
 0x6a1   : > { %v4872_v34 = vpop.f32.mrf.mxu0  ;;  %v5479_v44 = vpop.f32.mrf.mxu1  ;;  %v5905_v55 = vmax.f32 %v5713_v18, 0.0 }
 0x6a2   : > { %v4950_v4 = vpack.c.bf16 %v4872_v34, %v4872_v34  ;;  %v5584_v26 = vpack.c.bf16 %v5479_v44, %v5479_v44  ;;  %6733 = vmatmul.bf16.gmra.mxu3 %v6596_v23  ;;  %v6285_v59 = vunpack.c.l.bf16 %v6217_v20 }
 0x6a4   : > { %v5015_v49 = vunpack.c.l.bf16 %v4950_v4  ;;  %v5649_v38 = vunpack.c.l.bf16 %v5584_v26  ;;  %v6694_v22 = vpop.f32.mrf.mxu3  ;;  %v6350_v54 = vadd.f32 %v11945_v39, %v6285_v59  ;;  %v10223_v59 = vld [vmem:[%s12870_s4 + $0x20] sm:$0xff] }
 0x6a5   : > { %v6854_v25 = vpack.c.bf16 %v6694_v22, %v6694_v22  ;;  %8970 = vmatpush.bf16.msrb.mxu2 %v10223_v59 }
 0x6a6   : > { %v5080_v3 = vadd.f32 %v11714_v27, %v5015_v49  ;;  %v5714_v35 = vadd.f32 %v11818_v53, %v5649_v38  ;;  %v6542_v62 = vmax.f32 %v6350_v54, 0.0 }
 0x6a7   : > { %v6922_v57 = vunpack.c.l.bf16 %v6854_v25  ;;  %v6086_v9 = vpop.f32.mrf.mxu2 }
 0x6a8   : > { %v5272_v63 = vmax.f32 %v5080_v3, 0.0  ;;  %v5906_v56 = vmax.f32 %v5714_v35, 0.0  ;;  %v6218_v58 = vpack.c.bf16 %v6086_v9, %v6086_v9 }
 0x6a9   : > { %v4875_v48 = vpop.f32.mrf.mxu0  ;;  %v5482_v15 = vpop.f32.mrf.mxu1  ;;  %v6987_v21 = vadd.f32 %v12055_v37, %v6922_v57 }
 0x6aa   : > { %v5308_v13 = vpack.c.bf16 %v5272_v63, %v5271_v33  ;;  %v5951_v1 = vpack.c.bf16 %v5906_v56, %v5905_v55  ;;  %v6286_v31 = vunpack.c.l.bf16 %v6218_v58  ;;  %v4951_v46 = vpack.c.bf16 %v4875_v48, %v4875_v48 }
 0x6ab   : > { %v5585_v60 = vpack.c.bf16 %v5482_v15, %v5482_v15  ;;  %v7179_v51 = vmax.f32 %v6987_v21, 0.0 }
 0x6ac   : > { %5521 = vmatmul.bf16.gmra.mxu1 %v5308_v13  ;;  %v6696_v0 = vpop.f32.mrf.mxu3  ;;  %v6351_v43 = vadd.f32 %v11945_v39, %v6286_v31  ;;  %6128 = vmatmul.bf16.gmra.mxu2 %v5951_v1  ;;  %v5016_v11 = vunpack.c.l.bf16 %v4951_v46 }
 0x6ad   : > { %v6855_v47 = vpack.c.bf16 %v6696_v0, %v6696_v0  ;;  %v5650_v41 = vunpack.c.l.bf16 %v5585_v60  ;;  %v7243_v10 = vpack.c.bf16 %v7179_v51, %v7179_v51 }
 0x6ae   : > { %v6543_v14 = vmax.f32 %v6351_v43, 0.0  ;;  %v5081_v42 = vadd.f32 %v11714_v27, %v5016_v11 }
 0x6af   : > { %v6923_v6 = vunpack.c.l.bf16 %v6855_v47  ;;  %v6089_v29 = vpop.f32.mrf.mxu2  ;;  %v5715_v52 = vadd.f32 %v11818_v53, %v5650_v41  ;;  %v7388_v23 = vunpack.c.l.b16 %v7243_v10 }
 0x6b0   : > { %v6597_v19 = vpack.c.bf16 %v6543_v14, %v6542_v62  ;;  %v6219_v45 = vpack.c.bf16 %v6089_v29, %v6089_v29  ;;  %v5273_v20 = vmax.f32 %v5081_v42, 0.0 }
 0x6b1   : > { %v6988_v28 = vadd.f32 %v12055_v37, %v6923_v6  ;;  %v4877_v40 = vpop.f32.mrf.mxu0  ;;  %v5484_v32 = vpop.f32.mrf.mxu1  ;;  %v5907_v24 = vmax.f32 %v5715_v52, 0.0 }
 0x6b2   : > { %v4952_v61 = vpack.c.bf16 %v4877_v40, %v4877_v40  ;;  %v5586_v50 = vpack.c.bf16 %v5484_v32, %v5484_v32  ;;  %6738 = vmatmul.bf16.gmra.mxu3 %v6597_v19  ;;  %v6287_v4 = vunpack.c.l.bf16 %v6219_v45 }
 0x6b3   : > { %v7180_v7 = vmax.f32 %v6988_v28, 0.0 }
 0x6b4   : > { %v5017_v5 = vunpack.c.l.bf16 %v4952_v61  ;;  %v5651_v30 = vunpack.c.l.bf16 %v5586_v50  ;;  %v6699_v44 = vpop.f32.mrf.mxu3  ;;  %v6352_v55 = vadd.f32 %v11945_v39, %v6287_v4 }
 0x6b5   : > { %v7244_v8 = vpack.c.bf16 %v7180_v7, %v7180_v7  ;;  %v6856_v26 = vpack.c.bf16 %v6699_v44, %v6699_v44 }
 0x6b6   : > { %v5082_v36 = vadd.f32 %v11714_v27, %v5017_v5  ;;  %v5716_v34 = vadd.f32 %v11818_v53, %v5651_v30  ;;  %v6544_v13 = vmax.f32 %v6352_v55, 0.0 }
 0x6b7   : > { %v7389_v16 = vunpack.c.l.b16 %v7244_v8  ;;  %v6091_v49 = vpop.f32.mrf.mxu2  ;;  %v6924_v22 = vunpack.c.l.bf16 %v6856_v26 }
 0x6b8   : > { %v5274_v12 = vmax.f32 %v5082_v36, 0.0  ;;  %v5908_v18 = vmax.f32 %v5716_v34, 0.0  ;;  %v6220_v25 = vpack.c.bf16 %v6091_v49, %v6091_v49 }
 0x6b9   : > { %v12065_v38 = vpack.c.b16 %v7389_v16, %v7388_v23  ;;  %v4880_v3 = vpop.f32.mrf.mxu0  ;;  %v5487_v35 = vpop.f32.mrf.mxu1  ;;  %v6989_v58 = vadd.f32 %v12055_v37, %v6924_v22 }
 0x6ba   : > { %v5309_v57 = vpack.c.bf16 %v5274_v12, %v5273_v20  ;;  %v5952_v33 = vpack.c.bf16 %v5908_v18, %v5907_v24  ;;  %v6288_v63 = vunpack.c.l.bf16 %v6220_v25  ;;  %v4953_v56 = vpack.c.bf16 %v4880_v3, %v4880_v3  ;;  %v10231_v20 = vld [vmem:[%s12870_s4 + $0x60] sm:$0xff] }
 0x6bb   : > { %7572 = vmatmul.bf16.vlgmr.msrb.gmra.mxu0 %v12065_v38  ;;  %v5587_v9 = vpack.c.bf16 %v5487_v35, %v5487_v35  ;;  %v7181_v60 = vmax.f32 %v6989_v58, 0.0  ;;  %10239 = vmatpush.bf16.msrb.mxu3 %v10231_v20 }
 0x6bc   : > { %5526 = vmatmul.bf16.gmra.mxu1 %v5309_v57  ;;  %v6353_v48 = vadd.f32 %v11945_v39, %v6288_v63  ;;  %6133 = vmatmul.bf16.gmra.mxu2 %v5952_v33  ;;  %v6701_v15 = vpop.f32.mrf.mxu3  ;;  %v5018_v21 = vunpack.c.l.bf16 %v4953_v56 }
 0x6bd   : > { %v6857_v54 = vpack.c.bf16 %v6701_v15, %v6701_v15  ;;  %v5652_v31 = vunpack.c.l.bf16 %v5587_v9  ;;  %v7245_v32 = vpack.c.bf16 %v7181_v60, %v7181_v60  ;;  %9139 = vmatpush.bf16.msra.mxu0 %v10231_v20 }
 0x6be   : > { %v6545_v1 = vmax.f32 %v6353_v48, 0.0  ;;  %v5083_v41 = vadd.f32 %v11714_v27, %v5018_v21 }
 0x6bf   : > { %v6094_v46 = vpop.f32.mrf.mxu2  ;;  %v6925_v0 = vunpack.c.l.bf16 %v6857_v54  ;;  %v5717_v29 = vadd.f32 %v11818_v53, %v5652_v31  ;;  %v7390_v34 = vunpack.c.l.b16 %v7245_v32 }
 0x6c0   : > { %v6598_v62 = vpack.c.bf16 %v6545_v1, %v6544_v13  ;;  %v6221_v11 = vpack.c.bf16 %v6094_v46, %v6094_v46  ;;  %v5275_v52 = vmax.f32 %v5083_v41, 0.0 }
 0x6c1   : > { %v4882_v43 = vpop.f32.mrf.mxu0  ;;  %v5489_v47 = vpop.f32.mrf.mxu1  ;;  %v6990_v6 = vadd.f32 %v12055_v37, %v6925_v0  ;;  %v5909_v5 = vmax.f32 %v5717_v29, 0.0 }
 0x6c2   : > { %v4954_v51 = vpack.c.bf16 %v4882_v43, %v4882_v43  ;;  %v5588_v14 = vpack.c.bf16 %v5489_v47, %v5489_v47  ;;  %6743 = vmatmul.bf16.gmra.mxu3 %v6598_v62  ;;  %v6289_v45 = vunpack.c.l.bf16 %v6221_v11 }
 0x6c3   : > { %v7182_v19 = vmax.f32 %v6990_v6, 0.0 }
 0x6c4   : > { %v5019_v28 = vunpack.c.l.bf16 %v4954_v51  ;;  %v5653_v40 = vunpack.c.l.bf16 %v5588_v14  ;;  %v6704_v10 = vpop.f32.mrf.mxu3  ;;  %v6354_v18 = vadd.f32 %v11945_v39, %v6289_v45 }
 0x6c5   : > { %v7246_v7 = vpack.c.bf16 %v7182_v19, %v7182_v19  ;;  %v6858_v42 = vpack.c.bf16 %v6704_v10, %v6704_v10 }
 0x6c6   : > { %v5084_v61 = vadd.f32 %v11714_v27, %v5019_v28  ;;  %v5718_v50 = vadd.f32 %v11818_v53, %v5653_v40  ;;  %v6546_v33 = vmax.f32 %v6354_v18, 0.0 }
 0x6c7   : > { %v6096_v36 = vpop.f32.mrf.mxu2  ;;  %v7391_v44 = vunpack.c.l.b16 %v7246_v7  ;;  %v6926_v23 = vunpack.c.l.bf16 %v6858_v42 }
 0x6c8   : > { %v5276_v30 = vmax.f32 %v5084_v61, 0.0  ;;  %v5910_v8 = vmax.f32 %v5718_v50, 0.0  ;;  %v6222_v16 = vpack.c.bf16 %v6096_v36, %v6096_v36 }
 0x6c9   : > { %v4885_v4 = vpop.f32.mrf.mxu0  ;;  %v5492_v26 = vpop.f32.mrf.mxu1  ;;  %v12083_v22 = vpack.c.b16 %v7391_v44, %v7390_v34  ;;  %v6991_v35 = vadd.f32 %v12055_v37, %v6926_v23 }
 0x6ca   : > { %v5310_v24 = vpack.c.bf16 %v5276_v30, %v5275_v52  ;;  %v5953_v12 = vpack.c.bf16 %v5910_v8, %v5909_v5  ;;  %v6290_v49 = vunpack.c.l.bf16 %v6222_v16  ;;  %v4955_v25 = vpack.c.bf16 %v4885_v4, %v4885_v4 }
 0x6cb   : > { %v5589_v3 = vpack.c.bf16 %v5492_v26, %v5492_v26  ;;  %7577 = vmatmul.bf16.gmra.mxu0 %v12083_v22  ;;  %v7183_v48 = vmax.f32 %v6991_v35, 0.0 }
 0x6cc   : > { %5531 = vmatmul.bf16.gmra.mxu1 %v5310_v24  ;;  %v6355_v59 = vadd.f32 %v11945_v39, %v6290_v49  ;;  %6138 = vmatmul.bf16.gmra.mxu2 %v5953_v12  ;;  %v6706_v57 = vpop.f32.mrf.mxu3  ;;  %v5020_v56 = vunpack.c.l.bf16 %v4955_v25 }
 0x6cd   : > { %v6859_v63 = vpack.c.bf16 %v6706_v57, %v6706_v57  ;;  %v5654_v9 = vunpack.c.l.bf16 %v5589_v3  ;;  %v7247_v51 = vpack.c.bf16 %v7183_v48, %v7183_v48 }
 0x6ce   : > { %v6547_v55 = vmax.f32 %v6355_v59, 0.0  ;;  %v5085_v0 = vadd.f32 %v11714_v27, %v5020_v56  ;;  %v10212_v56 = vld [vmem:[%s12868_s2 + $0x288] sm:$0xff] }
 0x6cf   : > { %v6099_v58 = vpop.f32.mrf.mxu2  ;;  %v6927_v15 = vunpack.c.l.bf16 %v6859_v63  ;;  %v5719_v43 = vadd.f32 %v11818_v53, %v5654_v9  ;;  %v7392_v7 = vunpack.c.l.b16 %v7247_v51  ;;  %8030 = vmatpush.bf16.msrb.mxu1 %v10212_v56 }
 0x6d0   : > { %v6599_v54 = vpack.c.bf16 %v6547_v55, %v6546_v33  ;;  %v6223_v60 = vpack.c.bf16 %v6099_v58, %v6099_v58  ;;  %v5277_v32 = vmax.f32 %v5085_v0, 0.0 }
 0x6d1   : > { %v4887_v13 = vpop.f32.mrf.mxu0  ;;  %v5494_v1 = vpop.f32.mrf.mxu1  ;;  %v6992_v46 = vadd.f32 %v12055_v37, %v6927_v15  ;;  %v5911_v19 = vmax.f32 %v5719_v43, 0.0 }
 0x6d2   : > { %v4956_v21 = vpack.c.bf16 %v4887_v13, %v4887_v13  ;;  %v5590_v31 = vpack.c.bf16 %v5494_v1, %v5494_v1  ;;  %6748 = vmatmul.bf16.gmra.mxu3 %v6599_v54  ;;  %v6291_v28 = vunpack.c.l.bf16 %v6223_v60 }
 0x6d3   : > { %v7184_v14 = vmax.f32 %v6992_v46, 0.0 }
 0x6d4   : > { %v5021_v47 = vunpack.c.l.bf16 %v4956_v21  ;;  %v5655_v62 = vunpack.c.l.bf16 %v5590_v31  ;;  %v6709_v41 = vpop.f32.mrf.mxu3  ;;  %v6356_v34 = vadd.f32 %v11945_v39, %v6291_v28 }
 0x6d5   : > { %v7248_v29 = vpack.c.bf16 %v7184_v14, %v7184_v14  ;;  %v6860_v40 = vpack.c.bf16 %v6709_v41, %v6709_v41 }
 0x6d6   : > { %v5086_v6 = vadd.f32 %v11714_v27, %v5021_v47  ;;  %v5720_v11 = vadd.f32 %v11818_v53, %v5655_v62  ;;  %v6548_v12 = vmax.f32 %v6356_v34, 0.0 }
 0x6d7   : > { %v6101_v10 = vpop.f32.mrf.mxu2  ;;  %v7393_v45 = vunpack.c.l.b16 %v7248_v29  ;;  %v6928_v42 = vunpack.c.l.bf16 %v6860_v40 }
 0x6d8   : > { %v5278_v61 = vmax.f32 %v5086_v6, 0.0  ;;  %v5912_v50 = vmax.f32 %v5720_v11, 0.0  ;;  %v6224_v52 = vpack.c.bf16 %v6101_v10, %v6101_v10 }
 0x6d9   : > { %v4890_v5 = vpop.f32.mrf.mxu0  ;;  %v5497_v30 = vpop.f32.mrf.mxu1  ;;  %v12094_v23 = vpack.c.b16 %v7393_v45, %v7392_v7  ;;  %v6993_v26 = vadd.f32 %v12055_v37, %v6928_v42 }
 0x6da   : > { %v5311_v8 = vpack.c.bf16 %v5278_v61, %v5277_v32  ;;  %v5954_v36 = vpack.c.bf16 %v5912_v50, %v5911_v19  ;;  %v6292_v44 = vunpack.c.l.bf16 %v6224_v52  ;;  %v4957_v16 = vpack.c.bf16 %v4890_v5, %v4890_v5 }
 0x6db   : > { %v5591_v4 = vpack.c.bf16 %v5497_v30, %v5497_v30  ;;  %7582 = vmatmul.bf16.gmra.mxu0 %v12094_v23  ;;  %v7185_v59 = vmax.f32 %v6993_v26, 0.0 }
 0x6dc   : > { %5536 = vmatmul.bf16.gmra.mxu1 %v5311_v8  ;;  %v6357_v20 = vadd.f32 %v11945_v39, %v6292_v44  ;;  %6143 = vmatmul.bf16.gmra.mxu2 %v5954_v36  ;;  %v6711_v24 = vpop.f32.mrf.mxu3  ;;  %v5022_v25 = vunpack.c.l.bf16 %v4957_v16 }
 0x6dd   : > { %v6861_v49 = vpack.c.bf16 %v6711_v24, %v6711_v24  ;;  %v5656_v3 = vunpack.c.l.bf16 %v5591_v4  ;;  %v7249_v31 = vpack.c.bf16 %v7185_v59, %v7185_v59 }
 0x6de   : > { %v6549_v18 = vmax.f32 %v6357_v20, 0.0  ;;  %v5087_v13 = vadd.f32 %v11714_v27, %v5022_v25 }
 0x6df   : > { %v6104_v35 = vpop.f32.mrf.mxu2  ;;  %v6929_v57 = vunpack.c.l.bf16 %v6861_v49  ;;  %v5721_v1 = vadd.f32 %v11818_v53, %v5656_v3  ;;  %v7394_v28 = vunpack.c.l.b16 %v7249_v31  ;;  %v10222_v31 = vld [vmem:[%s12870_s4 + $0x18] sm:$0xff] }
 0x6e0   : > { %v6600_v63 = vpack.c.bf16 %v6549_v18, %v6548_v12  ;;  %v6225_v15 = vpack.c.bf16 %v6104_v35, %v6104_v35  ;;  %v5279_v14 = vmax.f32 %v5087_v13, 0.0  ;;  %8971 = vmatpush.bf16.msrb.mxu2 %v10222_v31 }
 0x6e1   : > { %v4892_v33 = vpop.f32.mrf.mxu0  ;;  %v5499_v55 = vpop.f32.mrf.mxu1  ;;  %v6994_v48 = vadd.f32 %v12055_v37, %v6929_v57  ;;  %v5913_v6 = vmax.f32 %v5721_v1, 0.0 }
 0x6e2   : > { %v4958_v9 = vpack.c.bf16 %v4892_v33, %v4892_v33  ;;  %v5592_v58 = vpack.c.bf16 %v5499_v55, %v5499_v55  ;;  %6753 = vmatmul.bf16.gmra.mxu3 %v6600_v63  ;;  %v6293_v62 = vunpack.c.l.bf16 %v6225_v15 }
 0x6e3   : > { %v7186_v46 = vmax.f32 %v6994_v48, 0.0 }
 0x6e4   : > { %v5023_v54 = vunpack.c.l.bf16 %v4958_v9  ;;  %v5657_v21 = vunpack.c.l.bf16 %v5592_v58  ;;  %v6714_v43 = vpop.f32.mrf.mxu3 }
 0x6e5   : > { %v7250_v47 = vpack.c.bf16 %v7186_v46, %v7186_v46  ;;  %v6862_v51 = vpack.c.bf16 %v6714_v43, %v6714_v43 }
 0x6e6   : > { %v5088_v60 = vadd.f32 %v11714_v27, %v5023_v54  ;;  %v5722_v0 = vadd.f32 %v11818_v53, %v5657_v21  ;;  %v6358_v27 = vadd.f32 %v11945_v39, %v6293_v62 }
 0x6e7   : > { %v6106_v29 = vpop.f32.mrf.mxu2  ;;  %v7395_v40 = vunpack.c.l.b16 %v7250_v47  ;;  %v6930_v32 = vunpack.c.l.bf16 %v6862_v51 }
 0x6e8   : > { %v5280_v11 = vmax.f32 %v5088_v60, 0.0  ;;  %v5914_v41 = vmax.f32 %v5722_v0, 0.0  ;;  %v6226_v19 = vpack.c.bf16 %v6106_v29, %v6106_v29  ;;  %v6550_v8 = vmax.f32 %v6358_v27, 0.0 }
 0x6e9   : > { %v5502_v61 = vpop.f32.mrf.mxu1  ;;  %v12108_v45 = vpack.c.b16 %v7395_v40, %v7394_v28  ;;  %v6995_v52 = vadd.f32 %v12055_v37, %v6930_v32 }
 0x6ea   : > { %v5312_v50 = vpack.c.bf16 %v5280_v11, %v5279_v14  ;;  %v5955_v10 = vpack.c.bf16 %v5914_v41, %v5913_v6  ;;  %v6294_v7 = vunpack.c.l.bf16 %v6226_v19  ;;  %v5593_v42 = vpack.c.bf16 %v5502_v61, %v5502_v61 }
 0x6eb   : > { %7587 = vmatmul.bf16.gmra.mxu0 %v12108_v45  ;;  %v7187_v4 = vmax.f32 %v6995_v52, 0.0 }
 0x6ec   : > { %5541 = vmatmul.bf16.gmra.mxu1 %v5312_v50  ;;  %v6359_v5 = vadd.f32 %v11945_v39, %v6294_v7  ;;  %6148 = vmatmul.bf16.gmra.mxu2 %v5955_v10  ;;  %v6716_v30 = vpop.f32.mrf.mxu3  ;;  %v5658_v44 = vunpack.c.l.bf16 %v5593_v42 }
 0x6ed   : > { %v6863_v34 = vpack.c.bf16 %v6716_v30, %v6716_v30  ;;  %v7251_v35 = vpack.c.bf16 %v7187_v4, %v7187_v4 }
 0x6ee   : > { %v6551_v36 = vmax.f32 %v6359_v5, 0.0  ;;  %v5723_v25 = vadd.f32 %v11818_v53, %v5658_v44 }
 0x6ef   : > { %v6109_v16 = vpop.f32.mrf.mxu2  ;;  %v6931_v26 = vunpack.c.l.bf16 %v6863_v34  ;;  %v7396_v15 = vunpack.c.l.b16 %v7251_v35 }
 0x6f0   : > { %v6601_v24 = vpack.c.bf16 %v6551_v36, %v6550_v8  ;;  %v6227_v49 = vpack.c.bf16 %v6109_v16, %v6109_v16  ;;  %v5915_v9 = vmax.f32 %v5723_v25, 0.0  ;;  %v10230_v25 = vld [vmem:[%s12870_s4 + $0x58] sm:$0xff] }
 0x6f1   : > { %v5504_v20 = vpop.f32.mrf.mxu1  ;;  %v6996_v18 = vadd.f32 %v12055_v37, %v6931_v26  ;;  %10240 = vmatpush.bf16.msrb.mxu3 %v10230_v25  ;;  %9140 = vmatpush.bf16.msra.mxu0 %v10230_v25 }
 0x6f2   : > { %v5594_v12 = vpack.c.bf16 %v5504_v20, %v5504_v20  ;;  %6758 = vmatmul.bf16.gmra.mxu3 %v6601_v24  ;;  %v6295_v63 = vunpack.c.l.bf16 %v6227_v49 }
 0x6f3   : > { %v7188_v59 = vmax.f32 %v6996_v18, 0.0 }
 0x6f4   : > { %v5659_v3 = vunpack.c.l.bf16 %v5594_v12  ;;  %v6719_v33 = vpop.f32.mrf.mxu3  ;;  %v6360_v60 = vadd.f32 %v11945_v39, %v6295_v63 }
 0x6f5   : > { %v7252_v55 = vpack.c.bf16 %v7188_v59, %v7188_v59  ;;  %v6864_v56 = vpack.c.bf16 %v6719_v33, %v6719_v33 }
 0x6f6   : > { %v5724_v57 = vadd.f32 %v11818_v53, %v5659_v3  ;;  %v6552_v6 = vmax.f32 %v6360_v60, 0.0 }
 0x6f7   : > { %v6111_v48 = vpop.f32.mrf.mxu2  ;;  %v7397_v13 = vunpack.c.l.b16 %v7252_v55  ;;  %v6932_v1 = vunpack.c.l.bf16 %v6864_v56 }
 0x6f8   : > { %v5916_v58 = vmax.f32 %v5724_v57, 0.0  ;;  %v6228_v54 = vpack.c.bf16 %v6111_v48, %v6111_v48 }
 0x6f9   : > { %v5507_v21 = vpop.f32.mrf.mxu1  ;;  %v12120_v43 = vpack.c.b16 %v7397_v13, %v7396_v15  ;;  %v6997_v62 = vadd.f32 %v12055_v37, %v6932_v1 }
 0x6fa   : > { %v5956_v46 = vpack.c.bf16 %v5916_v58, %v5915_v9  ;;  %v6296_v0 = vunpack.c.l.bf16 %v6228_v54  ;;  %v5595_v47 = vpack.c.bf16 %v5507_v21, %v5507_v21 }
 0x6fb   : > { %7592 = vmatmul.bf16.gmra.mxu0 %v12120_v43  ;;  %v7189_v40 = vmax.f32 %v6997_v62, 0.0 }
 0x6fc   : > { %v6361_v51 = vadd.f32 %v11945_v39, %v6296_v0  ;;  %6153 = vmatmul.bf16.gmra.mxu2 %v5956_v46  ;;  %v6721_v14 = vpop.f32.mrf.mxu3  ;;  %v5660_v29 = vunpack.c.l.bf16 %v5595_v47 }
 0x6fd   : > { %v6865_v41 = vpack.c.bf16 %v6721_v14, %v6721_v14  ;;  %v7253_v52 = vpack.c.bf16 %v7189_v40, %v7189_v40 }
 0x6fe   : > { %v6553_v11 = vmax.f32 %v6361_v51, 0.0  ;;  %v5725_v7 = vadd.f32 %v11818_v53, %v5660_v29 }
 0x6ff   : > { %v6114_v28 = vpop.f32.mrf.mxu2  ;;  %v6933_v32 = vunpack.c.l.bf16 %v6865_v41  ;;  %v7398_v20 = vunpack.c.l.b16 %v7253_v52 }
 0x700   : > { %v6602_v61 = vpack.c.bf16 %v6553_v11, %v6552_v6  ;;  %v6229_v27 = vpack.c.bf16 %v6114_v28, %v6114_v28  ;;  %v5917_v16 = vmax.f32 %v5725_v7, 0.0 }
 0x701   : > { %v5509_v19 = vpop.f32.mrf.mxu1  ;;  %v6998_v10 = vadd.f32 %v12055_v37, %v6933_v32 }
 0x702   : > { %v5596_v50 = vpack.c.bf16 %v5509_v19, %v5509_v19  ;;  %6763 = vmatmul.bf16.gmra.mxu3 %v6602_v61  ;;  %v6297_v34 = vunpack.c.l.bf16 %v6229_v27 }
 0x703   : > { %v7190_v5 = vmax.f32 %v6998_v10, 0.0 }
 0x704   : > { %v5661_v42 = vunpack.c.l.bf16 %v5596_v50  ;;  %v6724_v8 = vpop.f32.mrf.mxu3  ;;  %v6362_v35 = vadd.f32 %v11945_v39, %v6297_v34 }
 0x705   : > { %v7254_v36 = vpack.c.bf16 %v7190_v5, %v7190_v5  ;;  %v6866_v44 = vpack.c.bf16 %v6724_v8, %v6724_v8 }
 0x706   : > { %v5726_v30 = vadd.f32 %v11818_v53, %v5661_v42  ;;  %v6554_v9 = vmax.f32 %v6362_v35, 0.0 }
 0x707   : > { %v6116_v26 = vpop.f32.mrf.mxu2  ;;  %v7399_v24 = vunpack.c.l.b16 %v7254_v36  ;;  %v6934_v12 = vunpack.c.l.bf16 %v6866_v44 }
 0x708   : > { %v5918_v4 = vmax.f32 %v5726_v30, 0.0  ;;  %v6230_v18 = vpack.c.bf16 %v6116_v26, %v6116_v26 }
 0x709   : > { %v5512_v49 = vpop.f32.mrf.mxu1  ;;  %v12132_v57 = vpack.c.b16 %v7399_v24, %v7398_v20  ;;  %v6999_v55 = vadd.f32 %v12055_v37, %v6934_v12 }
 0x70a   : > { %v5957_v3 = vpack.c.bf16 %v5918_v4, %v5917_v16  ;;  %v6298_v59 = vunpack.c.l.bf16 %v6230_v18  ;;  %v5597_v33 = vpack.c.bf16 %v5512_v49, %v5512_v49 }
 0x70b   : > { %7597 = vmatmul.bf16.gmra.mxu0 %v12132_v57  ;;  %v7191_v1 = vmax.f32 %v6999_v55, 0.0 }
 0x70c   : > { %v6363_v63 = vadd.f32 %v11945_v39, %v6298_v59  ;;  %6158 = vmatmul.bf16.gmra.mxu2 %v5957_v3  ;;  %v6726_v56 = vpop.f32.mrf.mxu3  ;;  %v5662_v15 = vunpack.c.l.bf16 %v5597_v33  ;;  %v10211_v3 = vld [vmem:[%s12868_s2 + $0x280] sm:$0xff] }
 0x70d   : > { %v6867_v48 = vpack.c.bf16 %v6726_v56, %v6726_v56  ;;  %v7255_v51 = vpack.c.bf16 %v7191_v1, %v7191_v1  ;;  %8031 = vmatpush.bf16.msrb.mxu1 %v10211_v3 }
 0x70e   : > { %v6555_v58 = vmax.f32 %v6363_v63, 0.0  ;;  %v5727_v47 = vadd.f32 %v11818_v53, %v5662_v15 }
 0x70f   : > { %v6119_v13 = vpop.f32.mrf.mxu2  ;;  %v6935_v54 = vunpack.c.l.bf16 %v6867_v48  ;;  %v7400_v61 = vunpack.c.l.b16 %v7255_v51 }
 0x710   : > { %v6603_v31 = vpack.c.bf16 %v6555_v58, %v6554_v9  ;;  %v6231_v0 = vpack.c.bf16 %v6119_v13, %v6119_v13  ;;  %v5919_v40 = vmax.f32 %v5727_v47, 0.0 }
 0x711   : > { %v5514_v21 = vpop.f32.mrf.mxu1  ;;  %v7000_v60 = vadd.f32 %v12055_v37, %v6935_v54 }
 0x712   : > { %v5598_v46 = vpack.c.bf16 %v5514_v21, %v5514_v21  ;;  %6768 = vmatmul.bf16.gmra.mxu3 %v6603_v31  ;;  %v6299_v29 = vunpack.c.l.bf16 %v6231_v0 }
 0x713   : > { %v7192_v14 = vmax.f32 %v7000_v60, 0.0 }
 0x714   : > { %v5663_v62 = vunpack.c.l.bf16 %v5598_v46  ;;  %v6729_v11 = vpop.f32.mrf.mxu3  ;;  %v6364_v52 = vadd.f32 %v11945_v39, %v6299_v29 }
 0x715   : > { %v7256_v41 = vpack.c.bf16 %v7192_v14, %v7192_v14  ;;  %v6868_v28 = vpack.c.bf16 %v6729_v11, %v6729_v11 }
 0x716   : > { %v5728_v6 = vadd.f32 %v11818_v53, %v5663_v62  ;;  %v6556_v16 = vmax.f32 %v6364_v52, 0.0 }
 0x717   : > { %v6121_v19 = vpop.f32.mrf.mxu2  ;;  %v7401_v50 = vunpack.c.l.b16 %v7256_v41  ;;  %v6936_v10 = vunpack.c.l.bf16 %v6868_v28 }
 0x718   : > { %v5920_v32 = vmax.f32 %v5728_v6, 0.0  ;;  %v6232_v27 = vpack.c.bf16 %v6121_v19, %v6121_v19 }
 0x719   : > { %v5517_v7 = vpop.f32.mrf.mxu1  ;;  %v12141_v30 = vpack.c.b16 %v7401_v50, %v7400_v61  ;;  %v7001_v36 = vadd.f32 %v12055_v37, %v6936_v10 }
 0x71a   : > { %v5958_v42 = vpack.c.bf16 %v5920_v32, %v5919_v40  ;;  %v6300_v5 = vunpack.c.l.bf16 %v6232_v27  ;;  %v5599_v8 = vpack.c.bf16 %v5517_v7, %v5517_v7 }
 0x71b   : > { %7602 = vmatmul.bf16.gmra.mxu0 %v12141_v30  ;;  %v7193_v12 = vmax.f32 %v7001_v36, 0.0 }
 0x71c   : > { %v6365_v34 = vadd.f32 %v11945_v39, %v6300_v5  ;;  %6163 = vmatmul.bf16.gmra.mxu2 %v5958_v42  ;;  %v6731_v44 = vpop.f32.mrf.mxu3  ;;  %v5664_v20 = vunpack.c.l.bf16 %v5599_v8 }
 0x71d   : > { %v6869_v26 = vpack.c.bf16 %v6731_v44, %v6731_v44  ;;  %v7257_v56 = vpack.c.bf16 %v7193_v12, %v7193_v12 }
 0x71e   : > { %v6557_v4 = vmax.f32 %v6365_v34, 0.0  ;;  %v5729_v55 = vadd.f32 %v11818_v53, %v5664_v20 }
 0x71f   : > { %v6124_v24 = vpop.f32.mrf.mxu2  ;;  %v6937_v18 = vunpack.c.l.bf16 %v6869_v26  ;;  %v7402_v46 = vunpack.c.l.b16 %v7257_v56 }
 0x720   : > { %v6604_v25 = vpack.c.bf16 %v6557_v4, %v6556_v16  ;;  %v6233_v33 = vpack.c.bf16 %v6124_v24, %v6124_v24  ;;  %v5921_v54 = vmax.f32 %v5729_v55, 0.0 }
 0x721   : > { %v5519_v49 = vpop.f32.mrf.mxu1  ;;  %v7002_v59 = vadd.f32 %v12055_v37, %v6937_v18 }
 0x722   : > { %v5600_v35 = vpack.c.bf16 %v5519_v49, %v5519_v49  ;;  %6773 = vmatmul.bf16.gmra.mxu3 %v6604_v25  ;;  %v6301_v13 = vunpack.c.l.bf16 %v6233_v33 }
 0x723   : > { %v7194_v9 = vmax.f32 %v7002_v59, 0.0 }
 0x724   : > { %v5665_v63 = vunpack.c.l.bf16 %v5600_v35  ;;  %v6366_v14 = vadd.f32 %v11945_v39, %v6301_v13 }
 0x725   : > { %v6734_v48 = vpop.f32.mrf.mxu3  ;;  %v7258_v15 = vpack.c.bf16 %v7194_v9, %v7194_v9  ;;  %v10221_v9 = vld [vmem:[%s12870_s4 + $0x10] sm:$0xff] }
 0x726   : > { %v5730_v58 = vadd.f32 %v11818_v53, %v5665_v63  ;;  %v6870_v1 = vpack.c.bf16 %v6734_v48, %v6734_v48  ;;  %v6558_v32 = vmax.f32 %v6366_v14, 0.0  ;;  %8972 = vmatpush.bf16.msrb.mxu2 %v10221_v9 }
 0x727   : > { %v6126_v31 = vpop.f32.mrf.mxu2  ;;  %v7403_v60 = vunpack.c.l.b16 %v7258_v15 }
 0x728   : > { %v5922_v21 = vmax.f32 %v5730_v58, 0.0  ;;  %v6938_v0 = vunpack.c.l.bf16 %v6870_v1  ;;  %v6234_v47 = vpack.c.bf16 %v6126_v31, %v6126_v31 }
 0x729   : > { %v5522_v62 = vpop.f32.mrf.mxu1  ;;  %v12153_v11 = vpack.c.b16 %v7403_v60, %v7402_v46 }
 0x72a   : > { %v5959_v51 = vpack.c.bf16 %v5922_v21, %v5921_v54  ;;  %v6302_v6 = vunpack.c.l.bf16 %v6234_v47  ;;  %v5601_v41 = vpack.c.bf16 %v5522_v62, %v5522_v62  ;;  %v7003_v29 = vadd.f32 %v12055_v37, %v6938_v0 }
 0x72b   : > { %7607 = vmatmul.bf16.gmra.mxu0 %v12153_v11  ;;  %v7797_v54 = vperm.slane %v11934_v2, 1 }
 0x72c   : > { %v6367_v28 = vadd.f32 %v11945_v39, %v6302_v6  ;;  %6168 = vmatmul.bf16.gmra.mxu2 %v5959_v51  ;;  %v5666_v50 = vunpack.c.l.bf16 %v5601_v41  ;;  %v7195_v27 = vmax.f32 %v7003_v29, 0.0 }
 0x72d   : > { %v6736_v40 = vpop.f32.mrf.mxu3  ;;  %v12171_v14 = vunpack.c.l.bf16 %v7797_v54 }
 0x72e   : > { %v6559_v19 = vmax.f32 %v6367_v28, 0.0  ;;  %v6871_v61 = vpack.c.bf16 %v6736_v40, %v6736_v40  ;;  %v5731_v36 = vadd.f32 %v11818_v53, %v5666_v50  ;;  %v7259_v16 = vpack.c.bf16 %v7195_v27, %v7195_v27 }
 0x72f   : > { %v6129_v10 = vpop.f32.mrf.mxu2 }
 0x730   : > { %v6939_v7 = vunpack.c.l.bf16 %v6871_v61  ;;  %v6605_v52 = vpack.c.bf16 %v6559_v19, %v6558_v32  ;;  %v6235_v34 = vpack.c.bf16 %v6129_v10, %v6129_v10  ;;  %v5923_v18 = vmax.f32 %v5731_v36, 0.0 }
 0x731   : > { %v5524_v42 = vpop.f32.mrf.mxu1  ;;  %v7404_v59 = vunpack.c.l.b16 %v7259_v16 }
 0x732   : > { %v5602_v5 = vpack.c.bf16 %v5524_v42, %v5524_v42  ;;  %v7004_v8 = vadd.f32 %v12055_v37, %v6939_v7  ;;  %6778 = vmatmul.bf16.gmra.mxu3 %v6605_v52  ;;  %v6303_v49 = vunpack.c.l.bf16 %v6235_v34 }
 0x734   : > { %v5667_v44 = vunpack.c.l.bf16 %v5602_v5  ;;  %v7196_v4 = vmax.f32 %v7004_v8, 0.0  ;;  %v6368_v13 = vadd.f32 %v11945_v39, %v6303_v49 }
 0x735   : > { %v6739_v20 = vpop.f32.mrf.mxu3 }
 0x736   : > { %v5732_v26 = vadd.f32 %v11818_v53, %v5667_v44  ;;  %v7260_v24 = vpack.c.bf16 %v7196_v4, %v7196_v4  ;;  %v6872_v12 = vpack.c.bf16 %v6739_v20, %v6739_v20  ;;  %v6560_v62 = vmax.f32 %v6368_v13, 0.0 }
 0x737   : > { %v6131_v3 = vpop.f32.mrf.mxu2 }
 0x738   : > { %v5924_v25 = vmax.f32 %v5732_v26, 0.0  ;;  %v7573_v35 = vpop.f32.mrf.mxu0  ;;  %v7405_v33 = vunpack.c.l.b16 %v7260_v24  ;;  %v6940_v55 = vunpack.c.l.bf16 %v6872_v12  ;;  %v6236_v63 = vpack.c.bf16 %v6131_v3, %v6131_v3 }
 0x739   : > { %v5527_v56 = vpop.f32.mrf.mxu1  ;;  %v7733_v46 = vpack.c.bf16 %v7573_v35, %v7573_v35 }
 0x73a   : > { %v5960_v58 = vpack.c.bf16 %v5924_v25, %v5923_v18  ;;  %v6304_v48 = vunpack.c.l.bf16 %v6236_v63  ;;  %v12164_v15 = vpack.c.b16 %v7405_v33, %v7404_v59  ;;  %v5603_v1 = vpack.c.bf16 %v5527_v56, %v5527_v56  ;;  %v10229_v33 = vld [vmem:[%s12870_s4 + $0x50] sm:$0xff] }
 0x73b   : > { %v7005_v21 = vadd.f32 %v12055_v37, %v6940_v55  ;;  %v7798_v28 = vunpack.c.l.bf16 %v7733_v46  ;;  %10241 = vmatpush.bf16.msrb.mxu3 %v10229_v33  ;;  %9141 = vmatpush.bf16.msra.mxu0 %v10229_v33 }
 0x73c   : > { %v6369_v31 = vadd.f32 %v11945_v39, %v6304_v48  ;;  %6173 = vmatmul.bf16.gmra.mxu2 %v5960_v58  ;;  %7612 = vmatmul.bf16.gmra.mxu0 %v12164_v15  ;;  %v5668_v51 = vunpack.c.l.bf16 %v5603_v1 }
 0x73d   : > { %v6741_v60 = vpop.f32.mrf.mxu3  ;;  %v7197_v29 = vmax.f32 %v7005_v21, 0.0  ;;  %v7863_v5 = vadd.f32 %v12171_v14, %v7798_v28 }
 0x73e   : > { %v6561_v0 = vmax.f32 %v6369_v31, 0.0  ;;  %v6873_v47 = vpack.c.bf16 %v6741_v60, %v6741_v60  ;;  %v5733_v7 = vadd.f32 %v11818_v53, %v5668_v51 }
 0x73f   : > { %v6134_v6 = vpop.f32.mrf.mxu2  ;;  %v7261_v52 = vpack.c.bf16 %v7197_v29, %v7197_v29 }
 0x740   : > { %v7575_v41 = vpop.f32.mrf.mxu0  ;;  %v6941_v2 = vunpack.c.l.bf16 %v6873_v47  ;;  %v6606_v61 = vpack.c.bf16 %v6561_v0, %v6560_v62  ;;  %v6237_v10 = vpack.c.bf16 %v6134_v6, %v6134_v6  ;;  %v5925_v24 = vmax.f32 %v5733_v7, 0.0 }
 0x741   : > { %v5529_v40 = vpop.f32.mrf.mxu1  ;;  %v7734_v32 = vpack.c.bf16 %v7575_v41, %v7575_v41  ;;  %v7406_v49 = vunpack.c.l.b16 %v7261_v52 }
 0x742   : > { %v5604_v19 = vpack.c.bf16 %v5529_v40, %v5529_v40  ;;  %v7006_v50 = vadd.f32 %v12055_v37, %v6941_v2  ;;  %6783 = vmatmul.bf16.gmra.mxu3 %v6606_v61  ;;  %v6305_v4 = vunpack.c.l.bf16 %v6237_v10 }
 0x743   : > { %v7799_v27 = vunpack.c.l.bf16 %v7734_v32 }
 0x744   : > { %v5669_v42 = vunpack.c.l.bf16 %v5604_v19  ;;  %v7198_v8 = vmax.f32 %v7006_v50, 0.0  ;;  %v6370_v56 = vadd.f32 %v11945_v39, %v6305_v4 }
 0x745   : > { %v7864_v36 = vadd.f32 %v12171_v14, %v7799_v27  ;;  %v6744_v44 = vpop.f32.mrf.mxu3 }
 0x746   : > { %v5734_v34 = vadd.f32 %v11818_v53, %v5669_v42  ;;  %v7262_v16 = vpack.c.bf16 %v7198_v8, %v7198_v8  ;;  %v6874_v20 = vpack.c.bf16 %v6744_v44, %v6744_v44  ;;  %v6562_v31 = vmax.f32 %v6370_v56, 0.0 }
 0x747   : > { %v7927_v26 = vpack.c.bf16 %v7864_v36, %v7863_v5  ;;  %v6136_v18 = vpop.f32.mrf.mxu2 }
 0x748   : > { %v5926_v12 = vmax.f32 %v5734_v34, 0.0  ;;  %v7407_v25 = vunpack.c.l.b16 %v7262_v16  ;;  %v6942_v3 = vunpack.c.l.bf16 %v6874_v20  ;;  %v6238_v35 = vpack.c.bf16 %v6136_v18, %v6136_v18  ;;  %v7578_v55 = vpop.f32.mrf.mxu0 }
 0x749   : > { %v5532_v59 = vpop.f32.mrf.mxu1  ;;  %8032 = vmatmul.bf16.vlgmr.msrb.gmra.mxu1 %v7927_v26  ;;  %v7735_v54 = vpack.c.bf16 %v7578_v55, %v7578_v55 }
 0x74a   : > { %v5961_v63 = vpack.c.bf16 %v5926_v12, %v5925_v24  ;;  %v6306_v9 = vunpack.c.l.bf16 %v6238_v35  ;;  %v12182_v58 = vpack.c.b16 %v7407_v25, %v7406_v49  ;;  %v7007_v48 = vadd.f32 %v12055_v37, %v6942_v3 }
 0x74b   : > { %v5605_v13 = vpack.c.bf16 %v5532_v59, %v5532_v59  ;;  %v7800_v29 = vunpack.c.l.bf16 %v7735_v54 }
 0x74c   : > { %v6371_v1 = vadd.f32 %v11945_v39, %v6306_v9  ;;  %6178 = vmatmul.bf16.gmra.mxu2 %v5961_v63  ;;  %7617 = vmatmul.bf16.gmra.mxu0 %v12182_v58  ;;  %v7199_v0 = vmax.f32 %v7007_v48, 0.0 }
 0x74d   : > { %v6746_v21 = vpop.f32.mrf.mxu3  ;;  %v5670_v47 = vunpack.c.l.bf16 %v5605_v13  ;;  %v7865_v42 = vadd.f32 %v12171_v14, %v7800_v29 }
 0x74e   : > { %v6563_v46 = vmax.f32 %v6371_v1, 0.0  ;;  %v6875_v60 = vpack.c.bf16 %v6746_v21, %v6746_v21  ;;  %v7263_v61 = vpack.c.bf16 %v7199_v0, %v7199_v0 }
 0x74f   : > { %v6139_v62 = vpop.f32.mrf.mxu2  ;;  %v5735_v50 = vadd.f32 %v11818_v53, %v5670_v47 }
 0x750   : > { %v6943_v51 = vunpack.c.l.bf16 %v6875_v60  ;;  %v6607_v41 = vpack.c.bf16 %v6563_v46, %v6562_v31  ;;  %v7580_v2 = vpop.f32.mrf.mxu0  ;;  %v6239_v32 = vpack.c.bf16 %v6139_v62, %v6139_v62  ;;  %v7408_v16 = vunpack.c.l.b16 %v7263_v61 }
 0x751   : > { %v5534_v6 = vpop.f32.mrf.mxu1  ;;  %v7736_v19 = vpack.c.bf16 %v7580_v2, %v7580_v2  ;;  %v5927_v4 = vmax.f32 %v5735_v50, 0.0 }
 0x752   : > { %v5606_v28 = vpack.c.bf16 %v5534_v6, %v5534_v6  ;;  %v7008_v40 = vadd.f32 %v12055_v37, %v6943_v51  ;;  %6788 = vmatmul.bf16.gmra.mxu3 %v6607_v41  ;;  %v6307_v36 = vunpack.c.l.bf16 %v6239_v32 }
 0x753   : > { %v7801_v7 = vunpack.c.l.bf16 %v7736_v19 }
 0x754   : > { %v5671_v10 = vunpack.c.l.bf16 %v5606_v28  ;;  %v7200_v27 = vmax.f32 %v7008_v40, 0.0  ;;  %v6372_v59 = vadd.f32 %v11945_v39, %v6307_v36 }
 0x755   : > { %v6749_v5 = vpop.f32.mrf.mxu3  ;;  %v7866_v34 = vadd.f32 %v12171_v14, %v7801_v7 }
 0x756   : > { %v5736_v52 = vadd.f32 %v11818_v53, %v5671_v10  ;;  %v7264_v8 = vpack.c.bf16 %v7200_v27, %v7200_v27  ;;  %v6876_v44 = vpack.c.bf16 %v6749_v5, %v6749_v5  ;;  %v6564_v1 = vmax.f32 %v6372_v59, 0.0 }
 0x757   : > { %v6141_v20 = vpop.f32.mrf.mxu2  ;;  %v7928_v25 = vpack.c.bf16 %v7866_v34, %v7865_v42 }
 0x758   : > { %v5928_v26 = vmax.f32 %v5736_v52, 0.0  ;;  %v7409_v24 = vunpack.c.l.b16 %v7264_v8  ;;  %v6944_v12 = vunpack.c.l.bf16 %v6876_v44  ;;  %v6240_v18 = vpack.c.bf16 %v6141_v20, %v6141_v20  ;;  %v7583_v3 = vpop.f32.mrf.mxu0 }
 0x759   : > { %v5537_v49 = vpop.f32.mrf.mxu1  ;;  %8037 = vmatmul.bf16.gmra.mxu1 %v7928_v25  ;;  %v7737_v48 = vpack.c.bf16 %v7583_v3, %v7583_v3 }
 0x75a   : > { %v5962_v35 = vpack.c.bf16 %v5928_v26, %v5927_v4  ;;  %v6308_v33 = vunpack.c.l.bf16 %v6240_v18  ;;  %v12193_v55 = vpack.c.b16 %v7409_v24, %v7408_v16  ;;  %v7009_v63 = vadd.f32 %v12055_v37, %v6944_v12 }
 0x75b   : > { %v5607_v56 = vpack.c.bf16 %v5537_v49, %v5537_v49  ;;  %v7802_v51 = vunpack.c.l.bf16 %v7737_v48 }
 0x75c   : > { %v6373_v9 = vadd.f32 %v11945_v39, %v6308_v33  ;;  %6183 = vmatmul.bf16.gmra.mxu2 %v5962_v35  ;;  %7622 = vmatmul.bf16.gmra.mxu0 %v12193_v55  ;;  %v7201_v31 = vmax.f32 %v7009_v63, 0.0 }
 0x75d   : > { %v6751_v13 = vpop.f32.mrf.mxu3  ;;  %v5672_v46 = vunpack.c.l.bf16 %v5607_v56  ;;  %v7867_v10 = vadd.f32 %v12171_v14, %v7802_v51 }
 0x75e   : > { %v6565_v54 = vmax.f32 %v6373_v9, 0.0  ;;  %v6877_v21 = vpack.c.bf16 %v6751_v13, %v6751_v13  ;;  %v7265_v40 = vpack.c.bf16 %v7201_v31, %v7201_v31 }
 0x75f   : > { %v6144_v60 = vpop.f32.mrf.mxu2  ;;  %v5737_v32 = vadd.f32 %v11818_v53, %v5672_v46 }
 0x760   : > { %v6945_v0 = vunpack.c.l.bf16 %v6877_v21  ;;  %v6608_v62 = vpack.c.bf16 %v6565_v54, %v6564_v1  ;;  %v7585_v41 = vpop.f32.mrf.mxu0  ;;  %v6241_v28 = vpack.c.bf16 %v6144_v60, %v6144_v60  ;;  %v7410_v36 = vunpack.c.l.b16 %v7265_v40 }
 0x761   : > { %v5539_v47 = vpop.f32.mrf.mxu1  ;;  %v7738_v2 = vpack.c.bf16 %v7585_v41, %v7585_v41  ;;  %v5929_v34 = vmax.f32 %v5737_v32, 0.0 }
 0x762   : > { %v5608_v6 = vpack.c.bf16 %v5539_v47, %v5539_v47  ;;  %v7010_v29 = vadd.f32 %v12055_v37, %v6945_v0  ;;  %6793 = vmatmul.bf16.gmra.mxu3 %v6608_v62  ;;  %v6309_v52 = vunpack.c.l.bf16 %v6241_v28 }
 0x763   : > { %v7803_v50 = vunpack.c.l.bf16 %v7738_v2 }
 0x764   : > { %v5673_v19 = vunpack.c.l.bf16 %v5608_v6  ;;  %v7202_v61 = vmax.f32 %v7010_v29, 0.0  ;;  %v6374_v25 = vadd.f32 %v11945_v39, %v6309_v52 }
 0x765   : > { %v6754_v7 = vpop.f32.mrf.mxu3  ;;  %v7868_v5 = vadd.f32 %v12171_v14, %v7803_v50 }
 0x766   : > { %v5738_v27 = vadd.f32 %v11818_v53, %v5673_v19  ;;  %v7266_v42 = vpack.c.bf16 %v7202_v61, %v7202_v61  ;;  %v6878_v8 = vpack.c.bf16 %v6754_v7, %v6754_v7  ;;  %v6566_v48 = vmax.f32 %v6374_v25, 0.0 }
 0x767   : > { %v6146_v16 = vpop.f32.mrf.mxu2  ;;  %v7929_v12 = vpack.c.bf16 %v7868_v5, %v7867_v10 }
 0x768   : > { %v5930_v44 = vmax.f32 %v5738_v27, 0.0  ;;  %v7411_v4 = vunpack.c.l.b16 %v7266_v42  ;;  %v6946_v26 = vunpack.c.l.bf16 %v6878_v8  ;;  %v6242_v20 = vpack.c.bf16 %v6146_v16, %v6146_v16  ;;  %v7588_v18 = vpop.f32.mrf.mxu0 }
 0x769   : > { %v5542_v24 = vpop.f32.mrf.mxu1  ;;  %8042 = vmatmul.bf16.gmra.mxu1 %v7929_v12  ;;  %v7739_v56 = vpack.c.bf16 %v7588_v18, %v7588_v18 }
 0x76a   : > { %v5963_v49 = vpack.c.bf16 %v5930_v44, %v5929_v34  ;;  %v6310_v3 = vunpack.c.l.bf16 %v6242_v20  ;;  %v12204_v35 = vpack.c.b16 %v7411_v4, %v7410_v36  ;;  %v7011_v59 = vadd.f32 %v12055_v37, %v6946_v26  ;;  %v10220_v20 = vld [vmem:[%s12870_s4 + $0x8] sm:$0xff] }
 0x76b   : > { %v5609_v33 = vpack.c.bf16 %v5542_v24, %v5542_v24  ;;  %v7804_v47 = vunpack.c.l.bf16 %v7739_v56  ;;  %8973 = vmatpush.bf16.msrb.mxu2 %v10220_v20 }
 0x76c   : > { %v6375_v63 = vadd.f32 %v11945_v39, %v6310_v3  ;;  %6188 = vmatmul.bf16.gmra.mxu2 %v5963_v49  ;;  %7627 = vmatmul.bf16.gmra.mxu0 %v12204_v35  ;;  %v7203_v54 = vmax.f32 %v7011_v59, 0.0 }
 0x76d   : > { %v6756_v9 = vpop.f32.mrf.mxu3  ;;  %v5674_v21 = vunpack.c.l.bf16 %v5609_v33  ;;  %v7869_v61 = vadd.f32 %v12171_v14, %v7804_v47 }
 0x76e   : > { %v6567_v13 = vmax.f32 %v6375_v63, 0.0  ;;  %v6879_v1 = vpack.c.bf16 %v6756_v9, %v6756_v9  ;;  %v7267_v28 = vpack.c.bf16 %v7203_v54, %v7203_v54 }
 0x76f   : > { %v6149_v31 = vpop.f32.mrf.mxu2  ;;  %v5739_v2 = vadd.f32 %v11818_v53, %v5674_v21 }
 0x770   : > { %v6947_v46 = vunpack.c.l.bf16 %v6879_v1  ;;  %v6609_v0 = vpack.c.bf16 %v6567_v13, %v6566_v48  ;;  %v7590_v51 = vpop.f32.mrf.mxu0  ;;  %v6243_v41 = vpack.c.bf16 %v6149_v31, %v6149_v31  ;;  %v7412_v5 = vunpack.c.l.b16 %v7267_v28 }
 0x771   : > { %v5544_v60 = vpop.f32.mrf.mxu1  ;;  %v7740_v29 = vpack.c.bf16 %v7590_v51, %v7590_v51  ;;  %v5931_v8 = vmax.f32 %v5739_v2, 0.0 }
 0x772   : > { %v5610_v62 = vpack.c.bf16 %v5544_v60, %v5544_v60  ;;  %v7012_v6 = vadd.f32 %v12055_v37, %v6947_v46  ;;  %6798 = vmatmul.bf16.gmra.mxu3 %v6609_v0  ;;  %v6311_v7 = vunpack.c.l.bf16 %v6243_v41 }
 0x773   : > { %v7805_v19 = vunpack.c.l.bf16 %v7740_v29 }
 0x774   : > { %v5675_v40 = vunpack.c.l.bf16 %v5610_v62  ;;  %v7204_v32 = vmax.f32 %v7012_v6, 0.0  ;;  %v6376_v12 = vadd.f32 %v11945_v39, %v6311_v7  ;;  %v10228_v7 = vld [vmem:[%s12870_s4 + $0x48] sm:$0xff] }
 0x775   : > { %v6759_v10 = vpop.f32.mrf.mxu3  ;;  %v7870_v42 = vadd.f32 %v12171_v14, %v7805_v19  ;;  %10242 = vmatpush.bf16.msrb.mxu3 %v10228_v7  ;;  %9142 = vmatpush.bf16.msra.mxu0 %v10228_v7 }
 0x776   : > { %v5740_v50 = vadd.f32 %v11818_v53, %v5675_v40  ;;  %v7268_v27 = vpack.c.bf16 %v7204_v32, %v7204_v32  ;;  %v6880_v52 = vpack.c.bf16 %v6759_v10, %v6759_v10  ;;  %v6568_v63 = vmax.f32 %v6376_v12, 0.0 }
 0x777   : > { %v6151_v34 = vpop.f32.mrf.mxu2  ;;  %v7930_v26 = vpack.c.bf16 %v7870_v42, %v7869_v61 }
 0x778   : > { %v5932_v36 = vmax.f32 %v5740_v50, 0.0  ;;  %v7413_v44 = vunpack.c.l.b16 %v7268_v27  ;;  %v6948_v16 = vunpack.c.l.bf16 %v6880_v52  ;;  %v6244_v4 = vpack.c.bf16 %v6151_v34, %v6151_v34  ;;  %v7593_v24 = vpop.f32.mrf.mxu0 }
 0x779   : > { %8047 = vmatmul.bf16.gmra.mxu1 %v7930_v26  ;;  %v7741_v59 = vpack.c.bf16 %v7593_v24, %v7593_v24 }
 0x77a   : > { %v5964_v53 = vpack.c.bf16 %v5932_v36, %v5931_v8  ;;  %v6312_v18 = vunpack.c.l.bf16 %v6244_v4  ;;  %v12218_v49 = vpack.c.b16 %v7413_v44, %v7412_v5  ;;  %v7013_v25 = vadd.f32 %v12055_v37, %v6948_v16 }
 0x77b   : > { %v7806_v21 = vunpack.c.l.bf16 %v7741_v59 }
 0x77c   : > { %v6377_v3 = vadd.f32 %v11945_v39, %v6312_v18  ;;  %6193 = vmatmul.bf16.gmra.mxu2 %v5964_v53  ;;  %7632 = vmatmul.bf16.gmra.mxu0 %v12218_v49  ;;  %v7205_v48 = vmax.f32 %v7013_v25, 0.0 }
 0x77d   : > { %v6761_v33 = vpop.f32.mrf.mxu3  ;;  %v7871_v6 = vadd.f32 %v12171_v14, %v7806_v21 }
 0x77e   : > { %v6569_v56 = vmax.f32 %v6377_v3, 0.0  ;;  %v6881_v9 = vpack.c.bf16 %v6761_v33, %v6761_v33  ;;  %v7269_v47 = vpack.c.bf16 %v7205_v48, %v7205_v48 }
 0x77f   : > { %v6154_v13 = vpop.f32.mrf.mxu2 }
 0x780   : > { %v6949_v1 = vunpack.c.l.bf16 %v6881_v9  ;;  %v6610_v54 = vpack.c.bf16 %v6569_v56, %v6568_v63  ;;  %v7595_v31 = vpop.f32.mrf.mxu0  ;;  %v6245_v60 = vpack.c.bf16 %v6154_v13, %v6154_v13  ;;  %v7414_v32 = vunpack.c.l.b16 %v7269_v47 }
 0x781   : > { %v7742_v0 = vpack.c.bf16 %v7595_v31, %v7595_v31 }
 0x782   : > { %v7014_v46 = vadd.f32 %v12055_v37, %v6949_v1  ;;  %6803 = vmatmul.bf16.gmra.mxu3 %v6610_v54  ;;  %v6313_v28 = vunpack.c.l.bf16 %v6245_v60 }
 0x783   : > { %v7807_v51 = vunpack.c.l.bf16 %v7742_v0 }
 0x784   : > { %v7206_v62 = vmax.f32 %v7014_v46, 0.0  ;;  %v6378_v52 = vadd.f32 %v11945_v39, %v6313_v28 }
 0x785   : > { %v6764_v41 = vpop.f32.mrf.mxu3  ;;  %v7872_v2 = vadd.f32 %v12171_v14, %v7807_v51 }
 0x786   : > { %v7270_v29 = vpack.c.bf16 %v7206_v62, %v7206_v62  ;;  %v6882_v40 = vpack.c.bf16 %v6764_v41, %v6764_v41  ;;  %v6570_v4 = vmax.f32 %v6378_v52, 0.0 }
 0x787   : > { %v6156_v19 = vpop.f32.mrf.mxu2  ;;  %v7931_v27 = vpack.c.bf16 %v7872_v2, %v7871_v6 }
 0x788   : > { %v7415_v61 = vunpack.c.l.b16 %v7270_v29  ;;  %v6950_v50 = vunpack.c.l.bf16 %v6882_v40  ;;  %v6246_v10 = vpack.c.bf16 %v6156_v19, %v6156_v19  ;;  %v7598_v42 = vpop.f32.mrf.mxu0 }
 0x789   : > { %8052 = vmatmul.bf16.gmra.mxu1 %v7931_v27  ;;  %v7743_v44 = vpack.c.bf16 %v7598_v42, %v7598_v42 }
 0x78a   : > { %v6314_v5 = vunpack.c.l.bf16 %v6246_v10  ;;  %v12230_v8 = vpack.c.b16 %v7415_v61, %v7414_v32  ;;  %v7015_v36 = vadd.f32 %v12055_v37, %v6950_v50 }
 0x78b   : > { %v7808_v25 = vunpack.c.l.bf16 %v7743_v44 }
 0x78c   : > { %v6379_v34 = vadd.f32 %v11945_v39, %v6314_v5  ;;  %7637 = vmatmul.bf16.gmra.mxu0 %v12230_v8  ;;  %v7207_v24 = vmax.f32 %v7015_v36, 0.0 }
 0x78d   : > { %v6766_v16 = vpop.f32.mrf.mxu3  ;;  %v7873_v13 = vadd.f32 %v12171_v14, %v7808_v25 }
 0x78e   : > { %v6571_v26 = vmax.f32 %v6379_v34, 0.0  ;;  %v6883_v20 = vpack.c.bf16 %v6766_v16, %v6766_v16  ;;  %v7271_v56 = vpack.c.bf16 %v7207_v24, %v7207_v24 }
 0x78f   : > { %v6159_v53 = vpop.f32.mrf.mxu2 }
 0x790   : > { %v6951_v12 = vunpack.c.l.bf16 %v6883_v20  ;;  %v6611_v18 = vpack.c.bf16 %v6571_v26, %v6570_v4  ;;  %v7600_v3 = vpop.f32.mrf.mxu0  ;;  %v6247_v33 = vpack.c.bf16 %v6159_v53, %v6159_v53  ;;  %v7416_v60 = vunpack.c.l.b16 %v7271_v56 }
 0x791   : > { %v7744_v63 = vpack.c.bf16 %v7600_v3, %v7600_v3 }
 0x792   : > { %v7016_v59 = vadd.f32 %v12055_v37, %v6951_v12  ;;  %6808 = vmatmul.bf16.gmra.mxu3 %v6611_v18  ;;  %v6315_v21 = vunpack.c.l.bf16 %v6247_v33 }
 0x793   : > { %v7809_v48 = vunpack.c.l.bf16 %v7744_v63 }
 0x794   : > { %v7208_v9 = vmax.f32 %v7016_v59, 0.0  ;;  %v6380_v29 = vadd.f32 %v11945_v39, %v6315_v21 }
 0x795   : > { %v6769_v1 = vpop.f32.mrf.mxu3  ;;  %v7874_v31 = vadd.f32 %v12171_v14, %v7809_v48 }
 0x796   : > { %v7272_v54 = vpack.c.bf16 %v7208_v9, %v7208_v9  ;;  %v6884_v46 = vpack.c.bf16 %v6769_v1, %v6769_v1  ;;  %v6572_v50 = vmax.f32 %v6380_v29, 0.0 }
 0x797   : > { %v6161_v0 = vpop.f32.mrf.mxu2  ;;  %v7932_v6 = vpack.c.bf16 %v7874_v31, %v7873_v13 }
 0x798   : > { %v7417_v47 = vunpack.c.l.b16 %v7272_v54  ;;  %v6952_v62 = vunpack.c.l.bf16 %v6884_v46  ;;  %v6248_v51 = vpack.c.bf16 %v6161_v0, %v6161_v0  ;;  %v7603_v41 = vpop.f32.mrf.mxu0 }
 0x799   : > { %8057 = vmatmul.bf16.gmra.mxu1 %v7932_v6  ;;  %v7745_v19 = vpack.c.bf16 %v7603_v41, %v7603_v41 }
 0x79a   : > { %v6316_v28 = vunpack.c.l.bf16 %v6248_v51  ;;  %v12239_v2 = vpack.c.b16 %v7417_v47, %v7416_v60  ;;  %v7017_v40 = vadd.f32 %v12055_v37, %v6952_v62 }
 0x79b   : > { %v7810_v36 = vunpack.c.l.bf16 %v7745_v19 }
 0x79c   : > { %v6381_v32 = vadd.f32 %v11945_v39, %v6316_v28  ;;  %7642 = vmatmul.bf16.gmra.mxu0 %v12239_v2  ;;  %v7209_v7 = vmax.f32 %v7017_v40, 0.0 }
 0x79d   : > { %v6771_v61 = vpop.f32.mrf.mxu3  ;;  %v7875_v53 = vadd.f32 %v12171_v14, %v7810_v36 }
 0x79e   : > { %v6573_v10 = vmax.f32 %v6381_v32, 0.0  ;;  %v6885_v27 = vpack.c.bf16 %v6771_v61, %v6771_v61  ;;  %v7273_v26 = vpack.c.bf16 %v7209_v7, %v7209_v7 }
 0x79f   : > { %v6164_v42 = vpop.f32.mrf.mxu2 }
 0x7a0   : > { %v6953_v52 = vunpack.c.l.bf16 %v6885_v27  ;;  %v6612_v5 = vpack.c.bf16 %v6573_v10, %v6572_v50  ;;  %v7605_v34 = vpop.f32.mrf.mxu0  ;;  %v6249_v16 = vpack.c.bf16 %v6164_v42, %v6164_v42  ;;  %v7418_v33 = vunpack.c.l.b16 %v7273_v26 }
 0x7a1   : > { %v7746_v4 = vpack.c.bf16 %v7605_v34, %v7605_v34 }
 0x7a2   : > { %v7018_v44 = vadd.f32 %v12055_v37, %v6953_v52  ;;  %6813 = vmatmul.bf16.gmra.mxu3 %v6612_v5  ;;  %v6317_v25 = vunpack.c.l.bf16 %v6249_v16 }
 0x7a3   : > { %v7811_v24 = vunpack.c.l.bf16 %v7746_v4 }
 0x7a4   : > { %v7210_v20 = vmax.f32 %v7018_v44, 0.0  ;;  %v6382_v54 = vadd.f32 %v11945_v39, %v6317_v25 }
 0x7a5   : > { %v6774_v12 = vpop.f32.mrf.mxu3  ;;  %v7876_v3 = vadd.f32 %v12171_v14, %v7811_v24 }
 0x7a6   : > { %v7274_v18 = vpack.c.bf16 %v7210_v20, %v7210_v20  ;;  %v6886_v59 = vpack.c.bf16 %v6774_v12, %v6774_v12  ;;  %v6574_v62 = vmax.f32 %v6382_v54, 0.0 }
 0x7a7   : > { %v6166_v63 = vpop.f32.mrf.mxu2  ;;  %v7933_v13 = vpack.c.bf16 %v7876_v3, %v7875_v53 }
 0x7a8   : > { %v7419_v56 = vunpack.c.l.b16 %v7274_v18  ;;  %v6954_v9 = vunpack.c.l.bf16 %v6886_v59  ;;  %v6250_v48 = vpack.c.bf16 %v6166_v63, %v6166_v63  ;;  %v7608_v1 = vpop.f32.mrf.mxu0 }
 0x7a9   : > { %8062 = vmatmul.bf16.gmra.mxu1 %v7933_v13  ;;  %v7747_v0 = vpack.c.bf16 %v7608_v1, %v7608_v1 }
 0x7aa   : > { %v6318_v21 = vunpack.c.l.bf16 %v6250_v48  ;;  %v12248_v31 = vpack.c.b16 %v7419_v56, %v7418_v33  ;;  %v7019_v46 = vadd.f32 %v12055_v37, %v6954_v9  ;;  %v10219_v56 = vld [vmem:[%s12870_s4] sm:$0xff] }
 0x7ab   : > { %v7812_v32 = vunpack.c.l.bf16 %v7747_v0  ;;  %8974 = vmatpush.bf16.msrb.mxu2 %v10219_v56 }
 0x7ac   : > { %v6383_v60 = vadd.f32 %v11945_v39, %v6318_v21  ;;  %7647 = vmatmul.bf16.gmra.mxu0 %v12248_v31  ;;  %v7211_v41 = vmax.f32 %v7019_v46, 0.0 }
 0x7ad   : > { %v6776_v47 = vpop.f32.mrf.mxu3  ;;  %v7877_v52 = vadd.f32 %v12171_v14, %v7812_v32 }
 0x7ae   : > { %v6575_v51 = vmax.f32 %v6383_v60, 0.0  ;;  %v6887_v6 = vpack.c.bf16 %v6776_v47, %v6776_v47  ;;  %v7275_v27 = vpack.c.bf16 %v7211_v41, %v7211_v41 }
 0x7af   : > { %v6169_v29 = vpop.f32.mrf.mxu2 }
 0x7b0   : > { %v6955_v28 = vunpack.c.l.bf16 %v6887_v6  ;;  %v6613_v40 = vpack.c.bf16 %v6575_v51, %v6574_v62  ;;  %v7610_v19 = vpop.f32.mrf.mxu0  ;;  %v6251_v50 = vpack.c.bf16 %v6169_v29, %v6169_v29  ;;  %v7420_v4 = vunpack.c.l.b16 %v7275_v27 }
 0x7b1   : > { %v7748_v10 = vpack.c.bf16 %v7610_v19, %v7610_v19 }
 0x7b2   : > { %v7020_v61 = vadd.f32 %v12055_v37, %v6955_v28  ;;  %6818 = vmatmul.bf16.gmra.mxu3 %v6613_v40  ;;  %v6319_v34 = vunpack.c.l.bf16 %v6251_v50 }
 0x7b3   : > { %v7813_v42 = vunpack.c.l.bf16 %v7748_v10 }
 0x7b4   : > { %v7212_v7 = vmax.f32 %v7020_v61, 0.0  ;;  %v6384_v25 = vadd.f32 %v11945_v39, %v6319_v34  ;;  %v8257_v61 = vperm.slane %v12045_v17, 1 }
 0x7b5   : > { %v6779_v5 = vpop.f32.mrf.mxu3  ;;  %v7878_v44 = vadd.f32 %v12171_v14, %v7813_v42  ;;  %v13005_v42 = vld [vmem:[#allocation11_spill] sm:$0xff] }
 0x7b6   : > { %v7276_v36 = vpack.c.bf16 %v7212_v7, %v7212_v7  ;;  %v6888_v16 = vpack.c.bf16 %v6779_v5, %v6779_v5  ;;  %v6576_v13 = vmax.f32 %v6384_v25, 0.0 }
 0x7b7   : > { %v6171_v26 = vpop.f32.mrf.mxu2  ;;  %v7934_v12 = vpack.c.bf16 %v7878_v44, %v7877_v52 }
 0x7b8   : > { %v7421_v20 = vunpack.c.l.b16 %v7276_v36  ;;  %v6956_v24 = vunpack.c.l.bf16 %v6888_v16  ;;  %v6252_v53 = vpack.c.bf16 %v6171_v26, %v6171_v26 }
 0x7b9   : > { %v7613_v18 = vpop.f32.mrf.mxu0  ;;  %8067 = vmatmul.bf16.gmra.mxu1 %v7934_v12 }
 0x7ba   : > { %v6320_v3 = vunpack.c.l.bf16 %v6252_v53  ;;  %v12257_v59 = vpack.c.b16 %v7421_v20, %v7420_v4  ;;  %v7021_v33 = vadd.f32 %v12055_v37, %v6956_v24  ;;  %v7749_v9 = vpack.c.bf16 %v7613_v18, %v7613_v18 }
 0x7bb   : > { %v12270_v24 = vunpack.c.l.bf16 %v8257_v61 }
 0x7bc   : > { %v6385_v63 = vadd.f32 %v11945_v39, %v6320_v3  ;;  %7652 = vmatmul.bf16.gmra.mxu0 %v12257_v59  ;;  %v7213_v21 = vmax.f32 %v7021_v33, 0.0  ;;  %v7814_v47 = vunpack.c.l.bf16 %v7749_v9  ;;  %v10227_v3 = vld [vmem:[%s12870_s4 + $0x40] sm:$0xff] }
 0x7bd   : > { %v6781_v48 = vpop.f32.mrf.mxu3  ;;  %10243 = vmatpush.bf16.msrb.mxu3 %v10227_v3  ;;  %9143 = vmatpush.bf16.msra.mxu0 %v10227_v3 }
 0x7be   : > { %v6577_v1 = vmax.f32 %v6385_v63, 0.0  ;;  %v6889_v54 = vpack.c.bf16 %v6781_v48, %v6781_v48  ;;  %v7277_v29 = vpack.c.bf16 %v7213_v21, %v7213_v21  ;;  %v7879_v32 = vadd.f32 %v12171_v14, %v7814_v47  ;;  %v13006_v21 = vld [vmem:[#allocation13_spill] sm:$0xff] }
 0x7bf   : > { %v6174_v46 = vpop.f32.mrf.mxu2 }
 0x7c0   : > { %v6957_v60 = vunpack.c.l.bf16 %v6889_v54  ;;  %v6614_v0 = vpack.c.bf16 %v6577_v1, %v6576_v13  ;;  %v6253_v6 = vpack.c.bf16 %v6174_v46, %v6174_v46  ;;  %v7422_v5 = vunpack.c.l.b16 %v7277_v29 }
 0x7c1   : > { %v7615_v62 = vpop.f32.mrf.mxu0 }
 0x7c2   : > { %v7022_v51 = vadd.f32 %v12055_v37, %v6957_v60  ;;  %v7750_v41 = vpack.c.bf16 %v7615_v62, %v7615_v62  ;;  %6823 = vmatmul.bf16.gmra.mxu3 %v6614_v0  ;;  %v6321_v10 = vunpack.c.l.bf16 %v6253_v6 }
 0x7c4   : > { %v7214_v28 = vmax.f32 %v7022_v51, 0.0  ;;  %v7815_v40 = vunpack.c.l.bf16 %v7750_v41  ;;  %v6386_v17 = vadd.f32 %v11945_v39, %v6321_v10 }
 0x7c5   : > { %v6784_v7 = vpop.f32.mrf.mxu3 }
 0x7c6   : > { %v8033_v19 = vpop.f32.mrf.mxu1  ;;  %v7278_v50 = vpack.c.bf16 %v7214_v28, %v7214_v28  ;;  %v7880_v27 = vadd.f32 %v12171_v14, %v7815_v40  ;;  %v6890_v36 = vpack.c.bf16 %v6784_v7, %v6784_v7  ;;  %v6578_v48 = vmax.f32 %v6386_v17, 0.0 }
 0x7c7   : > { %v8034_v52 = vadd.f32 %v8033_v19, %v13005_v42  ;;  %v6176_v34 = vpop.f32.mrf.mxu2 }
 0x7c8   : > { %v7423_v44 = vunpack.c.l.b16 %v7278_v50  ;;  %v6254_v16 = vpack.c.bf16 %v6176_v34, %v6176_v34  ;;  %v7935_v26 = vpack.c.bf16 %v7880_v27, %v7879_v32  ;;  %v6958_v20 = vunpack.c.l.bf16 %v6890_v36 }
 0x7c9   : > { %v8193_v4 = vpack.c.bf16 %v8034_v52, %v8034_v52  ;;  %v7618_v53 = vpop.f32.mrf.mxu0 }
 0x7ca   : > { %v6322_v12 = vunpack.c.l.bf16 %v6254_v16  ;;  %8072 = vmatmul.bf16.gmra.mxu1 %v7935_v26  ;;  %v12273_v25 = vpack.c.b16 %v7423_v44, %v7422_v5  ;;  %v7023_v63 = vadd.f32 %v12055_v37, %v6958_v20  ;;  %v7751_v1 = vpack.c.bf16 %v7618_v53, %v7618_v53 }
 0x7cb   : > { %v8258_v18 = vunpack.c.l.bf16 %v8193_v4 }
 0x7cc   : > { %v6387_v33 = vadd.f32 %v11945_v39, %v6322_v12  ;;  %7657 = vmatmul.bf16.gmra.mxu0 %v12273_v25  ;;  %v7215_v51 = vmax.f32 %v7023_v63, 0.0  ;;  %v7816_v28 = vunpack.c.l.bf16 %v7751_v1  ;;  %v13007_v12 = vld [vmem:[#allocation15_spill] sm:$0xff] }
 0x7cd   : > { %v8323_v56 = vadd.f32 %v12270_v24, %v8258_v18  ;;  %v6786_v54 = vpop.f32.mrf.mxu3 }
 0x7ce   : > { %v8035_v9 = vpop.f32.mrf.mxu1  ;;  %v6579_v13 = vmax.f32 %v6387_v33, 0.0  ;;  %v6891_v60 = vpack.c.bf16 %v6786_v54, %v6786_v54  ;;  %v7279_v27 = vpack.c.bf16 %v7215_v51, %v7215_v51  ;;  %v7881_v52 = vadd.f32 %v12171_v14, %v7816_v28 }
 0x7cf   : > { %v8036_v46 = vadd.f32 %v8035_v9, %v13006_v21  ;;  %v6179_v0 = vpop.f32.mrf.mxu2  ;;  %v8515_v6 = vmax.f32 %v8323_v56, 0.0 }
 0x7d0   : > { %v6615_v62 = vpack.c.bf16 %v6579_v13, %v6578_v48  ;;  %v6959_v41 = vunpack.c.l.bf16 %v6891_v60  ;;  %v6255_v40 = vpack.c.bf16 %v6179_v0, %v6179_v0  ;;  %v7424_v33 = vunpack.c.l.b16 %v7279_v27 }
 0x7d1   : > { %v8194_v47 = vpack.c.bf16 %v8036_v46, %v8036_v46  ;;  %v7620_v29 = vpop.f32.mrf.mxu0  ;;  %v8579_v7 = vpack.c.bf16 %v8515_v6, %v8515_v6 }
 0x7d2   : > { %v7752_v19 = vpack.c.bf16 %v7620_v29, %v7620_v29  ;;  %v7024_v61 = vadd.f32 %v12055_v37, %v6959_v41  ;;  %6828 = vmatmul.bf16.gmra.mxu3 %v6615_v62  ;;  %v6323_v5 = vunpack.c.l.bf16 %v6255_v40 }
 0x7d3   : > { %v8259_v32 = vunpack.c.l.bf16 %v8194_v47  ;;  %v8707_v63 = vunpack.c.l.b16 %v8579_v7 }
 0x7d4   : > { %v7817_v10 = vunpack.c.l.bf16 %v7752_v19  ;;  %v7216_v42 = vmax.f32 %v7024_v61, 0.0  ;;  %v6388_v13 = vadd.f32 %v11945_v39, %v6323_v5  ;;  %v13008_v61 = vld [vmem:[#allocation17_spill] sm:$0xff] }
 0x7d5   : > { %v8324_v50 = vadd.f32 %v12270_v24, %v8259_v32  ;;  %v6789_v44 = vpop.f32.mrf.mxu3 }
 0x7d6   : > { %v7882_v34 = vadd.f32 %v12171_v14, %v7817_v10  ;;  %v7280_v16 = vpack.c.bf16 %v7216_v42, %v7216_v42  ;;  %v6892_v4 = vpack.c.bf16 %v6789_v44, %v6789_v44  ;;  %v8038_v20 = vpop.f32.mrf.mxu1  ;;  %v6580_v51 = vmax.f32 %v6388_v13, 0.0 }
 0x7d7   : > { %v8516_v36 = vmax.f32 %v8324_v50, 0.0  ;;  %v6181_v26 = vpop.f32.mrf.mxu2  ;;  %v8039_v18 = vadd.f32 %v8038_v20, %v13007_v12 }
 0x7d8   : > { %v6256_v17 = vpack.c.bf16 %v6181_v26, %v6181_v26  ;;  %v7936_v3 = vpack.c.bf16 %v7882_v34, %v7881_v52  ;;  %v7425_v56 = vunpack.c.l.b16 %v7280_v16  ;;  %v6960_v9 = vunpack.c.l.bf16 %v6892_v4 }
 0x7d9   : > { %v8580_v53 = vpack.c.bf16 %v8516_v36, %v8516_v36  ;;  %v7623_v48 = vpop.f32.mrf.mxu0  ;;  %v8195_v21 = vpack.c.bf16 %v8039_v18, %v8039_v18 }
 0x7da   : > { %v6324_v54 = vunpack.c.l.bf16 %v6256_v17  ;;  %8077 = vmatmul.bf16.gmra.mxu1 %v7936_v3  ;;  %v12289_v46 = vpack.c.b16 %v7425_v56, %v7424_v33  ;;  %v7025_v62 = vadd.f32 %v12055_v37, %v6960_v9  ;;  %v7753_v41 = vpack.c.bf16 %v7623_v48, %v7623_v48 }
 0x7db   : > { %v8708_v1 = vunpack.c.l.b16 %v8580_v53  ;;  %v8260_v47 = vunpack.c.l.bf16 %v8195_v21  ;;  %v13009_v21 = vld [vmem:[#allocation19_spill] sm:$0xff] }
 0x7dc   : > { %v6389_v0 = vadd.f32 %v11945_v39, %v6324_v54  ;;  %7662 = vmatmul.bf16.gmra.mxu0 %v12289_v46  ;;  %v7217_v27 = vmax.f32 %v7025_v62, 0.0  ;;  %v7818_v52 = vunpack.c.l.bf16 %v7753_v41 }
 0x7dd   : > { %v8771_v60 = vpack.c.b16 %v8708_v1, %v8707_v63  ;;  %v6791_v29 = vpop.f32.mrf.mxu3  ;;  %v8325_v28 = vadd.f32 %v12270_v24, %v8260_v47 }
 0x7de   : > { %v6581_v6 = vmax.f32 %v6389_v0, 0.0  ;;  %v6893_v40 = vpack.c.bf16 %v6791_v29, %v6791_v29  ;;  %v8040_v19 = vpop.f32.mrf.mxu1  ;;  %v7281_v20 = vpack.c.bf16 %v7217_v27, %v7217_v27  ;;  %v7883_v17 = vadd.f32 %v12171_v14, %v7818_v52 }
 0x7df   : > { %8975 = vmatmul.bf16.vlgmr.msrb.gmra.mxu2 %v8771_v60  ;;  %v6184_v32 = vpop.f32.mrf.mxu2  ;;  %v8041_v50 = vadd.f32 %v8040_v19, %v13008_v61  ;;  %v8517_v44 = vmax.f32 %v8325_v28, 0.0 }
 0x7e0   : > { %v6616_v10 = vpack.c.bf16 %v6581_v6, %v6580_v51  ;;  %v6961_v7 = vunpack.c.l.bf16 %v6893_v40  ;;  %v6257_v5 = vpack.c.bf16 %v6184_v32, %v6184_v32  ;;  %v7426_v47 = vunpack.c.l.b16 %v7281_v20 }
 0x7e1   : > { %v7625_v42 = vpop.f32.mrf.mxu0  ;;  %v8196_v36 = vpack.c.bf16 %v8041_v50, %v8041_v50  ;;  %v8581_v63 = vpack.c.bf16 %v8517_v44, %v8517_v44 }
 0x7e2   : > { %v7754_v34 = vpack.c.bf16 %v7625_v42, %v7625_v42  ;;  %v7026_v16 = vadd.f32 %v12055_v37, %v6961_v7  ;;  %6833 = vmatmul.bf16.gmra.mxu3 %v6616_v10  ;;  %v6325_v12 = vunpack.c.l.bf16 %v6257_v5 }
 0x7e3   : > { %v8261_v4 = vunpack.c.l.bf16 %v8196_v36  ;;  %v8709_v19 = vunpack.c.l.b16 %v8581_v63 }
 0x7e4   : > { %v7819_v26 = vunpack.c.l.bf16 %v7754_v34  ;;  %v7218_v53 = vmax.f32 %v7026_v16, 0.0  ;;  %v6390_v41 = vadd.f32 %v11945_v39, %v6325_v12 }
 0x7e5   : > { %v8326_v18 = vadd.f32 %v12270_v24, %v8261_v4  ;;  %v6794_v33 = vpop.f32.mrf.mxu3 }
 0x7e6   : > { %v7884_v3 = vadd.f32 %v12171_v14, %v7819_v26  ;;  %v7282_v56 = vpack.c.bf16 %v7218_v53, %v7218_v53  ;;  %v6894_v9 = vpack.c.bf16 %v6794_v33, %v6794_v33  ;;  %v8043_v13 = vpop.f32.mrf.mxu1  ;;  %v6582_v7 = vmax.f32 %v6390_v41, 0.0  ;;  %v13010_v26 = vld [vmem:[#allocation21_spill] sm:$0xff] }
 0x7e7   : > { %v6186_v48 = vpop.f32.mrf.mxu2  ;;  %v8518_v1 = vmax.f32 %v8326_v18, 0.0  ;;  %v8044_v60 = vadd.f32 %v8043_v13, %v13009_v21 }
 0x7e8   : > { %v6258_v54 = vpack.c.bf16 %v6186_v48, %v6186_v48  ;;  %v7937_v0 = vpack.c.bf16 %v7884_v3, %v7883_v17  ;;  %v7427_v62 = vunpack.c.l.b16 %v7282_v56  ;;  %v6962_v51 = vunpack.c.l.bf16 %v6894_v9 }
 0x7e9   : > { %v7628_v6 = vpop.f32.mrf.mxu0  ;;  %v8582_v29 = vpack.c.bf16 %v8518_v1, %v8518_v1  ;;  %v8197_v40 = vpack.c.bf16 %v8044_v60, %v8044_v60 }
 0x7ea   : > { %v6326_v28 = vunpack.c.l.bf16 %v6258_v54  ;;  %8082 = vmatmul.bf16.gmra.mxu1 %v7937_v0  ;;  %v12302_v32 = vpack.c.b16 %v7427_v62, %v7426_v47  ;;  %v7027_v27 = vadd.f32 %v12055_v37, %v6962_v51  ;;  %v7755_v52 = vpack.c.bf16 %v7628_v6, %v7628_v6 }
 0x7eb   : > { %v8262_v50 = vunpack.c.l.bf16 %v8197_v40  ;;  %v8710_v10 = vunpack.c.l.b16 %v8582_v29 }
 0x7ec   : > { %v6391_v61 = vadd.f32 %v11945_v39, %v6326_v28  ;;  %7667 = vmatmul.bf16.gmra.mxu0 %v12302_v32  ;;  %v7219_v17 = vmax.f32 %v7027_v27, 0.0  ;;  %v7820_v3 = vunpack.c.l.bf16 %v7755_v52 }
 0x7ed   : > { %v6796_v5 = vpop.f32.mrf.mxu3  ;;  %v8772_v36 = vpack.c.b16 %v8710_v10, %v8709_v19  ;;  %v8327_v34 = vadd.f32 %v12270_v24, %v8262_v50  ;;  %v13011_v50 = vld [vmem:[#allocation23_spill] sm:$0xff] }
 0x7ee   : > { %v6583_v42 = vmax.f32 %v6391_v61, 0.0  ;;  %v6895_v44 = vpack.c.bf16 %v6796_v5, %v6796_v5  ;;  %v8045_v4 = vpop.f32.mrf.mxu1  ;;  %v7283_v54 = vpack.c.bf16 %v7219_v17, %v7219_v17  ;;  %v7885_v60 = vadd.f32 %v12171_v14, %v7820_v3 }
 0x7ef   : > { %v6189_v16 = vpop.f32.mrf.mxu2  ;;  %v8046_v20 = vadd.f32 %v8045_v4, %v13010_v26  ;;  %8980 = vmatmul.bf16.gmra.mxu2 %v8772_v36  ;;  %v8519_v9 = vmax.f32 %v8327_v34, 0.0 }
 0x7f0   : > { %v6617_v53 = vpack.c.bf16 %v6583_v42, %v6582_v7  ;;  %v6963_v12 = vunpack.c.l.bf16 %v6895_v44  ;;  %v6259_v33 = vpack.c.bf16 %v6189_v16, %v6189_v16  ;;  %v7428_v7 = vunpack.c.l.b16 %v7283_v54  ;;  %v13012_v54 = vld [vmem:[#allocation25_spill] sm:$0xff] }
 0x7f1   : > { %v7630_v18 = vpop.f32.mrf.mxu0  ;;  %v8198_v63 = vpack.c.bf16 %v8046_v20, %v8046_v20  ;;  %v8583_v6 = vpack.c.bf16 %v8519_v9, %v8519_v9 }
 0x7f2   : > { %v7756_v56 = vpack.c.bf16 %v7630_v18, %v7630_v18  ;;  %v7028_v48 = vadd.f32 %v12055_v37, %v6963_v12  ;;  %6838 = vmatmul.bf16.gmra.mxu3 %v6617_v53  ;;  %v6327_v0 = vunpack.c.l.bf16 %v6259_v33 }
 0x7f3   : > { %v8263_v13 = vunpack.c.l.bf16 %v8198_v63  ;;  %v8711_v26 = vunpack.c.l.b16 %v8583_v6 }
 0x7f4   : > { %v7821_v1 = vunpack.c.l.bf16 %v7756_v56  ;;  %v7220_v21 = vmax.f32 %v7028_v48, 0.0  ;;  %v6392_v36 = vadd.f32 %v11945_v39, %v6327_v0 }
 0x7f5   : > { %v8328_v47 = vadd.f32 %v12270_v24, %v8263_v13  ;;  %v6799_v51 = vpop.f32.mrf.mxu3 }
 0x7f6   : > { %v7886_v62 = vadd.f32 %v12171_v14, %v7821_v1  ;;  %v7284_v41 = vpack.c.bf16 %v7220_v21, %v7220_v21  ;;  %v6896_v29 = vpack.c.bf16 %v6799_v51, %v6799_v51  ;;  %v8048_v40 = vpop.f32.mrf.mxu1  ;;  %v6584_v18 = vmax.f32 %v6392_v36, 0.0 }
 0x7f7   : > { %v6191_v28 = vpop.f32.mrf.mxu2  ;;  %v8520_v19 = vmax.f32 %v8328_v47, 0.0  ;;  %v8049_v10 = vadd.f32 %v8048_v40, %v13011_v50 }
 0x7f8   : > { %v6260_v61 = vpack.c.bf16 %v6191_v28, %v6191_v28  ;;  %v7938_v27 = vpack.c.bf16 %v7886_v62, %v7885_v60  ;;  %v7429_v42 = vunpack.c.l.b16 %v7284_v41  ;;  %v6964_v52 = vunpack.c.l.bf16 %v6896_v29 }
 0x7f9   : > { %v7633_v5 = vpop.f32.mrf.mxu0  ;;  %v8584_v34 = vpack.c.bf16 %v8520_v19, %v8520_v19  ;;  %v8199_v16 = vpack.c.bf16 %v8049_v10, %v8049_v10 }
 0x7fa   : > { %v6328_v44 = vunpack.c.l.bf16 %v6260_v61  ;;  %8087 = vmatmul.bf16.gmra.mxu1 %v7938_v27  ;;  %v12315_v4 = vpack.c.b16 %v7429_v42, %v7428_v7  ;;  %v7029_v12 = vadd.f32 %v12055_v37, %v6964_v52  ;;  %v7757_v33 = vpack.c.bf16 %v7633_v5, %v7633_v5 }
 0x7fb   : > { %v8264_v53 = vunpack.c.l.bf16 %v8199_v16  ;;  %v8712_v17 = vunpack.c.l.b16 %v8584_v34 }
 0x7fc   : > { %v6393_v20 = vadd.f32 %v11945_v39, %v6328_v44  ;;  %7672 = vmatmul.bf16.gmra.mxu0 %v12315_v4  ;;  %v7221_v0 = vmax.f32 %v7029_v12, 0.0  ;;  %v7822_v51 = vunpack.c.l.bf16 %v7757_v33 }
 0x7fd   : > { %v6801_v63 = vpop.f32.mrf.mxu3  ;;  %v8773_v56 = vpack.c.b16 %v8712_v17, %v8711_v26  ;;  %v8329_v9 = vadd.f32 %v12270_v24, %v8264_v53  ;;  %v13013_v17 = vld [vmem:[#allocation27_spill] sm:$0xff] }
 0x7fe   : > { %v6585_v3 = vmax.f32 %v6393_v20, 0.0  ;;  %v6897_v48 = vpack.c.bf16 %v6801_v63, %v6801_v63  ;;  %v8050_v1 = vpop.f32.mrf.mxu1  ;;  %v7285_v50 = vpack.c.bf16 %v7221_v0, %v7221_v0  ;;  %v7887_v27 = vadd.f32 %v12171_v14, %v7822_v51 }
 0x7ff   : > { %v6194_v13 = vpop.f32.mrf.mxu2  ;;  %v8051_v21 = vadd.f32 %v8050_v1, %v13012_v54  ;;  %8985 = vmatmul.bf16.gmra.mxu2 %v8773_v56  ;;  %v8521_v28 = vmax.f32 %v8329_v9, 0.0 }
 0x800   : > { %v6618_v60 = vpack.c.bf16 %v6585_v3, %v6584_v18  ;;  %v6965_v47 = vunpack.c.l.bf16 %v6897_v48  ;;  %v6261_v6 = vpack.c.bf16 %v6194_v13, %v6194_v13  ;;  %v7430_v3 = vunpack.c.l.b16 %v7285_v50  ;;  %v13014_v50 = vld [vmem:[#allocation29_spill] sm:$0xff] }
 0x801   : > { %v7635_v62 = vpop.f32.mrf.mxu0  ;;  %v8200_v41 = vpack.c.bf16 %v8051_v21, %v8051_v21  ;;  %v8585_v36 = vpack.c.bf16 %v8521_v28, %v8521_v28 }
 0x802   : > { %v7758_v29 = vpack.c.bf16 %v7635_v62, %v7635_v62  ;;  %v7030_v40 = vadd.f32 %v12055_v37, %v6965_v47  ;;  %6843 = vmatmul.bf16.gmra.mxu3 %v6618_v60  ;;  %v6329_v7 = vunpack.c.l.bf16 %v6261_v6 }
 0x803   : > { %v8265_v19 = vunpack.c.l.bf16 %v8200_v41  ;;  %v8713_v21 = vunpack.c.l.b16 %v8585_v36 }
 0x804   : > { %v7823_v61 = vunpack.c.l.bf16 %v7758_v29  ;;  %v7222_v10 = vmax.f32 %v7030_v40, 0.0  ;;  %v6394_v9 = vadd.f32 %v11945_v39, %v6329_v7 }
 0x805   : > { %v8330_v42 = vadd.f32 %v12270_v24, %v8265_v19  ;;  %v6804_v5 = vpop.f32.mrf.mxu3 }
 0x806   : > { %v7888_v52 = vadd.f32 %v12171_v14, %v7823_v61  ;;  %v7286_v34 = vpack.c.bf16 %v7222_v10, %v7222_v10  ;;  %v6898_v44 = vpack.c.bf16 %v6804_v5, %v6804_v5  ;;  %v8053_v26 = vpop.f32.mrf.mxu1  ;;  %v6586_v51 = vmax.f32 %v6394_v9, 0.0 }
 0x807   : > { %v6196_v16 = vpop.f32.mrf.mxu2  ;;  %v8522_v20 = vmax.f32 %v8330_v42, 0.0  ;;  %v8054_v12 = vadd.f32 %v8053_v26, %v13013_v17 }
 0x808   : > { %v6262_v53 = vpack.c.bf16 %v6196_v16, %v6196_v16  ;;  %v7939_v18 = vpack.c.bf16 %v7888_v52, %v7887_v27  ;;  %v7431_v33 = vunpack.c.l.b16 %v7286_v34  ;;  %v6966_v63 = vunpack.c.l.bf16 %v6898_v44 }
 0x809   : > { %v7638_v56 = vpop.f32.mrf.mxu0  ;;  %v8586_v48 = vpack.c.bf16 %v8522_v20, %v8522_v20  ;;  %v8201_v1 = vpack.c.bf16 %v8054_v12, %v8054_v12 }
 0x80a   : > { %v6330_v13 = vunpack.c.l.bf16 %v6262_v53  ;;  %8092 = vmatmul.bf16.gmra.mxu1 %v7939_v18  ;;  %v12328_v54 = vpack.c.b16 %v7431_v33, %v7430_v3  ;;  %v7031_v62 = vadd.f32 %v12055_v37, %v6966_v63  ;;  %v7759_v41 = vpack.c.bf16 %v7638_v56, %v7638_v56 }
 0x80b   : > { %v8266_v0 = vunpack.c.l.bf16 %v8201_v1  ;;  %v8714_v47 = vunpack.c.l.b16 %v8586_v48 }
 0x80c   : > { %v6395_v60 = vadd.f32 %v11945_v39, %v6330_v13  ;;  %7677 = vmatmul.bf16.gmra.mxu0 %v12328_v54  ;;  %v7223_v39 = vmax.f32 %v7031_v62, 0.0  ;;  %v7824_v52 = vunpack.c.l.bf16 %v7759_v41  ;;  %v13015_v13 = vld [vmem:[#allocation31_spill] sm:$0xff] }
 0x80d   : > { %v6806_v29 = vpop.f32.mrf.mxu3  ;;  %v8774_v28 = vpack.c.b16 %v8714_v47, %v8713_v21  ;;  %v8331_v61 = vadd.f32 %v12270_v24, %v8266_v0 }
 0x80e   : > { %v6587_v6 = vmax.f32 %v6395_v60, 0.0  ;;  %v6899_v40 = vpack.c.bf16 %v6806_v29, %v6806_v29  ;;  %v8055_v19 = vpop.f32.mrf.mxu1  ;;  %v7287_v20 = vpack.c.bf16 %v7223_v39, %v7223_v39  ;;  %v7889_v17 = vadd.f32 %v12171_v14, %v7824_v52 }
 0x80f   : > { %v8056_v10 = vadd.f32 %v8055_v19, %v13014_v50  ;;  %8990 = vmatmul.bf16.gmra.mxu2 %v8774_v28  ;;  %v8523_v44 = vmax.f32 %v8331_v61, 0.0 }
 0x810   : > { %v6619_v27 = vpack.c.bf16 %v6587_v6, %v6586_v51  ;;  %v6967_v7 = vunpack.c.l.bf16 %v6899_v40  ;;  %v7432_v60 = vunpack.c.l.b16 %v7287_v20 }
 0x811   : > { %v7640_v42 = vpop.f32.mrf.mxu0  ;;  %v8202_v5 = vpack.c.bf16 %v8056_v10, %v8056_v10  ;;  %v8587_v9 = vpack.c.bf16 %v8523_v44, %v8523_v44 }
 0x812   : > { %v7760_v36 = vpack.c.bf16 %v7640_v42, %v7640_v42  ;;  %v7032_v34 = vadd.f32 %v12055_v37, %v6967_v7  ;;  %6848 = vmatmul.bf16.gmra.mxu3 %v6619_v27  ;;  %v13016_v42 = vld [vmem:[#allocation33_spill] sm:$0xff] }
 0x813   : > { %v8267_v16 = vunpack.c.l.bf16 %v8202_v5  ;;  %v8715_v29 = vunpack.c.l.b16 %v8587_v9 }
 0x814   : > { %v7825_v26 = vunpack.c.l.bf16 %v7760_v36  ;;  %v7224_v53 = vmax.f32 %v7032_v34, 0.0 }
 0x815   : > { %v8332_v12 = vadd.f32 %v12270_v24, %v8267_v16  ;;  %v6809_v3 = vpop.f32.mrf.mxu3 }
 0x816   : > { %v7890_v18 = vadd.f32 %v12171_v14, %v7825_v26  ;;  %v7288_v33 = vpack.c.bf16 %v7224_v53, %v7224_v53  ;;  %v6900_v63 = vpack.c.bf16 %v6809_v3, %v6809_v3  ;;  %v8058_v56 = vpop.f32.mrf.mxu1 }
 0x817   : > { %v8524_v48 = vmax.f32 %v8332_v12, 0.0  ;;  %v8059_v1 = vadd.f32 %v8058_v56, %v13015_v13 }
 0x818   : > { %v7940_v21 = vpack.c.bf16 %v7890_v18, %v7889_v17  ;;  %v7433_v0 = vunpack.c.l.b16 %v7288_v33  ;;  %v6968_v47 = vunpack.c.l.bf16 %v6900_v63 }
 0x819   : > { %v7643_v62 = vpop.f32.mrf.mxu0  ;;  %v8588_v51 = vpack.c.bf16 %v8524_v48, %v8524_v48  ;;  %v8203_v6 = vpack.c.bf16 %v8059_v1, %v8059_v1 }
 0x81a   : > { %8097 = vmatmul.bf16.gmra.mxu1 %v7940_v21  ;;  %v12340_v41 = vpack.c.b16 %v7433_v0, %v7432_v60  ;;  %v7033_v19 = vadd.f32 %v12055_v37, %v6968_v47  ;;  %v7761_v61 = vpack.c.bf16 %v7643_v62, %v7643_v62  ;;  %v13017_v0 = vld [vmem:[#allocation35_spill] sm:$0xff] }
 0x81b   : > { %v8268_v28 = vunpack.c.l.bf16 %v8203_v6  ;;  %v8716_v40 = vunpack.c.l.b16 %v8588_v51 }
 0x81c   : > { %7682 = vmatmul.bf16.gmra.mxu0 %v12340_v41  ;;  %v7225_v5 = vmax.f32 %v7033_v19, 0.0  ;;  %v7826_v44 = vunpack.c.l.bf16 %v7761_v61 }
 0x81d   : > { %v6811_v50 = vpop.f32.mrf.mxu3  ;;  %v8775_v10 = vpack.c.b16 %v8716_v40, %v8715_v29  ;;  %v8333_v7 = vadd.f32 %v12270_v24, %v8268_v28 }
 0x81e   : > { %v6901_v27 = vpack.c.bf16 %v6811_v50, %v6811_v50  ;;  %v8060_v39 = vpop.f32.mrf.mxu1  ;;  %v7289_v18 = vpack.c.bf16 %v7225_v5, %v7225_v5  ;;  %v7891_v33 = vadd.f32 %v12171_v14, %v7826_v44 }
 0x81f   : > { %v8061_v52 = vadd.f32 %v8060_v39, %v13016_v42  ;;  %8995 = vmatmul.bf16.gmra.mxu2 %v8775_v10  ;;  %v8525_v53 = vmax.f32 %v8333_v7, 0.0 }
 0x820   : > { %v6969_v36 = vunpack.c.l.bf16 %v6901_v27  ;;  %v7434_v62 = vunpack.c.l.b16 %v7289_v18 }
 0x821   : > { %v7645_v34 = vpop.f32.mrf.mxu0  ;;  %v8204_v16 = vpack.c.bf16 %v8061_v52, %v8061_v52  ;;  %v8589_v21 = vpack.c.bf16 %v8525_v53, %v8525_v53 }
 0x822   : > { %v7762_v26 = vpack.c.bf16 %v7645_v34, %v7645_v34  ;;  %v7034_v20 = vadd.f32 %v12055_v37, %v6969_v36  ;;  %9149 = vmatmul.bf16.vlgmr.msrb.gmra.mxu3 %v12083_v22  ;;  %v13018_v34 = vld [vmem:[#allocation37_spill] sm:$0xff] }
 0x823   : > { %v8269_v17 = vunpack.c.l.bf16 %v8204_v16  ;;  %v8717_v61 = vunpack.c.l.b16 %v8589_v21 }
 0x824   : > { %v7827_v12 = vunpack.c.l.bf16 %v7762_v26  ;;  %v7226_v3 = vmax.f32 %v7034_v20, 0.0 }
 0x825   : > { %v8334_v63 = vadd.f32 %v12270_v24, %v8269_v17  ;;  %v6814_v9 = vpop.f32.mrf.mxu3 }
 0x826   : > { %v7892_v56 = vadd.f32 %v12171_v14, %v7827_v12  ;;  %v7290_v48 = vpack.c.bf16 %v7226_v3, %v7226_v3  ;;  %v6902_v13 = vpack.c.bf16 %v6814_v9, %v6814_v9  ;;  %v8063_v1 = vpop.f32.mrf.mxu1 }
 0x827   : > { %v8526_v60 = vmax.f32 %v8334_v63, 0.0  ;;  %v8064_v47 = vadd.f32 %v8063_v1, %v13017_v0 }
 0x828   : > { %v7941_v22 = vpack.c.bf16 %v7892_v56, %v7891_v33  ;;  %v7435_v51 = vunpack.c.l.b16 %v7290_v48  ;;  %v6970_v6 = vunpack.c.l.bf16 %v6902_v13 }
 0x829   : > { %v7648_v29 = vpop.f32.mrf.mxu0  ;;  %v8590_v28 = vpack.c.bf16 %v8526_v60, %v8526_v60  ;;  %v8205_v40 = vpack.c.bf16 %v8064_v47, %v8064_v47 }
 0x82a   : > { %8102 = vmatmul.bf16.gmra.mxu1 %v7941_v22  ;;  %v12352_v19 = vpack.c.b16 %v7435_v51, %v7434_v62  ;;  %v7035_v27 = vadd.f32 %v12055_v37, %v6970_v6  ;;  %v7763_v39 = vpack.c.bf16 %v7648_v29, %v7648_v29  ;;  %v13019_v51 = vld [vmem:[#allocation39_spill] sm:$0xff] }
 0x82b   : > { %v8270_v50 = vunpack.c.l.bf16 %v8205_v40  ;;  %v8718_v10 = vunpack.c.l.b16 %v8590_v28 }
 0x82c   : > { %7687 = vmatmul.bf16.gmra.mxu0 %v12352_v19  ;;  %v7227_v16 = vmax.f32 %v7035_v27, 0.0  ;;  %v7828_v53 = vunpack.c.l.bf16 %v7763_v39 }
 0x82d   : > { %v6816_v7 = vpop.f32.mrf.mxu3  ;;  %v8776_v42 = vpack.c.b16 %v8718_v10, %v8717_v61  ;;  %v8335_v36 = vadd.f32 %v12270_v24, %v8270_v50 }
 0x82e   : > { %v6903_v52 = vpack.c.bf16 %v6816_v7, %v6816_v7  ;;  %v8065_v5 = vpop.f32.mrf.mxu1  ;;  %v7291_v56 = vpack.c.bf16 %v7227_v16, %v7227_v16  ;;  %v7893_v48 = vadd.f32 %v12171_v14, %v7828_v53 }
 0x82f   : > { %v8066_v44 = vadd.f32 %v8065_v5, %v13018_v34  ;;  %9000 = vmatmul.bf16.gmra.mxu2 %v8776_v42  ;;  %v8527_v3 = vmax.f32 %v8335_v36, 0.0 }
 0x830   : > { %v6971_v26 = vunpack.c.l.bf16 %v6903_v52  ;;  %v7436_v29 = vunpack.c.l.b16 %v7291_v56 }
 0x831   : > { %v7650_v20 = vpop.f32.mrf.mxu0  ;;  %v8206_v17 = vpack.c.bf16 %v8066_v44, %v8066_v44  ;;  %v8591_v22 = vpack.c.bf16 %v8527_v3, %v8527_v3 }
 0x832   : > { %v7764_v12 = vpack.c.bf16 %v7650_v20, %v7650_v20  ;;  %v7036_v18 = vadd.f32 %v12055_v37, %v6971_v26  ;;  %9154 = vmatmul.bf16.gmra.mxu3 %v12094_v23  ;;  %v13020_v20 = vld [vmem:[#allocation41_spill] sm:$0xff] }
 0x833   : > { %v8271_v33 = vunpack.c.l.bf16 %v8206_v17  ;;  %v8719_v39 = vunpack.c.l.b16 %v8591_v22 }
 0x834   : > { %v7829_v63 = vunpack.c.l.bf16 %v7764_v12  ;;  %v7228_v9 = vmax.f32 %v7036_v18, 0.0 }
 0x835   : > { %v8336_v13 = vadd.f32 %v12270_v24, %v8271_v33  ;;  %v6819_v21 = vpop.f32.mrf.mxu3 }
 0x836   : > { %v7894_v1 = vadd.f32 %v12171_v14, %v7829_v63  ;;  %v7292_v60 = vpack.c.bf16 %v7228_v9, %v7228_v9  ;;  %v6904_v0 = vpack.c.bf16 %v6819_v21, %v6819_v21  ;;  %v8068_v47 = vpop.f32.mrf.mxu1 }
 0x837   : > { %v8528_v62 = vmax.f32 %v8336_v13, 0.0  ;;  %v8069_v6 = vadd.f32 %v8068_v47, %v13019_v51 }
 0x838   : > { %v7942_v23 = vpack.c.bf16 %v7894_v1, %v7893_v48  ;;  %v7437_v28 = vunpack.c.l.b16 %v7292_v60  ;;  %v6972_v40 = vunpack.c.l.bf16 %v6904_v0 }
 0x839   : > { %v7653_v61 = vpop.f32.mrf.mxu0  ;;  %v8592_v50 = vpack.c.bf16 %v8528_v62, %v8528_v62  ;;  %v8207_v10 = vpack.c.bf16 %v8069_v6, %v8069_v6 }
 0x83a   : > { %8107 = vmatmul.bf16.gmra.mxu1 %v7942_v23  ;;  %v12364_v27 = vpack.c.b16 %v7437_v28, %v7436_v29  ;;  %v7037_v52 = vadd.f32 %v12055_v37, %v6972_v40  ;;  %v7765_v5 = vpack.c.bf16 %v7653_v61, %v7653_v61  ;;  %v13021_v28 = vld [vmem:[#allocation43_spill] sm:$0xff] }
 0x83b   : > { %v8272_v7 = vunpack.c.l.bf16 %v8207_v10  ;;  %v8720_v42 = vunpack.c.l.b16 %v8592_v50 }
 0x83c   : > { %7692 = vmatmul.bf16.gmra.mxu0 %v12364_v27  ;;  %v7229_v17 = vmax.f32 %v7037_v52, 0.0  ;;  %v7830_v3 = vunpack.c.l.bf16 %v7765_v5 }
 0x83d   : > { %v6821_v36 = vpop.f32.mrf.mxu3  ;;  %v8777_v34 = vpack.c.b16 %v8720_v42, %v8719_v39  ;;  %v8337_v26 = vadd.f32 %v12270_v24, %v8272_v7 }
 0x83e   : > { %v6905_v44 = vpack.c.bf16 %v6821_v36, %v6821_v36  ;;  %v8070_v16 = vpop.f32.mrf.mxu1  ;;  %v7293_v1 = vpack.c.bf16 %v7229_v17, %v7229_v17  ;;  %v7895_v60 = vadd.f32 %v12171_v14, %v7830_v3 }
 0x83f   : > { %v8071_v53 = vadd.f32 %v8070_v16, %v13020_v20  ;;  %9005 = vmatmul.bf16.gmra.mxu2 %v8777_v34  ;;  %v8529_v9 = vmax.f32 %v8337_v26, 0.0 }
 0x840   : > { %v6973_v12 = vunpack.c.l.bf16 %v6905_v44  ;;  %v7438_v61 = vunpack.c.l.b16 %v7293_v1 }
 0x841   : > { %v7655_v18 = vpop.f32.mrf.mxu0  ;;  %v8208_v33 = vpack.c.bf16 %v8071_v53, %v8071_v53  ;;  %v8593_v23 = vpack.c.bf16 %v8529_v9, %v8529_v9 }
 0x842   : > { %v7766_v63 = vpack.c.bf16 %v7655_v18, %v7655_v18  ;;  %v7038_v56 = vadd.f32 %v12055_v37, %v6973_v12  ;;  %9159 = vmatmul.bf16.gmra.mxu3 %v12108_v45  ;;  %v13022_v18 = vld [vmem:[#allocation44_spill] sm:$0xff] }
 0x843   : > { %v8273_v48 = vunpack.c.l.bf16 %v8208_v33  ;;  %v8721_v5 = vunpack.c.l.b16 %v8593_v23 }
 0x844   : > { %v7831_v13 = vunpack.c.l.bf16 %v7766_v63  ;;  %v7230_v21 = vmax.f32 %v7038_v56, 0.0 }
 0x845   : > { %v8338_v0 = vadd.f32 %v12270_v24, %v8273_v48  ;;  %v6824_v22 = vpop.f32.mrf.mxu3 }
 0x846   : > { %v7896_v47 = vadd.f32 %v12171_v14, %v7831_v13  ;;  %v7294_v62 = vpack.c.bf16 %v7230_v21, %v7230_v21  ;;  %v6906_v51 = vpack.c.bf16 %v6824_v22, %v6824_v22 }
 0x847   : > { %v8073_v6 = vpop.f32.mrf.mxu1  ;;  %v8530_v29 = vmax.f32 %v8338_v0, 0.0 }
 0x848   : > { %v8074_v40 = vadd.f32 %v8073_v6, %v13021_v28  ;;  %v7943_v45 = vpack.c.bf16 %v7896_v47, %v7895_v60  ;;  %v7439_v50 = vunpack.c.l.b16 %v7294_v62  ;;  %v6974_v10 = vunpack.c.l.bf16 %v6906_v51 }
 0x849   : > { %v7658_v39 = vpop.f32.mrf.mxu0  ;;  %v8594_v7 = vpack.c.bf16 %v8530_v29, %v8530_v29 }
 0x84a   : > { %v8209_v42 = vpack.c.bf16 %v8074_v40, %v8074_v40  ;;  %8112 = vmatmul.bf16.gmra.mxu1 %v7943_v45  ;;  %v12376_v52 = vpack.c.b16 %v7439_v50, %v7438_v61  ;;  %v7039_v44 = vadd.f32 %v12055_v37, %v6974_v10  ;;  %v7767_v16 = vpack.c.bf16 %v7658_v39, %v7658_v39  ;;  %v13023_v50 = vld [vmem:[#allocation46_spill] sm:$0xff] }
 0x84b   : > { %v8722_v34 = vunpack.c.l.b16 %v8594_v7 }
 0x84c   : > { %v8274_v36 = vunpack.c.l.bf16 %v8209_v42  ;;  %7697 = vmatmul.bf16.gmra.mxu0 %v12376_v52  ;;  %v7231_v33 = vmax.f32 %v7039_v44, 0.0  ;;  %v7832_v9 = vunpack.c.l.bf16 %v7767_v16 }
 0x84d   : > { %v6826_v26 = vpop.f32.mrf.mxu3  ;;  %v8778_v20 = vpack.c.b16 %v8722_v34, %v8721_v5 }
 0x84e   : > { %v6907_v53 = vpack.c.bf16 %v6826_v26, %v6826_v26  ;;  %v8339_v12 = vadd.f32 %v12270_v24, %v8274_v36  ;;  %v7295_v47 = vpack.c.bf16 %v7231_v33, %v7231_v33  ;;  %v7897_v62 = vadd.f32 %v12171_v14, %v7832_v9 }
 0x84f   : > { %v8075_v17 = vpop.f32.mrf.mxu1  ;;  %9010 = vmatmul.bf16.gmra.mxu2 %v8778_v20 }
 0x850   : > { %v8076_v3 = vadd.f32 %v8075_v17, %v13022_v18  ;;  %v6975_v63 = vunpack.c.l.bf16 %v6907_v53  ;;  %v8531_v21 = vmax.f32 %v8339_v12, 0.0  ;;  %v7440_v39 = vunpack.c.l.b16 %v7295_v47 }
 0x851   : > { %v7660_v56 = vpop.f32.mrf.mxu0 }
 0x852   : > { %v8210_v48 = vpack.c.bf16 %v8076_v3, %v8076_v3  ;;  %v7768_v13 = vpack.c.bf16 %v7660_v56, %v7660_v56  ;;  %v7040_v1 = vadd.f32 %v12055_v37, %v6975_v63  ;;  %9164 = vmatmul.bf16.gmra.mxu3 %v12120_v43  ;;  %v8595_v45 = vpack.c.bf16 %v8531_v21, %v8531_v21  ;;  %v13024_v56 = vld [vmem:[#allocation48_spill] sm:$0xff] }
 0x854   : > { %v8275_v60 = vunpack.c.l.bf16 %v8210_v48  ;;  %v7833_v0 = vunpack.c.l.bf16 %v7768_v13  ;;  %v7232_v22 = vmax.f32 %v7040_v1, 0.0  ;;  %v8723_v16 = vunpack.c.l.b16 %v8595_v45 }
 0x855   : > { %v6829_v23 = vpop.f32.mrf.mxu3 }
 0x856   : > { %v8340_v51 = vadd.f32 %v12270_v24, %v8275_v60  ;;  %v7898_v6 = vadd.f32 %v12171_v14, %v7833_v0  ;;  %v7296_v29 = vpack.c.bf16 %v7232_v22, %v7232_v22  ;;  %v6908_v28 = vpack.c.bf16 %v6829_v23, %v6829_v23 }
 0x857   : > { %v8078_v40 = vpop.f32.mrf.mxu1 }
 0x858   : > { %v8532_v61 = vmax.f32 %v8340_v51, 0.0  ;;  %v8079_v10 = vadd.f32 %v8078_v40, %v13023_v50  ;;  %v7944_v43 = vpack.c.bf16 %v7898_v6, %v7897_v62  ;;  %v7441_v7 = vunpack.c.l.b16 %v7296_v29 }
 0x859   : > { %v6976_v42 = vunpack.c.l.bf16 %v6908_v28  ;;  %v7663_v34 = vpop.f32.mrf.mxu0 }
 0x85a   : > { %v8596_v5 = vpack.c.bf16 %v8532_v61, %v8532_v61  ;;  %v8211_v36 = vpack.c.bf16 %v8079_v10, %v8079_v10  ;;  %8117 = vmatmul.bf16.gmra.mxu1 %v7944_v43  ;;  %v12388_v44 = vpack.c.b16 %v7441_v7, %v7440_v39  ;;  %v7769_v18 = vpack.c.bf16 %v7663_v34, %v7663_v34 }
 0x85b   : > { %v7041_v53 = vadd.f32 %v12055_v37, %v6976_v42  ;;  %v13025_v42 = vld [vmem:[#allocation50_spill] sm:$0xff] }
 0x85c   : > { %v8276_v26 = vunpack.c.l.bf16 %v8211_v36  ;;  %v8724_v20 = vunpack.c.l.b16 %v8596_v5  ;;  %7702 = vmatmul.bf16.gmra.mxu0 %v12388_v44  ;;  %v7834_v0 = vunpack.c.l.bf16 %v7769_v18 }
 0x85d   : > { %v6831_v17 = vpop.f32.mrf.mxu3  ;;  %v7233_v48 = vmax.f32 %v7041_v53, 0.0 }
 0x85e   : > { %v8779_v12 = vpack.c.b16 %v8724_v20, %v8723_v16  ;;  %v6909_v3 = vpack.c.bf16 %v6831_v17, %v6831_v17  ;;  %v8341_v63 = vadd.f32 %v12270_v24, %v8276_v26  ;;  %v7899_v45 = vadd.f32 %v12171_v14, %v7834_v0  ;;  %v13026_v0 = vld [vmem:[#allocation52_spill] sm:$0xff] }
 0x85f   : > { %v8080_v33 = vpop.f32.mrf.mxu1  ;;  %v7297_v6 = vpack.c.bf16 %v7233_v48, %v7233_v48 }
 0x860   : > { %v8081_v9 = vadd.f32 %v8080_v33, %v13024_v56  ;;  %9015 = vmatmul.bf16.gmra.mxu2 %v8779_v12  ;;  %v6977_v13 = vunpack.c.l.bf16 %v6909_v3  ;;  %v8533_v62 = vmax.f32 %v8341_v63, 0.0 }
 0x861   : > { %v7665_v60 = vpop.f32.mrf.mxu0 }
 0x862   : > { %v12394_v1 = vpop.f32.mrf.mxu2  ;;  %v8212_v21 = vpack.c.bf16 %v8081_v9, %v8081_v9  ;;  %v7042_v47 = vadd.f32 %v12055_v37, %v6977_v13  ;;  %v7770_v22 = vpack.c.bf16 %v7665_v60, %v7665_v60  ;;  %9169 = vmatmul.bf16.gmra.mxu3 %v12132_v57  ;;  %v8597_v39 = vpack.c.bf16 %v8533_v62, %v8533_v62 }
 0x863   : > { %v7442_v57 = vunpack.c.l.b16 %v7297_v6 }
 0x864   : > { %v8277_v51 = vunpack.c.l.bf16 %v8212_v21  ;;  %v7234_v23 = vmax.f32 %v7042_v47, 0.0  ;;  %v7835_v29 = vunpack.c.l.bf16 %v7770_v22  ;;  %v8725_v18 = vunpack.c.l.b16 %v8597_v39 }
 0x865   : > { %v6834_v40 = vpop.f32.mrf.mxu3 }
 0x866   : > { %v8342_v28 = vadd.f32 %v12270_v24, %v8277_v51  ;;  %v7298_v61 = vpack.c.bf16 %v7234_v23, %v7234_v23  ;;  %v7900_v50 = vadd.f32 %v12171_v14, %v7835_v29  ;;  %v6910_v10 = vpack.c.bf16 %v6834_v40, %v6834_v40 }
 0x867   : > { %v8083_v43 = vpop.f32.mrf.mxu1 }
 0x868   : > { %v8534_v7 = vmax.f32 %v8342_v28, 0.0  ;;  %v8084_v5 = vadd.f32 %v8083_v43, %v13025_v42  ;;  %v7443_v36 = vunpack.c.l.b16 %v7298_v61  ;;  %v6978_v34 = vunpack.c.l.bf16 %v6910_v10 }
 0x869   : > { %v7945_v16 = vpack.c.bf16 %v7900_v50, %v7899_v45  ;;  %v7668_v17 = vpop.f32.mrf.mxu0 }
 0x86a   : > { %v12402_v26 = vpop.f32.mrf.mxu2  ;;  %v8598_v20 = vpack.c.bf16 %v8534_v7, %v8534_v7  ;;  %v8213_v53 = vpack.c.bf16 %v8084_v5, %v8084_v5  ;;  %v12404_v12 = vpack.c.b16 %v7443_v36, %v7442_v57  ;;  %v7043_v63 = vadd.f32 %v12055_v37, %v6978_v34 }
 0x86b   : > { %8122 = vmatmul.bf16.gmra.mxu1 %v7945_v16  ;;  %v7771_v48 = vpack.c.bf16 %v7668_v17, %v7668_v17 }
 0x86c   : > { %v8278_v3 = vunpack.c.l.bf16 %v8213_v53  ;;  %v8726_v33 = vunpack.c.l.b16 %v8598_v20  ;;  %7707 = vmatmul.bf16.gmra.mxu0 %v12404_v12  ;;  %v7235_v22 = vmax.f32 %v7043_v63, 0.0 }
 0x86d   : > { %v6836_v56 = vpop.f32.mrf.mxu3  ;;  %v7836_v23 = vunpack.c.l.bf16 %v7771_v48 }
 0x86e   : > { %v8780_v9 = vpack.c.b16 %v8726_v33, %v8725_v18  ;;  %v6911_v13 = vpack.c.bf16 %v6836_v56, %v6836_v56  ;;  %v8343_v60 = vadd.f32 %v12270_v24, %v8278_v3  ;;  %v7299_v50 = vpack.c.bf16 %v7235_v22, %v7235_v22 }
 0x86f   : > { %v8085_v21 = vpop.f32.mrf.mxu1  ;;  %v7901_v42 = vadd.f32 %v12171_v14, %v7836_v23 }
 0x870   : > { %v8086_v47 = vadd.f32 %v8085_v21, %v13026_v0  ;;  %9020 = vmatmul.bf16.gmra.mxu2 %v8780_v9  ;;  %v6979_v62 = vunpack.c.l.bf16 %v6911_v13  ;;  %v8535_v45 = vmax.f32 %v8343_v60, 0.0  ;;  %v7444_v17 = vunpack.c.l.b16 %v7299_v50 }
 0x871   : > { %v7670_v6 = vpop.f32.mrf.mxu0 }
 0x872   : > { %v8214_v51 = vpack.c.bf16 %v8086_v47, %v8086_v47  ;;  %v7044_v29 = vadd.f32 %v12055_v37, %v6979_v62  ;;  %v7772_v28 = vpack.c.bf16 %v7670_v6, %v7670_v6  ;;  %9174 = vmatmul.bf16.gmra.mxu3 %v12141_v30  ;;  %v12412_v40 = vpop.f32.mrf.mxu2  ;;  %v8599_v16 = vpack.c.bf16 %v8535_v45, %v8535_v45  ;;  %v13027_v30 = vld [vmem:[#allocation53_spill] sm:$0xff] }
 0x874   : > { %v8279_v61 = vunpack.c.l.bf16 %v8214_v51  ;;  %v7236_v10 = vmax.f32 %v7044_v29, 0.0  ;;  %v7837_v43 = vunpack.c.l.bf16 %v7772_v28  ;;  %v8727_v21 = vunpack.c.l.b16 %v8599_v16  ;;  %v13028_v28 = vld [vmem:[#allocation54_spill] sm:$0xff] }
 0x875   : > { %v6839_v7 = vpop.f32.mrf.mxu3 }
 0x876   : > { %v8344_v39 = vadd.f32 %v12270_v24, %v8279_v61  ;;  %v7300_v5 = vpack.c.bf16 %v7236_v10, %v7236_v10  ;;  %v7902_v57 = vadd.f32 %v12171_v14, %v7837_v43  ;;  %v6912_v36 = vpack.c.bf16 %v6839_v7, %v6839_v7 }
 0x877   : > { %v8088_v34 = vpop.f32.mrf.mxu1 }
 0x878   : > { %v8536_v20 = vmax.f32 %v8344_v39, 0.0  ;;  %v8089_v53 = vadd.f32 %v8088_v34, %v13027_v30  ;;  %v7445_v18 = vunpack.c.l.b16 %v7300_v5  ;;  %v6980_v3 = vunpack.c.l.bf16 %v6912_v36 }
 0x879   : > { %v7946_v33 = vpack.c.bf16 %v7902_v57, %v7901_v42  ;;  %v7673_v9 = vpop.f32.mrf.mxu0 }
 0x87a   : > { %v8600_v63 = vpack.c.bf16 %v8536_v20, %v8536_v20  ;;  %v8215_v56 = vpack.c.bf16 %v8089_v53, %v8089_v53  ;;  %v12418_v48 = vpop.f32.mrf.mxu2  ;;  %v12420_v13 = vpack.c.b16 %v7445_v18, %v7444_v17  ;;  %v7045_v47 = vadd.f32 %v12055_v37, %v6980_v3 }
 0x87b   : > { %8127 = vmatmul.bf16.gmra.mxu1 %v7946_v33  ;;  %v7773_v51 = vpack.c.bf16 %v7673_v9, %v7673_v9 }
 0x87c   : > { %v8280_v60 = vunpack.c.l.bf16 %v8215_v56  ;;  %v8728_v0 = vunpack.c.l.b16 %v8600_v63  ;;  %7712 = vmatmul.bf16.gmra.mxu0 %v12420_v13  ;;  %v7237_v61 = vmax.f32 %v7045_v47, 0.0 }
 0x87d   : > { %v6841_v22 = vpop.f32.mrf.mxu3  ;;  %v7838_v39 = vunpack.c.l.bf16 %v7773_v51 }
 0x87e   : > { %v8781_v62 = vpack.c.b16 %v8728_v0, %v8727_v21  ;;  %v6913_v6 = vpack.c.bf16 %v6841_v22, %v6841_v22  ;;  %v8345_v29 = vadd.f32 %v12270_v24, %v8280_v60  ;;  %v7301_v34 = vpack.c.bf16 %v7237_v61, %v7237_v61 }
 0x87f   : > { %v8090_v23 = vpop.f32.mrf.mxu1  ;;  %v7903_v17 = vadd.f32 %v12171_v14, %v7838_v39 }
 0x880   : > { %v8091_v45 = vadd.f32 %v8090_v23, %v13028_v28  ;;  %9025 = vmatmul.bf16.gmra.mxu2 %v8781_v62  ;;  %v6981_v50 = vunpack.c.l.bf16 %v6913_v6  ;;  %v8537_v57 = vmax.f32 %v8345_v29, 0.0  ;;  %v7446_v60 = vunpack.c.l.b16 %v7301_v34 }
 0x881   : > { %v7675_v43 = vpop.f32.mrf.mxu0 }
 0x882   : > { %v8216_v10 = vpack.c.bf16 %v8091_v45, %v8091_v45  ;;  %v7046_v7 = vadd.f32 %v12055_v37, %v6981_v50  ;;  %v7774_v42 = vpack.c.bf16 %v7675_v43, %v7675_v43  ;;  %9179 = vmatmul.bf16.gmra.mxu3 %v12153_v11  ;;  %v12428_v5 = vpop.f32.mrf.mxu2  ;;  %v8601_v56 = vpack.c.bf16 %v8537_v57, %v8537_v57  ;;  %v13029_v11 = vld [vmem:[#allocation55_spill] sm:$0xff] }
 0x884   : > { %v8281_v36 = vunpack.c.l.bf16 %v8216_v10  ;;  %v7238_v16 = vmax.f32 %v7046_v7, 0.0  ;;  %v7839_v20 = vunpack.c.l.bf16 %v7774_v42  ;;  %v8729_v28 = vunpack.c.l.b16 %v8601_v56 }
 0x885   : > { %v6844_v53 = vpop.f32.mrf.mxu3 }
 0x886   : > { %v8346_v30 = vadd.f32 %v12270_v24, %v8281_v36  ;;  %v7302_v18 = vpack.c.bf16 %v7238_v16, %v7238_v16  ;;  %v7904_v3 = vadd.f32 %v12171_v14, %v7839_v20  ;;  %v6914_v33 = vpack.c.bf16 %v6844_v53, %v6844_v53  ;;  %v13030_v36 = vld [vmem:[#allocation56_spill] sm:$0xff] }
 0x887   : > { %v8093_v63 = vpop.f32.mrf.mxu1 }
 0x888   : > { %v8538_v9 = vmax.f32 %v8346_v30, 0.0  ;;  %v8094_v21 = vadd.f32 %v8093_v63, %v13029_v11  ;;  %v7447_v0 = vunpack.c.l.b16 %v7302_v18  ;;  %v6982_v47 = vunpack.c.l.bf16 %v6914_v33 }
 0x889   : > { %v7947_v22 = vpack.c.bf16 %v7904_v3, %v7903_v17  ;;  %v7678_v6 = vpop.f32.mrf.mxu0 }
 0x88a   : > { %v8602_v62 = vpack.c.bf16 %v8538_v9, %v8538_v9  ;;  %v8217_v51 = vpack.c.bf16 %v8094_v21, %v8094_v21  ;;  %v12434_v23 = vpop.f32.mrf.mxu2  ;;  %v12436_v29 = vpack.c.b16 %v7447_v0, %v7446_v60  ;;  %v7047_v50 = vadd.f32 %v12055_v37, %v6982_v47 }
 0x88b   : > { %8132 = vmatmul.bf16.gmra.mxu1 %v7947_v22  ;;  %v7775_v39 = vpack.c.bf16 %v7678_v6, %v7678_v6 }
 0x88c   : > { %v8282_v45 = vunpack.c.l.bf16 %v8217_v51  ;;  %v8730_v61 = vunpack.c.l.b16 %v8602_v62  ;;  %7717 = vmatmul.bf16.gmra.mxu0 %v12436_v29  ;;  %v7239_v16 = vmax.f32 %v7047_v50, 0.0 }
 0x88d   : > { %v6846_v10 = vpop.f32.mrf.mxu3  ;;  %v7840_v17 = vunpack.c.l.bf16 %v7775_v39 }
 0x88e   : > { %v8782_v43 = vpack.c.b16 %v8730_v61, %v8729_v28  ;;  %v6915_v7 = vpack.c.bf16 %v6846_v10, %v6846_v10  ;;  %v8347_v57 = vadd.f32 %v12270_v24, %v8282_v45  ;;  %v7303_v9 = vpack.c.bf16 %v7239_v16, %v7239_v16 }
 0x88f   : > { %v8095_v42 = vpop.f32.mrf.mxu1  ;;  %v7905_v47 = vadd.f32 %v12171_v14, %v7840_v17 }
 0x890   : > { %v8096_v34 = vadd.f32 %v8095_v42, %v13030_v36  ;;  %9030 = vmatmul.bf16.gmra.mxu2 %v8782_v43  ;;  %v6983_v20 = vunpack.c.l.bf16 %v6915_v7  ;;  %v8539_v63 = vmax.f32 %v8347_v57, 0.0  ;;  %v7448_v50 = vunpack.c.l.b16 %v7303_v9 }
 0x891   : > { %v7680_v53 = vpop.f32.mrf.mxu0 }
 0x892   : > { %v8218_v30 = vpack.c.bf16 %v8096_v34, %v8096_v34  ;;  %v7048_v18 = vadd.f32 %v12055_v37, %v6983_v20  ;;  %v7776_v3 = vpack.c.bf16 %v7680_v53, %v7680_v53  ;;  %9184 = vmatmul.bf16.gmra.mxu3 %v12164_v15  ;;  %v12444_v33 = vpop.f32.mrf.mxu2  ;;  %v8603_v28 = vpack.c.bf16 %v8539_v63, %v8539_v63  ;;  %v13031_v15 = vld [vmem:[#allocation58_spill] sm:$0xff] }
 0x894   : > { %v8283_v56 = vunpack.c.l.bf16 %v8218_v30  ;;  %v7240_v11 = vmax.f32 %v7048_v18, 0.0  ;;  %v7841_v21 = vunpack.c.l.bf16 %v7776_v3  ;;  %v8731_v16 = vunpack.c.l.b16 %v8603_v28 }
 0x895   : > { %v6849_v0 = vpop.f32.mrf.mxu3 }
 0x896   : > { %v8348_v60 = vadd.f32 %v12270_v24, %v8283_v56  ;;  %v7304_v22 = vpack.c.bf16 %v7240_v11, %v7240_v11  ;;  %v7906_v62 = vadd.f32 %v12171_v14, %v7841_v21  ;;  %v6916_v51 = vpack.c.bf16 %v6849_v0, %v6849_v0  ;;  %v13032_v11 = vld [vmem:[#allocation59_spill] sm:$0xff] }
 0x897   : > { %v8098_v6 = vpop.f32.mrf.mxu1 }
 0x898   : > { %v8540_v45 = vmax.f32 %v8348_v60, 0.0  ;;  %v8099_v61 = vadd.f32 %v8098_v6, %v13031_v15  ;;  %v7449_v10 = vunpack.c.l.b16 %v7304_v22  ;;  %v6984_v43 = vunpack.c.l.bf16 %v6916_v51 }
 0x899   : > { %v7948_v39 = vpack.c.bf16 %v7906_v62, %v7905_v47  ;;  %v7683_v57 = vpop.f32.mrf.mxu0  ;;  %v12462_v62 = vld [vmem:[%s12871_s5] ss:$0 sm:$0xff] }
 0x89a   : > { %v8604_v7 = vpack.c.bf16 %v8540_v45, %v8540_v45  ;;  %v8219_v42 = vpack.c.bf16 %v8099_v61, %v8099_v61  ;;  %v12450_v36 = vpop.f32.mrf.mxu2  ;;  %v12452_v34 = vpack.c.b16 %v7449_v10, %v7448_v50  ;;  %v7049_v53 = vadd.f32 %v12055_v37, %v6984_v43 }
 0x89b   : > { %8137 = vmatmul.bf16.gmra.mxu1 %v7948_v39  ;;  %v7777_v3 = vpack.c.bf16 %v7683_v57, %v7683_v57  ;;  %v8982_v50 = vadd.f32 %v12462_v62, %v12412_v40 }
 0x89c   : > { %v8284_v20 = vunpack.c.l.bf16 %v8219_v42  ;;  %v8732_v30 = vunpack.c.l.b16 %v8604_v7  ;;  %7722 = vmatmul.bf16.gmra.mxu0 %v12452_v34  ;;  %v7241_v60 = vmax.f32 %v7049_v53, 0.0 }
 0x89d   : > { %v6851_v17 = vpop.f32.mrf.mxu3  ;;  %v7842_v51 = vunpack.c.l.bf16 %v7777_v3 }
 0x89e   : > { %v8783_v18 = vpack.c.b16 %v8732_v30, %v8731_v16  ;;  %v6917_v63 = vpack.c.bf16 %v6851_v17, %v6851_v17  ;;  %v8349_v9 = vadd.f32 %v12270_v24, %v8284_v20  ;;  %v7305_v10 = vpack.c.bf16 %v7241_v60, %v7241_v60  ;;  %v13033_v17 = vld [vmem:[#allocation60_spill] sm:$0xff] }
 0x89f   : > { %v8100_v56 = vpop.f32.mrf.mxu1 }
 0x8a0   : > { %v8101_v21 = vadd.f32 %v8100_v56, %v13032_v11  ;;  %9035 = vmatmul.bf16.gmra.mxu2 %v8783_v18  ;;  %v6985_v0 = vunpack.c.l.bf16 %v6917_v63  ;;  %v8541_v15 = vmax.f32 %v8349_v9, 0.0  ;;  %v7450_v3 = vunpack.c.l.b16 %v7305_v10 }
 0x8a1   : > { %v7685_v22 = vpop.f32.mrf.mxu0 }
 0x8a2   : > { %v8220_v47 = vpack.c.bf16 %v8101_v21, %v8101_v21  ;;  %v7050_v6 = vadd.f32 %v12055_v37, %v6985_v0  ;;  %v7778_v28 = vpack.c.bf16 %v7685_v22, %v7685_v22  ;;  %9189 = vmatmul.bf16.gmra.mxu3 %v12182_v58  ;;  %v12466_v45 = vpop.f32.mrf.mxu2  ;;  %v7907_v37 = vadd.f32 %v12171_v14, %v7842_v51 }
 0x8a3   : > { %v8605_v30 = vpack.c.bf16 %v8541_v15, %v8541_v15  ;;  %v8984_v51 = vadd.f32 %v12462_v62, %v12418_v48 }
 0x8a4   : > { %v8285_v61 = vunpack.c.l.bf16 %v8220_v47  ;;  %v7242_v43 = vmax.f32 %v7050_v6, 0.0  ;;  %v7843_v39 = vunpack.c.l.bf16 %v7778_v28 }
 0x8a5   : > { %v9150_v42 = vpop.f32.mrf.mxu3  ;;  %v8733_v0 = vunpack.c.l.b16 %v8605_v30 }
 0x8a6   : > { %v8350_v7 = vadd.f32 %v12270_v24, %v8285_v61  ;;  %v7306_v57 = vpack.c.bf16 %v7242_v43, %v7242_v43  ;;  %v7908_v58 = vadd.f32 %v12171_v14, %v7843_v39  ;;  %v9151_v16 = vadd.f32 %v9150_v42, %v8982_v50  ;;  %v13034_v43 = vld [vmem:[#allocation61_spill] sm:$0xff] }
 0x8a7   : > { %v8103_v20 = vpop.f32.mrf.mxu1 }
 0x8a8   : > { %v8542_v53 = vmax.f32 %v8350_v7, 0.0  ;;  %v8104_v18 = vadd.f32 %v8103_v20, %v13033_v17  ;;  %v7451_v63 = vunpack.c.l.b16 %v7306_v57  ;;  %9307 = vst [vmem:[%s12476_s12 + $0x10] sm:$0xff] %v9151_v16  ;;  %v7949_v40 = vpack.c.bf16 %v7908_v58, %v7907_v37 }
 0x8a9   : > { %v7688_v11 = vpop.f32.mrf.mxu0  ;;  %v8987_v20 = vadd.f32 %v12462_v62, %v12428_v5 }
 0x8aa   : > { %v8606_v56 = vpack.c.bf16 %v8542_v53, %v8542_v53  ;;  %v8221_v9 = vpack.c.bf16 %v8104_v18, %v8104_v18  ;;  %v12479_v21 = vpop.f32.mrf.mxu2  ;;  %v12481_v60 = vpack.c.b16 %v7451_v63, %v7450_v3  ;;  %v7779_v15 = vpack.c.bf16 %v7688_v11, %v7688_v11 }
 0x8ab   : > { %8142 = vmatmul.bf16.gmra.mxu1 %v7949_v40 }
 0x8ac   : > { %v8286_v47 = vunpack.c.l.bf16 %v8221_v9  ;;  %v8734_v22 = vunpack.c.l.b16 %v8606_v56  ;;  %7727 = vmatmul.bf16.gmra.mxu0 %v12481_v60  ;;  %v7844_v37 = vunpack.c.l.bf16 %v7779_v15 }
 0x8ad   : > { %v9152_v6 = vpop.f32.mrf.mxu3 }
 0x8ae   : > { %v8784_v28 = vpack.c.b16 %v8734_v22, %v8733_v0  ;;  %v9153_v61 = vadd.f32 %v9152_v6, %v8984_v51  ;;  %v8351_v10 = vadd.f32 %v12270_v24, %v8286_v47  ;;  %v7909_v18 = vadd.f32 %v12171_v14, %v7844_v37  ;;  %v13036_v37 = vld [vmem:[#allocation63_spill] sm:$0xff] }
 0x8af   : > { %v8105_v50 = vpop.f32.mrf.mxu1 }
 0x8b0   : > { %v8106_v39 = vadd.f32 %v8105_v50, %v13034_v43  ;;  %9040 = vmatmul.bf16.gmra.mxu2 %v8784_v28  ;;  %9308 = vst [vmem:[%s12476_s12 + $0x18] sm:$0xff] %v9153_v61  ;;  %v8543_v58 = vmax.f32 %v8351_v10, 0.0  ;;  %v8989_v61 = vadd.f32 %v12462_v62, %v12434_v23 }
 0x8b1   : > { %v7690_v42 = vpop.f32.mrf.mxu0 }
 0x8b2   : > { %v8222_v7 = vpack.c.bf16 %v8106_v39, %v8106_v39  ;;  %v7780_v57 = vpack.c.bf16 %v7690_v42, %v7690_v42  ;;  %9194 = vmatmul.bf16.gmra.mxu3 %v12193_v55  ;;  %v12490_v48 = vpop.f32.mrf.mxu2  ;;  %v8607_v56 = vpack.c.bf16 %v8543_v58, %v8543_v58  ;;  %v13035_v55 = vld [vmem:[#allocation62_spill] sm:$0xff] }
 0x8b4   : > { %v8287_v16 = vunpack.c.l.bf16 %v8222_v7  ;;  %v7845_v30 = vunpack.c.l.bf16 %v7780_v57  ;;  %v8735_v6 = vunpack.c.l.b16 %v8607_v56 }
 0x8b5   : > { %v9155_v17 = vpop.f32.mrf.mxu3 }
 0x8b6   : > { %v8352_v53 = vadd.f32 %v12270_v24, %v8287_v16  ;;  %v7910_v3 = vadd.f32 %v12171_v14, %v7845_v30  ;;  %v9156_v63 = vadd.f32 %v9155_v17, %v8987_v20  ;;  %v8992_v17 = vadd.f32 %v12462_v62, %v12444_v33 }
 0x8b7   : > { %v8108_v40 = vpop.f32.mrf.mxu1 }
 0x8b8   : > { %v8544_v9 = vmax.f32 %v8352_v53, 0.0  ;;  %v8109_v11 = vadd.f32 %v8108_v40, %v13035_v55  ;;  %9309 = vst [vmem:[%s12476_s12 + $0x20] sm:$0xff] %v9156_v63  ;;  %v7950_v0 = vpack.c.bf16 %v7910_v3, %v7909_v18 }
 0x8b9   : > { %v7693_v51 = vpop.f32.mrf.mxu0 }
 0x8ba   : > { %v8608_v47 = vpack.c.bf16 %v8544_v9, %v8544_v9  ;;  %v8223_v22 = vpack.c.bf16 %v8109_v11, %v8109_v11  ;;  %v12499_v5 = vpop.f32.mrf.mxu2  ;;  %v7781_v43 = vpack.c.bf16 %v7693_v51, %v7693_v51 }
 0x8bb   : > { %8147 = vmatmul.bf16.gmra.mxu1 %v7950_v0 }
 0x8bc   : > { %v8288_v28 = vunpack.c.l.bf16 %v8223_v22  ;;  %v8736_v15 = vunpack.c.l.b16 %v8608_v47  ;;  %9144 = vmatmul.bf16.vlgmr.msra.gmra.mxu0 %v12065_v38  ;;  %v7846_v20 = vunpack.c.l.bf16 %v7781_v43 }
 0x8bd   : > { %v9157_v50 = vpop.f32.mrf.mxu3 }
 0x8be   : > { %v8785_v10 = vpack.c.b16 %v8736_v15, %v8735_v6  ;;  %v9158_v39 = vadd.f32 %v9157_v50, %v8989_v61  ;;  %v8353_v42 = vadd.f32 %v12270_v24, %v8288_v28  ;;  %v7911_v40 = vadd.f32 %v12171_v14, %v7846_v20 }
 0x8bf   : > { %v8110_v7 = vpop.f32.mrf.mxu1 }
 0x8c0   : > { %v8111_v57 = vadd.f32 %v8110_v7, %v13036_v37  ;;  %9045 = vmatmul.bf16.gmra.mxu2 %v8785_v10  ;;  %9310 = vst [vmem:[%s12476_s12 + $0x28] sm:$0xff] %v9158_v39  ;;  %v8545_v38 = vmax.f32 %v8353_v42, 0.0  ;;  %v8994_v10 = vadd.f32 %v12462_v62, %v12450_v36 }
 0x8c1   : > { %v7695_v16 = vpop.f32.mrf.mxu0 }
 0x8c2   : > { %v8224_v58 = vpack.c.bf16 %v8111_v57, %v8111_v57  ;;  %v7782_v30 = vpack.c.bf16 %v7695_v16, %v7695_v16  ;;  %9199 = vmatmul.bf16.gmra.mxu3 %v12204_v35  ;;  %v12508_v23 = vpop.f32.mrf.mxu2  ;;  %v8609_v11 = vpack.c.bf16 %v8545_v38, %v8545_v38  ;;  %v13037_v35 = vld [vmem:[#allocation64_spill] sm:$0xff] }
 0x8c4   : > { %v8289_v53 = vunpack.c.l.bf16 %v8224_v58  ;;  %v7847_v18 = vunpack.c.l.bf16 %v7782_v30  ;;  %v8737_v15 = vunpack.c.l.b16 %v8609_v11  ;;  %v13038_v58 = vld [vmem:[#allocation65_spill] sm:$0xff] }
 0x8c5   : > { %v9160_v63 = vpop.f32.mrf.mxu3 }
 0x8c6   : > { %v8354_v3 = vadd.f32 %v12270_v24, %v8289_v53  ;;  %v7912_v56 = vadd.f32 %v12171_v14, %v7847_v18  ;;  %v9161_v9 = vadd.f32 %v9160_v63, %v8992_v17 }
 0x8c7   : > { %v8113_v55 = vpop.f32.mrf.mxu1 }
 0x8c8   : > { %v8546_v0 = vmax.f32 %v8354_v3, 0.0  ;;  %v8114_v47 = vadd.f32 %v8113_v55, %v13037_v35  ;;  %9311 = vst [vmem:[%s12476_s12 + $0x30] sm:$0xff] %v9161_v9  ;;  %v7951_v22 = vpack.c.bf16 %v7912_v56, %v7911_v40  ;;  %v8997_v3 = vadd.f32 %v12462_v62, %v12466_v45 }
 0x8c9   : > { %v7698_v33 = vpop.f32.mrf.mxu0 }
 0x8ca   : > { %v8610_v51 = vpack.c.bf16 %v8546_v0, %v8546_v0  ;;  %v8225_v6 = vpack.c.bf16 %v8114_v47, %v8114_v47  ;;  %v12517_v28 = vpop.f32.mrf.mxu2  ;;  %v7783_v7 = vpack.c.bf16 %v7698_v33, %v7698_v33 }
 0x8cb   : > { %8152 = vmatmul.bf16.gmra.mxu1 %v7951_v22 }
 0x8cc   : > { %v8290_v61 = vunpack.c.l.bf16 %v8225_v6  ;;  %v8738_v50 = vunpack.c.l.b16 %v8610_v51  ;;  %v7848_v38 = vunpack.c.l.bf16 %v7783_v7 }
 0x8cd   : > { %v9162_v43 = vpop.f32.mrf.mxu3 }
 0x8ce   : > { %v8786_v39 = vpack.c.b16 %v8738_v50, %v8737_v15  ;;  %v9163_v42 = vadd.f32 %v9162_v43, %v8994_v10  ;;  %v8355_v57 = vadd.f32 %v12270_v24, %v8290_v61  ;;  %v7913_v9 = vadd.f32 %v12171_v14, %v7848_v38 }
 0x8cf   : > { %v8115_v37 = vpop.f32.mrf.mxu1  ;;  %v8999_v43 = vadd.f32 %v12462_v62, %v12479_v21 }
 0x8d0   : > { %v8116_v16 = vadd.f32 %v8115_v37, %v13038_v58  ;;  %9050 = vmatmul.bf16.gmra.mxu2 %v8786_v39  ;;  %9312 = vst [vmem:[%s12476_s12 + $0x38] sm:$0xff] %v9163_v42  ;;  %v8547_v36 = vmax.f32 %v8355_v57, 0.0 }
 0x8d1   : > { %v7700_v30 = vpop.f32.mrf.mxu0 }
 0x8d2   : > { %v8226_v20 = vpack.c.bf16 %v8116_v16, %v8116_v16  ;;  %v7784_v53 = vpack.c.bf16 %v7700_v30, %v7700_v30  ;;  %9204 = vmatmul.bf16.gmra.mxu3 %v12218_v49  ;;  %v12525_v17 = vpop.f32.mrf.mxu2  ;;  %v8611_v35 = vpack.c.bf16 %v8547_v36, %v8547_v36  ;;  %v13039_v49 = vld [vmem:[#allocation66_spill] sm:$0xff]  ;;  %v13040_v16 = vld [vmem:[#allocation67_spill] sm:$0xff] }
 0x8d4   : > { %v8291_v18 = vunpack.c.l.bf16 %v8226_v20  ;;  %v7849_v63 = vunpack.c.l.bf16 %v7784_v53  ;;  %v8739_v61 = vunpack.c.l.b16 %v8611_v35 }
 0x8d5   : > { %v9165_v56 = vpop.f32.mrf.mxu3 }
 0x8d6   : > { %v8356_v40 = vadd.f32 %v12270_v24, %v8291_v18  ;;  %v7914_v55 = vadd.f32 %v12171_v14, %v7849_v63  ;;  %v9166_v11 = vadd.f32 %v9165_v56, %v8997_v3  ;;  %v9002_v63 = vadd.f32 %v12462_v62, %v12490_v48 }
 0x8d7   : > { %v8118_v0 = vpop.f32.mrf.mxu1 }
 0x8d8   : > { %v8548_v47 = vmax.f32 %v8356_v40, 0.0  ;;  %v8119_v22 = vadd.f32 %v8118_v0, %v13039_v49  ;;  %9313 = vst [vmem:[%s12476_s12 + $0x40] sm:$0xff] %v9166_v11  ;;  %v7952_v51 = vpack.c.bf16 %v7914_v55, %v7913_v9 }
 0x8d9   : > { %v7703_v45 = vpop.f32.mrf.mxu0 }
 0x8da   : > { %v8612_v6 = vpack.c.bf16 %v8548_v47, %v8548_v47  ;;  %v8227_v33 = vpack.c.bf16 %v8119_v22, %v8119_v22  ;;  %v12534_v15 = vpop.f32.mrf.mxu2  ;;  %v7785_v42 = vpack.c.bf16 %v7703_v45, %v7703_v45 }
 0x8db   : > { %8157 = vmatmul.bf16.gmra.mxu1 %v7952_v51 }
 0x8dc   : > { %v8292_v50 = vunpack.c.l.bf16 %v8227_v33  ;;  %v8740_v10 = vunpack.c.l.b16 %v8612_v6  ;;  %v7850_v53 = vunpack.c.l.bf16 %v7785_v42 }
 0x8dd   : > { %v9167_v39 = vpop.f32.mrf.mxu3 }
 0x8de   : > { %v8787_v7 = vpack.c.b16 %v8740_v10, %v8739_v61  ;;  %v9168_v37 = vadd.f32 %v9167_v39, %v8999_v43  ;;  %v8357_v58 = vadd.f32 %v12270_v24, %v8292_v50  ;;  %v7915_v55 = vadd.f32 %v12171_v14, %v7850_v53 }
 0x8df   : > { %v8120_v57 = vpop.f32.mrf.mxu1  ;;  %v9004_v10 = vadd.f32 %v12462_v62, %v12499_v5 }
 0x8e0   : > { %v8121_v20 = vadd.f32 %v8120_v57, %v13040_v16  ;;  %9055 = vmatmul.bf16.gmra.mxu2 %v8787_v7  ;;  %9314 = vst [vmem:[%s12476_s12 + $0x48] sm:$0xff] %v9168_v37  ;;  %v8549_v21 = vmax.f32 %v8357_v58, 0.0  ;;  %v13042_v16 = vld [vmem:[#allocation69_spill] sm:$0xff] }
 0x8e1   : > { %v7705_v38 = vpop.f32.mrf.mxu0 }
 0x8e2   : > { %v8228_v30 = vpack.c.bf16 %v8121_v20, %v8121_v20  ;;  %v7786_v36 = vpack.c.bf16 %v7705_v38, %v7705_v38  ;;  %9209 = vmatmul.bf16.gmra.mxu3 %v12230_v8  ;;  %v8613_v35 = vpack.c.bf16 %v8549_v21, %v8549_v21  ;;  %v13041_v8 = vld [vmem:[#allocation68_spill] sm:$0xff]  ;;  %v9007_v21 = vadd.f32 %v12462_v62, %v12508_v23 }
 0x8e3   : > { %v12542_v18 = vpop.f32.mrf.mxu2 }
 0x8e4   : > { %v8293_v3 = vunpack.c.l.bf16 %v8228_v30  ;;  %v7851_v40 = vunpack.c.l.bf16 %v7786_v36  ;;  %v8741_v61 = vunpack.c.l.b16 %v8613_v35 }
 0x8e5   : > { %v9170_v9 = vpop.f32.mrf.mxu3 }
 0x8e6   : > { %v8358_v56 = vadd.f32 %v12270_v24, %v8293_v3  ;;  %v7916_v11 = vadd.f32 %v12171_v14, %v7851_v40  ;;  %v9171_v0 = vadd.f32 %v9170_v9, %v9002_v63 }
 0x8e8   : > { %v8550_v47 = vmax.f32 %v8358_v56, 0.0  ;;  %v8123_v49 = vpop.f32.mrf.mxu1  ;;  %9315 = vst [vmem:[%s12476_s12 + $0x50] sm:$0xff] %v9171_v0  ;;  %v7953_v51 = vpack.c.bf16 %v7916_v11, %v7915_v55 }
 0x8e9   : > { %v8124_v22 = vadd.f32 %v8123_v49, %v13041_v8  ;;  %v7708_v33 = vpop.f32.mrf.mxu0 }
 0x8ea   : > { %v8614_v6 = vpack.c.bf16 %v8550_v47, %v8550_v47  ;;  %v7787_v42 = vpack.c.bf16 %v7708_v33, %v7708_v33 }
 0x8eb   : > { %v8229_v48 = vpack.c.bf16 %v8124_v22, %v8124_v22  ;;  %8162 = vmatmul.bf16.gmra.mxu1 %v7953_v51  ;;  %v12551_v45 = vpop.f32.mrf.mxu2 }
 0x8ec   : > { %v8742_v50 = vunpack.c.l.b16 %v8614_v6  ;;  %v7852_v38 = vunpack.c.l.bf16 %v7787_v42 }
 0x8ed   : > { %v8294_v43 = vunpack.c.l.bf16 %v8229_v48  ;;  %v9172_v39 = vpop.f32.mrf.mxu3  ;;  %v9009_v48 = vadd.f32 %v12462_v62, %v12517_v28 }
 0x8ee   : > { %v8788_v7 = vpack.c.b16 %v8742_v50, %v8741_v61  ;;  %v9173_v37 = vadd.f32 %v9172_v39, %v9004_v10  ;;  %v7917_v9 = vadd.f32 %v12171_v14, %v7852_v38 }
 0x8ef   : > { %v8359_v58 = vadd.f32 %v12270_v24, %v8294_v43 }
 0x8f0   : > { %v8125_v57 = vpop.f32.mrf.mxu1  ;;  %9060 = vmatmul.bf16.gmra.mxu2 %v8788_v7  ;;  %9316 = vst [vmem:[%s12476_s12 + $0x58] sm:$0xff] %v9173_v37 }
 0x8f1   : > { %v8126_v20 = vadd.f32 %v8125_v57, %v13042_v16  ;;  %v7710_v30 = vpop.f32.mrf.mxu0  ;;  %v8551_v3 = vmax.f32 %v8359_v58, 0.0  ;;  %v13044_v58 = vld [vmem:[#allocation71_spill] sm:$0xff] }
 0x8f2   : > { %v7788_v36 = vpack.c.bf16 %v7710_v30, %v7710_v30  ;;  %9214 = vmatmul.bf16.gmra.mxu3 %v12239_v2  ;;  %v13043_v2 = vld [vmem:[#allocation70_spill] sm:$0xff] }
 0x8f3   : > { %v8230_v53 = vpack.c.bf16 %v8126_v20, %v8126_v20  ;;  %v12559_v5 = vpop.f32.mrf.mxu2  ;;  %v8615_v47 = vpack.c.bf16 %v8551_v3, %v8551_v3 }
 0x8f4   : > { %v7853_v40 = vunpack.c.l.bf16 %v7788_v36  ;;  %v9012_v36 = vadd.f32 %v12462_v62, %v12525_v17 }
 0x8f5   : > { %v8295_v63 = vunpack.c.l.bf16 %v8230_v53  ;;  %v9175_v56 = vpop.f32.mrf.mxu3  ;;  %v8743_v61 = vunpack.c.l.b16 %v8615_v47 }
 0x8f6   : > { %v7918_v11 = vadd.f32 %v12171_v14, %v7853_v40  ;;  %v9176_v0 = vadd.f32 %v9175_v56, %v9007_v21 }
 0x8f7   : > { %v8360_v55 = vadd.f32 %v12270_v24, %v8295_v63 }
 0x8f8   : > { %v8128_v35 = vpop.f32.mrf.mxu1  ;;  %9317 = vst [vmem:[%s12476_s12 + $0x60] sm:$0xff] %v9176_v0  ;;  %v7954_v22 = vpack.c.bf16 %v7918_v11, %v7917_v9 }
 0x8f9   : > { %v8552_v49 = vmax.f32 %v8360_v55, 0.0  ;;  %v8129_v8 = vadd.f32 %v8128_v35, %v13043_v2  ;;  %v7713_v23 = vpop.f32.mrf.mxu0 }
 0x8fa   : > { %v7789_v39 = vpack.c.bf16 %v7713_v23, %v7713_v23 }
 0x8fb   : > { %v8616_v51 = vpack.c.bf16 %v8552_v49, %v8552_v49  ;;  %v8231_v6 = vpack.c.bf16 %v8129_v8, %v8129_v8  ;;  %8167 = vmatmul.bf16.gmra.mxu1 %v7954_v22  ;;  %v12568_v33 = vpop.f32.mrf.mxu2 }
 0x8fc   : > { %v7854_v30 = vunpack.c.l.bf16 %v7789_v39 }
 0x8fd   : > { %v8296_v50 = vunpack.c.l.bf16 %v8231_v6  ;;  %v8744_v10 = vunpack.c.l.b16 %v8616_v51  ;;  %v9177_v43 = vpop.f32.mrf.mxu3  ;;  %v9014_v51 = vadd.f32 %v12462_v62, %v12534_v15 }
 0x8fe   : > { %v9178_v7 = vadd.f32 %v9177_v43, %v9009_v48  ;;  %v7919_v56 = vadd.f32 %v12171_v14, %v7854_v30 }
 0x8ff   : > { %v8789_v42 = vpack.c.b16 %v8744_v10, %v8743_v61  ;;  %v8361_v57 = vadd.f32 %v12270_v24, %v8296_v50 }
 0x900   : > { %v8130_v37 = vpop.f32.mrf.mxu1  ;;  %9318 = vst [vmem:[%s12476_s12 + $0x68] sm:$0xff] %v9178_v7 }
 0x901   : > { %v8131_v16 = vadd.f32 %v8130_v37, %v13044_v58  ;;  %9065 = vmatmul.bf16.gmra.mxu2 %v8789_v42  ;;  %v7715_v20 = vpop.f32.mrf.mxu0  ;;  %v8553_v21 = vmax.f32 %v8361_v57, 0.0  ;;  %v13046_v37 = vld [vmem:[#allocation73_spill] sm:$0xff] }
 0x902   : > { %v7790_v53 = vpack.c.bf16 %v7715_v20, %v7715_v20  ;;  %9219 = vmatmul.bf16.gmra.mxu3 %v12248_v31  ;;  %v13045_v31 = vld [vmem:[#allocation72_spill] sm:$0xff] }
 0x903   : > { %v8232_v38 = vpack.c.bf16 %v8131_v16, %v8131_v16  ;;  %v12576_v28 = vpop.f32.mrf.mxu2  ;;  %v8617_v35 = vpack.c.bf16 %v8553_v21, %v8553_v21 }
 0x904   : > { %v7855_v63 = vunpack.c.l.bf16 %v7790_v53 }
 0x905   : > { %v8297_v3 = vunpack.c.l.bf16 %v8232_v38  ;;  %v9180_v40 = vpop.f32.mrf.mxu3  ;;  %v8745_v6 = vunpack.c.l.b16 %v8617_v35  ;;  %v9017_v38 = vadd.f32 %v12462_v62, %v12542_v18 }
 0x906   : > { %v7920_v55 = vadd.f32 %v12171_v14, %v7855_v63  ;;  %v9181_v11 = vadd.f32 %v9180_v40, %v9012_v36 }
 0x907   : > { %v8362_v9 = vadd.f32 %v12270_v24, %v8297_v3 }
 0x908   : > { %v8133_v0 = vpop.f32.mrf.mxu1  ;;  %9319 = vst [vmem:[%s12476_s12 + $0x70] sm:$0xff] %v9181_v11  ;;  %v7955_v2 = vpack.c.bf16 %v7920_v55, %v7919_v56 }
 0x909   : > { %v8554_v47 = vmax.f32 %v8362_v9, 0.0  ;;  %v8134_v49 = vadd.f32 %v8133_v0, %v13045_v31  ;;  %v7718_v17 = vpop.f32.mrf.mxu0 }
 0x90a   : > { %v7791_v10 = vpack.c.bf16 %v7718_v17, %v7718_v17  ;;  %v9019_v17 = vadd.f32 %v12462_v62, %v12551_v45 }
 0x90b   : > { %v8618_v8 = vpack.c.bf16 %v8554_v47, %v8554_v47  ;;  %v8233_v22 = vpack.c.bf16 %v8134_v49, %v8134_v49  ;;  %8172 = vmatmul.bf16.gmra.mxu1 %v7955_v2  ;;  %v12585_v23 = vpop.f32.mrf.mxu2 }
 0x90c   : > { %v7856_v16 = vunpack.c.l.bf16 %v7791_v10 }
 0x90d   : > { %v8298_v48 = vunpack.c.l.bf16 %v8233_v22  ;;  %v8746_v61 = vunpack.c.l.b16 %v8618_v8  ;;  %v9182_v50 = vpop.f32.mrf.mxu3 }
 0x90e   : > { %v9183_v43 = vadd.f32 %v9182_v50, %v9014_v51  ;;  %v7921_v63 = vadd.f32 %v12171_v14, %v7856_v16  ;;  %v9022_v16 = vadd.f32 %v12462_v62, %v12559_v5 }
 0x90f   : > { %v8790_v39 = vpack.c.b16 %v8746_v61, %v8745_v6  ;;  %v8363_v42 = vadd.f32 %v12270_v24, %v8298_v48 }
 0x910   : > { %v8135_v7 = vpop.f32.mrf.mxu1  ;;  %9320 = vst [vmem:[%s12476_s12 + $0x78] sm:$0xff] %v9183_v43 }
 0x911   : > { %v8136_v57 = vadd.f32 %v8135_v7, %v13046_v37  ;;  %9070 = vmatmul.bf16.gmra.mxu2 %v8790_v39  ;;  %v7720_v58 = vpop.f32.mrf.mxu0  ;;  %v8555_v53 = vmax.f32 %v8363_v42, 0.0  ;;  %v13048_v39 = vld [vmem:[#allocation76_spill] sm:$0xff] }
 0x912   : > { %v7792_v30 = vpack.c.bf16 %v7720_v58, %v7720_v58  ;;  %9224 = vmatmul.bf16.gmra.mxu3 %v12257_v59  ;;  %v13047_v59 = vld [vmem:[#allocation74_spill] sm:$0xff] }
 0x913   : > { %v8234_v20 = vpack.c.bf16 %v8136_v57, %v8136_v57  ;;  %v12593_v15 = vpop.f32.mrf.mxu2  ;;  %v8619_v11 = vpack.c.bf16 %v8555_v53, %v8555_v53 }
 0x914   : > { %v7857_v21 = vunpack.c.l.bf16 %v7792_v30 }
 0x915   : > { %v8299_v36 = vunpack.c.l.bf16 %v8234_v20  ;;  %v9185_v3 = vpop.f32.mrf.mxu3  ;;  %v8747_v8 = vunpack.c.l.b16 %v8619_v11 }
 0x916   : > { %v7922_v56 = vadd.f32 %v12171_v14, %v7857_v21  ;;  %v9186_v9 = vadd.f32 %v9185_v3, %v9017_v38 }
 0x917   : > { %v8364_v40 = vadd.f32 %v12270_v24, %v8299_v36 }
 0x918   : > { %v8138_v55 = vpop.f32.mrf.mxu1  ;;  %9321 = vst [vmem:[%s12476_s12 + $0x80] sm:$0xff] %v9186_v9  ;;  %v7956_v47 = vpack.c.bf16 %v7922_v56, %v7921_v63 }
 0x919   : > { %v8556_v0 = vmax.f32 %v8364_v40, 0.0  ;;  %v8139_v35 = vadd.f32 %v8138_v55, %v13047_v59  ;;  %v7723_v18 = vpop.f32.mrf.mxu0 }
 0x91a   : > { %v7793_v48 = vpack.c.bf16 %v7723_v18, %v7723_v18 }
 0x91b   : > { %v8620_v31 = vpack.c.bf16 %v8556_v0, %v8556_v0  ;;  %v8235_v49 = vpack.c.bf16 %v8139_v35, %v8139_v35  ;;  %8177 = vmatmul.bf16.gmra.mxu1 %v7956_v47  ;;  %v12602_v2 = vpop.f32.mrf.mxu2  ;;  %v9024_v47 = vadd.f32 %v12462_v62, %v12568_v33 }
 0x91c   : > { %v7858_v37 = vunpack.c.l.bf16 %v7793_v48 }
 0x91d   : > { %v8748_v22 = vunpack.c.l.b16 %v8620_v31  ;;  %v8300_v51 = vunpack.c.l.bf16 %v8235_v49  ;;  %v9187_v6 = vpop.f32.mrf.mxu3 }
 0x91e   : > { %v9188_v61 = vadd.f32 %v9187_v6, %v9019_v17  ;;  %v7923_v36 = vadd.f32 %v12171_v14, %v7858_v37 }
 0x91f   : > { %v8791_v50 = vpack.c.b16 %v8748_v22, %v8747_v8  ;;  %v8365_v43 = vadd.f32 %v12270_v24, %v8300_v51 }
 0x920   : > { %v8140_v10 = vpop.f32.mrf.mxu1  ;;  %9322 = vst [vmem:[%s12476_s12 + $0x88] sm:$0xff] %v9188_v61  ;;  %v13050_v61 = vld [vmem:[#allocation80_spill] sm:$0xff] }
 0x921   : > { %v8141_v7 = vadd.f32 %v8140_v10, %v13048_v39  ;;  %9075 = vmatmul.bf16.gmra.mxu2 %v8791_v50  ;;  %v7725_v42 = vpop.f32.mrf.mxu0  ;;  %v8557_v20 = vmax.f32 %v8365_v43, 0.0 }
 0x922   : > { %v7794_v58 = vpack.c.bf16 %v7725_v42, %v7725_v42  ;;  %9229 = vmatmul.bf16.gmra.mxu3 %v12273_v25  ;;  %v13049_v25 = vld [vmem:[#allocation78_spill] sm:$0xff]  ;;  %v9027_v42 = vadd.f32 %v12462_v62, %v12576_v28 }
 0x923   : > { %v8236_v57 = vpack.c.bf16 %v8141_v7, %v8141_v7  ;;  %v12610_v45 = vpop.f32.mrf.mxu2  ;;  %v8621_v56 = vpack.c.bf16 %v8557_v20, %v8557_v20  ;;  %v13051_v28 = vld [vmem:[#allocation82_spill] sm:$0xff] }
 0x924   : > { %v7859_v38 = vunpack.c.l.bf16 %v7794_v58 }
 0x925   : > { %v8301_v30 = vunpack.c.l.bf16 %v8236_v57  ;;  %v9190_v53 = vpop.f32.mrf.mxu3  ;;  %v8749_v18 = vunpack.c.l.b16 %v8621_v56 }
 0x926   : > { %v7924_v3 = vadd.f32 %v12171_v14, %v7859_v38  ;;  %v9191_v63 = vadd.f32 %v9190_v53, %v9022_v16 }
 0x927   : > { %v8366_v21 = vadd.f32 %v12270_v24, %v8301_v30 }
 0x928   : > { %v8143_v40 = vpop.f32.mrf.mxu1  ;;  %9323 = vst [vmem:[%s12476_s12 + $0x90] sm:$0xff] %v9191_v63  ;;  %v7957_v11 = vpack.c.bf16 %v7924_v3, %v7923_v36  ;;  %v8977_v36 = vadd.f32 %v12462_v62, %v12394_v1 }
 0x929   : > { %v8558_v9 = vmax.f32 %v8366_v21, 0.0  ;;  %v8144_v55 = vadd.f32 %v8143_v40, %v13049_v25  ;;  %v7728_v5 = vpop.f32.mrf.mxu0 }
 0x92a   : > { %v7795_v8 = vpack.c.bf16 %v7728_v5, %v7728_v5 }
 0x92b   : > { %v8622_v0 = vpack.c.bf16 %v8558_v9, %v8558_v9  ;;  %v8237_v59 = vpack.c.bf16 %v8144_v55, %v8144_v55  ;;  %8182 = vmatmul.bf16.gmra.mxu1 %v7957_v11  ;;  %v12619_v35 = vpop.f32.mrf.mxu2 }
 0x92c   : > { %v7860_v43 = vunpack.c.l.bf16 %v7795_v8  ;;  %v13052_v8 = vld [vmem:[#allocation84_spill] sm:$0xff] }
 0x92d   : > { %v8750_v31 = vunpack.c.l.b16 %v8622_v0  ;;  %v8302_v49 = vunpack.c.l.bf16 %v8237_v59  ;;  %v9192_v17 = vpop.f32.mrf.mxu3 }
 0x92e   : > { %v9193_v22 = vadd.f32 %v9192_v17, %v9024_v47  ;;  %v7925_v20 = vadd.f32 %v12171_v14, %v7860_v43 }
 0x92f   : > { %v8792_v51 = vpack.c.b16 %v8750_v31, %v8749_v18  ;;  %v8367_v48 = vadd.f32 %v12270_v24, %v8302_v49  ;;  %v8979_v49 = vadd.f32 %v12462_v62, %v12402_v26 }
 0x930   : > { %v8145_v6 = vpop.f32.mrf.mxu1  ;;  %9324 = vst [vmem:[%s12476_s12 + $0x98] sm:$0xff] %v9193_v22 }
 0x931   : > { %v8146_v50 = vadd.f32 %v8145_v6, %v13050_v61  ;;  %9080 = vmatmul.bf16.gmra.mxu2 %v8792_v51  ;;  %v7730_v10 = vpop.f32.mrf.mxu0  ;;  %v8559_v37 = vmax.f32 %v8367_v48, 0.0  ;;  %v9032_v61 = vadd.f32 %v12462_v62, %v12593_v15  ;;  %v9034_v15 = vadd.f32 %v12462_v62, %v12602_v2 }
 0x932   : > { %v7796_v7 = vpack.c.bf16 %v7730_v10, %v7730_v10  ;;  %9234 = vmatmul.bf16.gmra.mxu3 %v12289_v46  ;;  %v9037_v2 = vadd.f32 %v12462_v62, %v12610_v45  ;;  %v9039_v45 = vadd.f32 %v12462_v62, %v12619_v35 }
 0x933   : > { %v8238_v39 = vpack.c.bf16 %v8146_v50, %v8146_v50  ;;  %v12627_v33 = vpop.f32.mrf.mxu2  ;;  %v8623_v21 = vpack.c.bf16 %v8559_v37, %v8559_v37 }
 0x934   : > { %v7861_v58 = vunpack.c.l.bf16 %v7796_v7  ;;  %v9042_v35 = vadd.f32 %v12462_v62, %v12627_v33 }
 0x935   : > { %v8303_v57 = vunpack.c.l.bf16 %v8238_v39  ;;  %v9195_v16 = vpop.f32.mrf.mxu3  ;;  %v8751_v1 = vunpack.c.l.b16 %v8623_v21 }
 0x936   : > { %v7926_v38 = vadd.f32 %v12171_v14, %v7861_v58  ;;  %v9196_v53 = vadd.f32 %v9195_v16, %v9027_v42  ;;  %v9029_v14 = vadd.f32 %v12462_v62, %v12585_v23 }
 0x937   : > { %v8368_v30 = vadd.f32 %v12270_v24, %v8303_v57  ;;  %v13053_v57 = vld [vmem:[#allocation86_spill] sm:$0xff] }
 0x938   : > { %v8148_v46 = vpop.f32.mrf.mxu1  ;;  %9325 = vst [vmem:[%s12476_s12 + $0xa0] sm:$0xff] %v9196_v53  ;;  %v7958_v40 = vpack.c.bf16 %v7926_v38, %v7925_v20 }
 0x939   : > { %v8560_v3 = vmax.f32 %v8368_v30, 0.0  ;;  %v8149_v63 = vadd.f32 %v8148_v46, %v13051_v28  ;;  %v9145_v56 = vpop.f32.mrf.mxu0 }
 0x93a   : > { %v9146_v55 = vadd.f32 %v9145_v56, %v8977_v36 }
 0x93b   : > { %v8624_v9 = vpack.c.bf16 %v8560_v3, %v8560_v3  ;;  %v8239_v25 = vpack.c.bf16 %v8149_v63, %v8149_v63  ;;  %8187 = vmatmul.bf16.gmra.mxu1 %v7958_v40  ;;  %v12638_v11 = vpop.f32.mrf.mxu2  ;;  %v13054_v63 = vld [vmem:[#allocation87_spill] sm:$0xff] }
 0x93c   : > { %9305 = vst [vmem:[%s12476_s12] sm:$0xff] %v9146_v55  ;;  %v9044_v33 = vadd.f32 %v12462_v62, %v12638_v11 }
 0x93d   : > { %v8752_v5 = vunpack.c.l.b16 %v8624_v9  ;;  %v8304_v0 = vunpack.c.l.bf16 %v8239_v25  ;;  %v9197_v59 = vpop.f32.mrf.mxu3 }
 0x93e   : > { %v9198_v47 = vadd.f32 %v9197_v59, %v9029_v14 }
 0x93f   : > { %v8793_v18 = vpack.c.b16 %v8752_v5, %v8751_v1  ;;  %v8369_v17 = vadd.f32 %v12270_v24, %v8304_v0 }
 0x940   : > { %v8150_v31 = vpop.f32.mrf.mxu1  ;;  %9326 = vst [vmem:[%s12476_s12 + $0xa8] sm:$0xff] %v9198_v47 }
 0x941   : > { %v8151_v22 = vadd.f32 %v8150_v31, %v13052_v8  ;;  %9085 = vmatmul.bf16.gmra.mxu2 %v8793_v18  ;;  %v9147_v23 = vpop.f32.mrf.mxu0  ;;  %v8561_v50 = vmax.f32 %v8369_v17, 0.0  ;;  %v13055_v18 = vld [vmem:[#allocation88_spill] sm:$0xff] }
 0x942   : > { %v9148_v6 = vadd.f32 %v9147_v23, %v8979_v49  ;;  %9239 = vmatmul.bf16.gmra.mxu3 %v12302_v32 }
 0x943   : > { %v8240_v51 = vpack.c.bf16 %v8151_v22, %v8151_v22  ;;  %v12649_v48 = vpop.f32.mrf.mxu2  ;;  %v8625_v42 = vpack.c.bf16 %v8561_v50, %v8561_v50 }
 0x944   : > { %9306 = vst [vmem:[%s12476_s12 + $0x8] sm:$0xff] %v9148_v6  ;;  %v9047_v11 = vadd.f32 %v12462_v62, %v12649_v48 }
 0x945   : > { %v8305_v10 = vunpack.c.l.bf16 %v8240_v51  ;;  %v9200_v26 = vpop.f32.mrf.mxu3  ;;  %v8753_v30 = vunpack.c.l.b16 %v8625_v42 }
 0x946   : > { %v9201_v39 = vadd.f32 %v9200_v26, %v9032_v61  ;;  %v13056_v26 = vld [vmem:[#allocation89_spill] sm:$0xff] }
 0x947   : > { %v8370_v43 = vadd.f32 %v12270_v24, %v8305_v10 }
 0x948   : > { %v8153_v7 = vpop.f32.mrf.mxu1  ;;  %9327 = vst [vmem:[%s12476_s12 + $0xb0] sm:$0xff] %v9201_v39 }
 0x949   : > { %v8562_v37 = vmax.f32 %v8370_v43, 0.0  ;;  %v8154_v58 = vadd.f32 %v8153_v7, %v13053_v57 }
 0x94b   : > { %v8626_v32 = vpack.c.bf16 %v8562_v37, %v8562_v37  ;;  %v8241_v16 = vpack.c.bf16 %v8154_v58, %v8154_v58  ;;  %v12657_v20 = vpop.f32.mrf.mxu2 }
 0x94c   : > { %v9049_v48 = vadd.f32 %v12462_v62, %v12657_v20  ;;  %v12715_v62 = vld [vmem:[%s12871_s5] ss:$0 sm:$0xff] }
 0x94d   : > { %v8754_v38 = vunpack.c.l.b16 %v8626_v32  ;;  %v8306_v53 = vunpack.c.l.bf16 %v8241_v16  ;;  %v9202_v36 = vpop.f32.mrf.mxu3 }
 0x94e   : > { %v9203_v46 = vadd.f32 %v9202_v36, %v9034_v15 }
 0x94f   : > { %v8794_v21 = vpack.c.b16 %v8754_v38, %v8753_v30  ;;  %v8371_v28 = vadd.f32 %v12270_v24, %v8306_v53  ;;  %v13057_v38 = vld [vmem:[#allocation90_spill] sm:$0xff] }
 0x950   : > { %v8155_v3 = vpop.f32.mrf.mxu1  ;;  %9328 = vst [vmem:[%s12476_s12 + $0xb8] sm:$0xff] %v9203_v46 }
 0x951   : > { %v8156_v40 = vadd.f32 %v8155_v3, %v13054_v63  ;;  %9090 = vmatmul.bf16.gmra.mxu2 %v8794_v21  ;;  %v8563_v25 = vmax.f32 %v8371_v28, 0.0 }
 0x952   : > { %9244 = vmatmul.bf16.gmra.mxu3 %v12315_v4 }
 0x953   : > { %v8242_v56 = vpack.c.bf16 %v8156_v40, %v8156_v40  ;;  %v12665_v9 = vpop.f32.mrf.mxu2  ;;  %v8627_v59 = vpack.c.bf16 %v8563_v25, %v8563_v25 }
 0x954   : > { %v9052_v20 = vadd.f32 %v12715_v62, %v12665_v9 }
 0x955   : > { %v8307_v55 = vunpack.c.l.bf16 %v8242_v56  ;;  %v9205_v14 = vpop.f32.mrf.mxu3  ;;  %v8755_v8 = vunpack.c.l.b16 %v8627_v59 }
 0x956   : > { %v9206_v5 = vadd.f32 %v9205_v14, %v9037_v2 }
 0x957   : > { %v8372_v1 = vadd.f32 %v12270_v24, %v8307_v55  ;;  %v13058_v55 = vld [vmem:[#allocation91_spill] sm:$0xff] }
 0x958   : > { %v8158_v0 = vpop.f32.mrf.mxu1  ;;  %9329 = vst [vmem:[%s12476_s12 + $0xc0] sm:$0xff] %v9206_v5 }
 0x959   : > { %v8564_v47 = vmax.f32 %v8372_v1, 0.0  ;;  %v8159_v31 = vadd.f32 %v8158_v0, %v13055_v18 }
 0x95b   : > { %v8628_v49 = vpack.c.bf16 %v8564_v47, %v8564_v47  ;;  %v8243_v4 = vpack.c.bf16 %v8159_v31, %v8159_v31  ;;  %v12672_v17 = vpop.f32.mrf.mxu2 }
 0x95c   : > { %v9054_v9 = vadd.f32 %v12715_v62, %v12672_v17 }
 0x95d   : > { %v8756_v22 = vunpack.c.l.b16 %v8628_v49  ;;  %v8308_v23 = vunpack.c.l.bf16 %v8243_v4  ;;  %v9207_v51 = vpop.f32.mrf.mxu3 }
 0x95e   : > { %v9208_v6 = vadd.f32 %v9207_v51, %v9039_v45 }
 0x95f   : > { %v8795_v61 = vpack.c.b16 %v8756_v22, %v8755_v8  ;;  %v8373_v10 = vadd.f32 %v12270_v24, %v8308_v23  ;;  %v13059_v8 = vld [vmem:[#allocation92_spill] sm:$0xff] }
 0x960   : > { %v8160_v50 = vpop.f32.mrf.mxu1  ;;  %9330 = vst [vmem:[%s12476_s12 + $0xc8] sm:$0xff] %v9208_v6 }
 0x961   : > { %v8161_v43 = vadd.f32 %v8160_v50, %v13056_v26  ;;  %9095 = vmatmul.bf16.gmra.mxu2 %v8795_v61  ;;  %v8565_v42 = vmax.f32 %v8373_v10, 0.0 }
 0x962   : > { %9249 = vmatmul.bf16.gmra.mxu3 %v12328_v54 }
 0x963   : > { %v8244_v39 = vpack.c.bf16 %v8161_v43, %v8161_v43  ;;  %v12680_v7 = vpop.f32.mrf.mxu2  ;;  %v8629_v15 = vpack.c.bf16 %v8565_v42, %v8565_v42  ;;  %v13060_v42 = vld [vmem:[#allocation93_spill] sm:$0xff] }
 0x964   : > { %v9057_v17 = vadd.f32 %v12715_v62, %v12680_v7 }
 0x965   : > { %v8309_v37 = vunpack.c.l.bf16 %v8244_v39  ;;  %v9210_v57 = vpop.f32.mrf.mxu3  ;;  %v8757_v21 = vunpack.c.l.b16 %v8629_v15 }
 0x966   : > { %v9211_v32 = vadd.f32 %v9210_v57, %v9042_v35 }
 0x967   : > { %v8374_v58 = vadd.f32 %v12270_v24, %v8309_v37 }
 0x968   : > { %v8163_v16 = vpop.f32.mrf.mxu1  ;;  %9331 = vst [vmem:[%s12476_s12 + $0xd0] sm:$0xff] %v9211_v32 }
 0x969   : > { %v8566_v30 = vmax.f32 %v8374_v58, 0.0  ;;  %v8164_v53 = vadd.f32 %v8163_v16, %v13057_v38 }
 0x96b   : > { %v8630_v36 = vpack.c.bf16 %v8566_v30, %v8566_v30  ;;  %v8245_v54 = vpack.c.bf16 %v8164_v53, %v8164_v53  ;;  %v12687_v46 = vpop.f32.mrf.mxu2 }
 0x96c   : > { %v9059_v7 = vadd.f32 %v12715_v62, %v12687_v46 }
 0x96d   : > { %v8758_v3 = vunpack.c.l.b16 %v8630_v36  ;;  %v8310_v28 = vunpack.c.l.bf16 %v8245_v54  ;;  %v9212_v63 = vpop.f32.mrf.mxu3  ;;  %v13061_v54 = vld [vmem:[#allocation94_spill] sm:$0xff] }
 0x96e   : > { %v9213_v40 = vadd.f32 %v9212_v63, %v9044_v33 }
 0x96f   : > { %v8796_v56 = vpack.c.b16 %v8758_v3, %v8757_v21  ;;  %v8375_v25 = vadd.f32 %v12270_v24, %v8310_v28 }
 0x970   : > { %v8165_v2 = vpop.f32.mrf.mxu1  ;;  %9332 = vst [vmem:[%s12476_s12 + $0xd8] sm:$0xff] %v9213_v40 }
 0x971   : > { %v8166_v14 = vadd.f32 %v8165_v2, %v13058_v55  ;;  %9100 = vmatmul.bf16.gmra.mxu2 %v8796_v56  ;;  %v8567_v0 = vmax.f32 %v8375_v25, 0.0 }
 0x972   : > { %9254 = vmatmul.bf16.gmra.mxu3 %v12340_v41 }
 0x973   : > { %v8246_v1 = vpack.c.bf16 %v8166_v14, %v8166_v14  ;;  %v12695_v5 = vpop.f32.mrf.mxu2  ;;  %v8631_v4 = vpack.c.bf16 %v8567_v0, %v8567_v0 }
 0x974   : > { %v9062_v46 = vadd.f32 %v12715_v62, %v12695_v5 }
 0x975   : > { %v8311_v59 = vunpack.c.l.bf16 %v8246_v1  ;;  %v9215_v47 = vpop.f32.mrf.mxu3  ;;  %v8759_v6 = vunpack.c.l.b16 %v8631_v4 }
 0x976   : > { %v9216_v31 = vadd.f32 %v9215_v47, %v9047_v11  ;;  %v13062_v11 = vld [vmem:[#allocation95_spill] sm:$0xff] }
 0x977   : > { %v8376_v18 = vadd.f32 %v12270_v24, %v8311_v59 }
 0x978   : > { %v8168_v49 = vpop.f32.mrf.mxu1  ;;  %9333 = vst [vmem:[%s12476_s12 + $0xe0] sm:$0xff] %v9216_v31 }
 0x979   : > { %v8568_v45 = vmax.f32 %v8376_v18, 0.0  ;;  %v8169_v22 = vadd.f32 %v8168_v49, %v13059_v8 }
 0x97b   : > { %v8632_v23 = vpack.c.bf16 %v8568_v45, %v8568_v45  ;;  %v8247_v41 = vpack.c.bf16 %v8169_v22, %v8169_v22  ;;  %v12702_v51 = vpop.f32.mrf.mxu2 }
 0x97d   : > { %v8760_v61 = vunpack.c.l.b16 %v8632_v23  ;;  %v8312_v50 = vunpack.c.l.bf16 %v8247_v41  ;;  %v9217_v10 = vpop.f32.mrf.mxu3  ;;  %v13063_v41 = vld [vmem:[#allocation96_spill] sm:$0xff] }
 0x97e   : > { %v9218_v26 = vadd.f32 %v9217_v10, %v9049_v48 }
 0x97f   : > { %v8797_v43 = vpack.c.b16 %v8760_v61, %v8759_v6  ;;  %v8377_v35 = vadd.f32 %v12270_v24, %v8312_v50 }
 0x980   : > { %v8170_v39 = vpop.f32.mrf.mxu1  ;;  %9334 = vst [vmem:[%s12476_s12 + $0xe8] sm:$0xff] %v9218_v26 }
 0x981   : > { %v8171_v37 = vadd.f32 %v8170_v39, %v13060_v42  ;;  %9105 = vmatmul.bf16.gmra.mxu2 %v8797_v43  ;;  %v8569_v32 = vmax.f32 %v8377_v35, 0.0 }
 0x982   : > { %9259 = vmatmul.bf16.gmra.mxu3 %v12352_v19 }
 0x983   : > { %v8248_v57 = vpack.c.bf16 %v8171_v37, %v8171_v37  ;;  %v8633_v36 = vpack.c.bf16 %v8569_v32, %v8569_v32 }
 0x984   : > { %v12710_v58 = vpop.f32.mrf.mxu2 }
 0x985   : > { %v8313_v16 = vunpack.c.l.bf16 %v8248_v57  ;;  %v9220_v15 = vpop.f32.mrf.mxu3  ;;  %v8761_v63 = vunpack.c.l.b16 %v8633_v36  ;;  %v13064_v57 = vld [vmem:[#allocation97_spill] sm:$0xff] }
 0x986   : > { %v9221_v38 = vadd.f32 %v9220_v15, %v9052_v20 }
 0x987   : > { %v8378_v30 = vadd.f32 %v12270_v24, %v8313_v16 }
 0x988   : > { %v8173_v53 = vpop.f32.mrf.mxu1  ;;  %9335 = vst [vmem:[%s12476_s12 + $0xf0] sm:$0xff] %v9221_v38 }
 0x989   : > { %v8570_v19 = vmax.f32 %v8378_v30, 0.0  ;;  %v8174_v33 = vadd.f32 %v8173_v53, %v13061_v54 }
 0x98b   : > { %v8634_v21 = vpack.c.bf16 %v8570_v19, %v8570_v19  ;;  %v8249_v3 = vpack.c.bf16 %v8174_v33, %v8174_v33 }
 0x98c   : > { %v12722_v28 = vpop.f32.mrf.mxu2 }
 0x98d   : > { %v8762_v40 = vunpack.c.l.b16 %v8634_v21  ;;  %v8314_v56 = vunpack.c.l.bf16 %v8249_v3  ;;  %v9222_v2 = vpop.f32.mrf.mxu3  ;;  %v13065_v21 = vld [vmem:[#allocation98_spill] sm:$0xff] }
 0x98e   : > { %v9223_v25 = vadd.f32 %v9222_v2, %v9054_v9 }
 0x98f   : > { %v8798_v55 = vpack.c.b16 %v8762_v40, %v8761_v63  ;;  %v8379_v1 = vadd.f32 %v12270_v24, %v8314_v56  ;;  %v9064_v63 = vadd.f32 %v12715_v62, %v12702_v51  ;;  %v9067_v51 = vadd.f32 %v12715_v62, %v12710_v58 }
 0x990   : > { %v8175_v14 = vpop.f32.mrf.mxu1  ;;  %9336 = vst [vmem:[%s12476_s12 + $0xf8] sm:$0xff] %v9223_v25 }
 0x991   : > { %v8176_v0 = vadd.f32 %v8175_v14, %v13062_v11  ;;  %9110 = vmatmul.bf16.gmra.mxu2 %v8798_v55  ;;  %v8571_v18 = vmax.f32 %v8379_v1, 0.0 }
 0x992   : > { %9264 = vmatmul.bf16.gmra.mxu3 %v12364_v27 }
 0x993   : > { %v8250_v59 = vpack.c.bf16 %v8176_v0, %v8176_v0  ;;  %v8635_v22 = vpack.c.bf16 %v8571_v18, %v8571_v18  ;;  %v13066_v0 = vld [vmem:[#allocation99_spill] sm:$0xff] }
 0x994   : > { %v12730_v47 = vpop.f32.mrf.mxu2 }
 0x995   : > { %v8315_v31 = vunpack.c.l.bf16 %v8250_v59  ;;  %v9225_v49 = vpop.f32.mrf.mxu3  ;;  %v8763_v50 = vunpack.c.l.b16 %v8635_v22 }
 0x996   : > { %v9226_v45 = vadd.f32 %v9225_v49, %v9057_v17 }
 0x997   : > { %v8380_v4 = vadd.f32 %v12270_v24, %v8315_v31 }
 0x998   : > { %v8178_v8 = vpop.f32.mrf.mxu1  ;;  %9337 = vst [vmem:[%s12476_s12 + $0x100] sm:$0xff] %v9226_v45 }
 0x999   : > { %v8572_v23 = vmax.f32 %v8380_v4, 0.0  ;;  %v8179_v48 = vadd.f32 %v8178_v8, %v13063_v41 }
 0x99b   : > { %v8636_v6 = vpack.c.bf16 %v8572_v23, %v8572_v23  ;;  %v8251_v27 = vpack.c.bf16 %v8179_v48, %v8179_v48  ;;  %v13067_v48 = vld [vmem:[#allocation100_spill] sm:$0xff] }
 0x99c   : > { %v12737_v61 = vpop.f32.mrf.mxu2 }
 0x99d   : > { %v8764_v10 = vunpack.c.l.b16 %v8636_v6  ;;  %v8316_v26 = vunpack.c.l.bf16 %v8251_v27  ;;  %v9227_v43 = vpop.f32.mrf.mxu3 }
 0x99e   : > { %v9228_v39 = vadd.f32 %v9227_v43, %v9059_v7 }
 0x99f   : > { %v8799_v35 = vpack.c.b16 %v8764_v10, %v8763_v50  ;;  %v8381_v37 = vadd.f32 %v12270_v24, %v8316_v26 }
 0x9a0   : > { %v8180_v42 = vpop.f32.mrf.mxu1  ;;  %9338 = vst [vmem:[%s12476_s12 + $0x108] sm:$0xff] %v9228_v39 }
 0x9a1   : > { %v8181_v20 = vadd.f32 %v8180_v42, %v13064_v57  ;;  %9115 = vmatmul.bf16.gmra.mxu2 %v8799_v35  ;;  %v8573_v15 = vmax.f32 %v8381_v37, 0.0  ;;  %v13068_v37 = vld [vmem:[#allocation101_spill] sm:$0xff] }
 0x9a2   : > { %9269 = vmatmul.bf16.gmra.mxu3 %v12376_v52 }
 0x9a3   : > { %v8252_v32 = vpack.c.bf16 %v8181_v20, %v8181_v20  ;;  %v8637_v54 = vpack.c.bf16 %v8573_v15, %v8573_v15 }
 0x9a4   : > { %v12745_v16 = vpop.f32.mrf.mxu2 }
 0x9a5   : > { %v8317_v30 = vunpack.c.l.bf16 %v8252_v32  ;;  %v9230_v38 = vpop.f32.mrf.mxu3  ;;  %v8765_v40 = vunpack.c.l.b16 %v8637_v54 }
 0x9a6   : > { %v9231_v36 = vadd.f32 %v9230_v38, %v9062_v46 }
 0x9a7   : > { %v8382_v53 = vadd.f32 %v12270_v24, %v8317_v30 }
 0x9a8   : > { %v8183_v19 = vpop.f32.mrf.mxu1  ;;  %9339 = vst [vmem:[%s12476_s12 + $0x110] sm:$0xff] %v9231_v36 }
 0x9a9   : > { %v8574_v33 = vmax.f32 %v8382_v53, 0.0  ;;  %v8184_v3 = vadd.f32 %v8183_v19, %v13065_v21  ;;  %v9074_v21 = vadd.f32 %v12715_v62, %v12737_v61 }
 0x9ab   : > { %v8638_v9 = vpack.c.bf16 %v8574_v33, %v8574_v33  ;;  %v8253_v52 = vpack.c.bf16 %v8184_v3, %v8184_v3 }
 0x9ac   : > { %v12754_v2 = vpop.f32.mrf.mxu2 }
 0x9ad   : > { %v8766_v5 = vunpack.c.l.b16 %v8638_v9  ;;  %v8318_v56 = vunpack.c.l.bf16 %v8253_v52  ;;  %v9232_v25 = vpop.f32.mrf.mxu3  ;;  %v9079_v61 = vadd.f32 %v12715_v62, %v12754_v2 }
 0x9ae   : > { %v9233_v55 = vadd.f32 %v9232_v25, %v9064_v63 }
 0x9af   : > { %v8800_v14 = vpack.c.b16 %v8766_v5, %v8765_v40  ;;  %v8383_v11 = vadd.f32 %v12270_v24, %v8318_v56 }
 0x9b0   : > { %v8185_v1 = vpop.f32.mrf.mxu1  ;;  %9340 = vst [vmem:[%s12476_s12 + $0x118] sm:$0xff] %v9233_v55 }
 0x9b1   : > { %v8186_v59 = vadd.f32 %v8185_v1, %v13066_v0  ;;  %9120 = vmatmul.bf16.gmra.mxu2 %v8800_v14  ;;  %v8575_v18 = vmax.f32 %v8383_v11, 0.0 }
 0x9b2   : > { %9274 = vmatmul.bf16.gmra.mxu3 %v12388_v44  ;;  %v9069_v44 = vadd.f32 %v12715_v62, %v12722_v28  ;;  %v9072_v28 = vadd.f32 %v12715_v62, %v12730_v47 }
 0x9b3   : > { %v8254_v17 = vpack.c.bf16 %v8186_v59, %v8186_v59  ;;  %v8639_v23 = vpack.c.bf16 %v8575_v18, %v8575_v18 }
 0x9b4   : > { %v9081_v8 = vpop.f32.mrf.mxu2 }
 0x9b5   : > { %v8319_v31 = vunpack.c.l.bf16 %v8254_v17  ;;  %v9235_v49 = vpop.f32.mrf.mxu3  ;;  %v8767_v58 = vunpack.c.l.b16 %v8639_v23 }
 0x9b6   : > { %v9236_v45 = vadd.f32 %v9235_v49, %v9067_v51 }
 0x9b7   : > { %v8384_v4 = vadd.f32 %v12270_v24, %v8319_v31 }
 0x9b8   : > { %v8188_v22 = vpop.f32.mrf.mxu1  ;;  %9341 = vst [vmem:[%s12476_s12 + $0x120] sm:$0xff] %v9236_v45 }
 0x9b9   : > { %v8576_v41 = vmax.f32 %v8384_v4, 0.0  ;;  %v8189_v6 = vadd.f32 %v8188_v22, %v13067_v48 }
 0x9bb   : > { %v8640_v27 = vpack.c.bf16 %v8576_v41, %v8576_v41  ;;  %v8255_v7 = vpack.c.bf16 %v8189_v6, %v8189_v6 }
 0x9bc   : > { %v9083_v20 = vpop.f32.mrf.mxu2 }
 0x9bd   : > { %v8768_v50 = vunpack.c.l.b16 %v8640_v27  ;;  %v8320_v10 = vunpack.c.l.bf16 %v8255_v7  ;;  %v9237_v26 = vpop.f32.mrf.mxu3  ;;  %v9084_v11 = vadd.f32 %v12715_v62, %v9083_v20 }
 0x9be   : > { %v9238_v43 = vadd.f32 %v9237_v26, %v9069_v44 }
 0x9bf   : > { %v8801_v39 = vpack.c.b16 %v8768_v50, %v8767_v58  ;;  %v8385_v42 = vadd.f32 %v12270_v24, %v8320_v10 }
 0x9c0   : > { %v8190_v35 = vpop.f32.mrf.mxu1  ;;  %9342 = vst [vmem:[%s12476_s12 + $0x128] sm:$0xff] %v9238_v43 }
 0x9c1   : > { %v8191_v57 = vadd.f32 %v8190_v35, %v13068_v37  ;;  %9125 = vmatmul.bf16.gmra.mxu2 %v8801_v39  ;;  %v8577_v46 = vmax.f32 %v8385_v42, 0.0 }
 0x9c2   : > { %9279 = vmatmul.bf16.gmra.mxu3 %v12404_v12 }
 0x9c3   : > { %v8256_v32 = vpack.c.bf16 %v8191_v57, %v8191_v57  ;;  %v8641_v36 = vpack.c.bf16 %v8577_v46, %v8577_v46 }
 0x9c4   : > { %v9086_v33 = vpop.f32.mrf.mxu2 }
 0x9c5   : > { %v8321_v15 = vunpack.c.l.bf16 %v8256_v32  ;;  %v9240_v30 = vpop.f32.mrf.mxu3  ;;  %v8769_v12 = vunpack.c.l.b16 %v8641_v36  ;;  %v9087_v17 = vadd.f32 %v12715_v62, %v9086_v33 }
 0x9c6   : > { %v9241_v53 = vadd.f32 %v9240_v30, %v9072_v28 }
 0x9c7   : > { %v8386_v38 = vadd.f32 %v12270_v24, %v8321_v15  ;;  %v9077_v24 = vadd.f32 %v12715_v62, %v12745_v16 }
 0x9c8   : > { %9343 = vst [vmem:[%s12476_s12 + $0x130] sm:$0xff] %v9241_v53 }
 0x9c9   : > { %v8578_v19 = vmax.f32 %v8386_v38, 0.0 }
 0x9cb   : > { %v8642_v54 = vpack.c.bf16 %v8578_v19, %v8578_v19 }
 0x9cc   : > { %v9088_v63 = vpop.f32.mrf.mxu2 }
 0x9cd   : > { %v8770_v3 = vunpack.c.l.b16 %v8642_v54  ;;  %v9242_v47 = vpop.f32.mrf.mxu3  ;;  %v9089_v18 = vadd.f32 %v12715_v62, %v9088_v63 }
 0x9ce   : > { %v9243_v9 = vadd.f32 %v9242_v47, %v9074_v21 }
 0x9cf   : > { %v8802_v52 = vpack.c.b16 %v8770_v3, %v8769_v12 }
 0x9d0   : > { %9344 = vst [vmem:[%s12476_s12 + $0x138] sm:$0xff] %v9243_v9 }
 0x9d1   : > { %9130 = vmatmul.bf16.gmra.mxu2 %v8802_v52 }
 0x9d2   : > { %9284 = vmatmul.bf16.gmra.mxu3 %v12420_v13  ;;  %v9082_v13 = vadd.f32 %v12715_v62, %v9081_v8 }
 0x9d4   : > { %v9091_v55 = vpop.f32.mrf.mxu2 }
 0x9d5   : > { %v9245_v40 = vpop.f32.mrf.mxu3  ;;  %v9092_v45 = vadd.f32 %v12715_v62, %v9091_v55 }
 0x9d6   : > { %v9246_v5 = vadd.f32 %v9245_v40, %v9077_v24 }
 0x9d8   : > { %9345 = vst [vmem:[%s12476_s12 + $0x140] sm:$0xff] %v9246_v5 }
 0x9dc   : > { %v9093_v16 = vpop.f32.mrf.mxu2 }
 0x9dd   : > { %v9247_v56 = vpop.f32.mrf.mxu3  ;;  %v9094_v23 = vadd.f32 %v12715_v62, %v9093_v16 }
 0x9de   : > { %v9248_v25 = vadd.f32 %v9247_v56, %v9079_v61 }
 0x9e0   : > { %9346 = vst [vmem:[%s12476_s12 + $0x148] sm:$0xff] %v9248_v25 }
 0x9e2   : > { %9289 = vmatmul.bf16.gmra.mxu3 %v12436_v29 }
 0x9e4   : > { %v9096_v2 = vpop.f32.mrf.mxu2 }
 0x9e5   : > { %v9250_v14 = vpop.f32.mrf.mxu3  ;;  %v9097_v27 = vadd.f32 %v12715_v62, %v9096_v2 }
 0x9e6   : > { %v9251_v1 = vadd.f32 %v9250_v14, %v9082_v13 }
 0x9e8   : > { %9347 = vst [vmem:[%s12476_s12 + $0x150] sm:$0xff] %v9251_v1 }
 0x9ec   : > { %v9098_v31 = vpop.f32.mrf.mxu2 }
 0x9ed   : > { %v9252_v0 = vpop.f32.mrf.mxu3  ;;  %v9099_v58 = vadd.f32 %v12715_v62, %v9098_v31 }
 0x9ee   : > { %v9253_v59 = vadd.f32 %v9252_v0, %v9084_v11 }
 0x9f0   : > { %9348 = vst [vmem:[%s12476_s12 + $0x158] sm:$0xff] %v9253_v59 }
 0x9f2   : > { %9294 = vmatmul.bf16.gmra.mxu3 %v12452_v34 }
 0x9f4   : > { %v9101_v22 = vpop.f32.mrf.mxu2 }
 0x9f5   : > { %v9255_v51 = vpop.f32.mrf.mxu3  ;;  %v9102_v26 = vadd.f32 %v12715_v62, %v9101_v22 }
 0x9f6   : > { %v9256_v29 = vadd.f32 %v9255_v51, %v9087_v17 }
 0x9f8   : > { %9349 = vst [vmem:[%s12476_s12 + $0x160] sm:$0xff] %v9256_v29 }
 0x9fc   : > { %v9103_v6 = vpop.f32.mrf.mxu2 }
 0x9fd   : > { %v9257_v49 = vpop.f32.mrf.mxu3  ;;  %v9104_v42 = vadd.f32 %v12715_v62, %v9103_v6 }
 0x9fe   : > { %v9258_v4 = vadd.f32 %v9257_v49, %v9089_v18 }
 0xa00   : > { %9350 = vst [vmem:[%s12476_s12 + $0x168] sm:$0xff] %v9258_v4 }
 0xa02   : > { %9299 = vmatmul.bf16.gmra.mxu3 %v12481_v60 }
 0xa04   : > { %v9106_v60 = vpop.f32.mrf.mxu2 }
 0xa05   : > { %v9260_v34 = vpop.f32.mrf.mxu3  ;;  %v9107_v32 = vadd.f32 %v12715_v62, %v9106_v60 }
 0xa06   : > { %v9261_v8 = vadd.f32 %v9260_v34, %v9092_v45 }
 0xa08   : > { %9351 = vst [vmem:[%s12476_s12 + $0x170] sm:$0xff] %v9261_v8 }
 0xa0c   : > { %v9108_v43 = vpop.f32.mrf.mxu2 }
 0xa0d   : > { %v9262_v41 = vpop.f32.mrf.mxu3  ;;  %v9109_v30 = vadd.f32 %v12715_v62, %v9108_v43 }
 0xa0e   : > { %v9263_v48 = vadd.f32 %v9262_v41, %v9094_v23 }
 0xa10   : > { %9352 = vst [vmem:[%s12476_s12 + $0x178] sm:$0xff] %v9263_v48 }
 0xa14   : > { %v9111_v20 = vpop.f32.mrf.mxu2 }
 0xa15   : > { %v9265_v7 = vpop.f32.mrf.mxu3  ;;  %v9112_v19 = vadd.f32 %v12715_v62, %v9111_v20 }
 0xa16   : > { %v9266_v44 = vadd.f32 %v9265_v7, %v9097_v27 }
 0xa18   : > { %9353 = vst [vmem:[%s12476_s12 + $0x180] sm:$0xff] %v9266_v44 }
 0xa1c   : > { %v9113_v15 = vpop.f32.mrf.mxu2 }
 0xa1d   : > { %v9267_v50 = vpop.f32.mrf.mxu3  ;;  %v9114_v21 = vadd.f32 %v12715_v62, %v9113_v15 }
 0xa1e   : > { %v9268_v10 = vadd.f32 %v9267_v50, %v9099_v58 }
 0xa20   : > { %9354 = vst [vmem:[%s12476_s12 + $0x188] sm:$0xff] %v9268_v10 }
 0xa24   : > { %v9116_v36 = vpop.f32.mrf.mxu2 }
 0xa25   : > { %v9270_v39 = vpop.f32.mrf.mxu3  ;;  %v9117_v9 = vadd.f32 %v12715_v62, %v9116_v36 }
 0xa26   : > { %v9271_v35 = vadd.f32 %v9270_v39, %v9102_v26 }
 0xa28   : > { %9355 = vst [vmem:[%s12476_s12 + $0x190] sm:$0xff] %v9271_v35 }
 0xa2c   : > { %v9118_v12 = vpop.f32.mrf.mxu2 }
 0xa2d   : > { %v9272_v37 = vpop.f32.mrf.mxu3  ;;  %v9119_v40 = vadd.f32 %v12715_v62, %v9118_v12 }
 0xa2e   : > { %v9273_v57 = vadd.f32 %v9272_v37, %v9104_v42 }
 0xa30   : > { %9356 = vst [vmem:[%s12476_s12 + $0x198] sm:$0xff] %v9273_v57 }
 0xa34   : > { %v9121_v63 = vpop.f32.mrf.mxu2 }
 0xa35   : > { %v9275_v28 = vpop.f32.mrf.mxu3  ;;  %v9122_v25 = vadd.f32 %v12715_v62, %v9121_v63 }
 0xa36   : > { %v9276_v46 = vadd.f32 %v9275_v28, %v9107_v32 }
 0xa38   : > { %9357 = vst [vmem:[%s12476_s12 + $0x1a0] sm:$0xff] %v9276_v46 }
 0xa3c   : > { %v9123_v56 = vpop.f32.mrf.mxu2 }
 0xa3d   : > { %v9277_v38 = vpop.f32.mrf.mxu3  ;;  %v9124_v1 = vadd.f32 %v12715_v62, %v9123_v56 }
 0xa3e   : > { %v9278_v53 = vadd.f32 %v9277_v38, %v9109_v30 }
 0xa40   : > { %9358 = vst [vmem:[%s12476_s12 + $0x1a8] sm:$0xff] %v9278_v53 }
 0xa44   : > { %v9126_v14 = vpop.f32.mrf.mxu2 }
 0xa45   : > { %v9280_v54 = vpop.f32.mrf.mxu3  ;;  %v9127_v0 = vadd.f32 %v12715_v62, %v9126_v14 }
 0xa46   : > { %v9281_v33 = vadd.f32 %v9280_v54, %v9112_v19 }
 0xa48   : > { %9359 = vst [vmem:[%s12476_s12 + $0x1b0] sm:$0xff] %v9281_v33 }
 0xa4c   : > { %v9128_v59 = vpop.f32.mrf.mxu2 }
 0xa4d   : > { %v9282_v3 = vpop.f32.mrf.mxu3  ;;  %v9129_v51 = vadd.f32 %v12715_v62, %v9128_v59 }
 0xa4e   : > { %v9283_v47 = vadd.f32 %v9282_v3, %v9114_v21 }
 0xa50   : > { %9360 = vst [vmem:[%s12476_s12 + $0x1b8] sm:$0xff] %v9283_v47 }
 0xa54   : > { %v9131_v31 = vpop.f32.mrf.mxu2 }
 0xa55   : > { %v9285_v52 = vpop.f32.mrf.mxu3  ;;  %v9132_v49 = vadd.f32 %v12715_v62, %v9131_v31 }
 0xa56   : > { %v9286_v24 = vadd.f32 %v9285_v52, %v9117_v9 }
 0xa58   : > { %9361 = vst [vmem:[%s12476_s12 + $0x1c0] sm:$0xff] %v9286_v24 }
 0xa5c   : > { %v9133_v34 = vpop.f32.mrf.mxu2 }
 0xa5d   : > { %v9287_v5 = vpop.f32.mrf.mxu3  ;;  %v9134_v8 = vadd.f32 %v12715_v62, %v9133_v34 }
 0xa5e   : > { %v9288_v61 = vadd.f32 %v9287_v5, %v9119_v40 }
 0xa60   : > { %9362 = vst [vmem:[%s12476_s12 + $0x1c8] sm:$0xff] %v9288_v61 }
 0xa65   : > { %v9290_v55 = vpop.f32.mrf.mxu3 }
 0xa66   : > { %v9291_v13 = vadd.f32 %v9290_v55, %v9122_v25 }
 0xa68   : > { %9363 = vst [vmem:[%s12476_s12 + $0x1d0] sm:$0xff] %v9291_v13 }
 0xa6d   : > { %v9292_v16 = vpop.f32.mrf.mxu3 }
 0xa6e   : > { %v9293_v11 = vadd.f32 %v9292_v16, %v9124_v1 }
 0xa70   : > { %9364 = vst [vmem:[%s12476_s12 + $0x1d8] sm:$0xff] %v9293_v11 }
 0xa75   : > { %v9295_v2 = vpop.f32.mrf.mxu3 }
 0xa76   : > { %v9296_v17 = vadd.f32 %v9295_v2, %v9127_v0 }
 0xa78   : > { %9365 = vst [vmem:[%s12476_s12 + $0x1e0] sm:$0xff] %v9296_v17 }
 0xa7d   : > { %v9297_v29 = vpop.f32.mrf.mxu3 }
 0xa7e   : > { %v9298_v18 = vadd.f32 %v9297_v29, %v9129_v51 }
 0xa80   : > { %9366 = vst [vmem:[%s12476_s12 + $0x1e8] sm:$0xff] %v9298_v18 }
 0xa85   : > { %v9300_v4 = vpop.f32.mrf.mxu3 }
 0xa86   : > { %v9301_v45 = vadd.f32 %v9300_v4, %v9132_v49 }
 0xa88   : > { %9367 = vst [vmem:[%s12476_s12 + $0x1f0] sm:$0xff] %v9301_v45 }
 0xa8d   : > { %v9302_v22 = vpop.f32.mrf.mxu3 }
 0xa8e   : > { %v9303_v23 = vadd.f32 %v9302_v22, %v9134_v8 }
 0xa90   : > { %9368 = vst [vmem:[%s12476_s12 + $0x1f8] sm:$0xff] %v9303_v23 }
 0xa91   : > { %10314 = shalt.err (!%p10311_p3)
}
 0xa92   : > { %s10351_s29 = smov 128   ;;  %s10352_s12 = smov 8  }
 0xa93   : > { %10244 = dma.vmem_to_hbm [thread:$0]  (%p10426_p5), %s9383_s17, 8192, %s9385_s20, %s9370_s25, %s10351_s29, %s10351_s29, %s10352_s12  }
 0xa94 PF: > { %p10250_p4 = scmp.ge.s32.totalorder %s10349_s24, 2  ;;  %s9399_s15 = sand.u32 1, %s10337_s21  }
 0xa95   : > { %s9400_s16 = scalar_lea.sflag [#allocation3], %s9399_s15 }
 0xa96   : > { %p10247_p7 = pnand %p10250_p4, %p10430_p6 }
 0xa98   : > { %p10248_p8 = pneg %p10247_p7 }
 0xa9a   : > { %10332 = dma.done.wait (%p10248_p8), %s9400_s16, 8192  }
 0xa9b   : > { %10334 = vsyncadd (%p10248_p8), %s9400_s16, 4294959104  ;;  %p16_p9 = scmp.ge.s32.totalorder %s10413_s27, 4   ;;  %s13069_s21 = smov %s10341_s22 }
 0xa9c   : > { %s13070_s22 = smov %s10345_s23  ;;  %s13071_s23 = smov %s10424_s30 }
 0xa9d   : > { %s13072_s24 = smov %s10413_s27  ;;  %18 = sbr.rel (!%p16_p9) target bundleno = 3 (0x3), region = 89 }
 0xaa2   :  { %9406 = vsyncpa [#allocation3], 1 }
 0xaa3   :  { %9408 = vsyncpa [#allocation3 + $0x1], 1 }

</bundles_post_ra>
